<compile_context>
chip_gen: v5e
topology: v5e:2x2
jax: 0.10.0
libtpu: 0.0.40
codegen_flags: <defaults>
</compile_context>

<pallas_src>
import jax
import jax.numpy as jnp
from jax import lax
from jax.experimental import pallas as pl
from jax.experimental.pallas import tpu as pltpu

# ---- config mirroring the PyTorch module ----------------------------------
DELTA_T = 0.1
TARGET_RANGE = (0.0, 1.0)
MC_SAMPLES = 60
HIDDEN_DIM = 1024          # hidden_dims = [1024]
TORCH_SEED = 123
EMBED_DIM = 128            # small stand-in for the sentence-transformer dim


def _softplus(x):
    # numerically-safe softplus that lowers cleanly in Mosaic
    xc = jnp.minimum(x, 20.0)
    return jnp.where(x > 20.0, x, jnp.log(1.0 + jnp.exp(xc)))


# ---- the Pallas kernel ------------------------------------------------------
def pdf_kernel(s1_ref, s2_ref, score_ref, mc_ref, w1_ref, w1t_ref, b1_ref,
               w2_ref, b2_ref, out_ref, base_sc):
    # st_forward: elementwise product of the two sentence embeddings, then the
    # "vector" part of the first MLP layer — computed ONCE per batch block (MXU).
    x = s1_ref[...] * s2_ref[...]                                    # [Bt, D]
    base_sc[...] = (jnp.dot(x, w1_ref[...],
                            preferred_element_type=jnp.float32,
                            precision=lax.Precision.HIGHEST)
                    + b1_ref[...])                                   # [Bt, H]

    def f_of(t_bcast):
        # f(x, t) = softplus( ReLU(base + t * w1t) @ w2 + b2 )
        # The H-reduction rides the MXU ([Bt,H] x [H,1] matvec) instead of a
        # VPU multiply + 1024-lane XLU reduce.
        h = jnp.maximum(base_sc[...] + t_bcast * w1t_ref[...], 0.0)  # [Bt, H]
        y = jnp.dot(h, w2_ref[...],
                    preferred_element_type=jnp.float32,
                    precision=lax.Precision.HIGHEST) + b2_ref[0, 0]  # [Bt, 1]
        return _softplus(y)

    # numerator: unnormalized density at t = score (per-row value)
    f_score = f_of(score_ref[...])                                   # [Bt, 1]

    # denominator: Monte-Carlo normalizer over the shared sample points.
    # Loop over t-slots so only one [Bt, H] hidden tile is live per step.
    def mc_body(k, z_acc):
        return z_acc + f_of(mc_ref[k])                               # scalar t from SMEM

    z_sum = lax.fori_loop(0, MC_SAMPLES, mc_body, jnp.zeros_like(f_score))

    width = TARGET_RANGE[1] - TARGET_RANGE[0]
    # pdf = f_score / (width * mean_k f_k)  ==  f_score * (MC / width) / sum_k f_k
    out_ref[...] = f_score * (float(MC_SAMPLES) / width) / z_sum


# ---- wrapper ----------------------------------------------------------------
def sentence_transformer_mc_pdf_forward(s1_vec, s2_vec, score, params,
                                        mc_points, *, block_b=128):
    """Returns pdf(score | s1*s2) with MC normalization, shape [B, 1] f32."""
    w1, w1t, b1, w2, b2 = params
    B, D = s1_vec.shape
    H = w1.shape[1]
    block_b = min(block_b, B)
    assert B % block_b == 0

    score_col = score.astype(jnp.float32).reshape(B, 1)   # per-row t = score
    w2_col = w2.reshape(H, 1)                              # column for MXU matvec
    mc_points = mc_points.astype(jnp.float32)

    grid = (B // block_b,)
    batch_spec = lambda shp: pl.BlockSpec(shp, lambda i: (i, 0))
    fixed_spec = lambda shp: pl.BlockSpec(shp, lambda i: (0, 0))
    smem_spec = pl.BlockSpec(memory_space=pltpu.MemorySpace.SMEM)

    return pl.pallas_call(
        pdf_kernel,
        out_shape=jax.ShapeDtypeStruct((B, 1), jnp.float32),
        grid=grid,
        in_specs=[
            batch_spec((block_b, D)),     # s1
            batch_spec((block_b, D)),     # s2
            batch_spec((block_b, 1)),     # score column
            smem_spec,                    # shared MC points -> SMEM scalars
            fixed_spec((D, H)),           # W1 (vector part)
            fixed_spec((1, H)),           # w1t (t-feature row of W1)
            fixed_spec((1, H)),           # b1
            fixed_spec((H, 1)),           # w2 (output column)
            smem_spec,                    # b2 scalar -> SMEM
        ],
        out_specs=batch_spec((block_b, 1)),
        scratch_shapes=[pltpu.VMEM((block_b, H), jnp.float32)],   # base tile
        compiler_params=pltpu.CompilerParams(
            dimension_semantics=("parallel",)),                   # v7x: 2 TCs
    )(s1_vec, s2_vec, score_col, mc_points, w1, w1t, b1, w2_col, b2)


# ---- deterministic parameter / input construction ---------------------------
def init_params(key, D=EMBED_DIM, H=HIDDEN_DIM):
    k1, k2, k3 = jax.random.split(key, 3)
    scale1 = (2.0 / (D + 1)) ** 0.5          # kaiming-ish for ReLU, fan_in = D+1
    w_full = jax.random.normal(k1, (D + 1, H), jnp.float32) * scale1
    w1 = w_full[:D]                          # [D, H]  vector part
    w1t = w_full[D:D + 1]                    # [1, H]  t-feature row
    b1 = jnp.zeros((1, H), jnp.float32)
    w2 = jax.random.normal(k2, (1, H), jnp.float32) * (1.0 / H) ** 0.5   # [1, H]
    b2 = jnp.zeros((1, 1), jnp.float32)
    return (w1, w1t, b1, w2, b2)


def reference_forward(s1, s2, score, params, mc_points):
    """Pure-JAX reference of the reconstructed forward pass."""
    w1, w1t, b1, w2, b2 = params
    x = s1 * s2
    base = jnp.dot(x, w1, precision=lax.Precision.HIGHEST) + b1      # [B, H]

    def unnorm(tv):                                                  # tv: [B, K]
        h = jnp.maximum(base[:, None, :] + tv[:, :, None] * w1t[None, :, :], 0.0)
        y = jnp.sum(h * w2[None, :, :], axis=-1) + b2[0, 0]
        return jax.nn.softplus(y)

    f_score = unnorm(score[:, None].astype(jnp.float32))[:, 0]
    f_mc = unnorm(jnp.broadcast_to(mc_points[None, :], (s1.shape[0], MC_SAMPLES)))
    z = (TARGET_RANGE[1] - TARGET_RANGE[0]) * jnp.mean(f_mc, axis=1)
    return (f_score / z)[:, None]


if __name__ == "__main__":
    B, D = 16, EMBED_DIM

    # module attribute kept for parity with the PyTorch class (unused by forward)
    t_range = jnp.arange(TARGET_RANGE[0], TARGET_RANGE[1] + DELTA_T, DELTA_T)

    # deterministic parameters (torch_seed = 123) and MC sample points
    pkey = jax.random.PRNGKey(TORCH_SEED)
    params = init_params(pkey)
    mc_points = jax.random.uniform(
        jax.random.fold_in(pkey, 7), (MC_SAMPLES,), jnp.float32,
        minval=TARGET_RANGE[0], maxval=TARGET_RANGE[1])

    # deterministic example inputs: precomputed sentence embeddings + scores
    ikey = jax.random.PRNGKey(0)
    k1, k2, k3 = jax.random.split(ikey, 3)
    s1_vec = jax.random.normal(k1, (B, D), jnp.float32)
    s2_vec = jax.random.normal(k2, (B, D), jnp.float32)
    score = jax.random.uniform(k3, (B,), jnp.float32)

    out = sentence_transformer_mc_pdf_forward(s1_vec, s2_vec, score, params, mc_points)
    out = jax.block_until_ready(out)

    ref = reference_forward(s1_vec, s2_vec, score, params, mc_points)
    assert out.shape == (B, 1)
    assert bool(jnp.all(jnp.isfinite(out)))
    assert jnp.allclose(out, ref, rtol=1e-4, atol=1e-5), (out, ref)

    print("KERNEL_OK")
</pallas_src>

<mosaic_0001>
module attributes {stable_mosaic.version = 11 : i64} {
  func.func @pdf_kernel(%arg0: i32, %arg1: memref<16x128xf32, #tpu.memory_space<vmem>>, %arg2: memref<16x128xf32, #tpu.memory_space<vmem>>, %arg3: memref<16x1xf32, #tpu.memory_space<vmem>>, %arg4: memref<60xf32, #tpu.memory_space<smem>>, %arg5: memref<128x1024xf32, #tpu.memory_space<vmem>>, %arg6: memref<1x1024xf32, #tpu.memory_space<vmem>>, %arg7: memref<1x1024xf32, #tpu.memory_space<vmem>>, %arg8: memref<1024x1xf32, #tpu.memory_space<vmem>>, %arg9: memref<1x1xf32, #tpu.memory_space<smem>>, %arg10: memref<16x1xf32, #tpu.memory_space<vmem>>, %arg11: memref<16x1024xf32, #tpu.memory_space<vmem>>) attributes {dimension_semantics = [#tpu.dimension_semantics<parallel>], iteration_bounds = array<i64: 1>, scalar_prefetch = 0 : i64, scratch_operands = 1 : i64, tpu.core_type = #tpu.core_type<tc>, window_params = [{transform_indices = @transform_0, window_bounds = array<i64: 16, 128>}, {transform_indices = @transform_1, window_bounds = array<i64: 16, 128>}, {transform_indices = @transform_2, window_bounds = array<i64: 16, 1>}, {transform_indices = @transform_3, window_bounds = array<i64: 60>}, {pipeline_mode = #tpu.pipeline_mode<synchronous>, transform_indices = @transform_4, window_bounds = array<i64: 128, 1024>}, {pipeline_mode = #tpu.pipeline_mode<synchronous>, transform_indices = @transform_5, window_bounds = array<i64: 1, 1024>}, {pipeline_mode = #tpu.pipeline_mode<synchronous>, transform_indices = @transform_6, window_bounds = array<i64: 1, 1024>}, {pipeline_mode = #tpu.pipeline_mode<synchronous>, transform_indices = @transform_7, window_bounds = array<i64: 1024, 1>}, {transform_indices = @transform_8, window_bounds = array<i64: 1, 1>}, {transform_indices = @transform_9, window_bounds = array<i64: 16, 1>}]} {
    %c0 = arith.constant 0 : index
    %c0_0 = arith.constant 0 : index
    %0 = vector.load %arg1[%c0, %c0_0] : memref<16x128xf32, #tpu.memory_space<vmem>>, vector<16x128xf32>
    %c0_1 = arith.constant 0 : index
    %c0_2 = arith.constant 0 : index
    %1 = vector.load %arg2[%c0_1, %c0_2] : memref<16x128xf32, #tpu.memory_space<vmem>>, vector<16x128xf32>
    %2 = arith.mulf %0, %1 : vector<16x128xf32>
    %c0_3 = arith.constant 0 : index
    %c0_4 = arith.constant 0 : index
    %3 = vector.load %arg5[%c0_3, %c0_4] : memref<128x1024xf32, #tpu.memory_space<vmem>>, vector<128x1024xf32>
    %cst = arith.constant dense<0.000000e+00> : vector<16x1024xf32>
    %4 = tpu.matmul %2, %3, %cst {dimension_numbers = #tpu.dot_dimension_numbers<[1], [0], [0], [1], [0, 0, 1, 1], [], []>, precision = #tpu.contract_precision<fp32>} : vector<16x128xf32>, vector<128x1024xf32>, vector<16x1024xf32> -> vector<16x1024xf32>
    %c0_5 = arith.constant 0 : index
    %c0_6 = arith.constant 0 : index
    %5 = vector.load %arg7[%c0_5, %c0_6] : memref<1x1024xf32, #tpu.memory_space<vmem>>, vector<1x1024xf32>
    %6 = vector.broadcast %5 : vector<1x1024xf32> to vector<16x1024xf32>
    %7 = arith.addf %4, %6 : vector<16x1024xf32>
    %c0_7 = arith.constant 0 : index
    %c0_8 = arith.constant 0 : index
    %8 = vector.load %arg11[%c0_7, %c0_8] : memref<16x1024xf32, #tpu.memory_space<vmem>>, vector<16x1024xf32>
    tpu.vector_store %arg11[%c0_7, %c0_8], %7 {strides = array<i32>} : memref<16x1024xf32, #tpu.memory_space<vmem>>, vector<16x1024xf32>,
    %c0_9 = arith.constant 0 : index
    %c0_10 = arith.constant 0 : index
    %9 = vector.load %arg3[%c0_9, %c0_10] : memref<16x1xf32, #tpu.memory_space<vmem>>, vector<16x1xf32>
    %c0_11 = arith.constant 0 : index
    %c0_12 = arith.constant 0 : index
    %10 = vector.load %arg11[%c0_11, %c0_12] : memref<16x1024xf32, #tpu.memory_space<vmem>>, vector<16x1024xf32>
    %c0_13 = arith.constant 0 : index
    %c0_14 = arith.constant 0 : index
    %11 = vector.load %arg6[%c0_13, %c0_14] : memref<1x1024xf32, #tpu.memory_space<vmem>>, vector<1x1024xf32>
    %12 = vector.broadcast %9 : vector<16x1xf32> to vector<16x1024xf32>
    %13 = vector.broadcast %11 : vector<1x1024xf32> to vector<16x1024xf32>
    %14 = arith.mulf %12, %13 : vector<16x1024xf32>
    %15 = arith.addf %10, %14 : vector<16x1024xf32>
    %cst_15 = arith.constant 0.000000e+00 : f32
    %16 = vector.broadcast %cst_15 : f32 to vector<16x1024xf32>
    %17 = arith.maximumf %15, %16 : vector<16x1024xf32>
    %c0_16 = arith.constant 0 : index
    %c0_17 = arith.constant 0 : index
    %18 = vector.load %arg8[%c0_16, %c0_17] : memref<1024x1xf32, #tpu.memory_space<vmem>>, vector<1024x1xf32>
    %cst_18 = arith.constant dense<0.000000e+00> : vector<16x1xf32>
    %19 = tpu.matmul %17, %18, %cst_18 {dimension_numbers = #tpu.dot_dimension_numbers<[1], [0], [0], [1], [0, 0, 1, 1], [], []>, precision = #tpu.contract_precision<fp32>} : vector<16x1024xf32>, vector<1024x1xf32>, vector<16x1xf32> -> vector<16x1xf32>
    %c0_19 = arith.constant 0 : index
    %c0_20 = arith.constant 0 : index
    %20 = memref.load %arg9[%c0_19, %c0_20] : memref<1x1xf32, #tpu.memory_space<smem>>
    %21 = vector.broadcast %20 : f32 to vector<16x1xf32>
    %22 = arith.addf %19, %21 : vector<16x1xf32>
    %cst_21 = arith.constant 2.000000e+01 : f32
    %23 = vector.broadcast %cst_21 : f32 to vector<16x1xf32>
    %24 = arith.minimumf %22, %23 : vector<16x1xf32>
    %cst_22 = arith.constant 2.000000e+01 : f32
    %25 = vector.broadcast %cst_22 : f32 to vector<16x1xf32>
    %26 = arith.cmpf ogt, %22, %25 : vector<16x1xf32>
    %27 = math.exp %24 : vector<16x1xf32>
    %cst_23 = arith.constant 1.000000e+00 : f32
    %28 = vector.broadcast %cst_23 : f32 to vector<16x1xf32>
    %29 = arith.addf %28, %27 : vector<16x1xf32>
    %30 = math.log %29 : vector<16x1xf32>
    %31 = arith.select %26, %22, %30 : vector<16x1xi1>, vector<16x1xf32>
    %cst_24 = arith.constant 0.000000e+00 : f32
    %32 = vector.broadcast %cst_24 : f32 to vector<16x1xf32>
    %c0_i32 = arith.constant 0 : i32
    %c60_i32 = arith.constant 60 : i32
    %33 = arith.addi %c0_i32, %c60_i32 : i32
    %c1_i32 = arith.constant 1 : i32
    %34 = scf.for %arg12 = %c0_i32 to %33 step %c1_i32 iter_args(%arg13 = %32) -> (vector<16x1xf32>)  : i32 {
      %39 = arith.index_cast %arg12 : i32 to index
      %40 = memref.load %arg4[%39] : memref<60xf32, #tpu.memory_space<smem>>
      %c0_29 = arith.constant 0 : index
      %c0_30 = arith.constant 0 : index
      %41 = vector.load %arg11[%c0_29, %c0_30] : memref<16x1024xf32, #tpu.memory_space<vmem>>, vector<16x1024xf32>
      %c0_31 = arith.constant 0 : index
      %c0_32 = arith.constant 0 : index
      %42 = vector.load %arg6[%c0_31, %c0_32] : memref<1x1024xf32, #tpu.memory_space<vmem>>, vector<1x1024xf32>
      %43 = vector.broadcast %40 : f32 to vector<1x1024xf32>
      %44 = arith.mulf %43, %42 : vector<1x1024xf32>
      %45 = vector.broadcast %44 : vector<1x1024xf32> to vector<16x1024xf32>
      %46 = arith.addf %41, %45 : vector<16x1024xf32>
      %cst_33 = arith.constant 0.000000e+00 : f32
      %47 = vector.broadcast %cst_33 : f32 to vector<16x1024xf32>
      %48 = arith.maximumf %46, %47 : vector<16x1024xf32>
      %c0_34 = arith.constant 0 : index
      %c0_35 = arith.constant 0 : index
      %49 = vector.load %arg8[%c0_34, %c0_35] : memref<1024x1xf32, #tpu.memory_space<vmem>>, vector<1024x1xf32>
      %cst_36 = arith.constant dense<0.000000e+00> : vector<16x1xf32>
      %50 = tpu.matmul %48, %49, %cst_36 {dimension_numbers = #tpu.dot_dimension_numbers<[1], [0], [0], [1], [0, 0, 1, 1], [], []>, precision = #tpu.contract_precision<fp32>} : vector<16x1024xf32>, vector<1024x1xf32>, vector<16x1xf32> -> vector<16x1xf32>
      %c0_37 = arith.constant 0 : index
      %c0_38 = arith.constant 0 : index
      %51 = memref.load %arg9[%c0_37, %c0_38] : memref<1x1xf32, #tpu.memory_space<smem>>
      %52 = vector.broadcast %51 : f32 to vector<16x1xf32>
      %53 = arith.addf %50, %52 : vector<16x1xf32>
      %cst_39 = arith.constant 2.000000e+01 : f32
      %54 = vector.broadcast %cst_39 : f32 to vector<16x1xf32>
      %55 = arith.minimumf %53, %54 : vector<16x1xf32>
      %cst_40 = arith.constant 2.000000e+01 : f32
      %56 = vector.broadcast %cst_40 : f32 to vector<16x1xf32>
      %57 = arith.cmpf ogt, %53, %56 : vector<16x1xf32>
      %58 = math.exp %55 : vector<16x1xf32>
      %cst_41 = arith.constant 1.000000e+00 : f32
      %59 = vector.broadcast %cst_41 : f32 to vector<16x1xf32>
      %60 = arith.addf %59, %58 : vector<16x1xf32>
      %61 = math.log %60 : vector<16x1xf32>
      %62 = arith.select %57, %53, %61 : vector<16x1xi1>, vector<16x1xf32>
      %63 = arith.addf %arg13, %62 : vector<16x1xf32>
      scf.yield %63 : vector<16x1xf32>
    }
    %c60_i32_25 = arith.constant 60 : i32
    %cst_26 = arith.constant 6.000000e+01 : f32
    %35 = vector.broadcast %cst_26 : f32 to vector<16x1xf32>
    %36 = arith.mulf %31, %35 : vector<16x1xf32>
    %37 = arith.divf %36, %34 : vector<16x1xf32>
    %c0_27 = arith.constant 0 : index
    %c0_28 = arith.constant 0 : index
    %38 = vector.load %arg10[%c0_27, %c0_28] : memref<16x1xf32, #tpu.memory_space<vmem>>, vector<16x1xf32>
    tpu.vector_store %arg10[%c0_27, %c0_28], %37 {strides = array<i32>} : memref<16x1xf32, #tpu.memory_space<vmem>>, vector<16x1xf32>,
    return
  }
  func.func @transform_0(%arg0: i32) -> (i32, i32) {
    %c0_i32 = arith.constant 0 : i32
    %c0_i32_0 = arith.constant 0 : i32
    return %arg0, %c0_i32 : i32, i32
  }
  func.func @transform_1(%arg0: i32) -> (i32, i32) {
    %c0_i32 = arith.constant 0 : i32
    %c0_i32_0 = arith.constant 0 : i32
    return %arg0, %c0_i32 : i32, i32
  }
  func.func @transform_2(%arg0: i32) -> (i32, i32) {
    %c0_i32 = arith.constant 0 : i32
    %c0_i32_0 = arith.constant 0 : i32
    return %arg0, %c0_i32 : i32, i32
  }
  func.func @transform_3(%arg0: i32) -> i32 {
    %c0_i32 = arith.constant 0 : i32
    %c0_i32_0 = arith.constant 0 : i32
    return %c0_i32 : i32
  }
  func.func @transform_4(%arg0: i32) -> (i32, i32) {
    %c0_i32 = arith.constant 0 : i32
    %c0_i32_0 = arith.constant 0 : i32
    %c0_i32_1 = arith.constant 0 : i32
    return %c0_i32, %c0_i32_0 : i32, i32
  }
  func.func @transform_5(%arg0: i32) -> (i32, i32) {
    %c0_i32 = arith.constant 0 : i32
    %c0_i32_0 = arith.constant 0 : i32
    %c0_i32_1 = arith.constant 0 : i32
    return %c0_i32, %c0_i32_0 : i32, i32
  }
  func.func @transform_6(%arg0: i32) -> (i32, i32) {
    %c0_i32 = arith.constant 0 : i32
    %c0_i32_0 = arith.constant 0 : i32
    %c0_i32_1 = arith.constant 0 : i32
    return %c0_i32, %c0_i32_0 : i32, i32
  }
  func.func @transform_7(%arg0: i32) -> (i32, i32) {
    %c0_i32 = arith.constant 0 : i32
    %c0_i32_0 = arith.constant 0 : i32
    %c0_i32_1 = arith.constant 0 : i32
    return %c0_i32, %c0_i32_0 : i32, i32
  }
  func.func @transform_8(%arg0: i32) -> (i32, i32) {
    %c0_i32 = arith.constant 0 : i32
    %c0_i32_0 = arith.constant 0 : i32
    %c0_i32_1 = arith.constant 0 : i32
    return %c0_i32, %c0_i32_0 : i32, i32
  }
  func.func @transform_9(%arg0: i32) -> (i32, i32) {
    %c0_i32 = arith.constant 0 : i32
    %c0_i32_0 = arith.constant 0 : i32
    return %arg0, %c0_i32 : i32, i32
  }
}

</mosaic_0001>

<bundles_post_ra>
// kernel: tpu_custom_call.1
= control target key start
LH: loop header
LB: loop body
LE: loop exit
PB: predicated region body
PF: predicated region fallthrough
CT: control target
= control target key end

     0   :  { %s17767_s0 = inlined_call_operand.vmem [shape: f32[16,128], index: 0, kind: input, shape index: {}]   ;;  %s17768_s1 = inlined_call_operand.hbm [shape: f32[16,128], index: 1, kind: input, shape index: {}]   ;;  %s17769_s2 = inlined_call_operand.vmem [shape: f32[16,1], index: 2, kind: input, shape index: {}]   ;;  %s17770_s3 = inlined_call_operand.vmem [shape: f32[60], index: 3, kind: input, shape index: {}]   ;;  %s17771_s4 = inlined_call_operand.vmem [shape: f32[128,1024], index: 4, kind: input, shape index: {}]   ;;  %s17772_s5 = inlined_call_operand.hbm [shape: f32[1,1024], index: 5, kind: input, shape index: {}]   ;;  %s17773_s6 = inlined_call_operand.hbm [shape: f32[1,1024], index: 6, kind: input, shape index: {}]   ;;  %s17774_s7 = inlined_call_operand.vmem [shape: f32[1024,1], index: 7, kind: input, shape index: {}]   ;;  %s17775_s8 = inlined_call_operand.<no memory space> [shape: f32[1,1], index: 8, kind: input, shape index: {}]   ;;  %s17776_s9 = inlined_call_operand.vmem [shape: f32[16,1], index: 9, kind: output, shape index: {}]  }
   0x1   :  { %14 = sst [smem:[#allocation3]] %s17775_s8 }
   0x2   :  { %15 = vsyncpa [#allocation5], 0 }
   0x3   :  { %16 = vsyncpa [#allocation6], 0 }
   0x4   :  { %17 = vsyncpa [#allocation9], 0  ;;  %s51_s13 = sshll.u32 %s17772_s5, 4  ;;  %s9873_s14 = smov [#allocation8]   ;;  %s52_s13 = int_to_ptr.hbm [resolvable:$true] %s51_s13 }
   0x5   :  { %s53_s15 = sshll.u32 %s9873_s14, 4  ;;  %s24_s18 = sshll.u32 %s17768_s1, 4  ;;  %s54_s15 = int_to_ptr.vmem [resolvable:$true] %s53_s15  ;;  %s25_s18 = int_to_ptr.hbm [resolvable:$true] %s24_s18 }
   0x6   :  { %56 = dma.hbm_to_vmem [thread:$0]  %s52_s13, 128, %s54_s15, [#allocation9]  }
   0x7   :  { %s9874_s19 = smov [#allocation4]   ;;  %s9875_s8 = smov 128  }
   0x8   :  { %s26_s20 = sshll.u32 %s9874_s19, 4  ;;  %s9876_s21 = smov 8   ;;  %s27_s20 = int_to_ptr.vmem [resolvable:$true] %s26_s20 }
   0x9   :  { %32 = dma.hbm_to_vmem [thread:$0]  %s25_s18, 256, %s27_s20, [#allocation5], %s9875_s8, %s9875_s8, %s9876_s21  }
   0xa   :  { %s40_s5 = sshll.u32 %s17770_s3, 4  ;;  %s62_s26 = sshll.u32 %s17773_s6, 4  ;;  %s41_s5 = int_to_ptr.vmem [resolvable:$true] %s40_s5  ;;  %s63_s26 = int_to_ptr.hbm [resolvable:$true] %s62_s26 }
   0xb   :  { %s9877_s27 = smov [#allocation7]   ;;  %s9878_s1 = smov [#allocation10]  }
   0xc   :  { %43 = dma.vmem_to_smem %s41_s5, 16, %s9877_s27, [#allocation6]  }
   0xd   :  { %s64_s28 = sshll.u32 %s9878_s1, 4  ;;  %s65_s28 = int_to_ptr.vmem [resolvable:$true] %s64_s28 }
   0xe   :  { %67 = dma.hbm_to_vmem [thread:$0]  %s63_s26, 128, %s65_s28, [#allocation9]  }
   0xf   :  { %9855 = dma.done.wait [#allocation5], 256  }
  0x10   :  { %9856 = vsyncadd [#allocation5], 4294967040 }
  0x11   :  { %9857 = dma.done.wait [#allocation6], 16  }
  0x12   :  { %9858 = vsyncadd [#allocation6], 4294967280 }
  0x13   :  { %9859 = dma.done.wait [#allocation9], 256  }
  0x14   :  { %9860 = vsyncadd [#allocation9], 4294967040 }
  0x15   :  { %88 = sfence }
  0x16   :  { %v215_v0 = vld [vmem:[%s17771_s4 + $0x3c0] sm:$0xff]  ;;  %v216_v55 = vld [vmem:[%s17771_s4 + $0x3c8] sm:$0xff]  ;;  %s13586_s29 = sld [smem:[#allocation3]]  ;;  %s15127_s19 = smov 0  }
  0x17   :  { %v207_v1 = vld [vmem:[%s17771_s4 + $0x380] sm:$0xff]  ;;  %v9954_v3 = vand.u32 4294901760, %v215_v0  ;;  %v208_v59 = vld [vmem:[%s17771_s4 + $0x388] sm:$0xff] }
  0x18   :  { %v199_v2 = vld [vmem:[%s17771_s4 + $0x340] sm:$0xff]  ;;  %v9956_v4 = vand.u32 4294901760, %v207_v1 }
  0x19   :  { %v9958_v5 = vand.u32 4294901760, %v199_v2  ;;  %v191_v6 = vld [vmem:[%s17771_s4 + $0x300] sm:$0xff]  ;;  %242 = vmatpush.msra.mxu0 %v9954_v3  ;;  %455 = vmatpush.msra.mxu3 %v9954_v3  ;;  %v9984_v14 = vsub.f32 %v215_v0, %v9954_v3 }
  0x1a   :  { %v183_v7 = vld [vmem:[%s17771_s4 + $0x2c0] sm:$0xff]  ;;  %v9969_v9 = vand.u32 4294901760, %v191_v6  ;;  %v9987_v15 = vsub.f32 %v207_v1, %v9956_v4 }
  0x1b   :  { %v175_v8 = vld [vmem:[%s17771_s4 + $0x280] sm:$0xff]  ;;  %v9971_v10 = vand.u32 4294901760, %v183_v7  ;;  %v9990_v16 = vsub.f32 %v199_v2, %v9958_v5  ;;  %244 = vmatpush.msra.mxu0 %v9956_v4  ;;  %397 = vmatpush.msra.mxu2 %v9984_v14  ;;  %v17791_v22 = vand.u32 4294901760, %v9984_v14 }
  0x1c   :  { %v9973_v11 = vand.u32 4294901760, %v175_v8  ;;  %v167_v12 = vld [vmem:[%s17771_s4 + $0x240] sm:$0xff]  ;;  %v9998_v19 = vsub.f32 %v191_v6, %v9969_v9  ;;  %v17790_v23 = vand.u32 4294901760, %v9987_v15  ;;  %457 = vmatpush.msra.mxu3 %v9956_v4  ;;  %v10115_v6 = vand.u32 4294901760, %v216_v55 }
  0x1d   :  { %v159_v13 = vld [vmem:[%s17771_s4 + $0x200] sm:$0xff]  ;;  %v9992_v17 = vand.u32 4294901760, %v167_v12  ;;  %v10001_v20 = vsub.f32 %v183_v7, %v9971_v10  ;;  %v17789_v24 = vand.u32 4294901760, %v9990_v16  ;;  %246 = vmatpush.msra.mxu0 %v9958_v5  ;;  %400 = vmatpush.msra.mxu2 %v9987_v15  ;;  %v293_v30 = vsub.f32 %v9984_v14, %v17791_v22  ;;  %v200_v7 = vld [vmem:[%s17771_s4 + $0x348] sm:$0xff] }
  0x1e   :  { %v151_v18 = vld [vmem:[%s17771_s4 + $0x1c0] sm:$0xff]  ;;  %v10003_v21 = vand.u32 4294901760, %v159_v13  ;;  %v10011_v25 = vsub.f32 %v175_v8, %v9973_v11  ;;  %v17786_v27 = vand.u32 4294901760, %v9998_v19  ;;  %v299_v31 = vsub.f32 %v9987_v15, %v17790_v23  ;;  %459 = vmatpush.msra.mxu3 %v9958_v5 }
  0x1f   :  { %v143_v26 = vld [vmem:[%s17771_s4 + $0x180] sm:$0xff]  ;;  %v10019_v28 = vsub.f32 %v167_v12, %v9992_v17  ;;  %v10021_v29 = vand.u32 4294901760, %v151_v18  ;;  %v305_v32 = vsub.f32 %v9990_v16, %v17789_v24  ;;  %v17785_v33 = vand.u32 4294901760, %v10001_v20  ;;  %248 = vmatpush.msra.mxu0 %v9969_v9  ;;  %403 = vmatpush.msra.mxu2 %v9990_v16 }
  0x20   :  { %v10037_v34 = vsub.f32 %v159_v13, %v10003_v21  ;;  %v10039_v35 = vand.u32 4294901760, %v143_v26  ;;  %v135_v36 = vld [vmem:[%s17771_s4 + $0x140] sm:$0xff]  ;;  %v294_v37 = vand.u32 4294901760, %v293_v30  ;;  %v300_v38 = vand.u32 4294901760, %v299_v31  ;;  %461 = vmatpush.msra.mxu3 %v9969_v9 }
  0x21   :  { %v311_v39 = vsub.f32 %v9998_v19, %v17786_v27  ;;  %v17784_v40 = vand.u32 4294901760, %v10011_v25  ;;  %v10052_v41 = vsub.f32 %v151_v18, %v10021_v29  ;;  %v127_v42 = vld [vmem:[%s17771_s4 + $0x100] sm:$0xff]  ;;  %250 = vmatpush.msra.mxu0 %v9971_v10  ;;  %v306_v43 = vand.u32 4294901760, %v305_v32  ;;  %406 = vmatpush.msra.mxu2 %v9998_v19  ;;  %v192_v18 = vld [vmem:[%s17771_s4 + $0x308] sm:$0xff] }
  0x22   :  { %295 = vmatpush.msra.mxu1 %v294_v37  ;;  %v317_v44 = vsub.f32 %v10001_v20, %v17785_v33  ;;  %v10061_v45 = vand.u32 4294901760, %v135_v36  ;;  %v17782_v46 = vand.u32 4294901760, %v10019_v28  ;;  %463 = vmatpush.msra.mxu3 %v9971_v10  ;;  %v10067_v47 = vsub.f32 %v143_v26, %v10039_v35  ;;  %v119_v52 = vld [vmem:[%s17771_s4 + $0xc0] sm:$0xff]  ;;  %v144_v27 = vld [vmem:[%s17771_s4 + $0x188] sm:$0xff] }
  0x23   :  { %v17781_v48 = vand.u32 4294901760, %v10037_v34  ;;  %252 = vmatpush.msra.mxu0 %v9973_v11  ;;  %v312_v49 = vand.u32 4294901760, %v311_v39  ;;  %v323_v50 = vsub.f32 %v10011_v25, %v17784_v40  ;;  %v10074_v51 = vand.u32 4294901760, %v127_v42  ;;  %409 = vmatpush.msra.mxu2 %v10001_v20  ;;  %v111_v54 = vld [vmem:[%s17771_s4 + $0x80] sm:$0xff] }
  0x24   :  { %301 = vmatpush.msra.mxu1 %v300_v38  ;;  %465 = vmatpush.msra.mxu3 %v9973_v11  ;;  %v17779_v53 = vand.u32 4294901760, %v10052_v41  ;;  %v318_v56 = vand.u32 4294901760, %v317_v44  ;;  %v329_v57 = vsub.f32 %v10019_v28, %v17782_v46  ;;  %v10093_v58 = vsub.f32 %v135_v36, %v10061_v45  ;;  %v103_v63 = vld [vmem:[%s17771_s4 + $0x40] sm:$0xff]  ;;  %v160_v46 = vld [vmem:[%s17771_s4 + $0x208] sm:$0xff] }
  0x25   :  { %254 = vmatpush.msra.mxu0 %v9992_v17  ;;  %412 = vmatpush.msra.mxu2 %v10011_v25  ;;  %v335_v60 = vsub.f32 %v10037_v34, %v17781_v48  ;;  %v10103_v61 = vand.u32 4294901760, %v119_v52  ;;  %v17778_v62 = vand.u32 4294901760, %v10067_v47  ;;  %v324_v0 = vand.u32 4294901760, %v323_v50  ;;  %v95_v12 = vld [vmem:[%s17771_s4] sm:$0xff] }
  0x26   :  { %307 = vmatpush.msra.mxu1 %v306_v43  ;;  %467 = vmatpush.msra.mxu3 %v9992_v17  ;;  %v10111_v1 = vsub.f32 %v127_v42, %v10074_v51  ;;  %v10113_v2 = vand.u32 4294901760, %v111_v54  ;;  %v341_v8 = vsub.f32 %v10052_v41, %v17779_v53  ;;  %v10128_v13 = vand.u32 4294901760, %v208_v59  ;;  %v184_v42 = vld [vmem:[%s17771_s4 + $0x2c8] sm:$0xff] }
  0x27   :  { %18141 = vst [vmem:[#allocation14_spill] sm:$0xff] %v10103_v61  ;;  %256 = vmatpush.msra.mxu0 %v10003_v21  ;;  %415 = vmatpush.msra.mxu2 %v10019_v28  ;;  %v330_v26 = vand.u32 4294901760, %v329_v57  ;;  %v10134_v30 = vand.u32 4294901760, %v103_v63  ;;  %v17777_v31 = vand.u32 4294901760, %v10093_v58  ;;  %v10138_v32 = vsub.f32 %v216_v55, %v10115_v6 }
  0x28   :  { %313 = vmatpush.msra.mxu1 %v312_v49  ;;  %18142 = vst [vmem:[#allocation15_spill] sm:$0xff] %v10113_v2  ;;  %469 = vmatpush.msra.mxu3 %v10003_v21  ;;  %v336_v36 = vand.u32 4294901760, %v335_v60  ;;  %v347_v37 = vsub.f32 %v10067_v47, %v17778_v62  ;;  %v10146_v38 = vsub.f32 %v119_v52, %v10103_v61  ;;  %v10148_v39 = vand.u32 4294901760, %v200_v7 }
  0x29   :  { %258 = vmatpush.msra.mxu0 %v10021_v29  ;;  %18143 = vst [vmem:[#allocation16_spill] sm:$0xff] %v10134_v30  ;;  %418 = vmatpush.msra.mxu2 %v10037_v34  ;;  %v10155_v43 = vsub.f32 %v111_v54, %v10113_v2  ;;  %v10157_v44 = vand.u32 4294901760, %v95_v12  ;;  %v17780_v49 = vand.u32 4294901760, %v10111_v1  ;;  %v10160_v50 = vand.u32 4294901760, %v192_v18 }
  0x2a   :  { %319 = vmatpush.msra.mxu1 %v318_v56  ;;  %471 = vmatpush.msra.mxu3 %v10021_v29  ;;  %v342_v52 = vand.u32 4294901760, %v341_v8  ;;  %v10165_v55 = vsub.f32 %v208_v59, %v10128_v13  ;;  %v353_v54 = vsub.f32 %v10093_v58, %v17777_v31  ;;  %v10172_v56 = vsub.f32 %v103_v63, %v10134_v30 }
  0x2b   :  { %260 = vmatpush.msra.mxu0 %v10039_v35  ;;  %18144 = vst [vmem:[#allocation17_spill] sm:$0xff] %v10157_v44  ;;  %421 = vmatpush.msra.mxu2 %v10052_v41  ;;  %v17783_v57 = vand.u32 4294901760, %v10138_v32  ;;  %v10175_v60 = vand.u32 4294901760, %v184_v42  ;;  %v348_v59 = vand.u32 4294901760, %v347_v37  ;;  %v17787_v8 = vand.u32 4294901760, %v10146_v38 }
  0x2c   :  { %325 = vmatpush.msra.mxu1 %v324_v0  ;;  %473 = vmatpush.msra.mxu3 %v10039_v35  ;;  %18145 = vst [vmem:[#allocation18_spill] sm:$0xff] %v10165_v55  ;;  %v176_v0 = vld [vmem:[%s17771_s4 + $0x288] sm:$0xff]  ;;  %v359_v63 = vsub.f32 %v10111_v1, %v17780_v49  ;;  %v10191_v31 = vsub.f32 %v95_v12, %v10157_v44  ;;  %v17788_v62 = vand.u32 4294901760, %v10155_v43  ;;  %v354_v12 = vand.u32 4294901760, %v353_v54 }
  0x2d   :  { %262 = vmatpush.msra.mxu0 %v10061_v45  ;;  %424 = vmatpush.msra.mxu2 %v10067_v47  ;;  %v10195_v53 = vsub.f32 %v192_v18, %v10160_v50  ;;  %v10203_v37 = vand.u32 4294901760, %v176_v0  ;;  %v665_v18 = vsub.f32 %v10138_v32, %v17783_v57  ;;  %v17793_v49 = vand.u32 4294901760, %v10172_v56 }
  0x2e   :  { %331 = vmatpush.msra.mxu1 %v330_v26  ;;  %475 = vmatpush.msra.mxu3 %v10061_v45  ;;  %v10184_v26 = vsub.f32 %v200_v7, %v10148_v39  ;;  %v168_v7 = vld [vmem:[%s17771_s4 + $0x248] sm:$0xff]  ;;  %v10211_v48 = vsub.f32 %v184_v42, %v10175_v60  ;;  %v360_v42 = vand.u32 4294901760, %v359_v63  ;;  %v371_v40 = vsub.f32 %v10155_v43, %v17788_v62 }
  0x2f   :  { %264 = vmatpush.msra.mxu0 %v10074_v51  ;;  %18147 = vst [vmem:[#allocation20_spill] sm:$0xff] %v10195_v53  ;;  %427 = vmatpush.msra.mxu2 %v10093_v58  ;;  %v10222_v57 = vand.u32 4294901760, %v168_v7  ;;  %v17798_v33 = vand.u32 4294901760, %v10195_v53  ;;  %v10239_v63 = vsub.f32 %v176_v0, %v10203_v37  ;;  %v10241_v62 = vand.u32 4294901760, %v160_v46 }
  0x30   :  { %18146 = vst [vmem:[#allocation19_spill] sm:$0xff] %v10184_v26  ;;  %337 = vmatpush.msra.mxu1 %v336_v36  ;;  %477 = vmatpush.msra.mxu3 %v10074_v51  ;;  %v17792_v36 = vand.u32 4294901760, %v10165_v55  ;;  %v17795_v54 = vand.u32 4294901760, %v10184_v26  ;;  %v666_v24 = vand.u32 4294901760, %v665_v18  ;;  %v377_v23 = vsub.f32 %v10172_v56, %v17793_v49 }
  0x31   :  { %266 = vmatpush.msra.mxu0 %v10103_v61  ;;  %430 = vmatpush.msra.mxu2 %v10111_v1  ;;  %v10257_v18 = vsub.f32 %v168_v7, %v10222_v57  ;;  %v372_v49 = vand.u32 4294901760, %v371_v40  ;;  %v683_v22 = vsub.f32 %v10195_v53, %v17798_v33  ;;  %v10275_v40 = vsub.f32 %v160_v46, %v10241_v62  ;;  %v91_v33 = vld [vmem:[#allocation4] sm:$0xff]  ;;  %v128_v46 = vld [vmem:[%s17771_s4 + $0x108] sm:$0xff] }
  0x32   :  { %343 = vmatpush.msra.mxu1 %v342_v52  ;;  %479 = vmatpush.msra.mxu3 %v10103_v61  ;;  %v365_v52 = vsub.f32 %v10146_v38, %v17787_v8  ;;  %v152_v8 = vld [vmem:[%s17771_s4 + $0x1c8] sm:$0xff]  ;;  %v18149_v53 = vand.u32 4294901760, %v9984_v14 }
  0x33   :  { %268 = vmatpush.msra.mxu0 %v10113_v2  ;;  %433 = vmatpush.msra.mxu2 %v10146_v38 }
  0x34   :  { %349 = vmatpush.msra.mxu1 %v348_v59  ;;  %481 = vmatpush.msra.mxu3 %v10113_v2  ;;  %v671_v59 = vsub.f32 %v10165_v55, %v17792_v36  ;;  %v366_v0 = vand.u32 4294901760, %v365_v52  ;;  %v10259_v36 = vand.u32 4294901760, %v152_v8  ;;  %v378_v2 = vand.u32 4294901760, %v377_v23 }
  0x35   :  { %270 = vmatpush.msra.mxu0 %v10134_v30  ;;  %436 = vmatpush.msra.mxu2 %v10155_v43  ;;  %v18151_v23 = vand.u32 4294901760, %v9987_v15  ;;  %v17807_v55 = vand.u32 4294901760, %v10275_v40 }
  0x36   :  { %355 = vmatpush.msra.mxu1 %v354_v12  ;;  %483 = vmatpush.msra.mxu3 %v10134_v30  ;;  %v677_v12 = vsub.f32 %v10184_v26, %v17795_v54  ;;  %v18148_v30 = vand.u32 4294901760, %v10191_v31  ;;  %v136_v54 = vld [vmem:[%s17771_s4 + $0x148] sm:$0xff]  ;;  %v672_v7 = vand.u32 4294901760, %v671_v59  ;;  %v10277_v26 = vand.u32 4294901760, %v144_v27 }
  0x37   :  { %272 = vmatpush.msra.mxu0 %v10157_v44  ;;  %439 = vmatpush.msra.mxu2 %v10172_v56  ;;  %v10293_v61 = vsub.f32 %v152_v8, %v10259_v36  ;;  %v10295_v14 = vand.u32 4294901760, %v136_v54 }
  0x38   :  { %361 = vmatpush.msra.mxu1 %v360_v42  ;;  %v383_v52 = vsub.f32 %v10191_v31, %v18148_v30  ;;  %485 = vmatpush.msra.mxu3 %v10157_v44  ;;  %v89_v30 = vld [vmem:[%s17767_s0] sm:$0xff]  ;;  %v18150_v44 = vand.u32 4294901760, %v10211_v48  ;;  %v678_v42 = vand.u32 4294901760, %v677_v12  ;;  %v18152_v12 = vand.u32 4294901760, %v10239_v63 }
  0x39   :  { %502 = vmatpush.msrb.mxu0 %v18149_v53  ;;  %442 = vmatpush.msra.mxu2 %v10191_v31  ;;  %v10308_v15 = vsub.f32 %v144_v27, %v10277_v26 }
  0x3a   :  { %667 = vmatpush.msrb.mxu3 %v666_v24  ;;  %v689_v59 = vsub.f32 %v10211_v48, %v18150_v44  ;;  %367 = vmatpush.msra.mxu1 %v366_v0  ;;  %v684_v24 = vand.u32 4294901760, %v683_v22  ;;  %v384_v53 = vand.u32 4294901760, %v383_v52  ;;  %v120_v44 = vld [vmem:[%s17771_s4 + $0xc8] sm:$0xff]  ;;  %v93_v0 = vmul.f32 %v91_v33, %v89_v30 }
  0x3b   :  { %506 = vmatpush.msrb.mxu0 %v18151_v23  ;;  %614 = vmatpush.msrb.mxu2 %v10115_v6  ;;  %v695_v8 = vsub.f32 %v10239_v63, %v18152_v12  ;;  %v10310_v23 = vand.u32 4294901760, %v128_v46  ;;  %v18153_v22 = vand.u32 4294901760, %v9990_v16  ;;  %v18154_v33 = vand.u32 4294901760, %v10257_v18  ;;  %v112_v16 = vld [vmem:[%s17771_s4 + $0x88] sm:$0xff] }
  0x3c   :  { %673 = vmatpush.msrb.mxu3 %v672_v7  ;;  %373 = vmatpush.msra.mxu1 %v372_v49  ;;  %v690_v52 = vand.u32 4294901760, %v689_v59  ;;  %v17806_v7 = vand.u32 4294901760, %v10293_v61  ;;  %v10320_v30 = vsub.f32 %v136_v54, %v10295_v14  ;;  %v10322_v27 = vand.u32 4294901760, %v120_v44 }
  0x3d   :  { %510 = vmatpush.msrb.mxu0 %v18153_v22  ;;  %616 = vmatpush.msrb.mxu2 %v10128_v13  ;;  %v701_v49 = vsub.f32 %v10257_v18, %v18154_v33  ;;  %v18155_v12 = vand.u32 4294901760, %v9998_v19  ;;  %v707_v54 = vsub.f32 %v10275_v40, %v17807_v55  ;;  %v17808_v59 = vand.u32 4294901760, %v10308_v15  ;;  %v104_v19 = vld [vmem:[%s17771_s4 + $0x48] sm:$0xff] }
  0x3e   :  { %679 = vmatpush.msrb.mxu3 %v678_v42  ;;  %379 = vmatpush.msra.mxu1 %v378_v2  ;;  %v10330_v2 = vand.u32 4294901760, %v93_v0  ;;  %v696_v42 = vand.u32 4294901760, %v695_v8  ;;  %v10337_v22 = vsub.f32 %v128_v46, %v10310_v23  ;;  %v18157_v33 = vand.u32 4294901760, %v10001_v20  ;;  %v96_v20 = vld [vmem:[%s17771_s4 + $0x8] sm:$0xff] }
  0x3f   :  { %514 = vmatpush.msrb.mxu0 %v18155_v12  ;;  %618 = vmatpush.msrb.mxu2 %v10148_v39  ;;  %v713_v46 = vsub.f32 %v10293_v61, %v17806_v7  ;;  %v10353_v12 = vsub.f32 %v120_v44, %v10322_v27  ;;  %v10367_v7 = vand.u32 4294901760, %v104_v19  ;;  %v708_v44 = vand.u32 4294901760, %v707_v54 }
  0x40   :  { %18156 = vst [vmem:[#allocation21_spill] sm:$0xff] %v10330_v2  ;;  %685 = vmatpush.msrb.mxu3 %v684_v24  ;;  %385 = vmatpush.msra.mxu1 %v384_v53  ;;  %v10345_v24 = vand.u32 4294901760, %v112_v16  ;;  %v702_v53 = vand.u32 4294901760, %v701_v49  ;;  %v10365_v49 = vsub.f32 %v93_v0, %v10330_v2  ;;  %v719_v55 = vsub.f32 %v10308_v15, %v17808_v59 }
  0x41   :  { %518 = vmatpush.msrb.mxu0 %v18157_v33  ;;  %620 = vmatpush.msrb.mxu2 %v10160_v50  ;;  %v92_v33 = vld [vmem:[#allocation4 + $0x8] sm:$0xff]  ;;  %v10380_v0 = vand.u32 4294901760, %v96_v20  ;;  %v18161_v54 = vand.u32 4294901760, %v10320_v30  ;;  %v736_v8 = vand.u32 4294901760, %v10353_v12 }
  0x42   :  { %573 = vmatpush.msrb.mxu1 %v9954_v3  ;;  %691 = vmatpush.msrb.mxu3 %v690_v52  ;;  %v90_v3 = vld [vmem:[%s17767_s0 + $0x8] sm:$0xff]  ;;  %v18158_v52 = vand.u32 4294901760, %v10011_v25  ;;  %18159 = vst [vmem:[#allocation22_spill] sm:$0xff] %v10365_v49  ;;  %v18160_v25 = vand.u32 4294901760, %v10019_v28  ;;  %v18162_v28 = vand.u32 4294901760, %v10037_v34 }
  0x43   :  { %622 = vmatpush.msrb.mxu2 %v10175_v60  ;;  %v725_v59 = vsub.f32 %v10320_v30, %v18161_v54  ;;  %v10405_v34 = vsub.f32 %v96_v20, %v10380_v0  ;;  %387 = vmatmul.f32.vlgmr.msra.gmra.mxu1 %v10330_v2 }
  0x44   :  { %522 = vmatpush.msrb.mxu0 %v18158_v52  ;;  %575 = vmatpush.msrb.mxu1 %v9956_v4  ;;  %v10378_v4 = vsub.f32 %v112_v16, %v10345_v24  ;;  %v94_v52 = vmul.f32 %v92_v33, %v90_v3  ;;  %v10394_v16 = vsub.f32 %v104_v19, %v10367_v7  ;;  %v18165_v33 = vand.u32 4294901760, %v10052_v41 }
  0x45   :  { %697 = vmatpush.msrb.mxu3 %v696_v42  ;;  %624 = vmatpush.msrb.mxu2 %v10203_v37  ;;  %v714_v42 = vand.u32 4294901760, %v713_v46  ;;  %v18164_v46 = vand.u32 4294901760, %v10337_v22  ;;  %v18167_v41 = vand.u32 4294901760, %v10067_v47 }
  0x46   :  { %526 = vmatpush.msrb.mxu0 %v18160_v25  ;;  %577 = vmatpush.msrb.mxu1 %v9958_v5  ;;  %v10391_v5 = vand.u32 4294901760, %v10365_v49  ;;  %v10407_v19 = vand.u32 4294901760, %v94_v52  ;;  %v748_v20 = vand.u32 4294901760, %v10394_v16 }
  0x47   :  { %703 = vmatpush.msrb.mxu3 %v702_v53  ;;  %626 = vmatpush.msrb.mxu2 %v10222_v57  ;;  %v720_v53 = vand.u32 4294901760, %v719_v55  ;;  %v731_v3 = vsub.f32 %v10337_v22, %v18164_v46  ;;  %v726_v55 = vand.u32 4294901760, %v725_v59  ;;  %v18168_v59 = vand.u32 4294901760, %v10093_v58 }
  0x48   :  { %530 = vmatpush.msrb.mxu0 %v18162_v28  ;;  %579 = vmatpush.msrb.mxu1 %v9969_v9  ;;  %18163 = vst [vmem:[#allocation23_spill] sm:$0xff] %v10391_v5  ;;  %v742_v9 = vand.u32 4294901760, %v10378_v4  ;;  %v18170_v28 = vand.u32 4294901760, %v10111_v1 }
  0x49   :  { %709 = vmatpush.msrb.mxu3 %v708_v44  ;;  %18166 = vst [vmem:[#allocation24_spill] sm:$0xff] %v10407_v19  ;;  %628 = vmatpush.msrb.mxu2 %v10241_v62  ;;  %v737_v44 = vsub.f32 %v10353_v12, %v736_v8  ;;  %v732_v25 = vand.u32 4294901760, %v731_v3 }
  0x4a   :  { %534 = vmatpush.msrb.mxu0 %v18165_v33  ;;  %581 = vmatpush.msrb.mxu1 %v9971_v10  ;;  %v276_v10 = vsub.f32 %v10365_v49, %v10391_v5  ;;  %v743_v47 = vsub.f32 %v10378_v4, %v742_v9  ;;  %v18174_v33 = vand.u32 4294901760, %v10172_v56  ;;  %v18180_v56 = vld [vmem:[#allocation15_spill] sm:$0xff] }
  0x4b   :  { %715 = vmatpush.msrb.mxu3 %v714_v42  ;;  %630 = vmatpush.msrb.mxu2 %v10259_v36  ;;  %v10428_v42 = vsub.f32 %v94_v52, %v10407_v19  ;;  %v738_v54 = vand.u32 4294901760, %v737_v44  ;;  %v18171_v52 = vand.u32 4294901760, %v10146_v38  ;;  %v18173_v38 = vand.u32 4294901760, %v10155_v43  ;;  %v18182_v44 = vld [vmem:[#allocation19_spill] sm:$0xff] }
  0x4c   :  { %538 = vmatpush.msrb.mxu0 %v18167_v41  ;;  %583 = vmatpush.msrb.mxu1 %v9973_v11  ;;  %v754_v11 = vand.u32 4294901760, %v10405_v34  ;;  %v10434_v58 = vand.u32 4294901760, %v276_v10  ;;  %v18183_v41 = vld [vmem:[#allocation16_spill] sm:$0xff] }
  0x4d   :  { %721 = vmatpush.msrb.mxu3 %v720_v53  ;;  %18169 = vst [vmem:[#allocation25_spill] sm:$0xff] %v10428_v42  ;;  %632 = vmatpush.msrb.mxu2 %v10277_v26  ;;  %v744_v53 = vand.u32 4294901760, %v743_v47  ;;  %v18184_v10 = vld [vmem:[#allocation20_spill] sm:$0xff]  ;;  %v18188_v47 = vand.u32 4294901760, %v10211_v48 }
  0x4e   :  { %542 = vmatpush.msrb.mxu0 %v18168_v59  ;;  %585 = vmatpush.msrb.mxu1 %v9992_v17  ;;  %v749_v17 = vsub.f32 %v10394_v16, %v748_v20  ;;  %v755_v1 = vsub.f32 %v10405_v34, %v754_v11  ;;  %v18187_v59 = vand.u32 4294901760, %v18184_v10 }
  0x4f   :  { %727 = vmatpush.msrb.mxu3 %v726_v55  ;;  %634 = vmatpush.msrb.mxu2 %v10295_v14 }
  0x50   :  { %546 = vmatpush.msrb.mxu0 %v18170_v28  ;;  %587 = vmatpush.msrb.mxu1 %v10003_v21  ;;  %v10447_v21 = vand.u32 4294901760, %v10428_v42  ;;  %v750_v46 = vand.u32 4294901760, %v749_v17 }
  0x51   :  { %733 = vmatpush.msrb.mxu3 %v732_v25  ;;  %636 = vmatpush.msrb.mxu2 %v10310_v23  ;;  %v18186_v25 = vld [vmem:[#allocation17_spill] sm:$0xff] }
  0x52   :  { %550 = vmatpush.msrb.mxu0 %v18171_v52  ;;  %589 = vmatpush.msrb.mxu1 %v10021_v29  ;;  %18172 = vst [vmem:[#allocation26_spill] sm:$0xff] %v10447_v21  ;;  %v756_v29 = vand.u32 4294901760, %v755_v1  ;;  %v284_v3 = vsub.f32 %v10428_v42, %v10447_v21 }
  0x53   :  { %739 = vmatpush.msrb.mxu3 %v738_v54  ;;  %278 = vmatmul.f32.vlgmr.msra.gmra.mxu0 %v10434_v58 }
  0x54   :  { %591 = vmatpush.msrb.mxu1 %v10039_v35  ;;  %554 = vmatpush.msrb.mxu0 %v18173_v38  ;;  %v18175_v35 = vand.u32 4294901760, %v10191_v31  ;;  %v10466_v43 = vand.u32 4294901760, %v284_v3  ;;  %v18179_v31 = vld [vmem:[#allocation18_spill] sm:$0xff] }
  0x55   :  { %638 = vmatpush.msrb.mxu2 %v10322_v27  ;;  %745 = vmatpush.msrb.mxu3 %v744_v53  ;;  %v18181_v55 = vand.u32 4294901760, %v18179_v31 }
  0x56   :  { %558 = vmatpush.msrb.mxu0 %v18174_v33  ;;  %593 = vmatpush.msrb.mxu1 %v10061_v45  ;;  %18176 = vst [vmem:[#allocation27_spill] sm:$0xff] %v10466_v43  ;;  %v18177_v45 = vld [vmem:[#allocation14_spill] sm:$0xff] }
  0x57   :  { %640 = vmatpush.msrb.mxu2 %v10345_v24  ;;  %751 = vmatpush.msrb.mxu3 %v750_v46 }
  0x58   :  { %562 = vmatpush.msrb.mxu0 %v18175_v35  ;;  %595 = vmatpush.msrb.mxu1 %v10074_v51  ;;  %v18178_v51 = vand.u32 4294901760, %v10138_v32 }
  0x59   :  { %642 = vmatpush.msrb.mxu2 %v10367_v7  ;;  %757 = vmatpush.msrb.mxu3 %v756_v29 }
  0x5a   :  { %445 = vmatmul.f32.vlgmr.msra.gmra.mxu2 %v10365_v49  ;;  %489 = vmatmul.f32.vlgmr.msra.gmra.mxu3 %v10391_v5 }
  0x5b   :  { %769 = vmatpush.msra.mxu0 %v10138_v32  ;;  %945 = vmatpush.msra.mxu3 %v10115_v6  ;;  %v18185_v32 = vand.u32 4294901760, %v18182_v44 }
  0x5c   :  { %597 = vmatpush.msrb.mxu1 %v18177_v45  ;;  %644 = vmatpush.msrb.mxu2 %v10380_v0  ;;  %v145_v45 = vld [vmem:[%s17771_s4 + $0x190] sm:$0xff] }
  0x5d   :  { %286 = vmatmul.f32.gmra.mxu0 %v10466_v43  ;;  %947 = vmatpush.msra.mxu3 %v10128_v13 }
  0x5e   :  { %874 = vmatpush.msra.mxu2 %v18178_v51  ;;  %772 = vmatpush.msra.mxu0 %v18179_v31  ;;  %v137_v51 = vld [vmem:[%s17771_s4 + $0x150] sm:$0xff] }
  0x5f   :  { %599 = vmatpush.msrb.mxu1 %v18180_v56  ;;  %949 = vmatpush.msra.mxu3 %v10148_v39 }
  0x60   :  { %878 = vmatpush.msra.mxu2 %v18181_v55  ;;  %391 = vmatmul.f32.gmra.mxu1 %v10407_v19 }
  0x61   :  { %775 = vmatpush.msra.mxu0 %v18182_v44  ;;  %601 = vmatpush.msrb.mxu1 %v18183_v41  ;;  %v10677_v44 = vand.u32 4294901760, %v145_v45 }
  0x62   :  { %882 = vmatpush.msra.mxu2 %v18185_v32  ;;  %951 = vmatpush.msra.mxu3 %v10160_v50  ;;  %v10684_v32 = vand.u32 4294901760, %v137_v51 }
  0x63   :  { %778 = vmatpush.msra.mxu0 %v18184_v10  ;;  %603 = vmatpush.msrb.mxu1 %v18186_v25 }
  0x64   :  { %886 = vmatpush.msra.mxu2 %v18187_v59  ;;  %953 = vmatpush.msra.mxu3 %v10175_v60  ;;  %v129_v59 = vld [vmem:[%s17771_s4 + $0x110] sm:$0xff] }
  0x65   :  { %781 = vmatpush.msra.mxu0 %v10211_v48  ;;  %827 = vmatpush.msra.mxu1 %v10115_v6  ;;  %v18189_v6 = vand.u32 4294901760, %v10239_v63  ;;  %v18190_v48 = vand.u32 4294901760, %v10257_v18 }
  0x66   :  { %564 = vmatmul.f32.vlgmr.msrb.gmra.mxu0 %v10330_v2  ;;  %890 = vmatpush.msra.mxu2 %v18188_v47 }
  0x67   :  { %829 = vmatpush.msra.mxu1 %v10128_v13  ;;  %784 = vmatpush.msra.mxu0 %v10239_v63  ;;  %v18191_v13 = vand.u32 4294901760, %v10275_v40 }
  0x68   :  { %955 = vmatpush.msra.mxu3 %v10203_v37  ;;  %605 = vmatmul.f32.vlgmr.msrb.gmra.mxu1 %v10330_v2 }
  0x69   :  { %787 = vmatpush.msra.mxu0 %v10257_v18  ;;  %831 = vmatpush.msra.mxu1 %v10148_v39  ;;  %v18192_v39 = vand.u32 4294901760, %v10293_v61 }
  0x6a   :  { %894 = vmatpush.msra.mxu2 %v18189_v6  ;;  %957 = vmatpush.msra.mxu3 %v10222_v57  ;;  %v218_v6 = vld [vmem:[%s17771_s4 + $0x3d8] sm:$0xff] }
  0x6b   :  { %790 = vmatpush.msra.mxu0 %v10275_v40  ;;  %833 = vmatpush.msra.mxu1 %v10160_v50  ;;  %v18193_v50 = vand.u32 4294901760, %v10308_v15  ;;  %v3233_v40 = vld [vmem:[%s17769_s2] sm:$0xff] }
  0x6c   :  { %898 = vmatpush.msra.mxu2 %v18190_v48  ;;  %959 = vmatpush.msra.mxu3 %v10241_v62 }
  0x6d   :  { %450 = vmatmul.f32.gmra.mxu2 %v10428_v42  ;;  %793 = vmatpush.msra.mxu0 %v10293_v61  ;;  %v217_v61 = vld [vmem:[%s17771_s4 + $0x3d0] sm:$0xff] }
  0x6e   :  { %835 = vmatpush.msra.mxu1 %v10175_v60  ;;  %902 = vmatpush.msra.mxu2 %v18191_v13  ;;  %v18194_v60 = vand.u32 4294901760, %v10320_v30 }
  0x6f   :  { %961 = vmatpush.msra.mxu3 %v10259_v36  ;;  %796 = vmatpush.msra.mxu0 %v10308_v15 }
  0x70   :  { %495 = vmatmul.f32.gmra.mxu3 %v10447_v21  ;;  %837 = vmatpush.msra.mxu1 %v10203_v37  ;;  %v10543_v37 = vand.u32 4294901760, %v217_v61 }
  0x71   :  { %906 = vmatpush.msra.mxu2 %v18192_v39  ;;  %963 = vmatpush.msra.mxu3 %v10277_v26 }
  0x72   :  { %799 = vmatpush.msra.mxu0 %v10320_v30  ;;  %839 = vmatpush.msra.mxu1 %v10222_v57  ;;  %v18195_v57 = vand.u32 4294901760, %v10337_v22  ;;  %v10563_v18 = vsub.f32 %v217_v61, %v10543_v37  ;;  %v9879_v30 = vmov 0   ;;  %v10708_v61 = vand.u32 4294901760, %v129_v59 }
  0x73   :  { %910 = vmatpush.msra.mxu2 %v18193_v50  ;;  %965 = vmatpush.msra.mxu3 %v10295_v14  ;;  %v10706_v50 = vsub.f32 %v145_v45, %v10677_v44  ;;  %v202_v45 = vld [vmem:[%s17771_s4 + $0x358] sm:$0xff] }
  0x74   :  { %802 = vmatpush.msra.mxu0 %v10337_v22  ;;  %841 = vmatpush.msra.mxu1 %v10241_v62  ;;  %v209_v62 = vld [vmem:[%s17771_s4 + $0x390] sm:$0xff] }
  0x75   :  { %914 = vmatpush.msra.mxu2 %v18194_v60  ;;  %967 = vmatpush.msra.mxu3 %v10310_v23  ;;  %v10558_v63 = vand.u32 4294901760, %v209_v62  ;;  %v121_v60 = vld [vmem:[%s17771_s4 + $0xd0] sm:$0xff] }
  0x76   :  { %650 = vmatmul.f32.vlgmr.msrb.gmra.mxu2 %v10434_v58  ;;  %805 = vmatpush.msra.mxu0 %v10353_v12  ;;  %v17820_v12 = vand.u32 4294901760, %v10563_v18 }
  0x77   :  { %843 = vmatpush.msra.mxu1 %v10259_v36  ;;  %918 = vmatpush.msra.mxu2 %v18195_v57  ;;  %v201_v36 = vld [vmem:[%s17771_s4 + $0x350] sm:$0xff]  ;;  %v10584_v22 = vsub.f32 %v209_v62, %v10558_v63 }
  0x78   :  { %969 = vmatpush.msra.mxu3 %v10322_v27  ;;  %808 = vmatpush.msra.mxu0 %v10378_v4  ;;  %v10574_v15 = vand.u32 4294901760, %v201_v36  ;;  %v177_v4 = vld [vmem:[%s17771_s4 + $0x290] sm:$0xff] }
  0x79   :  { %759 = vmatmul.f32.vlgmr.msrb.gmra.mxu3 %v10330_v2  ;;  %845 = vmatpush.msra.mxu1 %v10277_v26  ;;  %v193_v26 = vld [vmem:[%s17771_s4 + $0x310] sm:$0xff]  ;;  %v10611_v54 = vand.u32 4294901760, %v177_v4  ;;  %v17818_v28 = vand.u32 4294901760, %v10584_v22 }
  0x7a   :  { %922 = vmatpush.msra.mxu2 %v736_v8  ;;  %971 = vmatpush.msra.mxu3 %v10345_v24  ;;  %v10586_v8 = vand.u32 4294901760, %v193_v26 }
  0x7b   :  { %811 = vmatpush.msra.mxu0 %v10394_v16  ;;  %847 = vmatpush.msra.mxu1 %v10295_v14  ;;  %v185_v14 = vld [vmem:[%s17771_s4 + $0x2d0] sm:$0xff]  ;;  %v1043_v53 = vsub.f32 %v10584_v22, %v17818_v28  ;;  %v10638_v1 = vsub.f32 %v177_v4, %v10611_v54  ;;  %v10729_v4 = vand.u32 4294901760, %v121_v60 }
  0x7c   :  { %926 = vmatpush.msra.mxu2 %v742_v9  ;;  %973 = vmatpush.msra.mxu3 %v10367_v7  ;;  %v10598_v16 = vand.u32 4294901760, %v185_v14  ;;  %v169_v9 = vld [vmem:[%s17771_s4 + $0x250] sm:$0xff] }
  0x7d   :  { %9734 = vset.pattern.permute.xlu0 %v9879_v30  ;;  %814 = vmatpush.msra.mxu0 %v10405_v34  ;;  %v161_v34 = vld [vmem:[%s17771_s4 + $0x210] sm:$0xff]  ;;  %v10627_v17 = vand.u32 4294901760, %v169_v9  ;;  %v1044_v31 = vand.u32 4294901760, %v1043_v53  ;;  %18196 = vst [vmem:[#allocation14_spill] sm:$0xff] %v10729_v4  ;;  %v17809_v53 = vand.u32 4294901760, %v10706_v50 }
  0x7e   :  { %849 = vmatpush.msra.mxu1 %v10310_v23  ;;  %930 = vmatpush.msra.mxu2 %v748_v20  ;;  %v10596_v23 = vsub.f32 %v201_v36, %v10574_v15  ;;  %v10609_v20 = vsub.f32 %v193_v26, %v10586_v8  ;;  %v10640_v46 = vand.u32 4294901760, %v161_v34  ;;  %v10718_v36 = vsub.f32 %v137_v51, %v10684_v32 }
  0x7f   :  { %975 = vmatpush.msra.mxu3 %v10380_v0  ;;  %3254 = vperm.xlu0 %9734, %v3233_v40   ;;  %v10654_v33 = vsub.f32 %v169_v9, %v10627_v17  ;;  %v10720_v26 = vand.u32 4294901760, %v218_v6  ;;  %v113_v9 = vld [vmem:[%s17771_s4 + $0x90] sm:$0xff] }
  0x80   :  { %658 = vmatmul.f32.gmra.mxu2 %v10466_v43  ;;  %986 = vmatpush.msrb.mxu0 %v10543_v37  ;;  %v17817_v52 = vand.u32 4294901760, %v10596_v23  ;;  %v17816_v38 = vand.u32 4294901760, %v10609_v20  ;;  %v10673_v55 = vsub.f32 %v161_v34, %v10640_v46  ;;  %v10740_v34 = vsub.f32 %v129_v59, %v10708_v61 }
  0x81   :  { %1199 = vmatpush.msrb.mxu3 %v10543_v37  ;;  %851 = vmatpush.msra.mxu1 %v10322_v27  ;;  %v1037_v27 = vsub.f32 %v10563_v18, %v17820_v12  ;;  %v17813_v25 = vand.u32 4294901760, %v10654_v33  ;;  %v10765_v59 = vsub.f32 %v121_v60, %v10729_v4  ;;  %v10779_v60 = vand.u32 4294901760, %v202_v45 }
  0x82   :  { %934 = vmatpush.msra.mxu2 %v754_v11  ;;  %568 = vmatmul.f32.gmra.mxu0 %v10407_v19  ;;  %v10625_v11 = vsub.f32 %v185_v14, %v10598_v16  ;;  %v1049_v3 = vsub.f32 %v10596_v23, %v17817_v52  ;;  %v1055_v56 = vsub.f32 %v10609_v20, %v17816_v38  ;;  %v17811_v39 = vand.u32 4294901760, %v10673_v55  ;;  %v178_v38 = vld [vmem:[%s17771_s4 + $0x298] sm:$0xff] }
  0x83   :  { %763 = vmatmul.f32.gmra.mxu3 %v10407_v19  ;;  %988 = vmatpush.msrb.mxu0 %v10558_v63  ;;  %v1038_v29 = vand.u32 4294901760, %v1037_v27  ;;  %v1073_v62 = vsub.f32 %v10654_v33, %v17813_v25  ;;  %v210_v27 = vld [vmem:[%s17771_s4 + $0x398] sm:$0xff] }
  0x84   :  { %1141 = vmatpush.msrb.mxu2 %v10563_v18  ;;  %1201 = vmatpush.msrb.mxu3 %v10558_v63  ;;  %v17815_v35 = vand.u32 4294901760, %v10625_v11  ;;  %v1050_v41 = vand.u32 4294901760, %v1049_v3  ;;  %v1056_v48 = vand.u32 4294901760, %v1055_v56  ;;  %v1079_v14 = vsub.f32 %v10673_v55, %v17811_v39  ;;  %v105_v56 = vld [vmem:[%s17771_s4 + $0x50] sm:$0xff] }
  0x85   :  { %853 = vmatpush.msra.mxu1 %v10345_v24  ;;  %990 = vmatpush.msrb.mxu0 %v10574_v15  ;;  %v153_v24 = vld [vmem:[%s17771_s4 + $0x1d0] sm:$0xff]  ;;  %v10746_v3 = vsub.f32 %v218_v6, %v10720_v26  ;;  %v194_v6 = vld [vmem:[%s17771_s4 + $0x318] sm:$0xff] }
  0x86   :  { %609 = vmatmul.f32.gmra.mxu1 %v10407_v19  ;;  %1144 = vmatpush.msrb.mxu2 %v10584_v22  ;;  %v1061_v10 = vsub.f32 %v10625_v11, %v17815_v35  ;;  %v10802_v25 = vand.u32 4294901760, %v194_v6  ;;  %v17822_v35 = vand.u32 4294901760, %v10765_v59 }
  0x87   :  { %1203 = vmatpush.msrb.mxu3 %v10574_v15  ;;  %855 = vmatpush.msra.mxu1 %v10367_v7  ;;  %v10662_v7 = vand.u32 4294901760, %v153_v24  ;;  %18197 = vst [vmem:[#allocation18_spill] sm:$0xff] %v10746_v3 }
  0x88   :  { %992 = vmatpush.msrb.mxu0 %v10586_v8  ;;  %1147 = vmatpush.msrb.mxu2 %v10596_v23  ;;  %v1062_v57 = vand.u32 4294901760, %v1061_v10  ;;  %v1080_v10 = vand.u32 4294901760, %v1079_v14  ;;  %v17821_v14 = vand.u32 4294901760, %v10746_v3  ;;  %v10832_v12 = vsub.f32 %v194_v6, %v10802_v25 }
  0x89   :  { %1205 = vmatpush.msrb.mxu3 %v10586_v8  ;;  %857 = vmatpush.msra.mxu1 %v10380_v0  ;;  %v17814_v0 = vand.u32 4294901760, %v10638_v1  ;;  %v10693_v47 = vsub.f32 %v153_v24, %v10662_v7  ;;  %v1074_v24 = vand.u32 4294901760, %v1073_v62  ;;  %v10782_v62 = vand.u32 4294901760, %v105_v56 }
  0x8a   :  { %936 = vmatmul.f32.vlgmr.msra.gmra.mxu2 %v10330_v2  ;;  %994 = vmatpush.msrb.mxu0 %v10598_v16  ;;  %18203 = vst [vmem:[#allocation28_spill] sm:$0xff] %v10832_v12 }
  0x8b   :  { %1039 = vmatpush.msrb.mxu1 %v1038_v29  ;;  %1150 = vmatpush.msrb.mxu2 %v10609_v20  ;;  %v1067_v13 = vsub.f32 %v10638_v1, %v17814_v0  ;;  %v17810_v40 = vand.u32 4294901760, %v10693_v47  ;;  %v17812_v29 = vand.u32 4294901760, %v10718_v36  ;;  %18199 = vst [vmem:[#allocation19_spill] sm:$0xff] %v10782_v62  ;;  %v10823_v28 = vsub.f32 %v105_v56, %v10782_v62  ;;  %v170_v56 = vld [vmem:[%s17771_s4 + $0x258] sm:$0xff] }
  0x8c   :  { %1207 = vmatpush.msrb.mxu3 %v10598_v16  ;;  %817 = vmatmul.f32.vlgmr.msra.gmra.mxu0 %v10365_v49 }
  0x8d   :  { %977 = vmatmul.f32.vlgmr.msra.gmra.mxu3 %v10330_v2  ;;  %996 = vmatpush.msrb.mxu0 %v10611_v54  ;;  %v1068_v30 = vand.u32 4294901760, %v1067_v13  ;;  %v1085_v51 = vsub.f32 %v10693_v47, %v17810_v40  ;;  %v97_v13 = vld [vmem:[%s17771_s4 + $0x10] sm:$0xff] }
  0x8e   :  { %1045 = vmatpush.msrb.mxu1 %v1044_v31  ;;  %1153 = vmatpush.msrb.mxu2 %v10625_v11  ;;  %v10756_v31 = vand.u32 4294901760, %v113_v9  ;;  %v10805_v0 = vand.u32 4294901760, %v97_v13 }
  0x8f   :  { %1209 = vmatpush.msrb.mxu3 %v10611_v54  ;;  %861 = vmatmul.f32.vlgmr.msra.gmra.mxu1 %v10391_v5  ;;  %v1086_v40 = vand.u32 4294901760, %v1085_v51  ;;  %v10817_v51 = vsub.f32 %v202_v45, %v10779_v60 }
  0x90   :  { %998 = vmatpush.msrb.mxu0 %v10627_v17  ;;  %1051 = vmatpush.msrb.mxu1 %v1050_v41  ;;  %18198 = vst [vmem:[#allocation15_spill] sm:$0xff] %v10756_v31  ;;  %v10761_v41 = vand.u32 4294901760, %v210_v27  ;;  %v10797_v39 = vsub.f32 %v113_v9, %v10756_v31 }
  0x91   :  { %1156 = vmatpush.msrb.mxu2 %v10638_v1  ;;  %1211 = vmatpush.msrb.mxu3 %v10627_v17  ;;  %18201 = vst [vmem:[#allocation20_spill] sm:$0xff] %v10805_v0 }
  0x92   :  { %1000 = vmatpush.msrb.mxu0 %v10640_v46  ;;  %1057 = vmatpush.msrb.mxu1 %v1056_v48  ;;  %v1091_v48 = vsub.f32 %v10706_v50, %v17809_v53  ;;  %v186_v53 = vld [vmem:[%s17771_s4 + $0x2d8] sm:$0xff]  ;;  %18202 = vst [vmem:[#allocation17_spill] sm:$0xff] %v10817_v51 }
  0x93   :  { %1159 = vmatpush.msrb.mxu2 %v10654_v33  ;;  %1213 = vmatpush.msrb.mxu3 %v10640_v46 }
  0x94   :  { %1002 = vmatpush.msrb.mxu0 %v10662_v7  ;;  %1063 = vmatpush.msrb.mxu1 %v1062_v57  ;;  %v17819_v57 = vand.u32 4294901760, %v10740_v34  ;;  %v1092_v9 = vand.u32 4294901760, %v1091_v48  ;;  %v1409_v48 = vsub.f32 %v10746_v3, %v17821_v14  ;;  %v18206_v14 = vand.u32 4294901760, %v10797_v39 }
  0x95   :  { %1162 = vmatpush.msrb.mxu2 %v10673_v55  ;;  %1215 = vmatpush.msrb.mxu3 %v10662_v7  ;;  %v18210_v3 = vand.u32 4294901760, %v10832_v12 }
  0x96   :  { %1004 = vmatpush.msrb.mxu0 %v10677_v44  ;;  %1069 = vmatpush.msrb.mxu1 %v1068_v30  ;;  %v1097_v30 = vsub.f32 %v10718_v36, %v17812_v29  ;;  %v10800_v29 = vsub.f32 %v210_v27, %v10761_v41  ;;  %v1103_v27 = vsub.f32 %v10740_v34, %v17819_v57  ;;  %v162_v57 = vld [vmem:[%s17771_s4 + $0x218] sm:$0xff] }
  0x97   :  { %1165 = vmatpush.msrb.mxu2 %v10693_v47  ;;  %1217 = vmatpush.msrb.mxu3 %v10677_v44  ;;  %v1115_v43 = vsub.f32 %v10797_v39, %v18206_v14  ;;  %v18207_v14 = vand.u32 4294901760, %v10817_v51 }
  0x98   :  { %1006 = vmatpush.msrb.mxu0 %v10684_v32  ;;  %1075 = vmatpush.msrb.mxu1 %v1074_v24  ;;  %v3234_v24 = vld [vmem:[%s17769_s2 + $0x8] sm:$0xff]  ;;  %18200 = vst [vmem:[#allocation16_spill] sm:$0xff] %v10800_v29  ;;  %v1098_v52 = vand.u32 4294901760, %v1097_v30  ;;  %v10845_v30 = vsub.f32 %v97_v13, %v10805_v0  ;;  %v1104_v6 = vand.u32 4294901760, %v1103_v27  ;;  %v18205_v27 = vand.u32 4294901760, %v10800_v29 }
  0x99   :  { %1168 = vmatpush.msrb.mxu2 %v10706_v50  ;;  %1219 = vmatpush.msrb.mxu3 %v10684_v32  ;;  %v10877_v13 = vand.u32 4294901760, %v162_v57 }
  0x9a   :  { %1008 = vmatpush.msrb.mxu0 %v10708_v61  ;;  %1081 = vmatpush.msrb.mxu1 %v1080_v10  ;;  %v10819_v10 = vand.u32 4294901760, %v186_v53 }
  0x9b   :  { %1171 = vmatpush.msrb.mxu2 %v10718_v36  ;;  %1221 = vmatpush.msrb.mxu3 %v10708_v61 }
  0x9c   :  { %3259 = vperm.xlu0 %9734, %v3234_v24   ;;  %1010 = vmatpush.msrb.mxu0 %v10729_v4  ;;  %v10834_v24 = vand.u32 4294901760, %v178_v38  ;;  %v10850_v45 = vsub.f32 %v186_v53, %v10819_v10  ;;  %v1415_v53 = vsub.f32 %v10800_v29, %v18205_v27 }
  0x9d   :  { %1087 = vmatpush.msrb.mxu1 %v1086_v40  ;;  %1174 = vmatpush.msrb.mxu2 %v10740_v34  ;;  %v1109_v40 = vsub.f32 %v10765_v59, %v17822_v35  ;;  %v1410_v35 = vand.u32 4294901760, %v1409_v48  ;;  %v154_v48 = vld [vmem:[%s17771_s4 + $0x1d8] sm:$0xff] }
  0x9e   :  { %1223 = vmatpush.msrb.mxu3 %v10729_v4  ;;  %1012 = vmatpush.msrb.mxu0 %v10756_v31  ;;  %18204 = vst [vmem:[#allocation29_spill] sm:$0xff] %v10850_v45  ;;  %v10869_v4 = vsub.f32 %v178_v38, %v10834_v24  ;;  %v1421_v38 = vsub.f32 %v10817_v51, %v18207_v14  ;;  %v10895_v29 = vand.u32 4294901760, %v154_v48  ;;  %v18209_v14 = vand.u32 4294901760, %v10563_v18 }
  0x9f   :  { %1093 = vmatpush.msrb.mxu1 %v1092_v9  ;;  %1177 = vmatpush.msrb.mxu2 %v10765_v59  ;;  %v10858_v9 = vand.u32 4294901760, %v170_v56  ;;  %v1116_v51 = vand.u32 4294901760, %v1115_v43 }
  0xa0   :  { %1225 = vmatpush.msrb.mxu3 %v10756_v31  ;;  %1014 = vmatpush.msrb.mxu0 %v10782_v62  ;;  %v1416_v31 = vand.u32 4294901760, %v1415_v53  ;;  %v18212_v53 = vand.u32 4294901760, %v10850_v45 }
  0xa1   :  { %1099 = vmatpush.msrb.mxu1 %v1098_v52  ;;  %1180 = vmatpush.msrb.mxu2 %v10797_v39  ;;  %v1110_v52 = vand.u32 4294901760, %v1109_v40  ;;  %v18208_v40 = vand.u32 4294901760, %v10823_v28  ;;  %v10893_v27 = vsub.f32 %v170_v56, %v10858_v9  ;;  %v18211_v56 = vand.u32 4294901760, %v10845_v30 }
  0xa2   :  { %1227 = vmatpush.msrb.mxu3 %v10782_v62  ;;  %1016 = vmatpush.msrb.mxu0 %v10805_v0  ;;  %v146_v62 = vld [vmem:[%s17771_s4 + $0x198] sm:$0xff] }
  0xa3   :  { %1105 = vmatpush.msrb.mxu1 %v1104_v6  ;;  %1183 = vmatpush.msrb.mxu2 %v10823_v28  ;;  %v1121_v6 = vsub.f32 %v10823_v28, %v18208_v40  ;;  %v138_v40 = vld [vmem:[%s17771_s4 + $0x158] sm:$0xff]  ;;  %v1127_v18 = vsub.f32 %v10845_v30, %v18211_v56  ;;  %v10913_v43 = vand.u32 4294901760, %v146_v62  ;;  %v18213_v56 = vand.u32 4294901760, %v10584_v22 }
  0xa4   :  { %1229 = vmatpush.msrb.mxu3 %v10805_v0  ;;  %940 = vmatmul.f32.gmra.mxu2 %v10407_v19  ;;  %v1427_v0 = vsub.f32 %v10832_v12, %v18210_v3  ;;  %v1422_v3 = vand.u32 4294901760, %v1421_v38  ;;  %v17843_v5 = vand.u32 4294901760, %v10893_v27  ;;  %v10930_v38 = vand.u32 4294901760, %v138_v40  ;;  %v122_v22 = vld [vmem:[%s17771_s4 + $0xd8] sm:$0xff] }
  0xa5   :  { %1246 = vmatpush.msra.mxu0 %v18209_v14  ;;  %1111 = vmatpush.msrb.mxu1 %v1110_v52  ;;  %v1433_v52 = vsub.f32 %v10850_v45, %v18212_v53  ;;  %v130_v14 = vld [vmem:[%s17771_s4 + $0x118] sm:$0xff]  ;;  %v18214_v45 = vand.u32 4294901760, %v10869_v4 }
  0xa6   :  { %1411 = vmatpush.msra.mxu3 %v1410_v35  ;;  %1186 = vmatpush.msrb.mxu2 %v10845_v30  ;;  %v10911_v35 = vsub.f32 %v162_v57, %v10877_v13  ;;  %v1122_v57 = vand.u32 4294901760, %v1121_v6  ;;  %v1428_v53 = vand.u32 4294901760, %v1427_v0  ;;  %v18215_v6 = vand.u32 4294901760, %v10596_v23 }
  0xa7   :  { %822 = vmatmul.f32.gmra.mxu0 %v10428_v42  ;;  %981 = vmatmul.f32.gmra.mxu3 %v10407_v19  ;;  %v10928_v42 = vsub.f32 %v154_v48, %v10895_v29  ;;  %v1439_v12 = vsub.f32 %v10869_v4, %v18214_v45  ;;  %v1128_v48 = vand.u32 4294901760, %v1127_v18  ;;  %v10945_v0 = vand.u32 4294901760, %v130_v14  ;;  %v114_v45 = vld [vmem:[%s17771_s4 + $0x98] sm:$0xff] }
  0xa8   :  { %1250 = vmatpush.msra.mxu0 %v18213_v56  ;;  %1358 = vmatpush.msra.mxu2 %v10720_v26  ;;  %v18216_v23 = vand.u32 4294901760, %v10609_v20  ;;  %v1445_v18 = vsub.f32 %v10893_v27, %v17843_v5  ;;  %v10960_v56 = vand.u32 4294901760, %v122_v22  ;;  %v18218_v20 = vand.u32 4294901760, %v10911_v35 }
  0xa9   :  { %1417 = vmatpush.msra.mxu3 %v1416_v31  ;;  %1117 = vmatpush.msrb.mxu1 %v1116_v51  ;;  %v10943_v31 = vsub.f32 %v146_v62, %v10913_v43  ;;  %v1434_v51 = vand.u32 4294901760, %v1433_v52  ;;  %v1456_v62 = vand.u32 4294901760, %v10928_v42  ;;  %v18217_v52 = vand.u32 4294901760, %v10625_v11 }
  0xaa   :  { %867 = vmatmul.f32.gmra.mxu1 %v10447_v21  ;;  %1254 = vmatpush.msra.mxu0 %v18215_v6  ;;  %v10958_v6 = vsub.f32 %v138_v40, %v10930_v38  ;;  %v10970_v5 = vsub.f32 %v130_v14, %v10945_v0  ;;  %v10972_v40 = vand.u32 4294901760, %v114_v45  ;;  %v1446_v11 = vand.u32 4294901760, %v1445_v18 }
  0xab   :  { %1360 = vmatpush.msra.mxu2 %v10761_v41  ;;  %1423 = vmatpush.msra.mxu3 %v1422_v3  ;;  %v1440_v3 = vand.u32 4294901760, %v1439_v12  ;;  %v18219_v12 = vand.u32 4294901760, %v10638_v1  ;;  %v1457_v14 = vsub.f32 %v10928_v42, %v1456_v62 }
  0xac   :  { %1123 = vmatpush.msrb.mxu1 %v1122_v57  ;;  %1258 = vmatpush.msra.mxu0 %v18216_v23  ;;  %v1451_v57 = vsub.f32 %v10911_v35, %v18218_v20  ;;  %v1462_v23 = vand.u32 4294901760, %v10943_v31  ;;  %v1474_v20 = vand.u32 4294901760, %v10970_v5 }
  0xad   :  { %1362 = vmatpush.msra.mxu2 %v10779_v60  ;;  %1429 = vmatpush.msra.mxu3 %v1428_v53  ;;  %v106_v53 = vld [vmem:[%s17771_s4 + $0x58] sm:$0xff] }
  0xae   :  { %1129 = vmatpush.msrb.mxu1 %v1128_v48  ;;  %1262 = vmatpush.msra.mxu0 %v18217_v52  ;;  %v1468_v48 = vand.u32 4294901760, %v10958_v6  ;;  %v10986_v52 = vsub.f32 %v122_v22, %v10960_v56  ;;  %v10993_v1 = vand.u32 4294901760, %v106_v53  ;;  %v1452_v18 = vand.u32 4294901760, %v1451_v57 }
  0xaf   :  { %1364 = vmatpush.msra.mxu2 %v10802_v25  ;;  %1435 = vmatpush.msra.mxu3 %v1434_v51  ;;  %v18220_v51 = vand.u32 4294901760, %v10654_v33  ;;  %v1463_v22 = vsub.f32 %v10943_v31, %v1462_v23  ;;  %v18221_v33 = vand.u32 4294901760, %v10673_v55 }
  0xb0   :  { %1317 = vmatpush.msra.mxu1 %v10543_v37  ;;  %1266 = vmatpush.msra.mxu0 %v18219_v12  ;;  %v98_v37 = vld [vmem:[%s17771_s4 + $0x18] sm:$0xff]  ;;  %v11002_v12 = vsub.f32 %v114_v45, %v10972_v40  ;;  %v1469_v57 = vsub.f32 %v10958_v6, %v1468_v48  ;;  %v18222_v45 = vand.u32 4294901760, %v10693_v47 }
  0xb1   :  { %1366 = vmatpush.msra.mxu2 %v10819_v10  ;;  %1441 = vmatpush.msra.mxu3 %v1440_v3  ;;  %v1458_v3 = vand.u32 4294901760, %v1457_v14  ;;  %v1464_v55 = vand.u32 4294901760, %v1463_v22  ;;  %v18224_v22 = vand.u32 4294901760, %v10718_v36 }
  0xb2   :  { %1319 = vmatpush.msra.mxu1 %v10558_v63  ;;  %1270 = vmatpush.msra.mxu0 %v18220_v51  ;;  %v11006_v63 = vand.u32 4294901760, %v98_v37  ;;  %v1480_v51 = vand.u32 4294901760, %v10986_v52  ;;  %v1486_v14 = vand.u32 4294901760, %v11002_v12  ;;  %v1470_v47 = vand.u32 4294901760, %v1469_v57 }
  0xb3   :  { %1368 = vmatpush.msra.mxu2 %v10834_v24  ;;  %1447 = vmatpush.msra.mxu3 %v1446_v11  ;;  %v1475_v11 = vsub.f32 %v10970_v5, %v1474_v20 }
  0xb4   :  { %1321 = vmatpush.msra.mxu1 %v10574_v15  ;;  %1274 = vmatpush.msra.mxu0 %v18221_v33  ;;  %v11017_v15 = vsub.f32 %v106_v53, %v10993_v1  ;;  %v18223_v53 = vand.u32 4294901760, %v10706_v50  ;;  %v1487_v50 = vsub.f32 %v11002_v12, %v1486_v14 }
  0xb5   :  { %1370 = vmatpush.msra.mxu2 %v10858_v9  ;;  %1453 = vmatpush.msra.mxu3 %v1452_v18  ;;  %v1481_v18 = vsub.f32 %v10986_v52, %v1480_v51 }
  0xb6   :  { %1323 = vmatpush.msra.mxu1 %v10586_v8  ;;  %1278 = vmatpush.msra.mxu0 %v18222_v45  ;;  %v11028_v8 = vsub.f32 %v98_v37, %v11006_v63  ;;  %v1476_v37 = vand.u32 4294901760, %v1475_v11  ;;  %v1488_v57 = vand.u32 4294901760, %v1487_v50  ;;  %v18236_v11 = vld [vmem:[#allocation15_spill] sm:$0xff] }
  0xb7   :  { %1372 = vmatpush.msra.mxu2 %v10877_v13  ;;  %1459 = vmatpush.msra.mxu3 %v1458_v3  ;;  %v1482_v3 = vand.u32 4294901760, %v1481_v18  ;;  %v18239_v18 = vld [vmem:[#allocation19_spill] sm:$0xff] }
  0xb8   :  { %1325 = vmatpush.msra.mxu1 %v10598_v16  ;;  %1282 = vmatpush.msra.mxu0 %v18223_v53  ;;  %v1492_v16 = vand.u32 4294901760, %v11017_v15  ;;  %v1498_v33 = vand.u32 4294901760, %v11028_v8  ;;  %v18237_v53 = vld [vmem:[#allocation17_spill] sm:$0xff] }
  0xb9   :  { %1374 = vmatpush.msra.mxu2 %v10895_v29  ;;  %1465 = vmatpush.msra.mxu3 %v1464_v55  ;;  %v18233_v55 = vld [vmem:[#allocation27_spill] sm:$0xff]  ;;  %v18241_v50 = vand.u32 4294901760, %v18237_v53 }
  0xba   :  { %1327 = vmatpush.msra.mxu1 %v10611_v54  ;;  %1286 = vmatpush.msra.mxu0 %v18224_v22  ;;  %v18225_v54 = vand.u32 4294901760, %v10740_v34  ;;  %v1493_v36 = vsub.f32 %v11017_v15, %v1492_v16  ;;  %v1499_v34 = vsub.f32 %v11028_v8, %v1498_v33  ;;  %v18240_v22 = vld [vmem:[#allocation28_spill] sm:$0xff] }
  0xbb   :  { %1376 = vmatpush.msra.mxu2 %v10913_v43  ;;  %1471 = vmatpush.msra.mxu3 %v1470_v47 }
  0xbc   :  { %1329 = vmatpush.msra.mxu1 %v10627_v17  ;;  %1290 = vmatpush.msra.mxu0 %v18225_v54  ;;  %v18226_v17 = vand.u32 4294901760, %v10765_v59  ;;  %v1494_v45 = vand.u32 4294901760, %v1493_v36  ;;  %v1500_v59 = vand.u32 4294901760, %v1499_v34  ;;  %v18243_v36 = vld [vmem:[#allocation29_spill] sm:$0xff] }
  0xbd   :  { %1378 = vmatpush.msra.mxu2 %v10930_v38  ;;  %1477 = vmatpush.msra.mxu3 %v1476_v37  ;;  %v11093_v37 = vld [vmem:[#allocation10] sm:$0xff] }
  0xbe   :  { %1331 = vmatpush.msra.mxu1 %v10640_v46  ;;  %1294 = vmatpush.msra.mxu0 %v18226_v17  ;;  %v18227_v46 = vand.u32 4294901760, %v10797_v39  ;;  %v18229_v39 = vand.u32 4294901760, %v10845_v30  ;;  %v18234_v30 = vld [vmem:[#allocation16_spill] sm:$0xff]  ;;  %v18244_v17 = vand.u32 4294901760, %v18240_v22 }
  0xbf   :  { %1380 = vmatpush.msra.mxu2 %v10945_v0  ;;  %1483 = vmatpush.msra.mxu3 %v1482_v3  ;;  %v18238_v47 = vand.u32 4294901760, %v18234_v30  ;;  %v18242_v3 = vld [vmem:[#allocation20_spill] sm:$0xff] }
  0xc0   :  { %1333 = vmatpush.msra.mxu1 %v10662_v7  ;;  %1022 = vmatmul.f32.vlgmr.msrb.gmra.mxu0 %v10434_v58  ;;  %v18228_v7 = vand.u32 4294901760, %v10823_v28  ;;  %v18231_v28 = vld [vmem:[#allocation18_spill] sm:$0xff]  ;;  %v388_v34 = vpop.f32.mrf.mxu1 }
  0xc1   :  { %1298 = vmatpush.msra.mxu0 %v18227_v46  ;;  %1382 = vmatpush.msra.mxu2 %v10960_v56  ;;  %v18245_v46 = vand.u32 4294901760, %v18243_v36 }
  0xc2   :  { %1335 = vmatpush.msra.mxu1 %v10677_v44  ;;  %1489 = vmatpush.msra.mxu3 %v1488_v57  ;;  %v18230_v44 = vld [vmem:[#allocation23_spill] sm:$0xff]  ;;  %v225_v57 = vperm.slane %v11093_v37, 0 }
  0xc3   :  { %1131 = vmatmul.f32.vlgmr.msrb.gmra.mxu1 %v10330_v2  ;;  %1302 = vmatpush.msra.mxu0 %v18228_v7  ;;  %v18248_v7 = vld [vmem:[#allocation25_spill] sm:$0xff] }
  0xc4   :  { %1337 = vmatpush.msra.mxu1 %v10684_v32  ;;  %1384 = vmatpush.msra.mxu2 %v10972_v40  ;;  %v18232_v32 = vld [vmem:[#allocation14_spill] sm:$0xff] }
  0xc5   :  { %1495 = vmatpush.msra.mxu3 %v1494_v45  ;;  %1306 = vmatpush.msra.mxu0 %v18229_v39  ;;  %v18246_v45 = vand.u32 4294901760, %v10869_v4 }
  0xc6   :  { %1339 = vmatpush.msra.mxu1 %v10708_v61  ;;  %1386 = vmatpush.msra.mxu2 %v10993_v1  ;;  %v18235_v61 = vand.u32 4294901760, %v18231_v28 }
  0xc7   :  { %1501 = vmatpush.msra.mxu3 %v1500_v59  ;;  %1189 = vmatmul.f32.vlgmr.msrb.gmra.mxu2 %v10365_v49 }
  0xc8   :  { %1233 = vmatmul.f32.vlgmr.msrb.gmra.mxu3 %v18230_v44  ;;  %1513 = vmatpush.msrb.mxu0 %v18231_v28 }
  0xc9   :  { %1689 = vmatpush.msrb.mxu3 %v10720_v26  ;;  %1341 = vmatpush.msra.mxu1 %v18232_v32 }
  0xca   :  { %1388 = vmatpush.msra.mxu2 %v11006_v63  ;;  %1030 = vmatmul.f32.gmra.mxu0 %v18233_v55 }
  0xcb   :  { %1516 = vmatpush.msrb.mxu0 %v18234_v30  ;;  %1691 = vmatpush.msrb.mxu3 %v10761_v41  ;;  %v163_v30 = vld [vmem:[%s17771_s4 + $0x220] sm:$0xff] }
  0xcc   :  { %1618 = vmatpush.msrb.mxu2 %v18235_v61  ;;  %1343 = vmatpush.msra.mxu1 %v18236_v11 }
  0xcd   :  { %1135 = vmatmul.f32.gmra.mxu1 %v10407_v19  ;;  %1519 = vmatpush.msrb.mxu0 %v18237_v53 }
  0xce   :  { %1622 = vmatpush.msrb.mxu2 %v18238_v47  ;;  %1693 = vmatpush.msrb.mxu3 %v10779_v60 }
  0xcf   :  { %1345 = vmatpush.msra.mxu1 %v18239_v18  ;;  %1522 = vmatpush.msrb.mxu0 %v18240_v22  ;;  %v155_v22 = vld [vmem:[%s17771_s4 + $0x1e0] sm:$0xff] }
  0xd0   :  { %1626 = vmatpush.msrb.mxu2 %v18241_v50  ;;  %1695 = vmatpush.msrb.mxu3 %v10802_v25  ;;  %v279_v54 = vpop.f32.mrf.mxu0 }
  0xd1   :  { %1347 = vmatpush.msra.mxu1 %v18242_v3  ;;  %1525 = vmatpush.msrb.mxu0 %v18243_v36 }
  0xd2   :  { %1630 = vmatpush.msrb.mxu2 %v18244_v17  ;;  %1697 = vmatpush.msrb.mxu3 %v10819_v10 }
  0xd3   :  { %1571 = vmatpush.msrb.mxu1 %v10720_v26  ;;  %1308 = vmatmul.f32.vlgmr.msra.gmra.mxu0 %v10330_v2  ;;  %v280_v26 = vadd.f32 %v279_v54, %v225_v57  ;;  %v11260_v54 = vand.u32 4294901760, %v163_v30 }
  0xd4   :  { %1528 = vmatpush.msrb.mxu0 %v10869_v4  ;;  %1634 = vmatpush.msrb.mxu2 %v18245_v46  ;;  %v18249_v4 = vand.u32 4294901760, %v10911_v35  ;;  %v11276_v46 = vand.u32 4294901760, %v155_v22 }
  0xd5   :  { %1573 = vmatpush.msrb.mxu1 %v10761_v41  ;;  %1699 = vmatpush.msrb.mxu3 %v10834_v24  ;;  %v18247_v41 = vand.u32 4294901760, %v10893_v27  ;;  %v389_v59 = vadd.f32 %v388_v34, %v280_v26 }
  0xd6   :  { %1349 = vmatmul.f32.vlgmr.msra.gmra.mxu1 %v10330_v2  ;;  %1531 = vmatpush.msrb.mxu0 %v10893_v27 }
  0xd7   :  { %1575 = vmatpush.msrb.mxu1 %v10779_v60  ;;  %1638 = vmatpush.msrb.mxu2 %v18246_v45 }
  0xd8   :  { %1701 = vmatpush.msrb.mxu3 %v10858_v9  ;;  %1534 = vmatpush.msrb.mxu0 %v10911_v35 }
  0xd9   :  { %1577 = vmatpush.msrb.mxu1 %v10802_v25  ;;  %1642 = vmatpush.msrb.mxu2 %v18247_v41  ;;  %v139_v41 = vld [vmem:[%s17771_s4 + $0x160] sm:$0xff] }
  0xda   :  { %1703 = vmatpush.msrb.mxu3 %v10877_v13  ;;  %1194 = vmatmul.f32.gmra.mxu2 %v18248_v7  ;;  %v11125_v39 = vpop.f32.mrf.mxu0 }
  0xdb   :  { %1537 = vmatpush.msrb.mxu0 %v10928_v42  ;;  %1579 = vmatpush.msrb.mxu1 %v10819_v10  ;;  %v219_v10 = vld [vmem:[%s17771_s4 + $0x3e0] sm:$0xff] }
  0xdc   :  { %1646 = vmatpush.msrb.mxu2 %v18249_v4  ;;  %1705 = vmatpush.msrb.mxu3 %v10895_v29  ;;  %v11154_v42 = vand.u32 4294901760, %v219_v10 }
  0xdd   :  { %1239 = vmatmul.f32.gmra.mxu3 %v10447_v21  ;;  %1540 = vmatpush.msrb.mxu0 %v10943_v31  ;;  %v11134_v25 = vpop.f32.mrf.mxu1  ;;  %v446_v60 = vpop.f32.mrf.mxu2 }
  0xde   :  { %1581 = vmatpush.msrb.mxu1 %v10834_v24  ;;  %1650 = vmatpush.msrb.mxu2 %v1456_v62  ;;  %v447_v27 = vadd.f32 %v446_v60, %v389_v59  ;;  %v490_v28 = vpop.f32.mrf.mxu3  ;;  %v211_v24 = vld [vmem:[%s17771_s4 + $0x3a0] sm:$0xff]  ;;  %v11289_v59 = vsub.f32 %v163_v30, %v11260_v54 }
  0xdf   :  { %1707 = vmatpush.msrb.mxu3 %v10913_v43  ;;  %1543 = vmatpush.msrb.mxu0 %v10958_v6  ;;  %v11169_v6 = vand.u32 4294901760, %v211_v24  ;;  %v131_v60 = vld [vmem:[%s17771_s4 + $0x120] sm:$0xff] }
  0xe0   :  { %1583 = vmatpush.msrb.mxu1 %v10858_v9  ;;  %1654 = vmatpush.msrb.mxu2 %v1462_v23  ;;  %v491_v35 = vadd.f32 %v490_v28, %v447_v27  ;;  %v11305_v28 = vsub.f32 %v155_v22, %v11276_v46  ;;  %v212_v22 = vld [vmem:[%s17771_s4 + $0x3a8] sm:$0xff] }
  0xe1   :  { %1709 = vmatpush.msrb.mxu3 %v10930_v38  ;;  %1546 = vmatpush.msrb.mxu0 %v10970_v5  ;;  %v11175_v5 = vsub.f32 %v219_v10, %v11154_v42  ;;  %v11307_v10 = vand.u32 4294901760, %v139_v41 }
  0xe2   :  { %1585 = vmatpush.msrb.mxu1 %v10877_v13  ;;  %1658 = vmatpush.msrb.mxu2 %v1468_v48  ;;  %v203_v13 = vld [vmem:[%s17771_s4 + $0x360] sm:$0xff] }
  0xe3   :  { %1711 = vmatpush.msrb.mxu3 %v10945_v0  ;;  %1394 = vmatmul.f32.vlgmr.msra.gmra.mxu2 %v10434_v58  ;;  %v565_v9 = vpop.f32.mrf.mxu0  ;;  %v11182_v48 = vand.u32 4294901760, %v203_v13  ;;  %18251 = vst [vmem:[#allocation14_spill] sm:$0xff] %v11307_v10 }
  0xe4   :  { %1549 = vmatpush.msrb.mxu0 %v10986_v52  ;;  %1587 = vmatpush.msrb.mxu1 %v10895_v29  ;;  %v566_v31 = vadd.f32 %v565_v9, %v491_v35  ;;  %v195_v29 = vld [vmem:[%s17771_s4 + $0x320] sm:$0xff]  ;;  %v220_v9 = vld [vmem:[%s17771_s4 + $0x3e8] sm:$0xff] }
  0xe5   :  { %1662 = vmatpush.msrb.mxu2 %v1474_v20  ;;  %1713 = vmatpush.msrb.mxu3 %v10960_v56  ;;  %v606_v62 = vpop.f32.mrf.mxu1  ;;  %v11192_v52 = vand.u32 4294901760, %v195_v29  ;;  %v187_v20 = vld [vmem:[%s17771_s4 + $0x2e0] sm:$0xff] }
  0xe6   :  { %1503 = vmatmul.f32.vlgmr.msra.gmra.mxu3 %v10330_v2  ;;  %1552 = vmatpush.msrb.mxu0 %v11002_v12  ;;  %v607_v23 = vadd.f32 %v606_v62, %v566_v31  ;;  %v11204_v12 = vsub.f32 %v203_v13, %v11182_v48 }
  0xe7   :  { %1589 = vmatpush.msrb.mxu1 %v10913_v43  ;;  %1666 = vmatpush.msrb.mxu2 %v1480_v51  ;;  %v11190_v43 = vsub.f32 %v211_v24, %v11169_v6  ;;  %v179_v51 = vld [vmem:[%s17771_s4 + $0x2a0] sm:$0xff] }
  0xe8   :  { %1715 = vmatpush.msrb.mxu3 %v10972_v40  ;;  %1555 = vmatpush.msrb.mxu0 %v11017_v15  ;;  %3217 = vst [vmem:[#allocation2 + $0x30] sm:$0xff] %v607_v23  ;;  %v11217_v15 = vsub.f32 %v195_v29, %v11192_v52  ;;  %v11228_v32 = vand.u32 4294901760, %v179_v51  ;;  %v11322_v23 = vand.u32 4294901760, %v131_v60  ;;  %v17844_v29 = vand.u32 4294901760, %v11289_v59 }
  0xe9   :  { %1591 = vmatpush.msrb.mxu1 %v10930_v38  ;;  %1670 = vmatpush.msrb.mxu2 %v1486_v14  ;;  %v17854_v38 = vand.u32 4294901760, %v11175_v5  ;;  %v17853_v14 = vand.u32 4294901760, %v11190_v43 }
  0xea   :  { %1717 = vmatpush.msrb.mxu3 %v10993_v1  ;;  %1558 = vmatpush.msrb.mxu0 %v11028_v8  ;;  %v288_v8 = vadd.f32 %v11125_v39, %v225_v57  ;;  %v17851_v18 = vand.u32 4294901760, %v11217_v15  ;;  %v11258_v50 = vsub.f32 %v179_v51, %v11228_v32  ;;  %v147_v57 = vld [vmem:[%s17771_s4 + $0x1a0] sm:$0xff]  ;;  %18252 = vst [vmem:[#allocation16_spill] sm:$0xff] %v11322_v23 }
  0xeb   :  { %1593 = vmatpush.msrb.mxu1 %v10945_v0  ;;  %1674 = vmatpush.msrb.mxu2 %v1492_v16  ;;  %v11211_v0 = vand.u32 4294901760, %v187_v20  ;;  %v171_v16 = vld [vmem:[%s17771_s4 + $0x260] sm:$0xff]  ;;  %v1787_v47 = vsub.f32 %v11190_v43, %v17853_v14  ;;  %v11291_v39 = vand.u32 4294901760, %v147_v57 }
  0xec   :  { %1719 = vmatpush.msrb.mxu3 %v11006_v63  ;;  %1402 = vmatmul.f32.gmra.mxu2 %v18233_v55  ;;  %v11244_v53 = vand.u32 4294901760, %v171_v16  ;;  %v393_v36 = vadd.f32 %v11134_v25, %v288_v8  ;;  %v1799_v45 = vsub.f32 %v11217_v15, %v17851_v18 }
  0xed   :  { %1730 = vmatpush.msra.mxu0 %v11154_v42  ;;  %1595 = vmatpush.msrb.mxu1 %v10960_v56  ;;  %v1781_v56 = vsub.f32 %v11175_v5, %v17854_v38  ;;  %v11242_v11 = vsub.f32 %v187_v20, %v11211_v0  ;;  %v1788_v26 = vand.u32 4294901760, %v1787_v47  ;;  %18250 = vst [vmem:[#allocation18_spill] sm:$0xff] %v11291_v39  ;;  %v123_v20 = vld [vmem:[%s17771_s4 + $0xe0] sm:$0xff]  ;;  %v17845_v47 = vand.u32 4294901760, %v11305_v28 }
  0xee   :  { %1943 = vmatpush.msra.mxu3 %v11154_v42  ;;  %1678 = vmatpush.msrb.mxu2 %v1498_v33  ;;  %v17852_v33 = vand.u32 4294901760, %v11204_v12  ;;  %v11274_v34 = vsub.f32 %v171_v16, %v11244_v53  ;;  %v1800_v31 = vand.u32 4294901760, %v1799_v45  ;;  %v11320_v62 = vsub.f32 %v147_v57, %v11291_v39 }
  0xef   :  { %1312 = vmatmul.f32.gmra.mxu0 %v10407_v19  ;;  %1507 = vmatmul.f32.gmra.mxu3 %v10407_v19  ;;  %v11330_v16 = vand.u32 4294901760, %v220_v9  ;;  %v1823_v57 = vsub.f32 %v11289_v59, %v17844_v29 }
  0xf0   :  { %1732 = vmatpush.msra.mxu0 %v11169_v6  ;;  %1885 = vmatpush.msra.mxu2 %v11175_v5  ;;  %v451_v61 = vpop.f32.mrf.mxu2  ;;  %v1793_v17 = vsub.f32 %v11204_v12, %v17852_v33  ;;  %v17846_v35 = vand.u32 4294901760, %v11274_v34  ;;  %v17850_v45 = vand.u32 4294901760, %v11320_v62 }
  0xf1   :  { %1945 = vmatpush.msra.mxu3 %v11169_v6  ;;  %1597 = vmatpush.msrb.mxu1 %v10972_v40  ;;  %v1782_v40 = vand.u32 4294901760, %v1781_v56  ;;  %v452_v25 = vadd.f32 %v451_v61, %v393_v36  ;;  %v11339_v61 = vsub.f32 %v139_v41, %v11307_v10  ;;  %v17849_v36 = vperm.slane %v11093_v37, 1 }
  0xf2   :  { %1353 = vmatmul.f32.gmra.mxu1 %v10407_v19  ;;  %1734 = vmatpush.msra.mxu0 %v11182_v48  ;;  %v1794_v4 = vand.u32 4294901760, %v1793_v17  ;;  %v1817_v30 = vsub.f32 %v11274_v34, %v17846_v35  ;;  %v1835_v35 = vsub.f32 %v11320_v62, %v17850_v45 }
  0xf3   :  { %1888 = vmatpush.msra.mxu2 %v11190_v43  ;;  %1947 = vmatpush.msra.mxu3 %v11182_v48  ;;  %v496_v3 = vpop.f32.mrf.mxu3 }
  0xf4   :  { %1599 = vmatpush.msrb.mxu1 %v10993_v1  ;;  %1736 = vmatpush.msra.mxu0 %v11192_v52  ;;  %v17848_v1 = vand.u32 4294901760, %v11242_v11  ;;  %v497_v51 = vadd.f32 %v496_v3, %v452_v25  ;;  %v115_v3 = vld [vmem:[%s17771_s4 + $0xa0] sm:$0xff]  ;;  %v11366_v25 = vand.u32 4294901760, %v212_v22 }
  0xf5   :  { %1891 = vmatpush.msra.mxu2 %v11204_v12  ;;  %1949 = vmatpush.msra.mxu3 %v11192_v52  ;;  %v11375_v29 = vand.u32 4294901760, %v115_v3 }
  0xf6   :  { %1601 = vmatpush.msrb.mxu1 %v11006_v63  ;;  %1680 = vmatmul.f32.vlgmr.msrb.gmra.mxu2 %v10330_v2  ;;  %v17847_v63 = vand.u32 4294901760, %v11258_v50  ;;  %v1805_v27 = vsub.f32 %v11242_v11, %v17848_v1  ;;  %v11409_v45 = vsub.f32 %v212_v22, %v11366_v25 }
  0xf7   :  { %1738 = vmatpush.msra.mxu0 %v11211_v0  ;;  %1894 = vmatpush.msra.mxu2 %v11217_v15  ;;  %18255 = vst [vmem:[#allocation19_spill] sm:$0xff] %v11375_v29  ;;  %v11416_v38 = vsub.f32 %v115_v3, %v11375_v29  ;;  %v180_v3 = vld [vmem:[%s17771_s4 + $0x2a8] sm:$0xff] }
  0xf8   :  { %1783 = vmatpush.msra.mxu1 %v1782_v40  ;;  %1951 = vmatpush.msra.mxu3 %v11211_v0  ;;  %v1811_v13 = vsub.f32 %v11258_v50, %v17847_v63  ;;  %v1806_v8 = vand.u32 4294901760, %v1805_v27  ;;  %v11347_v40 = vand.u32 4294901760, %v123_v20  ;;  %18257 = vst [vmem:[#allocation20_spill] sm:$0xff] %v11409_v45 }
  0xf9   :  { %1561 = vmatmul.f32.vlgmr.msrb.gmra.mxu0 %v10365_v49  ;;  %1721 = vmatmul.f32.vlgmr.msrb.gmra.mxu3 %v10330_v2  ;;  %v651_v24 = vpop.f32.mrf.mxu2  ;;  %v11460_v49 = vand.u32 4294901760, %v180_v3 }
  0xfa   :  { %1740 = vmatpush.msra.mxu0 %v11228_v32  ;;  %1789 = vmatpush.msra.mxu1 %v1788_v26  ;;  %18253 = vst [vmem:[#allocation15_spill] sm:$0xff] %v11347_v40  ;;  %v1812_v17 = vand.u32 4294901760, %v1811_v13  ;;  %v11358_v26 = vsub.f32 %v131_v60, %v11322_v23  ;;  %v1818_v60 = vand.u32 4294901760, %v1817_v30  ;;  %v1829_v13 = vsub.f32 %v11305_v28, %v17845_v47 }
  0xfb   :  { %1897 = vmatpush.msra.mxu2 %v11242_v11  ;;  %1953 = vmatpush.msra.mxu3 %v11228_v32  ;;  %v652_v30 = vadd.f32 %v651_v24, %v17849_v36  ;;  %v1824_v47 = vand.u32 4294901760, %v1823_v57  ;;  %v188_v57 = vld [vmem:[%s17771_s4 + $0x2e8] sm:$0xff] }
  0xfc   :  { %1605 = vmatmul.f32.vlgmr.msrb.gmra.mxu1 %v18230_v44  ;;  %1742 = vmatpush.msra.mxu0 %v11244_v53  ;;  %v11332_v56 = vpop.f32.mrf.mxu3  ;;  %v1830_v33 = vand.u32 4294901760, %v1829_v13 }
  0xfd   :  { %1795 = vmatpush.msra.mxu1 %v1794_v4  ;;  %1900 = vmatpush.msra.mxu2 %v11258_v50  ;;  %v11364_v4 = vsub.f32 %v220_v9, %v11330_v16  ;;  %v107_v9 = vld [vmem:[%s17771_s4 + $0x60] sm:$0xff] }
  0xfe   :  { %1955 = vmatpush.msra.mxu3 %v11244_v53  ;;  %1744 = vmatpush.msra.mxu0 %v11260_v54 }
  0xff   :  { %1801 = vmatpush.msra.mxu1 %v1800_v31  ;;  %1903 = vmatpush.msra.mxu2 %v11274_v34  ;;  %v569_v41 = vpop.f32.mrf.mxu0  ;;  %18254 = vst [vmem:[#allocation17_spill] sm:$0xff] %v11364_v4  ;;  %v204_v31 = vld [vmem:[%s17771_s4 + $0x368] sm:$0xff] }
 0x100   :  { %1957 = vmatpush.msra.mxu3 %v11260_v54  ;;  %1746 = vmatpush.msra.mxu0 %v11276_v46  ;;  %v570_v27 = vadd.f32 %v569_v41, %v497_v51  ;;  %v17855_v51 = vand.u32 4294901760, %v11339_v61  ;;  %v196_v41 = vld [vmem:[%s17771_s4 + $0x328] sm:$0xff]  ;;  %v11399_v1 = vand.u32 4294901760, %v204_v31 }
 0x101   :  { %1807 = vmatpush.msra.mxu1 %v1806_v8  ;;  %1906 = vmatpush.msra.mxu2 %v11289_v59  ;;  %v11384_v8 = vsub.f32 %v123_v20, %v11347_v40  ;;  %v99_v20 = vld [vmem:[%s17771_s4 + $0x20] sm:$0xff]  ;;  %v11418_v63 = vand.u32 4294901760, %v196_v41 }
 0x102   :  { %1959 = vmatpush.msra.mxu3 %v11276_v46  ;;  %1748 = vmatpush.msra.mxu0 %v11291_v39  ;;  %v1841_v14 = vsub.f32 %v11339_v61, %v17855_v51  ;;  %v11425_v22 = vand.u32 4294901760, %v99_v20  ;;  %v18259_v51 = vand.u32 4294901760, %v11358_v26  ;;  %v11439_v44 = vsub.f32 %v204_v31, %v11399_v1  ;;  %v172_v31 = vld [vmem:[%s17771_s4 + $0x268] sm:$0xff] }
 0x103   :  { %1813 = vmatpush.msra.mxu1 %v1812_v17  ;;  %1909 = vmatpush.msra.mxu2 %v11305_v28  ;;  %v610_v24 = vpop.f32.mrf.mxu1  ;;  %v11401_v36 = vpop.f32.mrf.mxu2  ;;  %v11405_v17 = vand.u32 4294901760, %v107_v9 }
 0x104   :  { %1961 = vmatpush.msra.mxu3 %v11291_v39  ;;  %1750 = vmatpush.msra.mxu0 %v11307_v10  ;;  %v611_v18 = vadd.f32 %v610_v24, %v570_v27  ;;  %18258 = vst [vmem:[#allocation29_spill] sm:$0xff] %v11425_v22  ;;  %v761_v27 = vadd.f32 %v11332_v56, %v652_v30  ;;  %v1836_v24 = vand.u32 4294901760, %v1835_v35  ;;  %v18261_v56 = vand.u32 4294901760, %v11364_v4 }
 0x105   :  { %18256 = vst [vmem:[#allocation28_spill] sm:$0xff] %v11405_v17  ;;  %1819 = vmatpush.msra.mxu1 %v1818_v60  ;;  %1912 = vmatpush.msra.mxu2 %v11320_v62  ;;  %v1847_v55 = vsub.f32 %v11358_v26, %v18259_v51  ;;  %v11450_v30 = vand.u32 4294901760, %v188_v57  ;;  %v1842_v51 = vand.u32 4294901760, %v1841_v14  ;;  %v18262_v35 = vand.u32 4294901760, %v11384_v8 }
 0x106   :  { %1963 = vmatpush.msra.mxu3 %v11307_v10  ;;  %1752 = vmatpush.msra.mxu0 %v11322_v23  ;;  %3225 = vst [vmem:[#allocation2 + $0x40] sm:$0xff] %v611_v18  ;;  %v11429_v13 = vpop.f32.mrf.mxu3  ;;  %v11444_v18 = vsub.f32 %v107_v9, %v11405_v17  ;;  %v11458_v9 = vsub.f32 %v196_v41, %v11418_v63  ;;  %v18264_v60 = vand.u32 4294901760, %v11416_v38  ;;  %v148_v10 = vld [vmem:[%s17771_s4 + $0x1a8] sm:$0xff] }
 0x107   :  { %1825 = vmatpush.msra.mxu1 %v1824_v47  ;;  %1915 = vmatpush.msra.mxu2 %v11339_v61  ;;  %18260 = vst [vmem:[#allocation30_spill] sm:$0xff] %v11439_v44  ;;  %v2153_v47 = vsub.f32 %v11364_v4, %v18261_v56  ;;  %v1853_v4 = vsub.f32 %v11384_v8, %v18262_v35  ;;  %v1848_v41 = vand.u32 4294901760, %v1847_v55 }
 0x108   :  { %1965 = vmatpush.msra.mxu3 %v11322_v23  ;;  %1754 = vmatpush.msra.mxu0 %v11347_v40  ;;  %v11472_v23 = vand.u32 4294901760, %v172_v31  ;;  %v11484_v55 = vsub.f32 %v188_v57, %v11450_v30  ;;  %v156_v57 = vld [vmem:[%s17771_s4 + $0x1e8] sm:$0xff] }
 0x109   :  { %1831 = vmatpush.msra.mxu1 %v1830_v33  ;;  %1918 = vmatpush.msra.mxu2 %v11358_v26  ;;  %v818_v56 = vpop.f32.mrf.mxu0  ;;  %v11468_v33 = vsub.f32 %v99_v20, %v11425_v22  ;;  %v2154_v35 = vand.u32 4294901760, %v2153_v47  ;;  %v18263_v20 = vand.u32 4294901760, %v11409_v45  ;;  %v11492_v47 = vsub.f32 %v180_v3, %v11460_v49 }
 0x10a   :  { %1967 = vmatpush.msra.mxu3 %v11347_v40  ;;  %1756 = vmatpush.msra.mxu0 %v11375_v29  ;;  %v819_v14 = vadd.f32 %v818_v56, %v761_v27  ;;  %v164_v40 = vld [vmem:[%s17771_s4 + $0x228] sm:$0xff] }
 0x10b   :  { %1837 = vmatpush.msra.mxu1 %v1836_v24  ;;  %1921 = vmatpush.msra.mxu2 %v11384_v8  ;;  %v2159_v27 = vsub.f32 %v11409_v45, %v18263_v20  ;;  %v11500_v45 = vand.u32 4294901760, %v164_v40 }
 0x10c   :  { %1969 = vmatpush.msra.mxu3 %v11375_v29  ;;  %1758 = vmatpush.msra.mxu0 %v11405_v17  ;;  %v862_v56 = vpop.f32.mrf.mxu1  ;;  %v1859_v29 = vsub.f32 %v11416_v38, %v18264_v60  ;;  %v18265_v60 = vand.u32 4294901760, %v11439_v44 }
 0x10d   :  { %1843 = vmatpush.msra.mxu1 %v1842_v51  ;;  %1924 = vmatpush.msra.mxu2 %v11416_v38  ;;  %v863_v2 = vadd.f32 %v862_v56, %v819_v14  ;;  %v937_v20 = vpop.f32.mrf.mxu2  ;;  %v1854_v51 = vand.u32 4294901760, %v1853_v4  ;;  %v11507_v14 = vsub.f32 %v172_v31, %v11472_v23  ;;  %v2160_v4 = vand.u32 4294901760, %v2159_v27 }
 0x10e   :  { %1971 = vmatpush.msra.mxu3 %v11405_v17  ;;  %1760 = vmatpush.msra.mxu0 %v11425_v22  ;;  %v2165_v3 = vsub.f32 %v11439_v44, %v18265_v60  ;;  %v11518_v60 = vand.u32 4294901760, %v156_v57  ;;  %v18268_v44 = vand.u32 4294901760, %v11458_v9  ;;  %v18269_v17 = vand.u32 4294901760, %v11468_v33 }
 0x10f   :  { %1849 = vmatpush.msra.mxu1 %v1848_v41  ;;  %1927 = vmatpush.msra.mxu2 %v11444_v18  ;;  %v938_v56 = vadd.f32 %v937_v20, %v863_v2  ;;  %v18266_v41 = vand.u32 4294901760, %v11444_v18  ;;  %v18267_v2 = vand.u32 4294901760, %v11175_v5  ;;  %v1860_v20 = vand.u32 4294901760, %v1859_v29 }
 0x110   :  { %1973 = vmatpush.msra.mxu3 %v11425_v22  ;;  %1684 = vmatmul.f32.gmra.mxu2 %v10407_v19  ;;  %v978_v31 = vpop.f32.mrf.mxu3  ;;  %v2171_v22 = vsub.f32 %v11458_v9, %v18268_v44  ;;  %v1871_v5 = vsub.f32 %v11468_v33, %v18269_v17  ;;  %v11534_v29 = vsub.f32 %v164_v40, %v11500_v45  ;;  %v2166_v44 = vand.u32 4294901760, %v2165_v3 }
 0x111   :  { %v1865_v24 = vsub.f32 %v11444_v18, %v18266_v41  ;;  %1990 = vmatpush.msrb.mxu0 %v18267_v2  ;;  %v979_v39 = vadd.f32 %v978_v31, %v938_v56  ;;  %v140_v41 = vld [vmem:[%s17771_s4 + $0x168] sm:$0xff]  ;;  %1855 = vmatpush.msra.mxu1 %v1854_v51  ;;  %v18270_v31 = vand.u32 4294901760, %v11190_v43  ;;  %v18271_v17 = vand.u32 4294901760, %v11484_v55 }
 0x112   :  { %2155 = vmatpush.msrb.mxu3 %v2154_v35  ;;  %1930 = vmatpush.msra.mxu2 %v11468_v33  ;;  %v11536_v35 = vand.u32 4294901760, %v148_v10  ;;  %v132_v51 = vld [vmem:[%s17771_s4 + $0x128] sm:$0xff]  ;;  %v11551_v27 = vsub.f32 %v156_v57, %v11518_v60  ;;  %v11553_v3 = vand.u32 4294901760, %v140_v41  ;;  %v18272_v56 = vand.u32 4294901760, %v11492_v47 }
 0x113   :  { %1566 = vmatmul.f32.gmra.mxu0 %v18248_v7  ;;  %1725 = vmatmul.f32.gmra.mxu3 %v10407_v19  ;;  %3218 = vst [vmem:[#allocation2] sm:$0xff] %v979_v39  ;;  %v1866_v40 = vand.u32 4294901760, %v1865_v24  ;;  %v2177_v2 = vsub.f32 %v11484_v55, %v18271_v17  ;;  %v2172_v39 = vand.u32 4294901760, %v2171_v22  ;;  %v124_v24 = vld [vmem:[%s17771_s4 + $0xe8] sm:$0xff]  ;;  %v1872_v57 = vand.u32 4294901760, %v1871_v5 }
 0x114   :  { %1994 = vmatpush.msrb.mxu0 %v18270_v31  ;;  %2102 = vmatpush.msrb.mxu2 %v11330_v16  ;;  %v2183_v43 = vsub.f32 %v11492_v47, %v18272_v56  ;;  %v18273_v31 = vand.u32 4294901760, %v11204_v12  ;;  %v11568_v22 = vand.u32 4294901760, %v132_v51  ;;  %v116_v12 = vld [vmem:[%s17771_s4 + $0xa8] sm:$0xff]  ;;  %v18275_v5 = vand.u32 4294901760, %v11217_v15 }
 0x115   :  { %2161 = vmatpush.msrb.mxu3 %v2160_v4  ;;  %1861 = vmatpush.msra.mxu1 %v1860_v20  ;;  %v11566_v4 = vsub.f32 %v148_v10, %v11536_v35  ;;  %v18274_v20 = vand.u32 4294901760, %v11507_v14  ;;  %v17877_v10 = vand.u32 4294901760, %v11551_v27  ;;  %v11581_v17 = vsub.f32 %v140_v41, %v11553_v3 }
 0x116   :  { %1611 = vmatmul.f32.gmra.mxu1 %v10447_v21  ;;  %1998 = vmatpush.msrb.mxu0 %v18273_v31  ;;  %v2178_v31 = vand.u32 4294901760, %v2177_v2  ;;  %v11583_v21 = vand.u32 4294901760, %v124_v24  ;;  %v11595_v41 = vand.u32 4294901760, %v116_v12 }
 0x117   :  { %2104 = vmatpush.msrb.mxu2 %v11366_v25  ;;  %2167 = vmatpush.msrb.mxu3 %v2166_v44  ;;  %v2189_v56 = vsub.f32 %v11507_v14, %v18274_v20  ;;  %v2184_v44 = vand.u32 4294901760, %v2183_v43  ;;  %v18276_v20 = vand.u32 4294901760, %v11242_v11  ;;  %v2206_v2 = vand.u32 4294901760, %v11566_v4 }
 0x118   :  { %1867 = vmatpush.msra.mxu1 %v1866_v40  ;;  %2002 = vmatpush.msrb.mxu0 %v18275_v5  ;;  %v18277_v40 = vand.u32 4294901760, %v11534_v29  ;;  %v11593_v5 = vsub.f32 %v132_v51, %v11568_v22  ;;  %v18278_v11 = vand.u32 4294901760, %v11258_v50  ;;  %v2201_v51 = vsub.f32 %v11551_v27, %v17877_v10 }
 0x119   :  { %2106 = vmatpush.msrb.mxu2 %v11399_v1  ;;  %2173 = vmatpush.msrb.mxu3 %v2172_v39  ;;  %v108_v39 = vld [vmem:[%s17771_s4 + $0x68] sm:$0xff]  ;;  %v2190_v43 = vand.u32 4294901760, %v2189_v56  ;;  %v18280_v56 = vand.u32 4294901760, %v11274_v34  ;;  %v18281_v34 = vand.u32 4294901760, %v11289_v59  ;;  %v18283_v59 = vand.u32 4294901760, %v11305_v28 }
 0x11a   :  { %1873 = vmatpush.msra.mxu1 %v1872_v57  ;;  %2006 = vmatpush.msrb.mxu0 %v18276_v20  ;;  %v2195_v15 = vsub.f32 %v11534_v29, %v18277_v40  ;;  %v11609_v20 = vsub.f32 %v124_v24, %v11583_v21  ;;  %v18279_v40 = vperm.slane %v11093_v37, 1  ;;  %v11619_v50 = vand.u32 4294901760, %v108_v39 }
 0x11b   :  { %2108 = vmatpush.msrb.mxu2 %v11418_v63  ;;  %2179 = vmatpush.msrb.mxu3 %v2178_v31  ;;  %v2218_v10 = vand.u32 4294901760, %v11593_v5  ;;  %v11628_v57 = vsub.f32 %v116_v12, %v11595_v41 }
 0x11c   :  { %2061 = vmatpush.msrb.mxu1 %v11154_v42  ;;  %2010 = vmatpush.msrb.mxu0 %v18278_v11  ;;  %v100_v42 = vld [vmem:[%s17771_s4 + $0x28] sm:$0xff]  ;;  %v660_v31 = vadd.f32 %v11401_v36, %v18279_v40  ;;  %v2196_v24 = vand.u32 4294901760, %v2195_v15  ;;  %v2207_v11 = vsub.f32 %v11566_v4, %v2206_v2  ;;  %v2202_v36 = vand.u32 4294901760, %v2201_v51 }
 0x11d   :  { %2110 = vmatpush.msrb.mxu2 %v11450_v30  ;;  %2185 = vmatpush.msrb.mxu3 %v2184_v44  ;;  %v18282_v44 = vand.u32 4294901760, %v11581_v17  ;;  %v2224_v40 = vand.u32 4294901760, %v11609_v20  ;;  %v2219_v51 = vsub.f32 %v11593_v5, %v2218_v10 }
 0x11e   :  { %2063 = vmatpush.msrb.mxu1 %v11169_v6  ;;  %2014 = vmatpush.msrb.mxu0 %v18280_v56  ;;  %v11632_v6 = vand.u32 4294901760, %v100_v42  ;;  %v765_v12 = vadd.f32 %v11429_v13, %v660_v31  ;;  %v2230_v56 = vand.u32 4294901760, %v11628_v57  ;;  %v18284_v13 = vand.u32 4294901760, %v11320_v62 }
 0x11f   :  { %2112 = vmatpush.msrb.mxu2 %v11460_v49  ;;  %2191 = vmatpush.msrb.mxu3 %v2190_v43  ;;  %v2213_v15 = vsub.f32 %v11581_v17, %v18282_v44  ;;  %v2208_v43 = vand.u32 4294901760, %v2207_v11  ;;  %v2220_v11 = vand.u32 4294901760, %v2219_v51  ;;  %v18286_v44 = vand.u32 4294901760, %v11358_v26 }
 0x120   :  { %2065 = vmatpush.msrb.mxu1 %v11182_v48  ;;  %2018 = vmatpush.msrb.mxu0 %v18281_v34  ;;  %v11644_v48 = vsub.f32 %v108_v39, %v11619_v50  ;;  %v2225_v39 = vsub.f32 %v11609_v20, %v2224_v40  ;;  %v2231_v62 = vsub.f32 %v11628_v57, %v2230_v56 }
 0x121   :  { %2114 = vmatpush.msrb.mxu2 %v11472_v23  ;;  %2197 = vmatpush.msrb.mxu3 %v2196_v24  ;;  %v2214_v28 = vand.u32 4294901760, %v2213_v15 }
 0x122   :  { %2067 = vmatpush.msrb.mxu1 %v11192_v52  ;;  %2022 = vmatpush.msrb.mxu0 %v18283_v59  ;;  %v11655_v52 = vsub.f32 %v100_v42, %v11632_v6  ;;  %v18285_v42 = vand.u32 4294901760, %v11339_v61  ;;  %v2226_v15 = vand.u32 4294901760, %v2225_v39  ;;  %v2232_v59 = vand.u32 4294901760, %v2231_v62  ;;  %v18296_v62 = vld [vmem:[#allocation23_spill] sm:$0xff] }
 0x123   :  { %2116 = vmatpush.msrb.mxu2 %v11500_v45  ;;  %2203 = vmatpush.msrb.mxu3 %v2202_v36  ;;  %v18291_v39 = vand.u32 4294901760, %v11444_v18  ;;  %v18297_v18 = vld [vmem:[#allocation17_spill] sm:$0xff] }
 0x124   :  { %2069 = vmatpush.msrb.mxu1 %v11211_v0  ;;  %2026 = vmatpush.msrb.mxu0 %v18284_v13  ;;  %v823_v31 = vpop.f32.mrf.mxu0  ;;  %v2236_v0 = vand.u32 4294901760, %v11644_v48  ;;  %v18288_v13 = vand.u32 4294901760, %v11416_v38  ;;  %v18293_v38 = vand.u32 4294901760, %v11468_v33  ;;  %v18300_v33 = vld [vmem:[#allocation20_spill] sm:$0xff] }
 0x125   :  { %2118 = vmatpush.msrb.mxu2 %v11518_v60  ;;  %v824_v24 = vadd.f32 %v823_v31, %v765_v12  ;;  %2209 = vmatpush.msrb.mxu3 %v2208_v43  ;;  %v18287_v12 = vand.u32 4294901760, %v11384_v8  ;;  %v18289_v8 = vld [vmem:[#allocation18_spill] sm:$0xff] }
 0x126   :  { %2071 = vmatpush.msrb.mxu1 %v11228_v32  ;;  %2030 = vmatpush.msrb.mxu0 %v18285_v42  ;;  %v2242_v32 = vand.u32 4294901760, %v11655_v52  ;;  %v18294_v42 = vld [vmem:[#allocation16_spill] sm:$0xff] }
 0x127   :  { %2120 = vmatpush.msrb.mxu2 %v11536_v35  ;;  %v868_v34 = vpop.f32.mrf.mxu1  ;;  %v941_v36 = vpop.f32.mrf.mxu2  ;;  %2215 = vmatpush.msrb.mxu3 %v2214_v28 }
 0x128   :  { %2073 = vmatpush.msrb.mxu1 %v11244_v53  ;;  %2034 = vmatpush.msrb.mxu0 %v18286_v44  ;;  %v869_v61 = vadd.f32 %v868_v34, %v824_v24  ;;  %v2237_v53 = vsub.f32 %v11644_v48, %v2236_v0  ;;  %v18292_v24 = vld [vmem:[#allocation14_spill] sm:$0xff]  ;;  %v18298_v34 = vld [vmem:[#allocation15_spill] sm:$0xff]  ;;  %v18301_v44 = vand.u32 4294901760, %v18297_v18 }
 0x129   :  { %2122 = vmatpush.msrb.mxu2 %v11553_v3  ;;  %2221 = vmatpush.msrb.mxu3 %v2220_v11  ;;  %v18295_v11 = vld [vmem:[#allocation22_spill] sm:$0xff] }
 0x12a   :  { %2075 = vmatpush.msrb.mxu1 %v11260_v54  ;;  %2038 = vmatpush.msrb.mxu0 %v18287_v12  ;;  %v942_v43 = vadd.f32 %v941_v36, %v869_v61  ;;  %v982_v51 = vpop.f32.mrf.mxu3  ;;  %v2243_v54 = vsub.f32 %v11655_v52, %v2242_v32  ;;  %v2238_v28 = vand.u32 4294901760, %v2237_v53  ;;  %v18299_v36 = vld [vmem:[#allocation27_spill] sm:$0xff]  ;;  %v18303_v61 = vld [vmem:[#allocation30_spill] sm:$0xff]  ;;  %v18304_v53 = vand.u32 4294901760, %v18300_v33  ;;  %v18305_v12 = vld [vmem:[#allocation28_spill] sm:$0xff] }
 0x12b   :  { %2124 = vmatpush.msrb.mxu2 %v11568_v22  ;;  %2227 = vmatpush.msrb.mxu3 %v2226_v15  ;;  %v18302_v15 = vld [vmem:[#allocation19_spill] sm:$0xff] }
 0x12c   :  { %2077 = vmatpush.msrb.mxu1 %v11276_v46  ;;  %1766 = vmatmul.f32.vlgmr.msra.gmra.mxu0 %v10434_v58  ;;  %v983_v26 = vadd.f32 %v982_v51, %v942_v43  ;;  %v18290_v46 = vld [vmem:[#allocation21_spill] sm:$0xff]  ;;  %v2244_v31 = vand.u32 4294901760, %v2243_v54  ;;  %v18308_v54 = vand.u32 4294901760, %v11458_v9 }
 0x12d   :  { %2042 = vmatpush.msrb.mxu0 %v18288_v13  ;;  %2126 = vmatpush.msrb.mxu2 %v11583_v21  ;;  %v18307_v43 = vld [vmem:[#allocation29_spill] sm:$0xff] }
 0x12e   :  { %2079 = vmatpush.msrb.mxu1 %v18289_v8  ;;  %2233 = vmatpush.msrb.mxu3 %v2232_v59  ;;  %3226 = vst [vmem:[#allocation2 + $0x20] sm:$0xff] %v983_v26  ;;  %v18306_v59 = vand.u32 4294901760, %v18303_v61  ;;  %v227_v26 = vperm.slane %v11093_v37, 2  ;;  %v18309_v8 = vand.u32 4294901760, %v11484_v55 }
 0x12f   :  { %1875 = vmatmul.f32.vlgmr.msra.gmra.mxu1 %v18290_v46  ;;  %2046 = vmatpush.msrb.mxu0 %v18291_v39 }
 0x130   :  { %2081 = vmatpush.msrb.mxu1 %v18292_v24  ;;  %2128 = vmatpush.msrb.mxu2 %v11595_v41 }
 0x131   :  { %2239 = vmatpush.msrb.mxu3 %v2238_v28  ;;  %2050 = vmatpush.msrb.mxu0 %v18293_v38 }
 0x132   :  { %2083 = vmatpush.msrb.mxu1 %v18294_v42  ;;  %2130 = vmatpush.msrb.mxu2 %v11619_v50  ;;  %v173_v42 = vld [vmem:[%s17771_s4 + $0x270] sm:$0xff] }
 0x133   :  { %2245 = vmatpush.msrb.mxu3 %v2244_v31  ;;  %1933 = vmatmul.f32.vlgmr.msra.gmra.mxu2 %v18295_v11  ;;  %v11868_v37 = vand.u32 4294901760, %v173_v42 }
 0x134   :  { %1977 = vmatmul.f32.vlgmr.msra.gmra.mxu3 %v18296_v62  ;;  %2257 = vmatpush.msra.mxu0 %v18297_v18 }
 0x135   :  { %2433 = vmatpush.msra.mxu3 %v11330_v16  ;;  %2085 = vmatpush.msrb.mxu1 %v18298_v34 }
 0x136   :  { %2132 = vmatpush.msrb.mxu2 %v11632_v6  ;;  %1774 = vmatmul.f32.gmra.mxu0 %v18299_v36 }
 0x137   :  { %2260 = vmatpush.msra.mxu0 %v18300_v33  ;;  %2435 = vmatpush.msra.mxu3 %v11366_v25 }
 0x138   :  { %2362 = vmatpush.msra.mxu2 %v18301_v44  ;;  %2087 = vmatpush.msrb.mxu1 %v18302_v15 }
 0x139   :  { %1879 = vmatmul.f32.gmra.mxu1 %v10407_v19  ;;  %2263 = vmatpush.msra.mxu0 %v18303_v61 }
 0x13a   :  { %2366 = vmatpush.msra.mxu2 %v18304_v53  ;;  %2437 = vmatpush.msra.mxu3 %v11399_v1  ;;  %v157_v53 = vld [vmem:[%s17771_s4 + $0x1f0] sm:$0xff] }
 0x13b   :  { %2089 = vmatpush.msrb.mxu1 %v18305_v12  ;;  %2266 = vmatpush.msra.mxu0 %v11458_v9  ;;  %v18310_v9 = vand.u32 4294901760, %v11492_v47 }
 0x13c   :  { %2370 = vmatpush.msra.mxu2 %v18306_v59  ;;  %2439 = vmatpush.msra.mxu3 %v11418_v63 }
 0x13d   :  { %2091 = vmatpush.msrb.mxu1 %v18307_v43  ;;  %2269 = vmatpush.msra.mxu0 %v11484_v55  ;;  %v1023_v51 = vpop.f32.mrf.mxu0  ;;  %v18312_v55 = vand.u32 4294901760, %v11507_v14 }
 0x13e   :  { %2374 = vmatpush.msra.mxu2 %v18308_v54  ;;  %2441 = vmatpush.msra.mxu3 %v11450_v30 }
 0x13f   :  { %2315 = vmatpush.msra.mxu1 %v11330_v16  ;;  %2052 = vmatmul.f32.vlgmr.msrb.gmra.mxu0 %v18290_v46  ;;  %v1024_v16 = vadd.f32 %v1023_v51, %v227_v26 }
 0x140   :  { %2272 = vmatpush.msra.mxu0 %v11492_v47  ;;  %v1132_v13 = vpop.f32.mrf.mxu1  ;;  %2378 = vmatpush.msra.mxu2 %v18309_v8  ;;  %v18313_v47 = vand.u32 4294901760, %v11534_v29  ;;  %v11903_v8 = vand.u32 4294901760, %v157_v53 }
 0x141   :  { %2317 = vmatpush.msra.mxu1 %v11366_v25  ;;  %2443 = vmatpush.msra.mxu3 %v11460_v49  ;;  %v18311_v25 = vld [vmem:[#allocation26_spill] sm:$0xff] }
 0x142   :  { %1938 = vmatmul.f32.gmra.mxu2 %v18248_v7  ;;  %2093 = vmatmul.f32.vlgmr.msrb.gmra.mxu1 %v18290_v46 }
 0x143   :  { %2275 = vmatpush.msra.mxu0 %v11507_v14  ;;  %2319 = vmatpush.msra.mxu1 %v11399_v1  ;;  %v1133_v1 = vadd.f32 %v1132_v13, %v1024_v16  ;;  %v11901_v13 = vsub.f32 %v173_v42, %v11868_v37 }
 0x144   :  { %2382 = vmatpush.msra.mxu2 %v18310_v9  ;;  %2445 = vmatpush.msra.mxu3 %v11472_v23 }
 0x145   :  { %1983 = vmatmul.f32.gmra.mxu3 %v18311_v25  ;;  %2278 = vmatpush.msra.mxu0 %v11534_v29  ;;  %v18315_v29 = vand.u32 4294901760, %v11581_v17 }
 0x146   :  { %2321 = vmatpush.msra.mxu1 %v11418_v63  ;;  %2386 = vmatpush.msra.mxu2 %v18312_v55  ;;  %v18314_v63 = vand.u32 4294901760, %v11551_v27  ;;  %v141_v55 = vld [vmem:[%s17771_s4 + $0x170] sm:$0xff] }
 0x147   :  { %2447 = vmatpush.msra.mxu3 %v11500_v45  ;;  %2281 = vmatpush.msra.mxu0 %v11551_v27  ;;  %v11752_v28 = vpop.f32.mrf.mxu0  ;;  %v221_v27 = vld [vmem:[%s17771_s4 + $0x3f0] sm:$0xff] }
 0x148   :  { %2323 = vmatpush.msra.mxu1 %v11450_v30  ;;  %2390 = vmatpush.msra.mxu2 %v18313_v47 }
 0x149   :  { %2449 = vmatpush.msra.mxu3 %v11518_v60  ;;  %2284 = vmatpush.msra.mxu0 %v11566_v4 }
 0x14a   :  { %2325 = vmatpush.msra.mxu1 %v11460_v49  ;;  %2394 = vmatpush.msra.mxu2 %v18314_v63  ;;  %v11762_v14 = vpop.f32.mrf.mxu1  ;;  %v1190_v39 = vpop.f32.mrf.mxu2 }
 0x14b   :  { %2451 = vmatpush.msra.mxu3 %v11536_v35  ;;  %2138 = vmatmul.f32.vlgmr.msrb.gmra.mxu2 %v10434_v58  ;;  %v1191_v30 = vadd.f32 %v1190_v39, %v1133_v1  ;;  %v1234_v31 = vpop.f32.mrf.mxu3  ;;  %v133_v39 = vld [vmem:[%s17771_s4 + $0x130] sm:$0xff] }
 0x14c   :  { %2287 = vmatpush.msra.mxu0 %v11581_v17  ;;  %2327 = vmatpush.msra.mxu1 %v11472_v23  ;;  %v213_v23 = vld [vmem:[%s17771_s4 + $0x3b0] sm:$0xff] }
 0x14d   :  { %2398 = vmatpush.msra.mxu2 %v2206_v2  ;;  %2453 = vmatpush.msra.mxu3 %v11553_v3  ;;  %v1235_v49 = vadd.f32 %v1234_v31, %v1191_v30  ;;  %v11787_v2 = vand.u32 4294901760, %v221_v27  ;;  %v205_v17 = vld [vmem:[%s17771_s4 + $0x370] sm:$0xff]  ;;  %v11929_v30 = vsub.f32 %v157_v53, %v11903_v8  ;;  %v11931_v31 = vand.u32 4294901760, %v141_v55 }
 0x14e   :  { %2247 = vmatmul.f32.vlgmr.msrb.gmra.mxu3 %v18290_v46  ;;  %2290 = vmatpush.msra.mxu0 %v11593_v5  ;;  %v11806_v38 = vand.u32 4294901760, %v205_v17 }
 0x14f   :  { %2329 = vmatpush.msra.mxu1 %v11500_v45  ;;  %2402 = vmatpush.msra.mxu2 %v18315_v29  ;;  %v11804_v24 = vsub.f32 %v221_v27, %v11787_v2  ;;  %18317 = vst [vmem:[#allocation21_spill] sm:$0xff] %v11931_v31 }
 0x150   :  { %2455 = vmatpush.msra.mxu3 %v11568_v22  ;;  %2293 = vmatpush.msra.mxu0 %v11609_v20  ;;  %v1309_v4 = vpop.f32.mrf.mxu0 }
 0x151   :  { %2331 = vmatpush.msra.mxu1 %v11518_v60  ;;  %2406 = vmatpush.msra.mxu2 %v2218_v10  ;;  %v1310_v45 = vadd.f32 %v1309_v4, %v1235_v49  ;;  %v11797_v60 = vand.u32 4294901760, %v213_v23  ;;  %v17879_v49 = vand.u32 4294901760, %v11901_v13 }
 0x152   :  { %2457 = vmatpush.msra.mxu3 %v11583_v21  ;;  %2296 = vmatpush.msra.mxu0 %v11628_v57  ;;  %v189_v57 = vld [vmem:[%s17771_s4 + $0x2f0] sm:$0xff] }
 0x153   :  { %2333 = vmatpush.msra.mxu1 %v11536_v35  ;;  %2410 = vmatpush.msra.mxu2 %v2224_v40  ;;  %v1350_v5 = vpop.f32.mrf.mxu1  ;;  %v197_v35 = vld [vmem:[%s17771_s4 + $0x330] sm:$0xff]  ;;  %v11830_v40 = vsub.f32 %v205_v17, %v11806_v38  ;;  %v11946_v17 = vand.u32 4294901760, %v133_v39  ;;  %v2561_v42 = vsub.f32 %v11901_v13, %v17879_v49 }
 0x154   :  { %2459 = vmatpush.msra.mxu3 %v11595_v41  ;;  %2146 = vmatmul.f32.gmra.mxu2 %v18299_v36  ;;  %v1351_v10 = vadd.f32 %v1350_v5, %v1310_v45  ;;  %v11821_v20 = vand.u32 4294901760, %v197_v35 }
 0x155   :  { %2299 = vmatpush.msra.mxu0 %v11644_v48  ;;  %2335 = vmatpush.msra.mxu1 %v11553_v3  ;;  %v11817_v3 = vsub.f32 %v213_v23, %v11797_v60  ;;  %v11840_v48 = vand.u32 4294901760, %v189_v57  ;;  %v222_v23 = vld [vmem:[%s17771_s4 + $0x3f8] sm:$0xff]  ;;  %18318 = vst [vmem:[#allocation14_spill] sm:$0xff] %v11946_v17 }
 0x156   :  { %2414 = vmatpush.msra.mxu2 %v2230_v56  ;;  %2461 = vmatpush.msra.mxu3 %v11619_v50  ;;  %3219 = vst [vmem:[#allocation2 + $0x58] sm:$0xff] %v1351_v10  ;;  %v17886_v56 = vand.u32 4294901760, %v11804_v24  ;;  %v11850_v18 = vsub.f32 %v197_v35, %v11821_v20  ;;  %v125_v10 = vld [vmem:[%s17771_s4 + $0xf0] sm:$0xff] }
 0x157   :  { %2056 = vmatmul.f32.gmra.mxu0 %v10407_v19  ;;  %2251 = vmatmul.f32.gmra.mxu3 %v10407_v19  ;;  %v11876_v61 = vsub.f32 %v189_v57, %v11840_v48 }
 0x158   :  { %2302 = vmatpush.msra.mxu0 %v11655_v52  ;;  %2337 = vmatpush.msra.mxu1 %v11568_v22  ;;  %v181_v22 = vld [vmem:[%s17771_s4 + $0x2b0] sm:$0xff]  ;;  %v2525_v34 = vsub.f32 %v11804_v24, %v17886_v56  ;;  %v17884_v52 = vand.u32 4294901760, %v11830_v40  ;;  %v17883_v12 = vand.u32 4294901760, %v11850_v18 }
 0x159   :  { %2418 = vmatpush.msra.mxu2 %v2236_v0  ;;  %2463 = vmatpush.msra.mxu3 %v11632_v6  ;;  %v17885_v0 = vand.u32 4294901760, %v11817_v3  ;;  %v11860_v33 = vand.u32 4294901760, %v181_v22  ;;  %v17881_v9 = vand.u32 4294901760, %v11876_v61 }
 0x15a   :  { %2097 = vmatmul.f32.gmra.mxu1 %v10407_v19  ;;  %2474 = vmatpush.msrb.mxu0 %v11787_v2  ;;  %v2526_v51 = vand.u32 4294901760, %v2525_v34  ;;  %v2537_v54 = vsub.f32 %v11830_v40, %v17884_v52  ;;  %v2543_v1 = vsub.f32 %v11850_v18, %v17883_v12  ;;  %v17882_v34 = vand.u32 4294901760, %v11929_v30 }
 0x15b   :  { %2687 = vmatpush.msrb.mxu3 %v11787_v2  ;;  %2339 = vmatpush.msra.mxu1 %v11583_v21  ;;  %v1032_v21 = vadd.f32 %v11752_v28, %v227_v26  ;;  %v2531_v15 = vsub.f32 %v11817_v3, %v17885_v0  ;;  %v11893_v26 = vsub.f32 %v181_v22, %v11860_v33 }
 0x15c   :  { %2422 = vmatpush.msra.mxu2 %v2242_v32  ;;  %2476 = vmatpush.msrb.mxu0 %v11797_v60  ;;  %v165_v32 = vld [vmem:[%s17771_s4 + $0x230] sm:$0xff]  ;;  %v2549_v29 = vsub.f32 %v11876_v61, %v17881_v9  ;;  %v2544_v4 = vand.u32 4294901760, %v2543_v1  ;;  %v2573_v49 = vsub.f32 %v11929_v30, %v17882_v34 }
 0x15d   :  { %2689 = vmatpush.msrb.mxu3 %v11797_v60  ;;  %v1195_v44 = vpop.f32.mrf.mxu2  ;;  %2341 = vmatpush.msra.mxu1 %v11595_v41  ;;  %v11883_v41 = vand.u32 4294901760, %v165_v32  ;;  %v1137_v43 = vadd.f32 %v11762_v14, %v1032_v21  ;;  %v2532_v16 = vand.u32 4294901760, %v2531_v15  ;;  %v17880_v63 = vand.u32 4294901760, %v11893_v26  ;;  %v214_v15 = vld [vmem:[%s17771_s4 + $0x3b8] sm:$0xff] }
 0x15e   :  { %2629 = vmatpush.msrb.mxu2 %v11804_v24  ;;  %2478 = vmatpush.msrb.mxu0 %v11806_v38  ;;  %v11964_v21 = vsub.f32 %v141_v55, %v11931_v31  ;;  %v2550_v53 = vand.u32 4294901760, %v2549_v29  ;;  %v109_v55 = vld [vmem:[%s17771_s4 + $0x70] sm:$0xff] }
 0x15f   :  { %2424 = vmatmul.f32.vlgmr.msra.gmra.mxu2 %v18290_v46  ;;  %2691 = vmatpush.msrb.mxu3 %v11806_v38  ;;  %v11917_v28 = vsub.f32 %v165_v32, %v11883_v41  ;;  %v1196_v14 = vadd.f32 %v1195_v44, %v1137_v43  ;;  %v2555_v35 = vsub.f32 %v11893_v26, %v17880_v63  ;;  %v117_v32 = vld [vmem:[%s17771_s4 + $0xb0] sm:$0xff]  ;;  %v11970_v44 = vand.u32 4294901760, %v222_v23  ;;  %v11979_v43 = vld [vmem:[#allocation10] sm:$0xff] }
 0x160   :  { %2632 = vmatpush.msrb.mxu2 %v11817_v3  ;;  %2343 = vmatpush.msra.mxu1 %v11619_v50  ;;  %v1240_v59 = vpop.f32.mrf.mxu3  ;;  %v149_v50 = vld [vmem:[%s17771_s4 + $0x1b0] sm:$0xff]  ;;  %v11998_v29 = vand.u32 4294901760, %v117_v32 }
 0x161   :  { %2305 = vmatmul.f32.vlgmr.msra.gmra.mxu0 %v18295_v11  ;;  %2465 = vmatmul.f32.vlgmr.msra.gmra.mxu3 %v18290_v46  ;;  %v11919_v47 = vand.u32 4294901760, %v149_v50  ;;  %v17878_v5 = vand.u32 4294901760, %v11917_v28  ;;  %v1241_v57 = vadd.f32 %v1240_v59, %v1196_v14  ;;  %v11977_v59 = vand.u32 4294901760, %v125_v10 }
 0x162   :  { %2480 = vmatpush.msrb.mxu0 %v11821_v20  ;;  %2635 = vmatpush.msrb.mxu2 %v11830_v40  ;;  %v2556_v14 = vand.u32 4294901760, %v2555_v35  ;;  %18320 = vst [vmem:[#allocation17_spill] sm:$0xff] %v11998_v29  ;;  %v101_v35 = vld [vmem:[%s17771_s4 + $0x30] sm:$0xff]  ;;  %v12012_v9 = vsub.f32 %v222_v23, %v11970_v44 }
 0x163   :  { %2693 = vmatpush.msrb.mxu3 %v11821_v20  ;;  %2345 = vmatpush.msra.mxu1 %v11632_v6  ;;  %18316 = vst [vmem:[#allocation18_spill] sm:$0xff] %v11919_v47  ;;  %v2538_v6 = vand.u32 4294901760, %v2537_v54  ;;  %v11944_v45 = vsub.f32 %v149_v50, %v11919_v47  ;;  %v2567_v54 = vsub.f32 %v11917_v28, %v17878_v5  ;;  %v2562_v5 = vand.u32 4294901760, %v2561_v42 }
 0x164   :  { %2349 = vmatmul.f32.vlgmr.msra.gmra.mxu1 %v18296_v62  ;;  %2482 = vmatpush.msrb.mxu0 %v11840_v48  ;;  %18319 = vst [vmem:[#allocation16_spill] sm:$0xff] %v11977_v59  ;;  %v11987_v50 = vsub.f32 %v133_v39, %v11946_v17  ;;  %v12000_v39 = vand.u32 4294901760, %v214_v15  ;;  %v12019_v42 = vsub.f32 %v125_v10, %v11977_v59 }
 0x165   :  { %2527 = vmatpush.msrb.mxu1 %v2526_v51  ;;  %2638 = vmatpush.msrb.mxu2 %v11850_v18  ;;  %v17887_v51 = vperm.slane %v11979_v43, 3  ;;  %18321 = vst [vmem:[#allocation15_spill] sm:$0xff] %v12012_v9 }
 0x166   :  { %2695 = vmatpush.msrb.mxu3 %v11840_v48  ;;  %2484 = vmatpush.msrb.mxu0 %v11860_v33  ;;  %v1395_v27 = vpop.f32.mrf.mxu2  ;;  %v12042_v63 = vsub.f32 %v214_v15, %v12000_v39 }
 0x167   :  { %2533 = vmatpush.msrb.mxu1 %v2532_v16  ;;  %2641 = vmatpush.msrb.mxu2 %v11876_v61  ;;  %v17889_v16 = vand.u32 4294901760, %v11944_v45  ;;  %v1396_v34 = vadd.f32 %v1395_v27, %v17887_v51  ;;  %v12037_v27 = vsub.f32 %v117_v32, %v11998_v29  ;;  %v12039_v51 = vand.u32 4294901760, %v101_v35 }
 0x168   :  { %2697 = vmatpush.msrb.mxu3 %v11860_v33  ;;  %2428 = vmatmul.f32.gmra.mxu2 %v10407_v19  ;;  %18324 = vst [vmem:[#allocation30_spill] sm:$0xff] %v12042_v63 }
 0x169   :  { %2486 = vmatpush.msrb.mxu0 %v11868_v37  ;;  %2539 = vmatpush.msrb.mxu1 %v2538_v6  ;;  %v11956_v22 = vpop.f32.mrf.mxu3  ;;  %v206_v6 = vld [vmem:[%s17771_s4 + $0x378] sm:$0xff]  ;;  %v2579_v10 = vsub.f32 %v11944_v45, %v17889_v16  ;;  %18323 = vst [vmem:[#allocation19_spill] sm:$0xff] %v12037_v27 }
 0x16a   :  { %2644 = vmatpush.msrb.mxu2 %v11893_v26  ;;  %2699 = vmatpush.msrb.mxu3 %v11868_v37  ;;  %v12025_v12 = vand.u32 4294901760, %v206_v6  ;;  %v1505_v0 = vadd.f32 %v11956_v22, %v1396_v34  ;;  %v12078_v22 = vsub.f32 %v101_v35, %v12039_v51 }
 0x16b   :  { %2310 = vmatmul.f32.gmra.mxu0 %v18248_v7  ;;  %2469 = vmatmul.f32.gmra.mxu3 %v10407_v19 }
 0x16c   :  { %2488 = vmatpush.msrb.mxu0 %v11883_v41  ;;  %2545 = vmatpush.msrb.mxu1 %v2544_v4  ;;  %v1313_v1 = vpop.f32.mrf.mxu0 }
 0x16d   :  { %2647 = vmatpush.msrb.mxu2 %v11901_v13  ;;  %2701 = vmatpush.msrb.mxu3 %v11883_v41  ;;  %v1314_v4 = vadd.f32 %v1313_v1, %v1241_v57  ;;  %v198_v57 = vld [vmem:[%s17771_s4 + $0x338] sm:$0xff]  ;;  %v12021_v1 = vand.u32 4294901760, %v109_v55 }
 0x16e   :  { %2355 = vmatmul.f32.gmra.mxu1 %v18311_v25  ;;  %2490 = vmatpush.msrb.mxu0 %v11903_v8  ;;  %v12044_v25 = vand.u32 4294901760, %v198_v57 }
 0x16f   :  { %2551 = vmatpush.msrb.mxu1 %v2550_v53  ;;  %2650 = vmatpush.msrb.mxu2 %v11917_v28  ;;  %18322 = vst [vmem:[#allocation20_spill] sm:$0xff] %v12021_v1  ;;  %v1354_v52 = vpop.f32.mrf.mxu1  ;;  %v12027_v23 = vpop.f32.mrf.mxu2  ;;  %v2568_v53 = vand.u32 4294901760, %v2567_v54  ;;  %v190_v54 = vld [vmem:[%s17771_s4 + $0x2f8] sm:$0xff]  ;;  %v12059_v16 = vsub.f32 %v109_v55, %v12021_v1 }
 0x170   :  { %2703 = vmatpush.msrb.mxu3 %v11903_v8  ;;  %2492 = vmatpush.msrb.mxu0 %v11919_v47  ;;  %v1355_v56 = vadd.f32 %v1354_v52, %v1314_v4  ;;  %v2574_v52 = vand.u32 4294901760, %v2573_v49  ;;  %v12064_v49 = vsub.f32 %v206_v6, %v12025_v12  ;;  %v12074_v4 = vand.u32 4294901760, %v190_v54 }
 0x171   :  { %2557 = vmatpush.msrb.mxu1 %v2556_v14  ;;  %2653 = vmatpush.msrb.mxu2 %v11929_v30  ;;  %v18325_v14 = vand.u32 4294901760, %v11964_v21  ;;  %v12083_v7 = vsub.f32 %v198_v57, %v12044_v25  ;;  %v18330_v57 = vand.u32 4294901760, %v12019_v42 }
 0x172   :  { %2705 = vmatpush.msrb.mxu3 %v11919_v47  ;;  %2494 = vmatpush.msrb.mxu0 %v11931_v31  ;;  %3227 = vst [vmem:[#allocation2 + $0x10] sm:$0xff] %v1355_v56  ;;  %v12055_v15 = vpop.f32.mrf.mxu3  ;;  %v2580_v56 = vand.u32 4294901760, %v2579_v10  ;;  %v174_v10 = vld [vmem:[%s17771_s4 + $0x278] sm:$0xff]  ;;  %v18333_v62 = vand.u32 4294901760, %v12064_v49  ;;  %v18334_v47 = vand.u32 4294901760, %v12059_v16 }
 0x173   :  { %v2585_v32 = vsub.f32 %v11964_v21, %v18325_v14  ;;  %2563 = vmatpush.msrb.mxu1 %v2562_v5  ;;  %2656 = vmatpush.msrb.mxu2 %v11944_v45  ;;  %18326 = vst [vmem:[#allocation28_spill] sm:$0xff] %v12064_v49  ;;  %v182_v14 = vld [vmem:[%s17771_s4 + $0x2b8] sm:$0xff]  ;;  %v18327_v5 = vand.u32 4294901760, %v11987_v50  ;;  %v2597_v6 = vsub.f32 %v12019_v42, %v18330_v57  ;;  %v18331_v57 = vand.u32 4294901760, %v12042_v63 }
 0x174   :  { %2707 = vmatpush.msrb.mxu3 %v11931_v31  ;;  %2496 = vmatpush.msrb.mxu0 %v11946_v17  ;;  %18328 = vst [vmem:[#allocation29_spill] sm:$0xff] %v12083_v7  ;;  %v12093_v19 = vand.u32 4294901760, %v182_v14  ;;  %v2909_v11 = vsub.f32 %v12064_v49, %v18333_v62  ;;  %v18335_v49 = vand.u32 4294901760, %v12083_v7 }
 0x175   :  { %v2591_v55 = vsub.f32 %v11987_v50, %v18327_v5  ;;  %2569 = vmatpush.msrb.mxu1 %v2568_v53  ;;  %2659 = vmatpush.msrb.mxu2 %v11964_v21  ;;  %v2586_v53 = vand.u32 4294901760, %v2585_v32  ;;  %v18329_v5 = vand.u32 4294901760, %v12012_v9  ;;  %v166_v32 = vld [vmem:[%s17771_s4 + $0x238] sm:$0xff] }
 0x176   :  { %2709 = vmatpush.msrb.mxu3 %v11946_v17  ;;  %2498 = vmatpush.msrb.mxu0 %v11977_v59  ;;  %v1562_v34 = vpop.f32.mrf.mxu0  ;;  %v12128_v31 = vand.u32 4294901760, %v166_v32 }
 0x177   :  { %v2897_v35 = vsub.f32 %v12012_v9, %v18329_v5  ;;  %2575 = vmatpush.msrb.mxu1 %v2574_v52  ;;  %2662 = vmatpush.msrb.mxu2 %v11987_v50  ;;  %v1563_v36 = vadd.f32 %v1562_v34, %v1505_v0  ;;  %v2592_v52 = vand.u32 4294901760, %v2591_v55  ;;  %v12107_v5 = vsub.f32 %v190_v54, %v12074_v4 }
 0x178   :  { %2711 = vmatpush.msrb.mxu3 %v11977_v59  ;;  %2500 = vmatpush.msrb.mxu0 %v11998_v29  ;;  %v12109_v9 = vand.u32 4294901760, %v174_v10  ;;  %v2903_v0 = vsub.f32 %v12042_v63, %v18331_v57  ;;  %v18332_v34 = vand.u32 4294901760, %v12037_v27  ;;  %v12126_v57 = vsub.f32 %v182_v14, %v12093_v19  ;;  %v150_v14 = vld [vmem:[%s17771_s4 + $0x1b8] sm:$0xff] }
 0x179   :  { %2581 = vmatpush.msrb.mxu1 %v2580_v56  ;;  %2665 = vmatpush.msrb.mxu2 %v12019_v42  ;;  %v1606_v59 = vpop.f32.mrf.mxu1  ;;  %v1681_v54 = vpop.f32.mrf.mxu2  ;;  %v158_v56 = vld [vmem:[%s17771_s4 + $0x1f8] sm:$0xff]  ;;  %v2598_v55 = vand.u32 4294901760, %v2597_v6 }
 0x17a   :  { %v2603_v17 = vsub.f32 %v12037_v27, %v18332_v34  ;;  %2713 = vmatpush.msrb.mxu3 %v11998_v29  ;;  %2502 = vmatpush.msrb.mxu0 %v12021_v1  ;;  %v1607_v63 = vadd.f32 %v1606_v59, %v1563_v36  ;;  %v2898_v34 = vand.u32 4294901760, %v2897_v35  ;;  %v2609_v29 = vsub.f32 %v12059_v16, %v18334_v47 }
 0x17b   :  { %2587 = vmatpush.msrb.mxu1 %v2586_v53  ;;  %2668 = vmatpush.msrb.mxu2 %v12037_v27  ;;  %v12144_v59 = vsub.f32 %v174_v10, %v12109_v9  ;;  %v12146_v53 = vand.u32 4294901760, %v158_v56  ;;  %v2904_v47 = vand.u32 4294901760, %v2903_v0  ;;  %v18336_v27 = vand.u32 4294901760, %v12078_v22 }
 0x17c   :  { %2715 = vmatpush.msrb.mxu3 %v12021_v1  ;;  %2504 = vmatpush.msrb.mxu0 %v12039_v51  ;;  %v1682_v6 = vadd.f32 %v1681_v54, %v1607_v63  ;;  %v1722_v62 = vpop.f32.mrf.mxu3  ;;  %v2604_v35 = vand.u32 4294901760, %v2603_v17  ;;  %v2915_v1 = vsub.f32 %v12083_v7, %v18335_v49  ;;  %v142_v63 = vld [vmem:[%s17771_s4 + $0x178] sm:$0xff]  ;;  %v18337_v10 = vand.u32 4294901760, %v11804_v24 }
 0x17d   :  { %2593 = vmatpush.msrb.mxu1 %v2592_v52  ;;  %2671 = vmatpush.msrb.mxu2 %v12059_v16  ;;  %v2615_v36 = vsub.f32 %v12078_v22, %v18336_v27  ;;  %v2926_v52 = vand.u32 4294901760, %v12126_v57  ;;  %v12163_v17 = vsub.f32 %v166_v32, %v12128_v31  ;;  %v12165_v49 = vand.u32 4294901760, %v150_v14  ;;  %v134_v7 = vld [vmem:[%s17771_s4 + $0x138] sm:$0xff] }
 0x17e   :  { %2717 = vmatpush.msrb.mxu3 %v12039_v51  ;;  %2734 = vmatpush.msra.mxu0 %v18337_v10  ;;  %v1723_v0 = vadd.f32 %v1722_v62, %v1682_v6  ;;  %v2910_v27 = vand.u32 4294901760, %v2909_v11  ;;  %v2610_v54 = vand.u32 4294901760, %v2609_v29  ;;  %v18338_v24 = vand.u32 4294901760, %v11817_v3 }
 0x17f   :  { %2599 = vmatpush.msrb.mxu1 %v2598_v55  ;;  %2674 = vmatpush.msrb.mxu2 %v12078_v22  ;;  %v18339_v10 = vand.u32 4294901760, %v12107_v5  ;;  %v2932_v6 = vand.u32 4294901760, %v12144_v59  ;;  %v12180_v11 = vand.u32 4294901760, %v142_v63  ;;  %v2916_v29 = vand.u32 4294901760, %v2915_v1  ;;  %v126_v1 = vld [vmem:[%s17771_s4 + $0xf8] sm:$0xff] }
 0x180   :  { %2899 = vmatpush.msra.mxu3 %v2898_v34  ;;  %2738 = vmatpush.msra.mxu0 %v18338_v24  ;;  %v12178_v34 = vsub.f32 %v158_v56, %v12146_v53  ;;  %3220 = vst [vmem:[#allocation2 + $0x18] sm:$0xff] %v1723_v0  ;;  %v2616_v55 = vand.u32 4294901760, %v2615_v36  ;;  %v18340_v3 = vand.u32 4294901760, %v11830_v40  ;;  %v2927_v62 = vsub.f32 %v12126_v57, %v2926_v52 }
 0x181   :  { %v2921_v32 = vsub.f32 %v12107_v5, %v18339_v10  ;;  %2846 = vmatpush.msra.mxu2 %v11970_v44  ;;  %2605 = vmatpush.msrb.mxu1 %v2604_v35  ;;  %v17911_v24 = vand.u32 4294901760, %v12163_v17  ;;  %v12190_v56 = vsub.f32 %v150_v14, %v12165_v49  ;;  %v12192_v0 = vand.u32 4294901760, %v134_v7  ;;  %v118_v10 = vld [vmem:[%s17771_s4 + $0xb8] sm:$0xff] }
 0x182   :  { %2905 = vmatpush.msra.mxu3 %v2904_v47  ;;  %2742 = vmatpush.msra.mxu0 %v18340_v3  ;;  %v18341_v40 = vand.u32 4294901760, %v11850_v18  ;;  %v2933_v47 = vsub.f32 %v12144_v59, %v2932_v6  ;;  %v2944_v14 = vand.u32 4294901760, %v12178_v34  ;;  %v12205_v35 = vsub.f32 %v142_v63, %v12180_v11 }
 0x183   :  { %2848 = vmatpush.msra.mxu2 %v12000_v39  ;;  %2611 = vmatpush.msrb.mxu1 %v2610_v54  ;;  %v2922_v36 = vand.u32 4294901760, %v2921_v32  ;;  %v18342_v18 = vand.u32 4294901760, %v11876_v61  ;;  %v2928_v54 = vand.u32 4294901760, %v2927_v62  ;;  %v2939_v32 = vsub.f32 %v12163_v17, %v17911_v24 }
 0x184   :  { %2911 = vmatpush.msra.mxu3 %v2910_v27  ;;  %2746 = vmatpush.msra.mxu0 %v18341_v40  ;;  %v12211_v27 = vand.u32 4294901760, %v126_v1  ;;  %v2950_v63 = vand.u32 4294901760, %v12190_v56  ;;  %v12220_v3 = vsub.f32 %v134_v7, %v12192_v0  ;;  %v12227_v61 = vand.u32 4294901760, %v118_v10 }
 0x185   :  { %2850 = vmatpush.msra.mxu2 %v12025_v12  ;;  %2617 = vmatpush.msrb.mxu1 %v2616_v55  ;;  %v18343_v55 = vand.u32 4294901760, %v11893_v26  ;;  %v2934_v62 = vand.u32 4294901760, %v2933_v47  ;;  %v2945_v7 = vsub.f32 %v12178_v34, %v2944_v14  ;;  %v2956_v40 = vand.u32 4294901760, %v12205_v35 }
 0x186   :  { %2917 = vmatpush.msra.mxu3 %v2916_v29  ;;  %2750 = vmatpush.msra.mxu0 %v18342_v18  ;;  %v110_v29 = vld [vmem:[%s17771_s4 + $0x78] sm:$0xff]  ;;  %v18344_v18 = vperm.slane %v11979_v43, 3  ;;  %v18345_v47 = vand.u32 4294901760, %v11901_v13 }
 0x187   :  { %2805 = vmatpush.msra.mxu1 %v11787_v2  ;;  %2852 = vmatpush.msra.mxu2 %v12044_v25  ;;  %v12241_v2 = vsub.f32 %v126_v1, %v12211_v27  ;;  %v12243_v26 = vand.u32 4294901760, %v110_v29  ;;  %v12257_v1 = vsub.f32 %v118_v10, %v12227_v61  ;;  %v2946_v13 = vand.u32 4294901760, %v2945_v7 }
 0x188   :  { %2923 = vmatpush.msra.mxu3 %v2922_v36  ;;  %2754 = vmatpush.msra.mxu0 %v18343_v55  ;;  %v1404_v24 = vadd.f32 %v12027_v23, %v18344_v18  ;;  %v102_v36 = vld [vmem:[%s17771_s4 + $0x38] sm:$0xff]  ;;  %v2940_v55 = vand.u32 4294901760, %v2939_v32  ;;  %v2962_v23 = vand.u32 4294901760, %v12220_v3  ;;  %v2957_v32 = vsub.f32 %v12205_v35, %v2956_v40 }
 0x189   :  { %2807 = vmatpush.msra.mxu1 %v11797_v60  ;;  %2854 = vmatpush.msra.mxu2 %v12074_v4  ;;  %v2951_v60 = vsub.f32 %v12190_v56, %v2950_v63  ;;  %v12264_v18 = vand.u32 4294901760, %v102_v36  ;;  %v12271_v10 = vsub.f32 %v110_v29, %v12243_v26 }
 0x18a   :  { %2929 = vmatpush.msra.mxu3 %v2928_v54  ;;  %2758 = vmatpush.msra.mxu0 %v18345_v47  ;;  %v18346_v54 = vand.u32 4294901760, %v11917_v28  ;;  %v1509_v47 = vadd.f32 %v12055_v15, %v1404_v24  ;;  %v18347_v28 = vand.u32 4294901760, %v11929_v30  ;;  %v2963_v7 = vsub.f32 %v12220_v3, %v2962_v23 }
 0x18b   :  { %2809 = vmatpush.msra.mxu1 %v11806_v38  ;;  %2856 = vmatpush.msra.mxu2 %v12093_v19  ;;  %v2968_v38 = vand.u32 4294901760, %v12241_v2  ;;  %v18348_v15 = vand.u32 4294901760, %v11944_v45  ;;  %v2958_v24 = vand.u32 4294901760, %v2957_v32  ;;  %v12284_v29 = vsub.f32 %v102_v36, %v12264_v18 }
 0x18c   :  { %2935 = vmatpush.msra.mxu3 %v2934_v62  ;;  %2762 = vmatpush.msra.mxu0 %v18346_v54  ;;  %v2952_v62 = vand.u32 4294901760, %v2951_v60  ;;  %v18349_v45 = vand.u32 4294901760, %v11964_v21  ;;  %v2964_v54 = vand.u32 4294901760, %v2963_v7  ;;  %v18350_v21 = vand.u32 4294901760, %v11987_v50 }
 0x18d   :  { %2811 = vmatpush.msra.mxu1 %v11821_v20  ;;  %2858 = vmatpush.msra.mxu2 %v12109_v9  ;;  %v2974_v20 = vand.u32 4294901760, %v12257_v1  ;;  %v2986_v32 = vand.u32 4294901760, %v12284_v29 }
 0x18e   :  { %2941 = vmatpush.msra.mxu3 %v2940_v55  ;;  %2766 = vmatpush.msra.mxu0 %v18347_v28  ;;  %v2980_v55 = vand.u32 4294901760, %v12271_v10 }
 0x18f   :  { %2813 = vmatpush.msra.mxu1 %v11840_v48  ;;  %2860 = vmatpush.msra.mxu2 %v12128_v31  ;;  %v2969_v48 = vsub.f32 %v12241_v2, %v2968_v38 }
 0x190   :  { %2947 = vmatpush.msra.mxu3 %v2946_v13  ;;  %2770 = vmatpush.msra.mxu0 %v18348_v15  ;;  %v1567_v30 = vpop.f32.mrf.mxu0  ;;  %v2981_v28 = vsub.f32 %v12271_v10, %v2980_v55  ;;  %v18351_v15 = vand.u32 4294901760, %v12019_v42  ;;  %v18355_v42 = vld [vmem:[#allocation22_spill] sm:$0xff] }
 0x191   :  { %2815 = vmatpush.msra.mxu1 %v11860_v33  ;;  %2862 = vmatpush.msra.mxu2 %v12146_v53  ;;  %v1568_v60 = vadd.f32 %v1567_v30, %v1509_v47  ;;  %v2975_v33 = vsub.f32 %v12257_v1, %v2974_v20  ;;  %v18352_v30 = vld [vmem:[#allocation19_spill] sm:$0xff] }
 0x192   :  { %2953 = vmatpush.msra.mxu3 %v2952_v62  ;;  %2774 = vmatpush.msra.mxu0 %v18349_v45  ;;  %v18354_v45 = vld [vmem:[#allocation18_spill] sm:$0xff] }
 0x193   :  { %2817 = vmatpush.msra.mxu1 %v11868_v37  ;;  %2864 = vmatpush.msra.mxu2 %v12165_v49  ;;  %v1612_v36 = vpop.f32.mrf.mxu1  ;;  %v1685_v13 = vpop.f32.mrf.mxu2  ;;  %v2970_v37 = vand.u32 4294901760, %v2969_v48  ;;  %v18353_v48 = vand.u32 4294901760, %v18352_v30  ;;  %v18372_v30 = vld [vmem:[#allocation26_spill] sm:$0xff] }
 0x194   :  { %2959 = vmatpush.msra.mxu3 %v2958_v24  ;;  %2510 = vmatmul.f32.vlgmr.msrb.gmra.mxu0 %v10434_v58  ;;  %v1613_v47 = vadd.f32 %v1612_v36, %v1568_v60  ;;  %v2976_v24 = vand.u32 4294901760, %v2975_v33  ;;  %v2982_v60 = vand.u32 4294901760, %v2981_v28  ;;  %v18358_v36 = vld [vmem:[#allocation27_spill] sm:$0xff]  ;;  %v18364_v28 = vld [vmem:[#allocation16_spill] sm:$0xff] }
 0x195   :  { %2778 = vmatpush.msra.mxu0 %v18350_v21  ;;  %2819 = vmatpush.msra.mxu1 %v11883_v41  ;;  %v2987_v41 = vsub.f32 %v12284_v29, %v2986_v32  ;;  %v18361_v21 = vld [vmem:[#allocation14_spill] sm:$0xff] }
 0x196   :  { %2866 = vmatpush.msra.mxu2 %v12180_v11  ;;  %2965 = vmatpush.msra.mxu3 %v2964_v54  ;;  %v1686_v62 = vadd.f32 %v1685_v13, %v1613_v47  ;;  %v1726_v7 = vpop.f32.mrf.mxu3  ;;  %v18357_v54 = vld [vmem:[#allocation21_spill] sm:$0xff]  ;;  %v18359_v13 = vld [vmem:[#allocation23_spill] sm:$0xff]  ;;  %v18360_v47 = vand.u32 4294901760, %v12078_v22 }
 0x197   :  { %2619 = vmatmul.f32.vlgmr.msrb.gmra.mxu1 %v18290_v46  ;;  %2782 = vmatpush.msra.mxu0 %v18351_v15  ;;  %v2988_v33 = vand.u32 4294901760, %v2987_v41  ;;  %v18368_v15 = vld [vmem:[#allocation25_spill] sm:$0xff] }
 0x198   :  { %2821 = vmatpush.msra.mxu1 %v11903_v8  ;;  %2868 = vmatpush.msra.mxu2 %v12192_v0  ;;  %v1727_v50 = vadd.f32 %v1726_v7, %v1686_v62  ;;  %v18356_v8 = vand.u32 4294901760, %v12059_v16  ;;  %v18362_v16 = vld [vmem:[#allocation24_spill] sm:$0xff]  ;;  %v18365_v62 = vld [vmem:[#allocation30_spill] sm:$0xff]  ;;  %v18367_v7 = vld [vmem:[#allocation17_spill] sm:$0xff] }
 0x199   :  { %2971 = vmatpush.msra.mxu3 %v2970_v37  ;;  %2786 = vmatpush.msra.mxu0 %v18353_v48  ;;  %v18363_v37 = vld [vmem:[#allocation15_spill] sm:$0xff]  ;;  %v18370_v41 = vand.u32 4294901760, %v18365_v62  ;;  %v18373_v48 = vld [vmem:[#allocation29_spill] sm:$0xff] }
 0x19a   :  { %2823 = vmatpush.msra.mxu1 %v18354_v45  ;;  %2870 = vmatpush.msra.mxu2 %v12211_v27  ;;  %3228 = vst [vmem:[#allocation2 + $0x38] sm:$0xff] %v1727_v50  ;;  %v18366_v22 = vand.u32 4294901760, %v18363_v37  ;;  %v18371_v50 = vld [vmem:[#allocation20_spill] sm:$0xff] }
 0x19b   :  { %2977 = vmatpush.msra.mxu3 %v2976_v24  ;;  %2677 = vmatmul.f32.vlgmr.msrb.gmra.mxu2 %v18355_v42  ;;  %v18369_v24 = vld [vmem:[#allocation28_spill] sm:$0xff] }
 0x19c   :  { %2790 = vmatpush.msra.mxu0 %v18356_v8  ;;  %2825 = vmatpush.msra.mxu1 %v18357_v54  ;;  %v229_v8 = vperm.slane %v11979_v43, 4  ;;  %v18375_v54 = vand.u32 4294901760, %v18373_v48 }
 0x19d   :  { %2872 = vmatpush.msra.mxu2 %v12227_v61  ;;  %2983 = vmatpush.msra.mxu3 %v2982_v60  ;;  %v18374_v60 = vand.u32 4294901760, %v18369_v24 }
 0x19e   :  { %2518 = vmatmul.f32.gmra.mxu0 %v18358_v36  ;;  %2721 = vmatmul.f32.vlgmr.msrb.gmra.mxu3 %v18359_v13 }
 0x19f   :  { %2794 = vmatpush.msra.mxu0 %v18360_v47  ;;  %2827 = vmatpush.msra.mxu1 %v18361_v21 }
 0x1a0   :  { %2874 = vmatpush.msra.mxu2 %v12243_v26  ;;  %2989 = vmatpush.msra.mxu3 %v2988_v33 }
 0x1a1   :  { %2623 = vmatmul.f32.gmra.mxu1 %v18362_v16  ;;  %3001 = vmatpush.msrb.mxu0 %v18363_v37 }
 0x1a2   :  { %3177 = vmatpush.msrb.mxu3 %v11970_v44  ;;  %2829 = vmatpush.msra.mxu1 %v18364_v28 }
 0x1a3   :  { %2876 = vmatpush.msra.mxu2 %v12264_v18  ;;  %3004 = vmatpush.msrb.mxu0 %v18365_v62 }
 0x1a4   :  { %3179 = vmatpush.msrb.mxu3 %v12000_v39  ;;  %2831 = vmatpush.msra.mxu1 %v18367_v7  ;;  %v3335_v7 = vld [vmem:[%s17774_s7 + $0x40] sm:$0xff] }
 0x1a5   :  { %3106 = vmatpush.msrb.mxu2 %v18366_v22  ;;  %3007 = vmatpush.msrb.mxu0 %v18369_v24  ;;  %v3235_v22 = vld [vmem:[#allocation2 + $0x30] sm:$0xff] }
 0x1a6   :  { %2682 = vmatmul.f32.gmra.mxu2 %v18368_v15  ;;  %3181 = vmatpush.msrb.mxu3 %v12025_v12 }
 0x1a7   :  { %3110 = vmatpush.msrb.mxu2 %v18370_v41  ;;  %2833 = vmatpush.msra.mxu1 %v18371_v50 }
 0x1a8   :  { %2727 = vmatmul.f32.gmra.mxu3 %v18372_v30  ;;  %2796 = vmatmul.f32.vlgmr.msra.gmra.mxu0 %v18290_v46 }
 0x1a9   :  { %3010 = vmatpush.msrb.mxu0 %v18373_v48  ;;  %3114 = vmatpush.msrb.mxu2 %v18374_v60  ;;  %v1767_v45 = vpop.f32.mrf.mxu0 }
 0x1aa   :  { %3183 = vmatpush.msrb.mxu3 %v12044_v25  ;;  %2835 = vmatpush.msra.mxu1 %v12039_v51  ;;  %v18376_v51 = vand.u32 4294901760, %v12107_v5 }
 0x1ab   :  { %2837 = vmatmul.f32.vlgmr.msra.gmra.mxu1 %v18290_v46  ;;  %3013 = vmatpush.msrb.mxu0 %v12107_v5 }
 0x1ac   :  { %3059 = vmatpush.msrb.mxu1 %v11970_v44  ;;  %3118 = vmatpush.msrb.mxu2 %v18375_v54  ;;  %v1876_v33 = vpop.f32.mrf.mxu1  ;;  %v1768_v44 = vadd.f32 %v1767_v45, %v229_v8 }
 0x1ad   :  { %3185 = vmatpush.msrb.mxu3 %v12074_v4  ;;  %3016 = vmatpush.msrb.mxu0 %v12126_v57 }
 0x1ae   :  { %3061 = vmatpush.msrb.mxu1 %v12000_v39  ;;  %3122 = vmatpush.msrb.mxu2 %v18376_v51  ;;  %v1877_v39 = vadd.f32 %v1876_v33, %v1768_v44  ;;  %v12527_v33 = vand.u32 4294901760, %v3335_v7 }
 0x1af   :  { %3187 = vmatpush.msrb.mxu3 %v12093_v19  ;;  %3019 = vmatpush.msrb.mxu0 %v12144_v59 }
 0x1b0   :  { %3063 = vmatpush.msrb.mxu1 %v12025_v12  ;;  %3126 = vmatpush.msrb.mxu2 %v2926_v52  ;;  %v18377_v12 = vand.u32 4294901760, %v12163_v17 }
 0x1b1   :  { %3189 = vmatpush.msrb.mxu3 %v12109_v9  ;;  %2800 = vmatmul.f32.gmra.mxu0 %v18362_v16 }
 0x1b2   :  { %3022 = vmatpush.msrb.mxu0 %v12163_v17  ;;  %3065 = vmatpush.msrb.mxu1 %v12044_v25 }
 0x1b3   :  { %3130 = vmatpush.msrb.mxu2 %v2932_v6  ;;  %3191 = vmatpush.msrb.mxu3 %v12128_v31  ;;  %v1775_v5 = vpop.f32.mrf.mxu0 }
 0x1b4   :  { %2841 = vmatmul.f32.gmra.mxu1 %v18362_v16  ;;  %3025 = vmatpush.msrb.mxu0 %v12178_v34 }
 0x1b5   :  { %3067 = vmatpush.msrb.mxu1 %v12074_v4  ;;  %3134 = vmatpush.msrb.mxu2 %v18377_v12 }
 0x1b6   :  { %3193 = vmatpush.msrb.mxu3 %v12146_v53  ;;  %3028 = vmatpush.msrb.mxu0 %v12190_v56  ;;  %v12386_v25 = vpop.f32.mrf.mxu1  ;;  %v1934_v57 = vpop.f32.mrf.mxu2 }
 0x1b7   :  { %3069 = vmatpush.msrb.mxu1 %v12093_v19  ;;  %3138 = vmatpush.msrb.mxu2 %v2944_v14  ;;  %v1935_v59 = vadd.f32 %v1934_v57, %v1877_v39  ;;  %v1978_v52 = vpop.f32.mrf.mxu3  ;;  %v3342_v19 = vld [vmem:[%s17774_s7 + $0x78] sm:$0xff]  ;;  %v12426_v14 = vld [vmem:[#allocation8] sm:$0xff] }
 0x1b8   :  { %3195 = vmatpush.msrb.mxu3 %v12165_v49  ;;  %2882 = vmatmul.f32.vlgmr.msra.gmra.mxu2 %v10434_v58  ;;  %v3341_v58 = vld [vmem:[%s17774_s7 + $0x70] sm:$0xff]  ;;  %v12411_v17 = vand.u32 4294901760, %v3342_v19 }
 0x1b9   :  { %3031 = vmatpush.msrb.mxu0 %v12205_v35  ;;  %3071 = vmatpush.msrb.mxu1 %v12109_v9  ;;  %v1979_v4 = vadd.f32 %v1978_v52, %v1935_v59  ;;  %v12421_v34 = vand.u32 4294901760, %v3341_v58 }
 0x1ba   :  { %3142 = vmatpush.msrb.mxu2 %v2950_v63  ;;  %3197 = vmatpush.msrb.mxu3 %v12180_v11  ;;  %v12431_v35 = vsub.f32 %v3342_v19, %v12411_v17 }
 0x1bb   :  { %2991 = vmatmul.f32.vlgmr.msra.gmra.mxu3 %v18290_v46  ;;  %3034 = vmatpush.msrb.mxu0 %v12220_v3  ;;  %v3339_v3 = vld [vmem:[%s17774_s7 + $0x60] sm:$0xff] }
 0x1bc   :  { %3073 = vmatpush.msrb.mxu1 %v12128_v31  ;;  %3146 = vmatpush.msrb.mxu2 %v2956_v40  ;;  %v2053_v9 = vpop.f32.mrf.mxu0  ;;  %v3340_v31 = vld [vmem:[%s17774_s7 + $0x68] sm:$0xff]  ;;  %v3263_v40 = vperm.slane %v12426_v14, 0 }
 0x1bd   :  { %3199 = vmatpush.msrb.mxu3 %v12192_v0  ;;  %3037 = vmatpush.msrb.mxu0 %v12241_v2  ;;  %v2054_v6 = vadd.f32 %v2053_v9, %v1979_v4  ;;  %v12433_v63 = vand.u32 4294901760, %v3340_v31  ;;  %v12449_v2 = vand.u32 4294901760, %v3339_v3  ;;  %v3331_v9 = vld [vmem:[%s17774_s7 + $0x20] sm:$0xff] }
 0x1be   :  { %3075 = vmatpush.msrb.mxu1 %v12146_v53  ;;  %3150 = vmatpush.msrb.mxu2 %v2962_v23  ;;  %v12454_v23 = vpop.permute.xlu0 %3254 }
 0x1bf   :  { %3201 = vmatpush.msrb.mxu3 %v12211_v27  ;;  %3040 = vmatpush.msrb.mxu0 %v12257_v1  ;;  %v2094_v56 = vpop.f32.mrf.mxu1  ;;  %v1776_v1 = vadd.f32 %v1775_v5, %v229_v8  ;;  %v12482_v21 = vsub.f32 %v3339_v3, %v12449_v2  ;;  %v230_v3 = vperm.slane %v11979_v43, 5  ;;  %v3353_v43 = vld [vmem:[%s17774_s7 + $0xd0] sm:$0xff] }
 0x1c0   :  { %3077 = vmatpush.msrb.mxu1 %v12165_v49  ;;  %3154 = vmatpush.msrb.mxu2 %v2968_v38  ;;  %v2095_v53 = vadd.f32 %v2094_v56, %v2054_v6  ;;  %v12444_v49 = vsub.f32 %v3341_v58, %v12421_v34  ;;  %v12462_v38 = vsub.f32 %v3340_v31, %v12433_v63 }
 0x1c1   :  { %3203 = vmatpush.msrb.mxu3 %v12227_v61  ;;  %2890 = vmatmul.f32.gmra.mxu2 %v18358_v36  ;;  %v3337_v36 = vld [vmem:[%s17774_s7 + $0x50] sm:$0xff]  ;;  %v1881_v62 = vadd.f32 %v12386_v25, %v1776_v1  ;;  %v17917_v60 = vand.u32 4294901760, %v12482_v21 }
 0x1c2   :  { %3043 = vmatpush.msrb.mxu0 %v12271_v10  ;;  %3079 = vmatpush.msrb.mxu1 %v12180_v11  ;;  %3221 = vst [vmem:[#allocation2 + $0x50] sm:$0xff] %v2095_v53  ;;  %v3338_v11 = vld [vmem:[%s17774_s7 + $0x58] sm:$0xff]  ;;  %v17920_v10 = vand.u32 4294901760, %v12444_v49  ;;  %v12484_v37 = vand.u32 4294901760, %v3337_v36 }
 0x1c3   :  { %3158 = vmatpush.msrb.mxu2 %v2974_v20  ;;  %3205 = vmatpush.msrb.mxu3 %v12243_v26  ;;  %v17921_v20 = vand.u32 4294901760, %v12431_v35  ;;  %v3527_v12 = vsub.f32 %v12482_v21, %v17917_v60 }
 0x1c4   :  { %2995 = vmatmul.f32.gmra.mxu3 %v18362_v16  ;;  %3046 = vmatpush.msrb.mxu0 %v12284_v29  ;;  %v3515_v24 = vsub.f32 %v12444_v49, %v17920_v10  ;;  %v12517_v48 = vsub.f32 %v3337_v36, %v12484_v37 }
 0x1c5   :  { %3081 = vmatpush.msrb.mxu1 %v12192_v0  ;;  %3162 = vmatpush.msrb.mxu2 %v2980_v55  ;;  %v1939_v47 = vpop.f32.mrf.mxu2  ;;  %v12472_v0 = vand.u32 4294901760, %v3338_v11  ;;  %v3279_v55 = vmul.f32 %v3263_v40, %v12454_v23  ;;  %v3509_v29 = vsub.f32 %v12431_v35, %v17921_v20 }
 0x1c6   :  { %3207 = vmatpush.msrb.mxu3 %v12264_v18  ;;  %3458 = vmatpush.msra.mxu0 %v12411_v17  ;;  %v1940_v51 = vadd.f32 %v1939_v47, %v1881_v62  ;;  %v17915_v25 = vand.u32 4294901760, %v12517_v48  ;;  %v12568_v6 = vpop.permute.xlu0 %3259  ;;  %v3330_v62 = vld [vmem:[%s17774_s7 + $0x18] sm:$0xff] }
 0x1c7   :  { %3083 = vmatpush.msrb.mxu1 %v12211_v27  ;;  %3166 = vmatpush.msrb.mxu2 %v2986_v32  ;;  %v3336_v27 = vld [vmem:[%s17774_s7 + $0x48] sm:$0xff]  ;;  %v17918_v32 = vand.u32 4294901760, %v12462_v38  ;;  %v12507_v41 = vsub.f32 %v3338_v11, %v12472_v0  ;;  %v12520_v45 = vadd.f32 %v3279_v55, %v3235_v22  ;;  %v3510_v8 = vand.u32 4294901760, %v3509_v29  ;;  %v3358_v22 = vld [vmem:[%s17774_s7 + $0xf8] sm:$0xff] }
 0x1c8   :  { %3671 = vmatpush.msra.mxu3 %v12411_v17  ;;  %3460 = vmatpush.msra.mxu0 %v12421_v34  ;;  %v1984_v28 = vpop.f32.mrf.mxu3  ;;  %v12509_v50 = vand.u32 4294901760, %v3336_v27  ;;  %v3528_v11 = vand.u32 4294901760, %v3527_v12  ;;  %v3539_v1 = vsub.f32 %v12517_v48, %v17915_v25 }
 0x1c9   :  { %3613 = vmatpush.msra.mxu2 %v12431_v35  ;;  %3085 = vmatpush.msrb.mxu1 %v12227_v61  ;;  %v3334_v61 = vld [vmem:[%s17774_s7 + $0x38] sm:$0xff]  ;;  %v3521_v54 = vsub.f32 %v12462_v38, %v17918_v32  ;;  %v17916_v5 = vand.u32 4294901760, %v12507_v41  ;;  %v3311_v57 = vmax.f32 %v12520_v45, 0.0  ;;  %v1985_v4 = vadd.f32 %v1984_v28, %v1940_v51 }
 0x1ca   :  { %3673 = vmatpush.msra.mxu3 %v12421_v34  ;;  %3168 = vmatmul.f32.vlgmr.msrb.gmra.mxu2 %v18290_v46  ;;  %v12539_v39 = vsub.f32 %v3336_v27, %v12509_v50  ;;  %v12589_v27 = vand.u32 4294901760, %v3331_v9 }
 0x1cb   :  { %3462 = vmatpush.msra.mxu0 %v12433_v63  ;;  %3616 = vmatpush.msra.mxu2 %v12444_v49  ;;  %v3522_v59 = vand.u32 4294901760, %v3521_v54  ;;  %v3533_v31 = vsub.f32 %v12507_v41, %v17916_v5  ;;  %v12583_v47 = vand.u32 4294901760, %v3311_v57 }
 0x1cc   :  { %3675 = vmatpush.msra.mxu3 %v12433_v63  ;;  %3087 = vmatpush.msrb.mxu1 %v12243_v26  ;;  %v12531_v26 = vand.u32 4294901760, %v3334_v61  ;;  %v17913_v53 = vand.u32 4294901760, %v12539_v39  ;;  %18380 = vst [vmem:[#allocation22_spill] sm:$0xff] %v12589_v27 }
 0x1cd   :  { %3049 = vmatmul.f32.vlgmr.msrb.gmra.mxu0 %v18355_v42  ;;  %3209 = vmatmul.f32.vlgmr.msrb.gmra.mxu3 %v18290_v46  ;;  %v3333_v42 = vld [vmem:[%s17774_s7 + $0x30] sm:$0xff]  ;;  %v3516_v46 = vand.u32 4294901760, %v3515_v24  ;;  %v3287_v24 = vmul.f32 %v3263_v40, %v12568_v6  ;;  %v12626_v12 = vsub.f32 %v3311_v57, %v12583_v47  ;;  %v3356_v57 = vld [vmem:[%s17774_s7 + $0xe8] sm:$0xff] }
 0x1ce   :  { %3464 = vmatpush.msra.mxu0 %v12449_v2  ;;  %3619 = vmatpush.msra.mxu2 %v12462_v38  ;;  %v2139_v44 = vpop.f32.mrf.mxu2  ;;  %v12556_v52 = vand.u32 4294901760, %v3333_v42  ;;  %v12563_v58 = vsub.f32 %v3334_v61, %v12531_v26  ;;  %v3534_v61 = vand.u32 4294901760, %v3533_v31  ;;  %v3545_v45 = vsub.f32 %v12539_v39, %v17913_v53  ;;  %v3357_v40 = vld [vmem:[%s17774_s7 + $0xf0] sm:$0xff] }
 0x1cf   :  { %3677 = vmatpush.msra.mxu3 %v12449_v2  ;;  %3089 = vmatpush.msrb.mxu1 %v12264_v18  ;;  %v3332_v18 = vld [vmem:[%s17774_s7 + $0x28] sm:$0xff]  ;;  %v2140_v54 = vadd.f32 %v2139_v44, %v230_v3  ;;  %v12628_v44 = vand.u32 4294901760, %v3358_v22  ;;  %v12636_v31 = vsub.f32 %v3331_v9, %v12589_v27  ;;  %v12650_v9 = vand.u32 4294901760, %v3357_v40 }
 0x1d0   :  { %3093 = vmatmul.f32.vlgmr.msrb.gmra.mxu1 %v18359_v13  ;;  %3466 = vmatpush.msra.mxu0 %v12472_v0  ;;  %v12554_v13 = vsub.f32 %v3335_v7, %v12527_v33  ;;  %18378 = vst [vmem:[#allocation19_spill] sm:$0xff] %v12556_v52  ;;  %v12574_v56 = vand.u32 4294901760, %v3332_v18  ;;  %v12587_v55 = vsub.f32 %v3333_v42, %v12556_v52  ;;  %v17914_v7 = vand.u32 4294901760, %v12563_v58 }
 0x1d1   :  { %3511 = vmatpush.msra.mxu1 %v3510_v8  ;;  %3622 = vmatpush.msra.mxu2 %v12482_v21  ;;  %v12558_v19 = vpop.f32.mrf.mxu3  ;;  %v17925_v5 = vand.u32 4294901760, %v12636_v31  ;;  %v12688_v60 = vsub.f32 %v3357_v40, %v12650_v9 }
 0x1d2   :  { %3679 = vmatpush.msra.mxu3 %v12472_v0  ;;  %3468 = vmatpush.msra.mxu0 %v12484_v37  ;;  %18379 = vst [vmem:[#allocation18_spill] sm:$0xff] %v12574_v56  ;;  %v17912_v28 = vand.u32 4294901760, %v12554_v13  ;;  %v12610_v8 = vsub.f32 %v3332_v18, %v12574_v56  ;;  %v2249_v53 = vadd.f32 %v12558_v19, %v2140_v54  ;;  %v12676_v54 = vand.u32 4294901760, %v3356_v57 }
 0x1d3   :  { %3517 = vmatpush.msra.mxu1 %v3516_v46  ;;  %3625 = vmatpush.msra.mxu2 %v12507_v41  ;;  %v3329_v46 = vld [vmem:[%s17774_s7 + $0x10] sm:$0xff]  ;;  %v12674_v19 = vsub.f32 %v3358_v22, %v12628_v44  ;;  %18385 = vst [vmem:[#allocation24_spill] sm:$0xff] %v12688_v60 }
 0x1d4   :  { %3681 = vmatpush.msra.mxu3 %v12484_v37  ;;  %3172 = vmatmul.f32.gmra.mxu2 %v18362_v16  ;;  %v2057_v36 = vpop.f32.mrf.mxu0 }
 0x1d5   :  { %3470 = vmatpush.msra.mxu0 %v12509_v50  ;;  %3523 = vmatpush.msra.mxu1 %v3522_v59  ;;  %v2058_v29 = vadd.f32 %v2057_v36, %v1985_v4  ;;  %v3540_v59 = vand.u32 4294901760, %v3539_v1  ;;  %v3551_v4 = vsub.f32 %v12554_v13, %v17912_v28  ;;  %v3557_v1 = vsub.f32 %v12563_v58, %v17914_v7  ;;  %v3328_v36 = vld [vmem:[%s17774_s7 + $0x8] sm:$0xff] }
 0x1d6   :  { %3628 = vmatpush.msra.mxu2 %v12517_v48  ;;  %3683 = vmatpush.msra.mxu3 %v12509_v50  ;;  %v12657_v28 = vand.u32 4294901760, %v3329_v46  ;;  %v17922_v7 = vand.u32 4294901760, %v12610_v8  ;;  %18383 = vst [vmem:[#allocation23_spill] sm:$0xff] %v12674_v19  ;;  %v12682_v25 = vand.u32 4294901760, %v3328_v36 }
 0x1d7   :  { %3054 = vmatmul.f32.gmra.mxu0 %v18368_v15  ;;  %3213 = vmatmul.f32.gmra.mxu3 %v18362_v16  ;;  %v2098_v51 = vpop.f32.mrf.mxu1  ;;  %v12617_v42 = vpop.f32.mrf.mxu2  ;;  %v3243_v15 = vld [vmem:[#allocation2 + $0x40] sm:$0xff]  ;;  %v12620_v16 = vand.u32 4294901760, %v3330_v62  ;;  %v3558_v22 = vand.u32 4294901760, %v3557_v1 }
 0x1d8   :  { %3472 = vmatpush.msra.mxu0 %v12527_v33  ;;  %3529 = vmatpush.msra.mxu1 %v3528_v11  ;;  %v2099_v18 = vadd.f32 %v2098_v51, %v2058_v29  ;;  %v17919_v11 = vand.u32 4294901760, %v12587_v55  ;;  %v12654_v51 = vadd.f32 %v3287_v24, %v3243_v15  ;;  %18382 = vst [vmem:[#allocation27_spill] sm:$0xff] %v12657_v28  ;;  %v3552_v15 = vand.u32 4294901760, %v3551_v4 }
 0x1d9   :  { %18381 = vst [vmem:[#allocation21_spill] sm:$0xff] %v12620_v16  ;;  %3631 = vmatpush.msra.mxu2 %v12539_v39  ;;  %3685 = vmatpush.msra.mxu3 %v12527_v33  ;;  %v12667_v24 = vsub.f32 %v3330_v62, %v12620_v16  ;;  %v12698_v10 = vsub.f32 %v3329_v46, %v12657_v28 }
 0x1da   :  { %3099 = vmatmul.f32.gmra.mxu1 %v18372_v30  ;;  %3474 = vmatpush.msra.mxu0 %v12531_v26  ;;  %3229 = vst [vmem:[#allocation2 + $0x60] sm:$0xff] %v2099_v18  ;;  %v12652_v29 = vpop.f32.mrf.mxu3  ;;  %v3546_v30 = vand.u32 4294901760, %v3545_v45  ;;  %v3355_v18 = vld [vmem:[%s17774_s7 + $0xe0] sm:$0xff]  ;;  %v17923_v45 = vand.u32 4294901760, %v12626_v12  ;;  %v3563_v62 = vsub.f32 %v12587_v55, %v17919_v11  ;;  %v3319_v4 = vmax.f32 %v12654_v51, 0.0 }
 0x1db   :  { %3535 = vmatpush.msra.mxu1 %v3534_v61  ;;  %3634 = vmatpush.msra.mxu2 %v12554_v13  ;;  %v3327_v61 = vld [vmem:[%s17774_s7] sm:$0xff]  ;;  %18384 = vst [vmem:[#allocation14_spill] sm:$0xff] %v12682_v25  ;;  %v3569_v11 = vsub.f32 %v12610_v8, %v17922_v7  ;;  %v12712_v7 = vsub.f32 %v3356_v57, %v12676_v54 }
 0x1dc   :  { %3687 = vmatpush.msra.mxu3 %v12531_v26  ;;  %3476 = vmatpush.msra.mxu0 %v12556_v52  ;;  %v12700_v20 = vand.u32 4294901760, %v3327_v61  ;;  %v12707_v40 = vsub.f32 %v12626_v12, %v17923_v45  ;;  %v3575_v46 = vsub.f32 %v12636_v31, %v17925_v5  ;;  %v12722_v45 = vsub.f32 %v3328_v36, %v12682_v25  ;;  %v3352_v36 = vld [vmem:[%s17774_s7 + $0xc8] sm:$0xff] }
 0x1dd   :  { %3541 = vmatpush.msra.mxu1 %v3540_v59  ;;  %3637 = vmatpush.msra.mxu2 %v12563_v58  ;;  %v12690_v59 = vand.u32 4294901760, %v3355_v18  ;;  %18387 = vst [vmem:[#allocation16_spill] sm:$0xff] %v12712_v7  ;;  %v2148_v57 = vadd.f32 %v12617_v42, %v230_v3  ;;  %v3570_v3 = vand.u32 4294901760, %v3569_v11 }
 0x1de   :  { %3689 = vmatpush.msra.mxu3 %v12556_v52  ;;  %3478 = vmatpush.msra.mxu0 %v12574_v56  ;;  %v2306_v32 = vpop.f32.mrf.mxu0  ;;  %18386 = vst [vmem:[#allocation15_spill] sm:$0xff] %v12700_v20  ;;  %v12740_v42 = vsub.f32 %v3327_v61, %v12700_v20 }
 0x1df   :  { %3547 = vmatpush.msra.mxu1 %v3546_v30  ;;  %3640 = vmatpush.msra.mxu2 %v12587_v55  ;;  %v2307_v1 = vadd.f32 %v2306_v32, %v2249_v53  ;;  %v3354_v32 = vld [vmem:[%s17774_s7 + $0xd8] sm:$0xff]  ;;  %v3564_v53 = vand.u32 4294901760, %v3563_v62  ;;  %v12731_v62 = vsub.f32 %v3355_v18, %v12690_v59  ;;  %v18389_v18 = vand.u32 4294901760, %v12674_v19 }
 0x1e0   :  { %3691 = vmatpush.msra.mxu3 %v12574_v56  ;;  %3480 = vmatpush.msra.mxu0 %v12589_v27  ;;  %v12733_v56 = vand.u32 4294901760, %v3319_v4  ;;  %v2253_v52 = vadd.f32 %v12652_v29, %v2148_v57  ;;  %v3351_v29 = vld [vmem:[%s17774_s7 + $0xc0] sm:$0xff]  ;;  %v18392_v57 = vand.u32 4294901760, %v12698_v10 }
 0x1e1   :  { %3553 = vmatpush.msra.mxu1 %v3552_v15  ;;  %3643 = vmatpush.msra.mxu2 %v12610_v8  ;;  %v2350_v30 = vpop.f32.mrf.mxu1  ;;  %18388 = vst [vmem:[#allocation30_spill] sm:$0xff] %v12731_v62  ;;  %v12743_v15 = vand.u32 4294901760, %v3354_v32 }
 0x1e2   :  { %v2425_v51 = vpop.f32.mrf.mxu2  ;;  %3693 = vmatpush.msra.mxu3 %v12589_v27  ;;  %3482 = vmatpush.msra.mxu0 %v12620_v16  ;;  %v2351_v5 = vadd.f32 %v2350_v30, %v2307_v1  ;;  %v3881_v1 = vsub.f32 %v12674_v19, %v18389_v18  ;;  %v12760_v19 = vand.u32 4294901760, %v3353_v43  ;;  %v3587_v18 = vsub.f32 %v12698_v10, %v18392_v57 }
 0x1e3   :  { %3559 = vmatpush.msra.mxu1 %v3558_v22  ;;  %3646 = vmatpush.msra.mxu2 %v12636_v31  ;;  %v18390_v22 = vand.u32 4294901760, %v12667_v24 }
 0x1e4   :  { %3695 = vmatpush.msra.mxu3 %v12620_v16  ;;  %3484 = vmatpush.msra.mxu0 %v12657_v28  ;;  %v2426_v61 = vadd.f32 %v2425_v51, %v2351_v5  ;;  %v2466_v27 = vpop.f32.mrf.mxu3  ;;  %v3576_v16 = vand.u32 4294901760, %v3575_v46  ;;  %v18391_v5 = vand.u32 4294901760, %v12688_v60 }
 0x1e5   :  { %v3581_v30 = vsub.f32 %v12667_v24, %v18390_v22  ;;  %3565 = vmatpush.msra.mxu1 %v3564_v53  ;;  %3649 = vmatpush.msra.mxu2 %v12667_v24  ;;  %v12769_v53 = vsub.f32 %v3319_v4, %v12733_v56  ;;  %v12782_v22 = vand.u32 4294901760, %v3352_v36  ;;  %v3882_v4 = vand.u32 4294901760, %v3881_v1  ;;  %v3350_v1 = vld [vmem:[%s17774_s7 + $0xb8] sm:$0xff] }
 0x1e6   :  { %3697 = vmatpush.msra.mxu3 %v12657_v28  ;;  %3486 = vmatpush.msra.mxu0 %v12682_v25  ;;  %v3887_v51 = vsub.f32 %v12688_v60, %v18391_v5  ;;  %v2467_v46 = vadd.f32 %v2466_v27, %v2426_v61  ;;  %v12780_v5 = vsub.f32 %v3354_v32, %v12743_v15  ;;  %v3493_v27 = vand.u32 4294901760, %v12707_v40 }
 0x1e7   :  { %3571 = vmatpush.msra.mxu1 %v3570_v3  ;;  %3652 = vmatpush.msra.mxu2 %v12698_v10  ;;  %v3582_v3 = vand.u32 4294901760, %v3581_v30  ;;  %v18393_v61 = vand.u32 4294901760, %v12712_v7  ;;  %v18394_v32 = vand.u32 4294901760, %v12722_v45  ;;  %v12797_v60 = vand.u32 4294901760, %v3351_v29 }
 0x1e8   :  { %3699 = vmatpush.msra.mxu3 %v12682_v25  ;;  %3488 = vmatpush.msra.mxu0 %v12700_v20  ;;  %3222 = vst [vmem:[#allocation2 + $0x68] sm:$0xff] %v2467_v46  ;;  %v2311_v57 = vpop.f32.mrf.mxu0  ;;  %v12795_v25 = vsub.f32 %v3353_v43, %v12760_v19  ;;  %v18395_v30 = vand.u32 4294901760, %v12731_v62  ;;  %v18396_v43 = vand.u32 4294901760, %v12626_v12 }
 0x1e9   :  { %v3893_v28 = vsub.f32 %v12712_v7, %v18393_v61  ;;  %3577 = vmatpush.msra.mxu1 %v3576_v16  ;;  %3655 = vmatpush.msra.mxu2 %v12722_v45  ;;  %v3593_v11 = vsub.f32 %v12722_v45, %v18394_v32  ;;  %v2312_v40 = vadd.f32 %v2311_v57, %v2253_v52  ;;  %v3888_v16 = vand.u32 4294901760, %v3887_v51 }
 0x1ea   :  { %3701 = vmatpush.msra.mxu3 %v12700_v20  ;;  %3494 = vmatmul.f32.vlgmr.msra.gmra.mxu0 %v3493_v27  ;;  %v3899_v46 = vsub.f32 %v12731_v62, %v18395_v30  ;;  %v3499_v61 = vand.u32 4294901760, %v12769_v53  ;;  %v18397_v32 = vand.u32 4294901760, %v12431_v35  ;;  %v3588_v52 = vand.u32 4294901760, %v3587_v18  ;;  %v3349_v30 = vld [vmem:[%s17774_s7 + $0xb0] sm:$0xff] }
 0x1eb   :  { %3705 = vmatmul.f32.vlgmr.msra.gmra.mxu3 %v18396_v43  ;;  %v18398_v57 = vand.u32 4294901760, %v12740_v42  ;;  %v12816_v51 = vsub.f32 %v3352_v36, %v12782_v22  ;;  %v2356_v20 = vpop.f32.mrf.mxu1  ;;  %v2429_v62 = vpop.f32.mrf.mxu2  ;;  %3583 = vmatpush.msra.mxu1 %v3582_v3  ;;  %v3894_v35 = vand.u32 4294901760, %v3893_v28  ;;  %v12821_v43 = vand.u32 4294901760, %v3350_v1 }
 0x1ec   :  { %3718 = vmatpush.msrb.mxu0 %v18397_v32  ;;  %3883 = vmatpush.msrb.mxu3 %v3882_v4  ;;  %v2357_v18 = vadd.f32 %v2356_v20, %v2312_v40  ;;  %v18399_v32 = vand.u32 4294901760, %v12444_v49  ;;  %v12828_v27 = vsub.f32 %v3351_v29, %v12797_v60  ;;  %v3348_v4 = vld [vmem:[%s17774_s7 + $0xa8] sm:$0xff]  ;;  %v3900_v28 = vand.u32 4294901760, %v3899_v46 }
 0x1ed   :  { %v3599_v7 = vsub.f32 %v12740_v42, %v18398_v57  ;;  %3658 = vmatpush.msra.mxu2 %v12740_v42  ;;  %v3594_v57 = vand.u32 4294901760, %v3593_v11  ;;  %v3500_v20 = vsub.f32 %v12769_v53, %v3499_v61  ;;  %v12835_v3 = vand.u32 4294901760, %v3349_v30  ;;  %3589 = vmatpush.msra.mxu1 %v3588_v52 }
 0x1ee   :  { %3722 = vmatpush.msrb.mxu0 %v18399_v32  ;;  %3661 = vmatmul.f32.vlgmr.msra.gmra.mxu2 %v12626_v12  ;;  %v2430_v49 = vadd.f32 %v2429_v62, %v2357_v18  ;;  %v2470_v40 = vpop.f32.mrf.mxu3  ;;  %v18400_v29 = vand.u32 4294901760, %v12780_v5  ;;  %v3347_v12 = vld [vmem:[%s17774_s7 + $0xa0] sm:$0xff]  ;;  %v18401_v46 = vand.u32 4294901760, %v12462_v38  ;;  %v12849_v62 = vsub.f32 %v3350_v1, %v12821_v43  ;;  %v3346_v38 = vld [vmem:[%s17774_s7 + $0x98] sm:$0xff] }
 0x1ef   :  { %3889 = vmatpush.msrb.mxu3 %v3888_v16  ;;  %3830 = vmatpush.msrb.mxu2 %v12628_v44  ;;  %v3600_v11 = vand.u32 4294901760, %v3599_v7  ;;  %v17941_v16 = vperm.slane %v12426_v14, 1  ;;  %v12851_v7 = vand.u32 4294901760, %v3348_v4  ;;  %v18402_v18 = vand.u32 4294901760, %v12795_v25 }
 0x1f0   :  { %v3905_v32 = vsub.f32 %v12780_v5, %v18400_v29  ;;  %3726 = vmatpush.msrb.mxu0 %v18401_v46  ;;  %v2471_v52 = vadd.f32 %v2470_v40, %v2430_v49  ;;  %3595 = vmatpush.msra.mxu1 %v3594_v57  ;;  %v17940_v36 = vand.u32 4294901760, %v12828_v27  ;;  %v3501_v1 = vand.u32 4294901760, %v3500_v20 }
 0x1f1   :  { %3895 = vmatpush.msrb.mxu3 %v3894_v35  ;;  %3832 = vmatpush.msrb.mxu2 %v12650_v9  ;;  %v3911_v29 = vsub.f32 %v12795_v25, %v18402_v18  ;;  %v18403_v35 = vand.u32 4294901760, %v12482_v21  ;;  %v12864_v49 = vsub.f32 %v3349_v30, %v12835_v3  ;;  %v12866_v57 = vand.u32 4294901760, %v3347_v12  ;;  %v3345_v21 = vld [vmem:[%s17774_s7 + $0x90] sm:$0xff] }
 0x1f2   :  { %3230 = vst [vmem:[#allocation2 + $0x70] sm:$0xff] %v2471_v52  ;;  %3601 = vmatpush.msra.mxu1 %v3600_v11  ;;  %v3906_v40 = vand.u32 4294901760, %v3905_v32  ;;  %v18404_v46 = vand.u32 4294901760, %v12816_v51  ;;  %v3280_v30 = vmul.f32 %v17941_v16, %v12454_v23  ;;  %3502 = vmatmul.f32.gmra.mxu0 %v3501_v1  ;;  %v12881_v20 = vsub.f32 %v3348_v4, %v12851_v7  ;;  %v3236_v32 = vld [vmem:[#allocation2] sm:$0xff]  ;;  %v3344_v1 = vld [vmem:[%s17774_s7 + $0x88] sm:$0xff] }
 0x1f3   :  { %3730 = vmatpush.msrb.mxu0 %v18403_v35  ;;  %3901 = vmatpush.msrb.mxu3 %v3900_v28  ;;  %v3928_v28 = vand.u32 4294901760, %v12849_v62  ;;  %v12883_v11 = vand.u32 4294901760, %v3346_v38  ;;  %v18405_v52 = vand.u32 4294901760, %v12507_v41  ;;  %v3912_v35 = vand.u32 4294901760, %v3911_v29 }
 0x1f4   :  { %3834 = vmatpush.msrb.mxu2 %v12676_v54  ;;  %v3917_v18 = vsub.f32 %v12816_v51, %v18404_v46  ;;  %3603 = vmatmul.f32.vlgmr.msra.gmra.mxu1 %v12583_v47  ;;  %v3923_v46 = vsub.f32 %v12828_v27, %v17940_v36  ;;  %v3934_v4 = vand.u32 4294901760, %v12864_v49  ;;  %v12899_v41 = vand.u32 4294901760, %v3345_v21 }
 0x1f5   :  { %3711 = vmatmul.f32.gmra.mxu3 %v3499_v61  ;;  %3734 = vmatpush.msrb.mxu0 %v18405_v52  ;;  %v12897_v61 = vsub.f32 %v3347_v12, %v12866_v57  ;;  %v3343_v52 = vld [vmem:[%s17774_s7 + $0x80] sm:$0xff]  ;;  %v3296_v36 = vadd.f32 %v3280_v30, %v3236_v32  ;;  %v3929_v12 = vsub.f32 %v12849_v62, %v3928_v28  ;;  %v3940_v16 = vand.u32 4294901760, %v12881_v20 }
 0x1f6   :  { %3789 = vmatpush.msrb.mxu1 %v12411_v17  ;;  %3836 = vmatpush.msrb.mxu2 %v12690_v59  ;;  %v3918_v29 = vand.u32 4294901760, %v3917_v18  ;;  %v18406_v17 = vand.u32 4294901760, %v12517_v48  ;;  %v3924_v18 = vand.u32 4294901760, %v3923_v46  ;;  %v18407_v48 = vand.u32 4294901760, %v12539_v39 }
 0x1f7   :  { %3907 = vmatpush.msrb.mxu3 %v3906_v40  ;;  %3666 = vmatmul.f32.gmra.mxu2 %v12769_v53  ;;  %v12913_v40 = vsub.f32 %v3346_v38, %v12883_v11  ;;  %v12915_v53 = vand.u32 4294901760, %v3344_v1  ;;  %v3946_v30 = vand.u32 4294901760, %v12897_v61  ;;  %v12926_v38 = vsub.f32 %v3345_v21, %v12899_v41 }
 0x1f8   :  { %3738 = vmatpush.msrb.mxu0 %v18406_v17  ;;  %3791 = vmatpush.msrb.mxu1 %v12421_v34  ;;  %v3935_v34 = vsub.f32 %v12864_v49, %v3934_v4  ;;  %v12928_v32 = vand.u32 4294901760, %v3343_v52  ;;  %v18408_v39 = vand.u32 4294901760, %v12554_v13  ;;  %v3941_v46 = vsub.f32 %v12881_v20, %v3940_v16 }
 0x1f9   :  { %3838 = vmatpush.msrb.mxu2 %v12743_v15  ;;  %3913 = vmatpush.msrb.mxu3 %v3912_v35  ;;  %v3312_v35 = vmax.f32 %v3296_v36, 0.0  ;;  %v3952_v17 = vand.u32 4294901760, %v12913_v40  ;;  %v12939_v21 = vsub.f32 %v3344_v1, %v12915_v53  ;;  %v18409_v36 = vperm.slane %v12426_v14, 1 }
 0x1fa   :  { %3742 = vmatpush.msrb.mxu0 %v18407_v48  ;;  %3793 = vmatpush.msrb.mxu1 %v12433_v63  ;;  %v3930_v63 = vand.u32 4294901760, %v3929_v12  ;;  %v3947_v12 = vsub.f32 %v12897_v61, %v3946_v30  ;;  %v3958_v1 = vand.u32 4294901760, %v12926_v38  ;;  %v12953_v48 = vsub.f32 %v3343_v52, %v12928_v32 }
 0x1fb   :  { %3840 = vmatpush.msrb.mxu2 %v12760_v19  ;;  %3919 = vmatpush.msrb.mxu3 %v3918_v29  ;;  %v3288_v13 = vmul.f32 %v18409_v36, %v12568_v6  ;;  %v3936_v29 = vand.u32 4294901760, %v3935_v34  ;;  %v18411_v14 = vand.u32 4294901760, %v12587_v55  ;;  %v3953_v34 = vsub.f32 %v12913_v40, %v3952_v17 }
 0x1fc   :  { %3746 = vmatpush.msrb.mxu0 %v18408_v39  ;;  %3795 = vmatpush.msrb.mxu1 %v12449_v2  ;;  %v18410_v2 = vand.u32 4294901760, %v12563_v58  ;;  %v3942_v58 = vand.u32 4294901760, %v3941_v46  ;;  %v3964_v39 = vand.u32 4294901760, %v12939_v21  ;;  %v12963_v36 = vand.u32 4294901760, %v3312_v35 }
 0x1fd   :  { %3842 = vmatpush.msrb.mxu2 %v12782_v22  ;;  %3925 = vmatpush.msrb.mxu3 %v3924_v18  ;;  %v3244_v18 = vld [vmem:[#allocation2 + $0x20] sm:$0xff]  ;;  %v18412_v52 = vand.u32 4294901760, %v12610_v8  ;;  %v3948_v55 = vand.u32 4294901760, %v3947_v12  ;;  %v3970_v46 = vand.u32 4294901760, %v12953_v48 }
 0x1fe   :  { %3607 = vmatmul.f32.gmra.mxu1 %v12733_v56  ;;  %3750 = vmatpush.msrb.mxu0 %v18410_v2  ;;  %v3965_v8 = vsub.f32 %v12939_v21, %v3964_v39  ;;  %v12981_v2 = vsub.f32 %v3312_v35, %v12963_v36  ;;  %v18415_v35 = vand.u32 4294901760, %v12698_v10  ;;  %v18419_v10 = vand.u32 4294901760, %v12740_v42  ;;  %v18422_v42 = vld [vmem:[#allocation21_spill] sm:$0xff] }
 0x1ff   :  { %3797 = vmatpush.msrb.mxu1 %v12472_v0  ;;  %3844 = vmatpush.msrb.mxu2 %v12797_v60  ;;  %v3304_v0 = vadd.f32 %v3288_v13, %v3244_v18  ;;  %v3954_v13 = vand.u32 4294901760, %v3953_v34  ;;  %v18418_v34 = vld [vmem:[#allocation18_spill] sm:$0xff] }
 0x200   :  { %3931 = vmatpush.msrb.mxu3 %v3930_v63  ;;  %3754 = vmatpush.msrb.mxu0 %v18411_v14  ;;  %v3959_v63 = vsub.f32 %v12926_v38, %v3958_v1  ;;  %v3863_v18 = vand.u32 4294901760, %v12981_v2  ;;  %v18416_v14 = vld [vmem:[#allocation19_spill] sm:$0xff] }
 0x201   :  { %3799 = vmatpush.msrb.mxu1 %v12484_v37  ;;  %3846 = vmatpush.msrb.mxu2 %v12821_v43  ;;  %v18413_v37 = vand.u32 4294901760, %v12636_v31  ;;  %v3971_v31 = vsub.f32 %v12953_v48, %v3970_v46 }
 0x202   :  { %3937 = vmatpush.msrb.mxu3 %v3936_v29  ;;  %3758 = vmatpush.msrb.mxu0 %v18412_v52  ;;  %v3320_v29 = vmax.f32 %v3304_v0, 0.0  ;;  %v3960_v12 = vand.u32 4294901760, %v3959_v63  ;;  %v3864_v0 = vsub.f32 %v12981_v2, %v3863_v18  ;;  %v18420_v52 = vld [vmem:[#allocation22_spill] sm:$0xff] }
 0x203   :  { %3801 = vmatpush.msrb.mxu1 %v12509_v50  ;;  %3848 = vmatpush.msrb.mxu2 %v12835_v3  ;;  %v18414_v50 = vand.u32 4294901760, %v12667_v24 }
 0x204   :  { %3943 = vmatpush.msrb.mxu3 %v3942_v58  ;;  %3762 = vmatpush.msrb.mxu0 %v18413_v37  ;;  %v12997_v24 = vand.u32 4294901760, %v3320_v29  ;;  %v18417_v58 = vand.u32 4294901760, %v12722_v45  ;;  %v3865_v63 = vand.u32 4294901760, %v3864_v0  ;;  %v18423_v37 = vld [vmem:[#allocation24_spill] sm:$0xff]  ;;  %v18431_v0 = vld [vmem:[#allocation15_spill] sm:$0xff] }
 0x205   :  { %3803 = vmatpush.msrb.mxu1 %v12527_v33  ;;  %3850 = vmatpush.msrb.mxu2 %v12851_v7  ;;  %v3966_v33 = vand.u32 4294901760, %v3965_v8 }
 0x206   :  { %3949 = vmatpush.msrb.mxu3 %v3948_v55  ;;  %3766 = vmatpush.msrb.mxu0 %v18414_v50  ;;  %v13011_v45 = vsub.f32 %v3320_v29, %v12997_v24  ;;  %v18421_v55 = vld [vmem:[#allocation23_spill] sm:$0xff] }
 0x207   :  { %3805 = vmatpush.msrb.mxu1 %v12531_v26  ;;  %3852 = vmatpush.msrb.mxu2 %v12866_v57  ;;  %v3972_v26 = vand.u32 4294901760, %v3971_v31  ;;  %v18424_v29 = vand.u32 4294901760, %v18421_v55  ;;  %v18425_v50 = vld [vmem:[#allocation27_spill] sm:$0xff] }
 0x208   :  { %3955 = vmatpush.msrb.mxu3 %v3954_v13  ;;  %3770 = vmatpush.msrb.mxu0 %v18415_v35  ;;  %v3871_v13 = vand.u32 4294901760, %v13011_v45  ;;  %v18426_v35 = vld [vmem:[#allocation16_spill] sm:$0xff] }
 0x209   :  { %3807 = vmatpush.msrb.mxu1 %v18416_v14  ;;  %3854 = vmatpush.msrb.mxu2 %v12883_v11  ;;  %v18427_v14 = vand.u32 4294901760, %v18423_v37 }
 0x20a   :  { %3961 = vmatpush.msrb.mxu3 %v3960_v12  ;;  %3774 = vmatpush.msrb.mxu0 %v18417_v58  ;;  %v13025_v12 = vld [vmem:[#allocation10] sm:$0xff]  ;;  %v18428_v58 = vld [vmem:[#allocation14_spill] sm:$0xff] }
 0x20b   :  { %3809 = vmatpush.msrb.mxu1 %v18418_v34  ;;  %3856 = vmatpush.msrb.mxu2 %v12899_v41  ;;  %v231_v31 = vperm.slane %v13025_v12, 6  ;;  %v18429_v34 = vld [vmem:[#allocation30_spill] sm:$0xff] }
 0x20c   :  { %3967 = vmatpush.msrb.mxu3 %v3966_v33  ;;  %3778 = vmatpush.msrb.mxu0 %v18419_v10  ;;  %v18430_v10 = vand.u32 4294901760, %v18426_v35 }
 0x20d   :  { %3811 = vmatpush.msrb.mxu1 %v18420_v52  ;;  %3858 = vmatpush.msrb.mxu2 %v12915_v53 }
 0x20e   :  { %3973 = vmatpush.msrb.mxu3 %v3972_v26  ;;  %3780 = vmatmul.f32.vlgmr.msrb.gmra.mxu0 %v12583_v47  ;;  %v3872_v26 = vsub.f32 %v13011_v45, %v3871_v13 }
 0x20f   :  { %3975 = vmatmul.f32.vlgmr.msrb.gmra.mxu3 %v12963_v36  ;;  %3985 = vmatpush.msra.mxu0 %v18421_v55 }
 0x210   :  { %4161 = vmatpush.msra.mxu3 %v12628_v44  ;;  %3813 = vmatpush.msrb.mxu1 %v18422_v42  ;;  %v3873_v55 = vand.u32 4294901760, %v3872_v26  ;;  %v18432_v42 = vand.u32 4294901760, %v18429_v34  ;;  %v3369_v26 = vld [vmem:[%s17774_s7 + $0x150] sm:$0xff] }
 0x211   :  { %3860 = vmatpush.msrb.mxu2 %v12928_v32  ;;  %3988 = vmatpush.msra.mxu0 %v18423_v37  ;;  %v2511_v8 = vpop.f32.mrf.mxu0 }
 0x212   :  { %3866 = vmatmul.f32.vlgmr.msrb.gmra.mxu2 %v3865_v63  ;;  %4163 = vmatpush.msra.mxu3 %v12650_v9  ;;  %v2512_v52 = vadd.f32 %v2511_v8, %v231_v31 }
 0x213   :  { %4090 = vmatpush.msra.mxu2 %v18424_v29  ;;  %3815 = vmatpush.msrb.mxu1 %v18425_v50  ;;  %v18434_v29 = vand.u32 4294901760, %v12795_v25 }
 0x214   :  { %3991 = vmatpush.msra.mxu0 %v18426_v35  ;;  %4165 = vmatpush.msra.mxu3 %v12676_v54  ;;  %v2620_v33 = vpop.f32.mrf.mxu1 }
 0x215   :  { %4094 = vmatpush.msra.mxu2 %v18427_v14  ;;  %3817 = vmatpush.msrb.mxu1 %v18428_v58  ;;  %v2621_v63 = vadd.f32 %v2620_v33, %v2512_v52  ;;  %v13164_v52 = vand.u32 4294901760, %v3369_v26 }
 0x216   :  { %3994 = vmatpush.msra.mxu0 %v18429_v34  ;;  %4167 = vmatpush.msra.mxu3 %v12690_v59 }
 0x217   :  { %4098 = vmatpush.msra.mxu2 %v18430_v10  ;;  %3819 = vmatpush.msrb.mxu1 %v18431_v0  ;;  %v3368_v0 = vld [vmem:[%s17774_s7 + $0x148] sm:$0xff] }
 0x218   :  { %3784 = vmatmul.f32.gmra.mxu0 %v12733_v56  ;;  %3821 = vmatmul.f32.vlgmr.msrb.gmra.mxu1 %v12583_v47  ;;  %v18433_v47 = vand.u32 4294901760, %v12780_v5 }
 0x219   :  { %3979 = vmatmul.f32.gmra.mxu3 %v12997_v24  ;;  %3997 = vmatpush.msra.mxu0 %v12780_v5 }
 0x21a   :  { %4043 = vmatpush.msra.mxu1 %v12628_v44  ;;  %4102 = vmatpush.msra.mxu2 %v18432_v42 }
 0x21b   :  { %4169 = vmatpush.msra.mxu3 %v12743_v15  ;;  %3874 = vmatmul.f32.gmra.mxu2 %v3873_v55  ;;  %v2519_v37 = vpop.f32.mrf.mxu0  ;;  %v3237_v55 = vld [vmem:[#allocation2 + $0x58] sm:$0xff] }
 0x21c   :  { %4000 = vmatpush.msra.mxu0 %v12795_v25  ;;  %4045 = vmatpush.msra.mxu1 %v12650_v9  ;;  %v18435_v9 = vand.u32 4294901760, %v12816_v51  ;;  %v2520_v5 = vadd.f32 %v2519_v37, %v231_v31 }
 0x21d   :  { %4106 = vmatpush.msra.mxu2 %v18433_v47  ;;  %4171 = vmatpush.msra.mxu3 %v12760_v19 }
 0x21e   :  { %4003 = vmatpush.msra.mxu0 %v12816_v51  ;;  %4047 = vmatpush.msra.mxu1 %v12676_v54  ;;  %v2624_v44 = vpop.f32.mrf.mxu1  ;;  %v2678_v8 = vpop.f32.mrf.mxu2  ;;  %v18436_v54 = vand.u32 4294901760, %v12828_v27 }
 0x21f   :  { %4110 = vmatpush.msra.mxu2 %v18434_v29  ;;  %4173 = vmatpush.msra.mxu3 %v12782_v22  ;;  %v2679_v50 = vadd.f32 %v2678_v8, %v2621_v63  ;;  %v3366_v63 = vld [vmem:[%s17774_s7 + $0x138] sm:$0xff] }
 0x220   :  { %4006 = vmatpush.msra.mxu0 %v12828_v27  ;;  %4049 = vmatpush.msra.mxu1 %v12690_v59  ;;  %v2625_v59 = vadd.f32 %v2624_v44, %v2520_v5  ;;  %v13196_v44 = vsub.f32 %v3369_v26, %v13164_v52  ;;  %v3390_v26 = vld [vmem:[%s17774_s7 + $0x1f8] sm:$0xff] }
 0x221   :  { %4114 = vmatpush.msra.mxu2 %v18435_v9  ;;  %4175 = vmatpush.msra.mxu3 %v12797_v60  ;;  %v2722_v35 = vpop.f32.mrf.mxu3  ;;  %v13205_v9 = vand.u32 4294901760, %v3366_v63 }
 0x222   :  { %3825 = vmatmul.f32.gmra.mxu1 %v12733_v56  ;;  %4009 = vmatpush.msra.mxu0 %v12849_v62  ;;  %v2723_v25 = vadd.f32 %v2722_v35, %v2679_v50 }
 0x223   :  { %4051 = vmatpush.msra.mxu1 %v12743_v15  ;;  %4118 = vmatpush.msra.mxu2 %v18436_v54  ;;  %v3374_v15 = vld [vmem:[%s17774_s7 + $0x178] sm:$0xff] }
 0x224   :  { %4177 = vmatpush.msra.mxu3 %v12821_v43  ;;  %4012 = vmatpush.msra.mxu0 %v12864_v49 }
 0x225   :  { %4053 = vmatpush.msra.mxu1 %v12760_v19  ;;  %4122 = vmatpush.msra.mxu2 %v3928_v28  ;;  %v2797_v51 = vpop.f32.mrf.mxu0  ;;  %v13092_v28 = vand.u32 4294901760, %v3374_v15 }
 0x226   :  { %4179 = vmatpush.msra.mxu3 %v12835_v3  ;;  %4015 = vmatpush.msra.mxu0 %v12881_v20  ;;  %v2798_v56 = vadd.f32 %v2797_v51, %v2723_v25 }
 0x227   :  { %4055 = vmatpush.msra.mxu1 %v12782_v22  ;;  %4126 = vmatpush.msra.mxu2 %v3934_v4  ;;  %v3373_v22 = vld [vmem:[%s17774_s7 + $0x170] sm:$0xff] }
 0x228   :  { %4181 = vmatpush.msra.mxu3 %v12851_v7  ;;  %4018 = vmatpush.msra.mxu0 %v12897_v61  ;;  %v2838_v19 = vpop.f32.mrf.mxu1  ;;  %v13102_v20 = vand.u32 4294901760, %v3373_v22  ;;  %v13113_v61 = vsub.f32 %v3374_v15, %v13092_v28 }
 0x229   :  { %v2683_v27 = vpop.f32.mrf.mxu2  ;;  %4057 = vmatpush.msra.mxu1 %v12797_v60  ;;  %4130 = vmatpush.msra.mxu2 %v3940_v16  ;;  %v2839_v62 = vadd.f32 %v2838_v19, %v2798_v56  ;;  %v3372_v60 = vld [vmem:[%s17774_s7 + $0x168] sm:$0xff]  ;;  %v13236_v19 = vsub.f32 %v3366_v63, %v13205_v9  ;;  %v3389_v63 = vld [vmem:[%s17774_s7 + $0x1f0] sm:$0xff] }
 0x22a   :  { %v2684_v49 = vadd.f32 %v2683_v27, %v2625_v59  ;;  %4183 = vmatpush.msra.mxu3 %v12866_v57  ;;  %4021 = vmatpush.msra.mxu0 %v12913_v40  ;;  %v13120_v40 = vld [vmem:[#allocation8] sm:$0xff]  ;;  %v13126_v33 = vsub.f32 %v3373_v22, %v13102_v20  ;;  %v17951_v58 = vand.u32 4294901760, %v13113_v61  ;;  %v3363_v27 = vld [vmem:[%s17774_s7 + $0x120] sm:$0xff] }
 0x22b   :  { %4059 = vmatpush.msra.mxu1 %v12821_v43  ;;  %4134 = vmatpush.msra.mxu2 %v3946_v30  ;;  %3223 = vst [vmem:[#allocation2 + $0x8] sm:$0xff] %v2839_v62  ;;  %v2728_v16 = vpop.f32.mrf.mxu3  ;;  %v3371_v43 = vld [vmem:[%s17774_s7 + $0x160] sm:$0xff]  ;;  %v13115_v30 = vand.u32 4294901760, %v3372_v60 }
 0x22c   :  { %4185 = vmatpush.msra.mxu3 %v12883_v11  ;;  %4024 = vmatpush.msra.mxu0 %v12926_v38  ;;  %v2729_v4 = vadd.f32 %v2728_v16, %v2684_v49  ;;  %v13128_v14 = vand.u32 4294901760, %v3371_v43  ;;  %v17950_v10 = vand.u32 4294901760, %v13126_v33  ;;  %v232_v16 = vperm.slane %v13025_v12, 7 }
 0x22d   :  { %4061 = vmatpush.msra.mxu1 %v12835_v3  ;;  %4138 = vmatpush.msra.mxu2 %v3952_v17  ;;  %v3265_v17 = vperm.slane %v13120_v40, 2 }
 0x22e   :  { %4187 = vmatpush.msra.mxu3 %v12899_v41  ;;  %4027 = vmatpush.msra.mxu0 %v12939_v21  ;;  %v2801_v31 = vpop.f32.mrf.mxu0  ;;  %v4259_v37 = vsub.f32 %v13126_v33, %v17950_v10 }
 0x22f   :  { %4063 = vmatpush.msra.mxu1 %v12851_v7  ;;  %4142 = vmatpush.msra.mxu2 %v3958_v1  ;;  %v2802_v3 = vadd.f32 %v2801_v31, %v2729_v4  ;;  %v3370_v7 = vld [vmem:[%s17774_s7 + $0x158] sm:$0xff]  ;;  %v13139_v1 = vsub.f32 %v3372_v60, %v13115_v30  ;;  %v3281_v21 = vmul.f32 %v3265_v17, %v12454_v23 }
 0x230   :  { %4189 = vmatpush.msra.mxu3 %v12915_v53  ;;  %4030 = vmatpush.msra.mxu0 %v12953_v48  ;;  %v3367_v48 = vld [vmem:[%s17774_s7 + $0x140] sm:$0xff]  ;;  %v4260_v54 = vand.u32 4294901760, %v4259_v37 }
 0x231   :  { %4065 = vmatpush.msra.mxu1 %v12866_v57  ;;  %4146 = vmatpush.msra.mxu2 %v3964_v39  ;;  %v2842_v38 = vpop.f32.mrf.mxu1  ;;  %v13147_v57 = vand.u32 4294901760, %v3370_v7  ;;  %v13155_v39 = vsub.f32 %v3371_v43, %v13128_v14  ;;  %v17948_v42 = vand.u32 4294901760, %v13139_v1  ;;  %v13198_v8 = vand.u32 4294901760, %v3367_v48 }
 0x232   :  { %4191 = vmatpush.msra.mxu3 %v12928_v32  ;;  %4033 = vmatmul.f32.vlgmr.msra.gmra.mxu0 %v12981_v2  ;;  %v2843_v34 = vadd.f32 %v2842_v38, %v2802_v3  ;;  %v13261_v3 = vand.u32 4294901760, %v3363_v27  ;;  %v3362_v38 = vld [vmem:[%s17774_s7 + $0x118] sm:$0xff] }
 0x233   :  { %4193 = vmatmul.f32.vlgmr.msra.gmra.mxu3 %v12963_v36  ;;  %4202 = vmatpush.msrb.mxu0 %v13092_v28  ;;  %v17947_v47 = vand.u32 4294901760, %v13155_v39  ;;  %v4265_v50 = vsub.f32 %v13139_v1, %v17948_v42  ;;  %v13229_v56 = vsub.f32 %v3367_v48, %v13198_v8  ;;  %v13289_v37 = vand.u32 4294901760, %v3362_v38 }
 0x234   :  { %4415 = vmatpush.msrb.mxu3 %v13092_v28  ;;  %4067 = vmatpush.msra.mxu1 %v12883_v11  ;;  %3231 = vst [vmem:[#allocation2 + $0x78] sm:$0xff] %v2843_v34  ;;  %v4253_v11 = vsub.f32 %v13113_v61, %v17951_v58  ;;  %v17944_v34 = vand.u32 4294901760, %v13236_v19 }
 0x235   :  { %4150 = vmatpush.msra.mxu2 %v3970_v46  ;;  %4204 = vmatpush.msrb.mxu0 %v13102_v20  ;;  %v13178_v46 = vsub.f32 %v3370_v7, %v13147_v57  ;;  %v4271_v59 = vsub.f32 %v13155_v39, %v17947_v47  ;;  %v4266_v15 = vand.u32 4294901760, %v4265_v50  ;;  %18439 = vst [vmem:[#allocation28_spill] sm:$0xff] %v13261_v3  ;;  %v17942_v7 = vand.u32 4294901760, %v13229_v56 }
 0x236   :  { %4152 = vmatmul.f32.vlgmr.msra.gmra.mxu2 %v12963_v36  ;;  %4417 = vmatpush.msrb.mxu3 %v13102_v20  ;;  %v13180_v36 = vand.u32 4294901760, %v3368_v0  ;;  %v4254_v29 = vand.u32 4294901760, %v4253_v11  ;;  %18440 = vst [vmem:[#allocation20_spill] sm:$0xff] %v13289_v37  ;;  %v13297_v50 = vand.u32 4294901760, %v3390_v26 }
 0x237   :  { %4357 = vmatpush.msrb.mxu2 %v13113_v61  ;;  %4069 = vmatpush.msra.mxu1 %v12899_v41  ;;  %v13191_v41 = vadd.f32 %v3281_v21, %v3237_v55  ;;  %v17946_v35 = vand.u32 4294901760, %v13178_v46  ;;  %v4272_v4 = vand.u32 4294901760, %v4271_v59  ;;  %v3289_v21 = vmul.f32 %v3265_v17, %v12568_v6  ;;  %v3245_v17 = vld [vmem:[#allocation2 + $0x10] sm:$0xff] }
 0x238   :  { %4206 = vmatpush.msrb.mxu0 %v13115_v30  ;;  %4419 = vmatpush.msrb.mxu3 %v13115_v30  ;;  %v13213_v5 = vsub.f32 %v3368_v0, %v13180_v36  ;;  %v13305_v59 = vsub.f32 %v3363_v27, %v13261_v3  ;;  %v3360_v27 = vld [vmem:[%s17774_s7 + $0x108] sm:$0xff] }
 0x239   :  { %4360 = vmatpush.msrb.mxu2 %v13126_v33  ;;  %4071 = vmatpush.msra.mxu1 %v12915_v53  ;;  %v3365_v53 = vld [vmem:[%s17774_s7 + $0x130] sm:$0xff]  ;;  %v3313_v51 = vmax.f32 %v13191_v41, 0.0  ;;  %v4277_v62 = vsub.f32 %v13178_v46, %v17946_v35 }
 0x23a   :  { %4208 = vmatpush.msrb.mxu0 %v13128_v14  ;;  %4421 = vmatpush.msrb.mxu3 %v13128_v14  ;;  %v13231_v2 = vand.u32 4294901760, %v3365_v53  ;;  %v17943_v60 = vand.u32 4294901760, %v13213_v5  ;;  %v3361_v41 = vld [vmem:[%s17774_s7 + $0x110] sm:$0xff]  ;;  %v17955_v35 = vand.u32 4294901760, %v13305_v59 }
 0x23b   :  { %4363 = vmatpush.msrb.mxu2 %v13139_v1  ;;  %4073 = vmatpush.msra.mxu1 %v12928_v32  ;;  %v2883_v25 = vpop.f32.mrf.mxu2  ;;  %v3364_v32 = vld [vmem:[%s17774_s7 + $0x128] sm:$0xff]  ;;  %v13251_v43 = vand.u32 4294901760, %v3313_v51  ;;  %v4278_v0 = vand.u32 4294901760, %v4277_v62  ;;  %v13320_v62 = vand.u32 4294901760, %v3389_v63 }
 0x23c   :  { %4038 = vmatmul.f32.gmra.mxu0 %v13011_v45  ;;  %4077 = vmatmul.f32.vlgmr.msra.gmra.mxu1 %v3863_v18  ;;  %18437 = vst [vmem:[#allocation17_spill] sm:$0xff] %v13231_v2  ;;  %v17945_v18 = vand.u32 4294901760, %v13196_v44  ;;  %v13246_v49 = vand.u32 4294901760, %v3364_v32  ;;  %v13259_v31 = vsub.f32 %v3365_v53, %v13231_v2  ;;  %v4289_v55 = vsub.f32 %v13213_v5, %v17943_v60 }
 0x23d   :  { %4197 = vmatmul.f32.gmra.mxu3 %v12997_v24  ;;  %4210 = vmatpush.msrb.mxu0 %v13147_v57  ;;  %v2884_v48 = vadd.f32 %v2883_v25, %v232_v16  ;;  %v13325_v45 = vand.u32 4294901760, %v3361_v41  ;;  %v13357_v47 = vsub.f32 %v3389_v63, %v13320_v62 }
 0x23e   :  { %4255 = vmatpush.msrb.mxu1 %v4254_v29  ;;  %4366 = vmatpush.msrb.mxu2 %v13155_v39  ;;  %v2992_v22 = vpop.f32.mrf.mxu3  ;;  %18438 = vst [vmem:[#allocation25_spill] sm:$0xff] %v13246_v49  ;;  %v13281_v11 = vsub.f32 %v3364_v32, %v13246_v49  ;;  %v13295_v29 = vsub.f32 %v3313_v51, %v13251_v43  ;;  %v17949_v32 = vand.u32 4294901760, %v13259_v31  ;;  %v3388_v51 = vld [vmem:[%s17774_s7 + $0x1e8] sm:$0xff] }
 0x23f   :  { %4423 = vmatpush.msrb.mxu3 %v13147_v57  ;;  %4156 = vmatmul.f32.gmra.mxu2 %v12997_v24  ;;  %v4283_v24 = vsub.f32 %v13196_v44, %v17945_v18  ;;  %18441 = vst [vmem:[#allocation26_spill] sm:$0xff] %v13325_v45  ;;  %v13351_v18 = vand.u32 4294901760, %v3360_v27  ;;  %v13367_v10 = vsub.f32 %v3361_v41, %v13325_v45 }
 0x240   :  { %4212 = vmatpush.msrb.mxu0 %v13164_v52  ;;  %4261 = vmatpush.msrb.mxu1 %v4260_v54  ;;  %v4295_v54 = vsub.f32 %v13229_v56, %v17942_v7  ;;  %v17952_v7 = vand.u32 4294901760, %v13281_v11  ;;  %18444 = vst [vmem:[#allocation18_spill] sm:$0xff] %v13357_v47 }
 0x241   :  { %4369 = vmatpush.msrb.mxu2 %v13178_v46  ;;  %4425 = vmatpush.msrb.mxu3 %v13164_v52  ;;  %v4284_v25 = vand.u32 4294901760, %v4283_v24  ;;  %v4290_v24 = vand.u32 4294901760, %v4289_v55  ;;  %v13343_v55 = vsub.f32 %v3390_v26, %v13297_v50  ;;  %18443 = vst [vmem:[#allocation19_spill] sm:$0xff] %v13351_v18 }
 0x242   :  { %4214 = vmatpush.msrb.mxu0 %v13180_v36  ;;  %4267 = vmatpush.msrb.mxu1 %v4266_v15  ;;  %v4301_v15 = vsub.f32 %v13236_v19, %v17944_v34  ;;  %v3387_v34 = vld [vmem:[%s17774_s7 + $0x1e0] sm:$0xff] }
 0x243   :  { %4372 = vmatpush.msrb.mxu2 %v13196_v44  ;;  %4427 = vmatpush.msrb.mxu3 %v13180_v36  ;;  %18442 = vst [vmem:[#allocation29_spill] sm:$0xff] %v13343_v55 }
 0x244   :  { %4216 = vmatpush.msrb.mxu0 %v13198_v8  ;;  %4273 = vmatpush.msrb.mxu1 %v4272_v4  ;;  %v2891_v53 = vpop.f32.mrf.mxu2  ;;  %v13322_v4 = vadd.f32 %v3289_v21, %v3245_v17  ;;  %v13336_v21 = vsub.f32 %v3362_v38, %v13289_v37  ;;  %v4296_v17 = vand.u32 4294901760, %v4295_v54  ;;  %v4307_v38 = vsub.f32 %v13259_v31, %v17949_v32 }
 0x245   :  { %4375 = vmatpush.msrb.mxu2 %v13213_v5  ;;  %4429 = vmatpush.msrb.mxu3 %v13198_v8  ;;  %v4302_v26 = vand.u32 4294901760, %v4301_v15  ;;  %v4313_v32 = vsub.f32 %v13281_v11, %v17952_v7 }
 0x246   :  { %4083 = vmatmul.f32.gmra.mxu1 %v3871_v13  ;;  %4218 = vmatpush.msrb.mxu0 %v13205_v9  ;;  %v2993_v13 = vadd.f32 %v2992_v22, %v2884_v48  ;;  %v17953_v22 = vand.u32 4294901760, %v13295_v29  ;;  %v13345_v48 = vand.u32 4294901760, %v3388_v51  ;;  %v3321_v54 = vmax.f32 %v13322_v4, 0.0 }
 0x247   :  { %4279 = vmatpush.msrb.mxu1 %v4278_v0  ;;  %4378 = vmatpush.msrb.mxu2 %v13229_v56  ;;  %v13328_v60 = vpop.f32.mrf.mxu3  ;;  %v3359_v0 = vld [vmem:[%s17774_s7 + $0x100] sm:$0xff]  ;;  %v4308_v41 = vand.u32 4294901760, %v4307_v38  ;;  %v4314_v12 = vand.u32 4294901760, %v4313_v32 }
 0x248   :  { %4431 = vmatpush.msrb.mxu3 %v13205_v9  ;;  %4220 = vmatpush.msrb.mxu0 %v13231_v2  ;;  %v13369_v58 = vand.u32 4294901760, %v3359_v0  ;;  %v13376_v63 = vsub.f32 %v13295_v29, %v17953_v22  ;;  %v13381_v7 = vsub.f32 %v3388_v51, %v13345_v48  ;;  %v13391_v22 = vsub.f32 %v3360_v27, %v13351_v18  ;;  %v3385_v27 = vld [vmem:[%s17774_s7 + $0x1d0] sm:$0xff] }
 0x249   :  { %4285 = vmatpush.msrb.mxu1 %v4284_v25  ;;  %4381 = vmatpush.msrb.mxu2 %v13236_v19  ;;  %v13359_v25 = vand.u32 4294901760, %v3387_v34 }
 0x24a   :  { %4433 = vmatpush.msrb.mxu3 %v13231_v2  ;;  %4222 = vmatpush.msrb.mxu0 %v13246_v49  ;;  %v3050_v42 = vpop.f32.mrf.mxu0  ;;  %18445 = vst [vmem:[#allocation22_spill] sm:$0xff] %v13369_v58 }
 0x24b   :  { %4291 = vmatpush.msrb.mxu1 %v4290_v24  ;;  %4384 = vmatpush.msrb.mxu2 %v13259_v31  ;;  %v3051_v15 = vadd.f32 %v3050_v42, %v2993_v13  ;;  %18446 = vst [vmem:[#allocation23_spill] sm:$0xff] %v13381_v7  ;;  %v3386_v42 = vld [vmem:[%s17774_s7 + $0x1d8] sm:$0xff]  ;;  %v4319_v13 = vsub.f32 %v13305_v59, %v17955_v35 }
 0x24c   :  { %4435 = vmatpush.msrb.mxu3 %v13246_v49  ;;  %4224 = vmatpush.msrb.mxu0 %v13261_v3  ;;  %v2892_v24 = vadd.f32 %v2891_v53, %v232_v16  ;;  %v13399_v38 = vsub.f32 %v3387_v34, %v13359_v25  ;;  %v13401_v49 = vand.u32 4294901760, %v3321_v54  ;;  %v13408_v16 = vsub.f32 %v3359_v0, %v13369_v58  ;;  %v3384_v53 = vld [vmem:[%s17774_s7 + $0x1c8] sm:$0xff] }
 0x24d   :  { %4297 = vmatpush.msrb.mxu1 %v4296_v17  ;;  %4387 = vmatpush.msrb.mxu2 %v13281_v11  ;;  %v3094_v51 = vpop.f32.mrf.mxu1  ;;  %v3169_v4 = vpop.f32.mrf.mxu2  ;;  %v13411_v17 = vand.u32 4294901760, %v3386_v42  ;;  %v18448_v34 = vand.u32 4294901760, %v13343_v55 }
 0x24e   :  { %4437 = vmatpush.msrb.mxu3 %v13261_v3  ;;  %4226 = vmatpush.msrb.mxu0 %v13289_v37  ;;  %18447 = vst [vmem:[#allocation21_spill] sm:$0xff] %v13399_v38  ;;  %v3095_v35 = vadd.f32 %v3094_v51, %v3051_v15  ;;  %v2997_v2 = vadd.f32 %v13328_v60, %v2892_v24  ;;  %v3383_v60 = vld [vmem:[%s17774_s7 + $0x1c0] sm:$0xff]  ;;  %v18451_v24 = vand.u32 4294901760, %v13367_v10 }
 0x24f   :  { %4303 = vmatpush.msrb.mxu1 %v4302_v26  ;;  %4390 = vmatpush.msrb.mxu2 %v13305_v59  ;;  %v4625_v15 = vsub.f32 %v13343_v55, %v18448_v34  ;;  %v18449_v26 = vand.u32 4294901760, %v13336_v21  ;;  %v13428_v55 = vand.u32 4294901760, %v3385_v27 }
 0x250   :  { %4439 = vmatpush.msrb.mxu3 %v13289_v37  ;;  %4228 = vmatpush.msrb.mxu0 %v13325_v45  ;;  %v3170_v0 = vadd.f32 %v3169_v4, %v3095_v35  ;;  %v3210_v3 = vpop.f32.mrf.mxu3  ;;  %v4320_v37 = vand.u32 4294901760, %v4319_v13  ;;  %v18450_v35 = vand.u32 4294901760, %v13357_v47  ;;  %v4331_v34 = vsub.f32 %v13367_v10, %v18451_v24 }
 0x251   :  { %v4325_v51 = vsub.f32 %v13336_v21, %v18449_v26  ;;  %4309 = vmatpush.msrb.mxu1 %v4308_v41  ;;  %4393 = vmatpush.msrb.mxu2 %v13336_v21  ;;  %v13437_v41 = vsub.f32 %v3321_v54, %v13401_v49  ;;  %v13450_v26 = vand.u32 4294901760, %v3384_v53  ;;  %v4626_v54 = vand.u32 4294901760, %v4625_v15  ;;  %v3382_v15 = vld [vmem:[%s17774_s7 + $0x1b8] sm:$0xff] }
 0x252   :  { %4441 = vmatpush.msrb.mxu3 %v13325_v45  ;;  %4230 = vmatpush.msrb.mxu0 %v13351_v18  ;;  %v4631_v4 = vsub.f32 %v13357_v47, %v18450_v35  ;;  %v3211_v13 = vadd.f32 %v3210_v3, %v3170_v0  ;;  %v13448_v35 = vsub.f32 %v3386_v42, %v13411_v17  ;;  %v4237_v3 = vand.u32 4294901760, %v13376_v63 }
 0x253   :  { %4315 = vmatpush.msrb.mxu1 %v4314_v12  ;;  %4396 = vmatpush.msrb.mxu2 %v13367_v10  ;;  %v4326_v12 = vand.u32 4294901760, %v4325_v51  ;;  %v18452_v0 = vand.u32 4294901760, %v13381_v7  ;;  %v18453_v42 = vand.u32 4294901760, %v13391_v22  ;;  %v13465_v47 = vand.u32 4294901760, %v3383_v60 }
 0x254   :  { %4443 = vmatpush.msrb.mxu3 %v13351_v18  ;;  %4232 = vmatpush.msrb.mxu0 %v13369_v58  ;;  %3224 = vst [vmem:[#allocation2 + $0x48] sm:$0xff] %v3211_v13  ;;  %v3055_v24 = vpop.f32.mrf.mxu0  ;;  %v13463_v18 = vsub.f32 %v3385_v27, %v13428_v55  ;;  %v18454_v51 = vand.u32 4294901760, %v13399_v38  ;;  %v18455_v27 = vand.u32 4294901760, %v13295_v29 }
 0x255   :  { %v4637_v45 = vsub.f32 %v13381_v7, %v18452_v0  ;;  %4321 = vmatpush.msrb.mxu1 %v4320_v37  ;;  %4399 = vmatpush.msrb.mxu2 %v13391_v22  ;;  %v4337_v32 = vsub.f32 %v13391_v22, %v18453_v42  ;;  %v3056_v63 = vadd.f32 %v3055_v24, %v2997_v2  ;;  %v4632_v37 = vand.u32 4294901760, %v4631_v4 }
 0x256   :  { %4445 = vmatpush.msrb.mxu3 %v13369_v58  ;;  %4238 = vmatmul.f32.vlgmr.msrb.gmra.mxu0 %v4237_v3  ;;  %v4643_v13 = vsub.f32 %v13399_v38, %v18454_v51  ;;  %v4243_v0 = vand.u32 4294901760, %v13437_v41  ;;  %v18456_v42 = vand.u32 4294901760, %v13113_v61  ;;  %v4332_v2 = vand.u32 4294901760, %v4331_v34  ;;  %v3381_v51 = vld [vmem:[%s17774_s7 + $0x1b0] sm:$0xff] }
 0x257   :  { %4449 = vmatmul.f32.vlgmr.msrb.gmra.mxu3 %v18455_v27  ;;  %v18457_v24 = vand.u32 4294901760, %v13408_v16  ;;  %v13484_v4 = vsub.f32 %v3384_v53, %v13450_v26  ;;  %v3100_v58 = vpop.f32.mrf.mxu1  ;;  %v3173_v38 = vpop.f32.mrf.mxu2  ;;  %4327 = vmatpush.msrb.mxu1 %v4326_v12  ;;  %v4638_v61 = vand.u32 4294901760, %v4637_v45  ;;  %v13489_v27 = vand.u32 4294901760, %v3382_v15 }
 0x258   :  { %4462 = vmatpush.msra.mxu0 %v18456_v42  ;;  %4627 = vmatpush.msra.mxu3 %v4626_v54  ;;  %v3101_v34 = vadd.f32 %v3100_v58, %v3056_v63  ;;  %v18458_v42 = vand.u32 4294901760, %v13126_v33  ;;  %v13496_v3 = vsub.f32 %v3383_v60, %v13465_v47  ;;  %v3380_v54 = vld [vmem:[%s17774_s7 + $0x1a8] sm:$0xff]  ;;  %v4644_v45 = vand.u32 4294901760, %v4643_v13 }
 0x259   :  { %v4343_v7 = vsub.f32 %v13408_v16, %v18457_v24  ;;  %4402 = vmatpush.msrb.mxu2 %v13408_v16  ;;  %v4338_v24 = vand.u32 4294901760, %v4337_v32  ;;  %v4244_v58 = vsub.f32 %v13437_v41, %v4243_v0  ;;  %v13503_v12 = vand.u32 4294901760, %v3381_v51  ;;  %4333 = vmatpush.msrb.mxu1 %v4332_v2 }
 0x25a   :  { %4466 = vmatpush.msra.mxu0 %v18458_v42  ;;  %4405 = vmatmul.f32.vlgmr.msrb.gmra.mxu2 %v13295_v29  ;;  %v3174_v33 = vadd.f32 %v3173_v38, %v3101_v34  ;;  %v3214_v63 = vpop.f32.mrf.mxu3  ;;  %v18459_v60 = vand.u32 4294901760, %v13448_v35  ;;  %v3379_v29 = vld [vmem:[%s17774_s7 + $0x1a0] sm:$0xff]  ;;  %v18460_v13 = vand.u32 4294901760, %v13139_v1  ;;  %v13517_v38 = vsub.f32 %v3382_v15, %v13489_v27  ;;  %v3378_v1 = vld [vmem:[%s17774_s7 + $0x198] sm:$0xff] }
 0x25b   :  { %4633 = vmatpush.msra.mxu3 %v4632_v37  ;;  %4574 = vmatpush.msra.mxu2 %v13297_v50  ;;  %v4344_v32 = vand.u32 4294901760, %v4343_v7  ;;  %v17971_v37 = vperm.slane %v13120_v40, 3  ;;  %v13519_v7 = vand.u32 4294901760, %v3380_v54  ;;  %v18461_v34 = vand.u32 4294901760, %v13463_v18 }
 0x25c   :  { %v4649_v42 = vsub.f32 %v13448_v35, %v18459_v60  ;;  %4470 = vmatpush.msra.mxu0 %v18460_v13  ;;  %v3215_v2 = vadd.f32 %v3214_v63, %v3174_v33  ;;  %4339 = vmatpush.msrb.mxu1 %v4338_v24  ;;  %v17970_v53 = vand.u32 4294901760, %v13496_v3  ;;  %v4245_v15 = vand.u32 4294901760, %v4244_v58 }
 0x25d   :  { %4639 = vmatpush.msra.mxu3 %v4638_v61  ;;  %4576 = vmatpush.msra.mxu2 %v13320_v62  ;;  %v4655_v60 = vsub.f32 %v13463_v18, %v18461_v34  ;;  %v18462_v61 = vand.u32 4294901760, %v13155_v39  ;;  %v13532_v33 = vsub.f32 %v3381_v51, %v13503_v12  ;;  %v13534_v24 = vand.u32 4294901760, %v3379_v29  ;;  %v3377_v39 = vld [vmem:[%s17774_s7 + $0x190] sm:$0xff] }
 0x25e   :  { %3232 = vst [vmem:[#allocation2 + $0x28] sm:$0xff] %v3215_v2  ;;  %4345 = vmatpush.msrb.mxu1 %v4344_v32  ;;  %v4650_v63 = vand.u32 4294901760, %v4649_v42  ;;  %v18463_v13 = vand.u32 4294901760, %v13484_v4  ;;  %v3282_v51 = vmul.f32 %v17971_v37, %v12454_v23  ;;  %4246 = vmatmul.f32.gmra.mxu0 %v4245_v15  ;;  %v13549_v58 = vsub.f32 %v3380_v54, %v13519_v7  ;;  %v3238_v42 = vld [vmem:[#allocation2 + $0x18] sm:$0xff]  ;;  %v3376_v15 = vld [vmem:[%s17774_s7 + $0x188] sm:$0xff] }
 0x25f   :  { %4474 = vmatpush.msra.mxu0 %v18462_v61  ;;  %4645 = vmatpush.msra.mxu3 %v4644_v45  ;;  %v4672_v45 = vand.u32 4294901760, %v13517_v38  ;;  %v13551_v32 = vand.u32 4294901760, %v3378_v1  ;;  %v18464_v2 = vand.u32 4294901760, %v13178_v46  ;;  %v4656_v61 = vand.u32 4294901760, %v4655_v60 }
 0x260   :  { %4578 = vmatpush.msra.mxu2 %v13345_v48  ;;  %v4661_v34 = vsub.f32 %v13484_v4, %v18463_v13  ;;  %4347 = vmatmul.f32.vlgmr.msrb.gmra.mxu1 %v13251_v43  ;;  %v4667_v13 = vsub.f32 %v13496_v3, %v17970_v53  ;;  %v4678_v54 = vand.u32 4294901760, %v13532_v33  ;;  %v13567_v46 = vand.u32 4294901760, %v3377_v39 }
 0x261   :  { %4455 = vmatmul.f32.gmra.mxu3 %v4243_v0  ;;  %4478 = vmatpush.msra.mxu0 %v18464_v2  ;;  %v13565_v0 = vsub.f32 %v3379_v29, %v13534_v24  ;;  %v3375_v2 = vld [vmem:[%s17774_s7 + $0x180] sm:$0xff]  ;;  %v3298_v53 = vadd.f32 %v3282_v51, %v3238_v42  ;;  %v4673_v29 = vsub.f32 %v13517_v38, %v4672_v45  ;;  %v4684_v37 = vand.u32 4294901760, %v13549_v58 }
 0x262   :  { %4533 = vmatpush.msra.mxu1 %v13092_v28  ;;  %4580 = vmatpush.msra.mxu2 %v13359_v25  ;;  %v4662_v60 = vand.u32 4294901760, %v4661_v34  ;;  %v18465_v28 = vand.u32 4294901760, %v13196_v44  ;;  %v4668_v34 = vand.u32 4294901760, %v4667_v13  ;;  %v18466_v44 = vand.u32 4294901760, %v13213_v5 }
 0x263   :  { %4651 = vmatpush.msra.mxu3 %v4650_v63  ;;  %4410 = vmatmul.f32.gmra.mxu2 %v13437_v41  ;;  %v13581_v63 = vsub.f32 %v3378_v1, %v13551_v32  ;;  %v13583_v41 = vand.u32 4294901760, %v3376_v15  ;;  %v17972_v1 = vand.u32 4294901760, %v13565_v0  ;;  %v13596_v51 = vsub.f32 %v3377_v39, %v13567_v46 }
 0x264   :  { %4482 = vmatpush.msra.mxu0 %v18465_v28  ;;  %4535 = vmatpush.msra.mxu1 %v13102_v20  ;;  %v4679_v20 = vsub.f32 %v13532_v33, %v4678_v54  ;;  %v13598_v42 = vand.u32 4294901760, %v3375_v2  ;;  %v18467_v5 = vand.u32 4294901760, %v13229_v56  ;;  %v4685_v13 = vsub.f32 %v13549_v58, %v4684_v37 }
 0x265   :  { %4582 = vmatpush.msra.mxu2 %v13411_v17  ;;  %4657 = vmatpush.msra.mxu3 %v4656_v61  ;;  %v3314_v61 = vmax.f32 %v3298_v53, 0.0  ;;  %v4696_v28 = vand.u32 4294901760, %v13581_v63  ;;  %v13609_v39 = vsub.f32 %v3376_v15, %v13583_v41  ;;  %v18468_v53 = vperm.slane %v13120_v40, 3 }
 0x266   :  { %4486 = vmatpush.msra.mxu0 %v18466_v44  ;;  %4537 = vmatpush.msra.mxu1 %v13115_v30  ;;  %v4674_v30 = vand.u32 4294901760, %v4673_v29  ;;  %v4691_v29 = vsub.f32 %v13565_v0, %v17972_v1  ;;  %v4702_v15 = vand.u32 4294901760, %v13596_v51  ;;  %v13623_v44 = vsub.f32 %v3375_v2, %v13598_v42 }
 0x267   :  { %4584 = vmatpush.msra.mxu2 %v13428_v55  ;;  %4663 = vmatpush.msra.mxu3 %v4662_v60  ;;  %v3290_v56 = vmul.f32 %v18468_v53, %v12568_v6  ;;  %v4680_v60 = vand.u32 4294901760, %v4679_v20  ;;  %v4697_v20 = vsub.f32 %v13581_v63, %v4696_v28  ;;  %v4708_v53 = vand.u32 4294901760, %v13609_v39  ;;  %v3495_v2 = vpop.f32.mrf.mxu0 }
 0x268   :  { %4490 = vmatpush.msra.mxu0 %v18467_v5  ;;  %4539 = vmatpush.msra.mxu1 %v13128_v14  ;;  %v18469_v14 = vand.u32 4294901760, %v13236_v19  ;;  %v18470_v19 = vand.u32 4294901760, %v13259_v31  ;;  %v4686_v5 = vand.u32 4294901760, %v4685_v13  ;;  %v18471_v31 = vand.u32 4294901760, %v13281_v11 }
 0x269   :  { %4586 = vmatpush.msra.mxu2 %v13450_v26  ;;  %4669 = vmatpush.msra.mxu3 %v4668_v34  ;;  %v3246_v34 = vld [vmem:[#allocation2 + $0x38] sm:$0xff]  ;;  %v4703_v13 = vsub.f32 %v13596_v51, %v4702_v15  ;;  %v4709_v11 = vsub.f32 %v13609_v39, %v4708_v53 }
 0x26a   :  { %4351 = vmatmul.f32.gmra.mxu1 %v13401_v49  ;;  %4494 = vmatpush.msra.mxu0 %v18469_v14  ;;  %v13633_v14 = vand.u32 4294901760, %v3314_v61  ;;  %v3306_v1 = vadd.f32 %v3290_v56, %v3246_v34  ;;  %v4698_v56 = vand.u32 4294901760, %v4697_v20 }
 0x26b   :  { %4541 = vmatpush.msra.mxu1 %v13147_v57  ;;  %4588 = vmatpush.msra.mxu2 %v13465_v47  ;;  %v3456_v57 = vstv %s13586_s29 }
 0x26c   :  { %4675 = vmatpush.msra.mxu3 %v4674_v30  ;;  %4498 = vmatpush.msra.mxu0 %v18470_v19  ;;  %v4692_v30 = vand.u32 4294901760, %v4691_v29  ;;  %v4714_v19 = vand.u32 4294901760, %v13623_v44  ;;  %v3496_v29 = vadd.f32 %v3495_v2, %v3456_v57 }
 0x26d   :  { %4543 = vmatpush.msra.mxu1 %v13164_v52  ;;  %4590 = vmatpush.msra.mxu2 %v13489_v27  ;;  %v18472_v52 = vand.u32 4294901760, %v13305_v59  ;;  %v4704_v59 = vand.u32 4294901760, %v4703_v13 }
 0x26e   :  { %4681 = vmatpush.msra.mxu3 %v4680_v60  ;;  %4502 = vmatpush.msra.mxu0 %v18471_v31  ;;  %v13652_v60 = vsub.f32 %v3314_v61, %v13633_v14  ;;  %v4715_v20 = vsub.f32 %v13623_v44, %v4714_v19  ;;  %v3706_v13 = vpop.f32.mrf.mxu3 }
 0x26f   :  { %4545 = vmatpush.msra.mxu1 %v13180_v36  ;;  %4592 = vmatpush.msra.mxu2 %v13503_v12  ;;  %v3322_v36 = vmax.f32 %v3306_v1, 0.0  ;;  %v4710_v1 = vand.u32 4294901760, %v4709_v11  ;;  %v18478_v11 = vand.u32 4294901760, %v13408_v16 }
 0x270   :  { %4687 = vmatpush.msra.mxu3 %v4686_v5  ;;  %4506 = vmatpush.msra.mxu0 %v18472_v52  ;;  %v18473_v5 = vand.u32 4294901760, %v13336_v21  ;;  %v4607_v2 = vand.u32 4294901760, %v13652_v60 }
 0x271   :  { %4547 = vmatpush.msra.mxu1 %v13198_v8  ;;  %4594 = vmatpush.msra.mxu2 %v13519_v7  ;;  %v3604_v34 = vpop.f32.mrf.mxu1  ;;  %v3662_v61 = vpop.f32.mrf.mxu2  ;;  %v18474_v8 = vand.u32 4294901760, %v13367_v10  ;;  %v13668_v52 = vand.u32 4294901760, %v3322_v36 }
 0x272   :  { %4693 = vmatpush.msra.mxu3 %v4692_v30  ;;  %4510 = vmatpush.msra.mxu0 %v18473_v5  ;;  %v3605_v31 = vadd.f32 %v3604_v34, %v3496_v29  ;;  %v18475_v30 = vld [vmem:[#allocation17_spill] sm:$0xff]  ;;  %v4716_v29 = vand.u32 4294901760, %v4715_v20  ;;  %v3503_v10 = vpop.f32.mrf.mxu0  ;;  %v4608_v5 = vsub.f32 %v13652_v60, %v4607_v2 }
 0x273   :  { %4549 = vmatpush.msra.mxu1 %v13205_v9  ;;  %4596 = vmatpush.msra.mxu2 %v13534_v24  ;;  %v18476_v9 = vand.u32 4294901760, %v13391_v22  ;;  %v18477_v34 = vld [vmem:[#allocation25_spill] sm:$0xff]  ;;  %v13682_v22 = vsub.f32 %v3322_v36, %v13668_v52 }
 0x274   :  { %4699 = vmatpush.msra.mxu3 %v4698_v56  ;;  %4514 = vmatpush.msra.mxu0 %v18474_v8  ;;  %v3663_v21 = vadd.f32 %v3662_v61, %v3605_v31  ;;  %v18479_v31 = vld [vmem:[#allocation28_spill] sm:$0xff]  ;;  %v18480_v20 = vld [vmem:[#allocation29_spill] sm:$0xff]  ;;  %v4609_v8 = vand.u32 4294901760, %v4608_v5  ;;  %v18487_v5 = vld [vmem:[#allocation19_spill] sm:$0xff] }
 0x275   :  { %4551 = vmatpush.msra.mxu1 %v18475_v30  ;;  %4598 = vmatpush.msra.mxu2 %v13551_v32  ;;  %v18481_v61 = vld [vmem:[#allocation20_spill] sm:$0xff]  ;;  %v4615_v36 = vand.u32 4294901760, %v13682_v22 }
 0x276   :  { %4705 = vmatpush.msra.mxu3 %v4704_v59  ;;  %4518 = vmatpush.msra.mxu0 %v18476_v9  ;;  %v3707_v56 = vadd.f32 %v3706_v13, %v3663_v21  ;;  %v3504_v59 = vadd.f32 %v3503_v10, %v3456_v57  ;;  %v18482_v21 = vld [vmem:[#allocation18_spill] sm:$0xff]  ;;  %v18483_v13 = vand.u32 4294901760, %v18480_v20 }
 0x277   :  { %4553 = vmatpush.msra.mxu1 %v18477_v34  ;;  %4600 = vmatpush.msra.mxu2 %v13567_v46  ;;  %v18484_v9 = vld [vmem:[#allocation26_spill] sm:$0xff]  ;;  %v18485_v34 = vld [vmem:[#allocation23_spill] sm:$0xff] }
 0x278   :  { %4711 = vmatpush.msra.mxu3 %v4710_v1  ;;  %4522 = vmatpush.msra.mxu0 %v18478_v11  ;;  %v18486_v11 = vand.u32 4294901760, %v18482_v21 }
 0x279   :  { %4555 = vmatpush.msra.mxu1 %v18479_v31  ;;  %4602 = vmatpush.msra.mxu2 %v13583_v41  ;;  %v4616_v31 = vsub.f32 %v13682_v22, %v4615_v36 }
 0x27a   :  { %4717 = vmatpush.msra.mxu3 %v4716_v29  ;;  %4524 = vmatmul.f32.vlgmr.msra.gmra.mxu0 %v13251_v43  ;;  %v3667_v30 = vpop.f32.mrf.mxu2  ;;  %v3712_v29 = vpop.f32.mrf.mxu3 }
 0x27b   :  { %4719 = vmatmul.f32.vlgmr.msra.gmra.mxu3 %v13633_v14  ;;  %4729 = vmatpush.msrb.mxu0 %v18480_v20  ;;  %v3608_v16 = vpop.f32.mrf.mxu1  ;;  %v18489_v20 = vand.u32 4294901760, %v18485_v34 }
 0x27c   :  { %4905 = vmatpush.msrb.mxu3 %v13297_v50  ;;  %4557 = vmatpush.msra.mxu1 %v18481_v61  ;;  %v3609_v1 = vadd.f32 %v3608_v16, %v3504_v59  ;;  %v18488_v59 = vld [vmem:[#allocation21_spill] sm:$0xff]  ;;  %v18490_v16 = vld [vmem:[#allocation22_spill] sm:$0xff]  ;;  %v4617_v61 = vand.u32 4294901760, %v4616_v31 }
 0x27d   :  { %4604 = vmatpush.msra.mxu2 %v13598_v42  ;;  %4732 = vmatpush.msrb.mxu0 %v18482_v21 }
 0x27e   :  { %4610 = vmatmul.f32.vlgmr.msra.gmra.mxu2 %v4609_v8  ;;  %4907 = vmatpush.msrb.mxu3 %v13320_v62  ;;  %v3668_v57 = vadd.f32 %v3667_v30, %v3609_v1  ;;  %v18491_v8 = vand.u32 4294901760, %v18488_v59  ;;  %v18492_v1 = vand.u32 4294901760, %v13448_v35  ;;  %v3400_v30 = vld [vmem:[%s17774_s7 + $0x248] sm:$0xff] }
 0x27f   :  { %4834 = vmatpush.msrb.mxu2 %v18483_v13  ;;  %4559 = vmatpush.msra.mxu1 %v18484_v9 }
 0x280   :  { %4735 = vmatpush.msrb.mxu0 %v18485_v34  ;;  %4909 = vmatpush.msrb.mxu3 %v13345_v48  ;;  %v3713_v10 = vadd.f32 %v3712_v29, %v3668_v57 }
 0x281   :  { %4838 = vmatpush.msrb.mxu2 %v18486_v11  ;;  %4561 = vmatpush.msra.mxu1 %v18487_v5  ;;  %v13848_v11 = vand.u32 4294901760, %v3400_v30  ;;  %v3239_v5 = vld [vmem:[#allocation2 + $0x50] sm:$0xff] }
 0x282   :  { %4738 = vmatpush.msrb.mxu0 %v18488_v59  ;;  %4911 = vmatpush.msrb.mxu3 %v13359_v25 }
 0x283   :  { %4842 = vmatpush.msrb.mxu2 %v18489_v20  ;;  %4563 = vmatpush.msra.mxu1 %v18490_v16 }
 0x284   :  { %4528 = vmatmul.f32.gmra.mxu0 %v13401_v49  ;;  %4565 = vmatmul.f32.vlgmr.msra.gmra.mxu1 %v13251_v43  ;;  %v18493_v43 = vand.u32 4294901760, %v13463_v18 }
 0x285   :  { %4723 = vmatmul.f32.gmra.mxu3 %v13668_v52  ;;  %4741 = vmatpush.msrb.mxu0 %v13448_v35  ;;  %v18494_v35 = vand.u32 4294901760, %v13484_v4 }
 0x286   :  { %4787 = vmatpush.msrb.mxu1 %v13297_v50  ;;  %4846 = vmatpush.msrb.mxu2 %v18491_v8 }
 0x287   :  { %4913 = vmatpush.msrb.mxu3 %v13411_v17  ;;  %4618 = vmatmul.f32.gmra.mxu2 %v4617_v61 }
 0x288   :  { %4744 = vmatpush.msrb.mxu0 %v13463_v18  ;;  %4789 = vmatpush.msrb.mxu1 %v13320_v62  ;;  %v18495_v18 = vand.u32 4294901760, %v13496_v3 }
 0x289   :  { %4850 = vmatpush.msrb.mxu2 %v18492_v1  ;;  %4915 = vmatpush.msrb.mxu3 %v13428_v55 }
 0x28a   :  { %4747 = vmatpush.msrb.mxu0 %v13484_v4  ;;  %4791 = vmatpush.msrb.mxu1 %v13345_v48  ;;  %v3404_v4 = vld [vmem:[%s17774_s7 + $0x268] sm:$0xff] }
 0x28b   :  { %4854 = vmatpush.msrb.mxu2 %v18493_v43  ;;  %4917 = vmatpush.msrb.mxu3 %v13450_v26  ;;  %v3781_v50 = vpop.f32.mrf.mxu0  ;;  %v3397_v43 = vld [vmem:[%s17774_s7 + $0x230] sm:$0xff] }
 0x28c   :  { %4750 = vmatpush.msrb.mxu0 %v13496_v3  ;;  %4793 = vmatpush.msrb.mxu1 %v13359_v25  ;;  %v3782_v62 = vadd.f32 %v3781_v50, %v3707_v56  ;;  %v3401_v56 = vld [vmem:[%s17774_s7 + $0x250] sm:$0xff] }
 0x28d   :  { %4858 = vmatpush.msrb.mxu2 %v18494_v35  ;;  %4919 = vmatpush.msrb.mxu3 %v13465_v47  ;;  %v13829_v13 = vand.u32 4294901760, %v3401_v56 }
 0x28e   :  { %4569 = vmatmul.f32.gmra.mxu1 %v13401_v49  ;;  %4753 = vmatpush.msrb.mxu0 %v13517_v38  ;;  %v3406_v49 = vld [vmem:[%s17774_s7 + $0x278] sm:$0xff] }
 0x28f   :  { %4795 = vmatpush.msrb.mxu1 %v13411_v17  ;;  %4862 = vmatpush.msrb.mxu2 %v18495_v18  ;;  %v13760_v17 = vand.u32 4294901760, %v3406_v49  ;;  %v13864_v16 = vsub.f32 %v3401_v56, %v13829_v13  ;;  %v3394_v56 = vld [vmem:[%s17774_s7 + $0x218] sm:$0xff] }
 0x290   :  { %4921 = vmatpush.msrb.mxu3 %v13489_v27  ;;  %4756 = vmatpush.msrb.mxu0 %v13532_v33 }
 0x291   :  { %4797 = vmatpush.msrb.mxu1 %v13428_v55  ;;  %4866 = vmatpush.msrb.mxu2 %v4672_v45  ;;  %v3405_v55 = vld [vmem:[%s17774_s7 + $0x270] sm:$0xff] }
 0x292   :  { %4923 = vmatpush.msrb.mxu3 %v13503_v12  ;;  %4759 = vmatpush.msrb.mxu0 %v13549_v58  ;;  %v13770_v38 = vand.u32 4294901760, %v3405_v55  ;;  %v3976_v45 = vpop.f32.mrf.mxu3  ;;  %v13781_v58 = vsub.f32 %v3406_v49, %v13760_v17 }
 0x293   :  { %4799 = vmatpush.msrb.mxu1 %v13450_v26  ;;  %4870 = vmatpush.msrb.mxu2 %v4678_v54  ;;  %v13783_v54 = vand.u32 4294901760, %v3404_v4 }
 0x294   :  { %4925 = vmatpush.msrb.mxu3 %v13519_v7  ;;  %4762 = vmatpush.msrb.mxu0 %v13565_v0 }
 0x295   :  { %4801 = vmatpush.msrb.mxu1 %v13465_v47  ;;  %4874 = vmatpush.msrb.mxu2 %v4684_v37  ;;  %v3785_v48 = vpop.f32.mrf.mxu0  ;;  %v3822_v25 = vpop.f32.mrf.mxu1  ;;  %v18496_v47 = vand.u32 4294901760, %v13565_v0 }
 0x296   :  { %4927 = vmatpush.msrb.mxu3 %v13534_v24  ;;  %4765 = vmatpush.msrb.mxu0 %v13581_v63  ;;  %v3786_v26 = vadd.f32 %v3785_v48, %v3713_v10  ;;  %v3823_v3 = vadd.f32 %v3822_v25, %v3782_v62  ;;  %v3867_v37 = vpop.f32.mrf.mxu2  ;;  %v13900_v48 = vand.u32 4294901760, %v3397_v43  ;;  %v3395_v25 = vld [vmem:[%s17774_s7 + $0x220] sm:$0xff] }
 0x297   :  { %4803 = vmatpush.msrb.mxu1 %v13489_v27  ;;  %4878 = vmatpush.msrb.mxu2 %v18496_v47  ;;  %v3403_v27 = vld [vmem:[%s17774_s7 + $0x260] sm:$0xff] }
 0x298   :  { %4929 = vmatpush.msrb.mxu3 %v13551_v32  ;;  %4768 = vmatpush.msrb.mxu0 %v13596_v51  ;;  %v3868_v33 = vadd.f32 %v3867_v37, %v3823_v3  ;;  %v13795_v63 = vand.u32 4294901760, %v3403_v27  ;;  %v13807_v51 = vsub.f32 %v3404_v4, %v13783_v54 }
 0x299   :  { %4805 = vmatpush.msrb.mxu1 %v13503_v12  ;;  %4882 = vmatpush.msrb.mxu2 %v4696_v28  ;;  %v13793_v12 = vsub.f32 %v3405_v55, %v13770_v38  ;;  %v3402_v28 = vld [vmem:[%s17774_s7 + $0x258] sm:$0xff] }
 0x29a   :  { %4931 = vmatpush.msrb.mxu3 %v13567_v46  ;;  %4771 = vmatpush.msrb.mxu0 %v13609_v39  ;;  %v13785_v0 = vadd.f32 %v3976_v45, %v3868_v33 }
 0x29b   :  { %4807 = vmatpush.msrb.mxu1 %v13519_v7  ;;  %4886 = vmatpush.msrb.mxu2 %v4702_v15  ;;  %v3267_v7 = vperm.slane %v13120_v40, 4  ;;  %v17983_v15 = vand.u32 4294901760, %v13781_v58  ;;  %v17982_v21 = vand.u32 4294901760, %v13793_v12 }
 0x29c   :  { %4933 = vmatpush.msrb.mxu3 %v13583_v41  ;;  %4774 = vmatpush.msrb.mxu0 %v13623_v44  ;;  %v3980_v20 = vpop.f32.mrf.mxu3 }
 0x29d   :  { %4809 = vmatpush.msrb.mxu1 %v13534_v24  ;;  %4890 = vmatpush.msrb.mxu2 %v4708_v53  ;;  %v13815_v24 = vand.u32 4294901760, %v3402_v28  ;;  %v13820_v53 = vsub.f32 %v3403_v27, %v13795_v63  ;;  %v3283_v29 = vmul.f32 %v3267_v7, %v12454_v23  ;;  %v4997_v44 = vsub.f32 %v13781_v58, %v17983_v15  ;;  %v3247_v27 = vld [vmem:[#allocation2 + $0x60] sm:$0xff] }
 0x29e   :  { %4935 = vmatpush.msrb.mxu3 %v13598_v42  ;;  %4777 = vmatmul.f32.vlgmr.msrb.gmra.mxu0 %v13652_v60  ;;  %v3875_v9 = vpop.f32.mrf.mxu2  ;;  %v17977_v60 = vand.u32 4294901760, %v13864_v16  ;;  %v3291_v3 = vmul.f32 %v3267_v7, %v12568_v6  ;;  %v13932_v7 = vand.u32 4294901760, %v3395_v25 }
 0x29f   :  { %4937 = vmatmul.f32.vlgmr.msrb.gmra.mxu3 %v13633_v14  ;;  %4946 = vmatpush.msra.mxu0 %v13760_v17  ;;  %v3826_v39 = vpop.f32.mrf.mxu1  ;;  %v13846_v10 = vsub.f32 %v3402_v28, %v13815_v24  ;;  %v17980_v59 = vand.u32 4294901760, %v13820_v53  ;;  %v4998_v8 = vand.u32 4294901760, %v4997_v44  ;;  %v13876_v50 = vadd.f32 %v3283_v29, %v3239_v5  ;;  %v3393_v5 = vld [vmem:[%s17774_s7 + $0x210] sm:$0xff] }
 0x2a0   :  { %5159 = vmatpush.msra.mxu3 %v13760_v17  ;;  %4811 = vmatpush.msrb.mxu1 %v13551_v32  ;;  %v3827_v57 = vadd.f32 %v3826_v39, %v3786_v26  ;;  %v3399_v32 = vld [vmem:[%s17774_s7 + $0x240] sm:$0xff]  ;;  %v13930_v28 = vsub.f32 %v3397_v43, %v13900_v48  ;;  %18498 = vst [vmem:[#allocation27_spill] sm:$0xff] %v13932_v7  ;;  %v3422_v39 = vld [vmem:[%s17774_s7 + $0x2f8] sm:$0xff] }
 0x2a1   :  { %4894 = vmatpush.msrb.mxu2 %v4714_v19  ;;  %4948 = vmatpush.msra.mxu0 %v13770_v38  ;;  %v17981_v19 = vand.u32 4294901760, %v13807_v51  ;;  %v13855_v31 = vand.u32 4294901760, %v3399_v32  ;;  %v17979_v35 = vand.u32 4294901760, %v13846_v10  ;;  %v5015_v49 = vsub.f32 %v13820_v53, %v17980_v59 }
 0x2a2   :  { %4896 = vmatmul.f32.vlgmr.msrb.gmra.mxu2 %v13633_v14  ;;  %5161 = vmatpush.msra.mxu3 %v13770_v38  ;;  %v3876_v34 = vadd.f32 %v3875_v9, %v3827_v57  ;;  %v5003_v14 = vsub.f32 %v13793_v12, %v17982_v21  ;;  %v3315_v26 = vmax.f32 %v13876_v50, 0.0  ;;  %v3421_v57 = vld [vmem:[%s17774_s7 + $0x2f0] sm:$0xff]  ;;  %v13974_v50 = vsub.f32 %v3395_v25, %v13932_v7 }
 0x2a3   :  { %5101 = vmatpush.msra.mxu2 %v13781_v58  ;;  %4813 = vmatpush.msrb.mxu1 %v13567_v46  ;;  %v3398_v46 = vld [vmem:[%s17774_s7 + $0x238] sm:$0xff]  ;;  %v5009_v1 = vsub.f32 %v13807_v51, %v17981_v19  ;;  %v13893_v55 = vsub.f32 %v3399_v32, %v13855_v31  ;;  %v5021_v47 = vsub.f32 %v13846_v10, %v17979_v35  ;;  %v5016_v40 = vand.u32 4294901760, %v5015_v49 }
 0x2a4   :  { %4950 = vmatpush.msra.mxu0 %v13783_v54  ;;  %5163 = vmatpush.msra.mxu3 %v13783_v54  ;;  %v13866_v61 = vadd.f32 %v3980_v20, %v3876_v34  ;;  %v13883_v62 = vand.u32 4294901760, %v3398_v46  ;;  %v5004_v18 = vand.u32 4294901760, %v5003_v14  ;;  %v13946_v32 = vadd.f32 %v3291_v3, %v3247_v27 }
 0x2a5   :  { %5104 = vmatpush.msra.mxu2 %v13793_v12  ;;  %4815 = vmatpush.msrb.mxu1 %v13583_v41  ;;  %v13881_v41 = vsub.f32 %v3400_v30, %v13848_v11  ;;  %v17975_v45 = vand.u32 4294901760, %v13893_v55  ;;  %v13941_v30 = vand.u32 4294901760, %v3315_v26  ;;  %v5022_v9 = vand.u32 4294901760, %v5021_v47  ;;  %v3419_v47 = vld [vmem:[%s17774_s7 + $0x2e0] sm:$0xff] }
 0x2a6   :  { %4952 = vmatpush.msra.mxu0 %v13795_v63  ;;  %5165 = vmatpush.msra.mxu3 %v13795_v63  ;;  %v13917_v4 = vsub.f32 %v3398_v46, %v13883_v62  ;;  %v13964_v46 = vand.u32 4294901760, %v3394_v56  ;;  %v13977_v49 = vand.u32 4294901760, %v3421_v57  ;;  %v17984_v27 = vmax.f32 %v13946_v32, 0.0 }
 0x2a7   :  { %5107 = vmatpush.msra.mxu2 %v13807_v51  ;;  %4817 = vmatpush.msrb.mxu1 %v13598_v42  ;;  %v3396_v42 = vld [vmem:[%s17774_s7 + $0x228] sm:$0xff]  ;;  %v17976_v33 = vand.u32 4294901760, %v13881_v41  ;;  %v5039_v20 = vsub.f32 %v13893_v55, %v17975_v45  ;;  %v13991_v25 = vsub.f32 %v3315_v26, %v13941_v30 }
 0x2a8   :  { %4782 = vmatmul.f32.gmra.mxu0 %v13682_v22  ;;  %4821 = vmatmul.f32.vlgmr.msrb.gmra.mxu1 %v4607_v2  ;;  %v5010_v2 = vand.u32 4294901760, %v5009_v1  ;;  %v13919_v37 = vand.u32 4294901760, %v3396_v42  ;;  %v17973_v34 = vand.u32 4294901760, %v13917_v4  ;;  %18499 = vst [vmem:[#allocation16_spill] sm:$0xff] %v13964_v46 }
 0x2a9   :  { %4941 = vmatmul.f32.gmra.mxu3 %v13668_v52  ;;  %4954 = vmatpush.msra.mxu0 %v13815_v24  ;;  %v5033_v29 = vsub.f32 %v13881_v41, %v17976_v33  ;;  %v5040_v26 = vand.u32 4294901760, %v5039_v20 }
 0x2aa   :  { %4999 = vmatpush.msra.mxu1 %v4998_v8  ;;  %5110 = vmatpush.msra.mxu2 %v13820_v53  ;;  %18497 = vst [vmem:[#allocation24_spill] sm:$0xff] %v13919_v37  ;;  %v13954_v44 = vsub.f32 %v3396_v42, %v13919_v37  ;;  %v13966_v8 = vand.u32 4294901760, %v3422_v39  ;;  %v3420_v42 = vld [vmem:[%s17774_s7 + $0x2e8] sm:$0xff]  ;;  %v5045_v22 = vsub.f32 %v13917_v4, %v17973_v34 }
 0x2ab   :  { %5167 = vmatpush.msra.mxu3 %v13815_v24  ;;  %4900 = vmatmul.f32.gmra.mxu2 %v13668_v52  ;;  %v5027_v52 = vsub.f32 %v13864_v16, %v17977_v60  ;;  %v5034_v3 = vand.u32 4294901760, %v5033_v29  ;;  %v14013_v29 = vand.u32 4294901760, %v3420_v42  ;;  %v14023_v34 = vsub.f32 %v3421_v57, %v13977_v49 }
 0x2ac   :  { %4956 = vmatpush.msra.mxu0 %v13829_v13  ;;  %5005 = vmatpush.msra.mxu1 %v5004_v18  ;;  %v17974_v18 = vand.u32 4294901760, %v13930_v28  ;;  %v17986_v57 = vand.u32 4294901760, %v13991_v25 }
 0x2ad   :  { %5113 = vmatpush.msra.mxu2 %v13846_v10  ;;  %5169 = vmatpush.msra.mxu3 %v13829_v13  ;;  %v5028_v43 = vand.u32 4294901760, %v5027_v52  ;;  %v3391_v52 = vld [vmem:[%s17774_s7 + $0x200] sm:$0xff]  ;;  %18503 = vst [vmem:[#allocation17_spill] sm:$0xff] %v14023_v34 }
 0x2ae   :  { %4958 = vmatpush.msra.mxu0 %v13848_v11  ;;  %5011 = vmatpush.msra.mxu1 %v5010_v2  ;;  %v3392_v2 = vld [vmem:[%s17774_s7 + $0x208] sm:$0xff]  ;;  %v14036_v33 = vand.u32 4294901760, %v3391_v52 }
 0x2af   :  { %5116 = vmatpush.msra.mxu2 %v13864_v16  ;;  %5171 = vmatpush.msra.mxu3 %v13848_v11  ;;  %v4034_v14 = vpop.f32.mrf.mxu0  ;;  %v14019_v20 = vand.u32 4294901760, %v3392_v2 }
 0x2b0   :  { %4960 = vmatpush.msra.mxu0 %v13855_v31  ;;  %5017 = vmatpush.msra.mxu1 %v5016_v40  ;;  %v13969_v1 = vadd.f32 %v4034_v14, %v13785_v0  ;;  %v13985_v0 = vand.u32 4294901760, %v3393_v5  ;;  %v14005_v40 = vsub.f32 %v3394_v56, %v13964_v46  ;;  %v5051_v14 = vsub.f32 %v13930_v28, %v17974_v18 }
 0x2b1   :  { %5119 = vmatpush.msra.mxu2 %v13881_v41  ;;  %5173 = vmatpush.msra.mxu3 %v13855_v31  ;;  %18502 = vst [vmem:[#allocation15_spill] sm:$0xff] %v14019_v20  ;;  %v17985_v56 = vand.u32 4294901760, %v13974_v50  ;;  %v5046_v18 = vand.u32 4294901760, %v5045_v22  ;;  %v14048_v22 = vand.u32 4294901760, %v17984_v27  ;;  %v14058_v19 = vsub.f32 %v3392_v2, %v14019_v20  ;;  %v3417_v2 = vld [vmem:[%s17774_s7 + $0x2d0] sm:$0xff] }
 0x2b2   :  { %4827 = vmatmul.f32.gmra.mxu1 %v4615_v36  ;;  %4962 = vmatpush.msra.mxu0 %v13883_v62  ;;  %18500 = vst [vmem:[#allocation14_spill] sm:$0xff] %v13985_v0  ;;  %v17978_v36 = vand.u32 4294901760, %v13954_v44  ;;  %v5052_v35 = vand.u32 4294901760, %v5051_v14 }
 0x2b3   :  { %5023 = vmatpush.msra.mxu1 %v5022_v9  ;;  %5122 = vmatpush.msra.mxu2 %v13893_v55  ;;  %v14011_v9 = vsub.f32 %v3422_v39, %v13966_v8  ;;  %v14028_v39 = vsub.f32 %v3393_v5, %v13985_v0  ;;  %18504 = vst [vmem:[#allocation25_spill] sm:$0xff] %v14036_v33 }
 0x2b4   :  { %5175 = vmatpush.msra.mxu3 %v13883_v62  ;;  %4964 = vmatpush.msra.mxu0 %v13900_v48  ;;  %v5057_v45 = vsub.f32 %v13954_v44, %v17978_v36  ;;  %v3418_v36 = vld [vmem:[%s17774_s7 + $0x2d8] sm:$0xff]  ;;  %v5063_v59 = vsub.f32 %v13974_v50, %v17985_v56  ;;  %18506 = vst [vmem:[#allocation29_spill] sm:$0xff] %v14058_v19 }
 0x2b5   :  { %18501 = vst [vmem:[#allocation30_spill] sm:$0xff] %v14011_v9  ;;  %5029 = vmatpush.msra.mxu1 %v5028_v43  ;;  %5125 = vmatpush.msra.mxu2 %v13917_v4  ;;  %v14030_v43 = vand.u32 4294901760, %v3419_v47  ;;  %v17989_v5 = vand.u32 4294901760, %v14011_v9  ;;  %v14081_v60 = vand.u32 4294901760, %v3418_v36 }
 0x2b6   :  { %5177 = vmatpush.msra.mxu3 %v13900_v48  ;;  %4966 = vmatpush.msra.mxu0 %v13919_v37 }
 0x2b7   :  { %5035 = vmatpush.msra.mxu1 %v5034_v3  ;;  %5128 = vmatpush.msra.mxu2 %v13930_v28  ;;  %v14044_v3 = vsub.f32 %v3420_v42, %v14013_v29  ;;  %v14065_v27 = vsub.f32 %v3419_v47, %v14030_v43  ;;  %v5058_v42 = vand.u32 4294901760, %v5057_v45  ;;  %v14079_v47 = vsub.f32 %v3391_v52, %v14036_v33  ;;  %v3416_v52 = vld [vmem:[%s17774_s7 + $0x2c8] sm:$0xff] }
 0x2b8   :  { %5179 = vmatpush.msra.mxu3 %v13919_v37  ;;  %4968 = vmatpush.msra.mxu0 %v13932_v7  ;;  %v18516_v37 = vand.u32 4294901760, %v13991_v25 }
 0x2b9   :  { %18505 = vst [vmem:[#allocation28_spill] sm:$0xff] %v14044_v3  ;;  %5041 = vmatpush.msra.mxu1 %v5040_v26  ;;  %5131 = vmatpush.msra.mxu2 %v13954_v44  ;;  %v4039_v21 = vpop.f32.mrf.mxu0  ;;  %v4078_v15 = vpop.f32.mrf.mxu1  ;;  %v4980_v26 = vsub.f32 %v13991_v25, %v17986_v57  ;;  %v5064_v57 = vand.u32 4294901760, %v5063_v59  ;;  %v18512_v59 = vand.u32 4294901760, %v14028_v39 }
 0x2ba   :  { %5181 = vmatpush.msra.mxu3 %v13932_v7  ;;  %4970 = vmatpush.msra.mxu0 %v13964_v46  ;;  %18507 = vst [vmem:[#allocation20_spill] sm:$0xff] %v14065_v27  ;;  %v14068_v14 = vadd.f32 %v4039_v21, %v13866_v61  ;;  %v4079_v56 = vadd.f32 %v4078_v15, %v13969_v1  ;;  %v4153_v21 = vpop.f32.mrf.mxu2  ;;  %v18509_v61 = vand.u32 4294901760, %v14005_v40  ;;  %v4194_v7 = vpop.f32.mrf.mxu3 }
 0x2bb   :  { %5047 = vmatpush.msra.mxu1 %v5046_v18  ;;  %5134 = vmatpush.msra.mxu2 %v13974_v50  ;;  %18508 = vst [vmem:[#allocation18_spill] sm:$0xff] %v14079_v47  ;;  %v5369_v15 = vsub.f32 %v14011_v9, %v17989_v5  ;;  %v18510_v5 = vmax.f32 %v13946_v32, 0.0  ;;  %v3415_v32 = vld [vmem:[%s17774_s7 + $0x2c0] sm:$0xff] }
 0x2bc   :  { %5183 = vmatpush.msra.mxu3 %v13964_v46  ;;  %4972 = vmatpush.msra.mxu0 %v13985_v0  ;;  %v5069_v45 = vsub.f32 %v14005_v40, %v18509_v61  ;;  %v4154_v18 = vadd.f32 %v4153_v21, %v4079_v56  ;;  %v14102_v61 = vand.u32 4294901760, %v3417_v2  ;;  %v18511_v56 = vand.u32 4294901760, %v14023_v34 }
 0x2bd   :  { %5053 = vmatpush.msra.mxu1 %v5052_v35  ;;  %5137 = vmatpush.msra.mxu2 %v14005_v40  ;;  %v14100_v9 = vsub.f32 %v18510_v5, %v14048_v22  ;;  %v5075_v21 = vsub.f32 %v14028_v39, %v18512_v59  ;;  %v4981_v59 = vand.u32 4294901760, %v4980_v26  ;;  %v5370_v46 = vand.u32 4294901760, %v5369_v15 }
 0x2be   :  { %5185 = vmatpush.msra.mxu3 %v13985_v0  ;;  %4974 = vmatpush.msra.mxu0 %v14019_v20  ;;  %v5375_v35 = vsub.f32 %v14023_v34, %v18511_v56  ;;  %v14116_v5 = vadd.f32 %v4194_v7, %v4154_v18  ;;  %v14121_v0 = vsub.f32 %v3418_v36, %v14081_v60  ;;  %v14123_v56 = vand.u32 4294901760, %v3416_v52  ;;  %v3414_v18 = vld [vmem:[%s17774_s7 + $0x2b8] sm:$0xff] }
 0x2bf   :  { %5059 = vmatpush.msra.mxu1 %v5058_v42  ;;  %5140 = vmatpush.msra.mxu2 %v14028_v39  ;;  %v5070_v34 = vand.u32 4294901760, %v5069_v45  ;;  %v18513_v7 = vand.u32 4294901760, %v14044_v3  ;;  %v18514_v36 = vand.u32 4294901760, %v14058_v19  ;;  %v14140_v26 = vand.u32 4294901760, %v3415_v32 }
 0x2c0   :  { %5187 = vmatpush.msra.mxu3 %v14019_v20  ;;  %4976 = vmatpush.msra.mxu0 %v14036_v33  ;;  %v14138_v20 = vsub.f32 %v3417_v2, %v14102_v61  ;;  %v5376_v15 = vand.u32 4294901760, %v5375_v35  ;;  %v5076_v45 = vand.u32 4294901760, %v5075_v21  ;;  %v18518_v2 = vand.u32 4294901760, %v14079_v47 }
 0x2c1   :  { %v5381_v42 = vsub.f32 %v14044_v3, %v18513_v7  ;;  %5065 = vmatpush.msra.mxu1 %v5064_v57  ;;  %5143 = vmatpush.msra.mxu2 %v14058_v19  ;;  %v5081_v1 = vsub.f32 %v14058_v19, %v18514_v36  ;;  %v18515_v7 = vand.u32 4294901760, %v14065_v27  ;;  %v4987_v3 = vand.u32 4294901760, %v14100_v9 }
 0x2c2   :  { %5189 = vmatpush.msra.mxu3 %v14036_v33  ;;  %4982 = vmatmul.f32.vlgmr.msra.gmra.mxu0 %v4981_v59  ;;  %v18517_v36 = vand.u32 4294901760, %v13781_v58  ;;  %v5087_v19 = vsub.f32 %v14079_v47, %v18518_v2  ;;  %v14156_v35 = vsub.f32 %v3416_v52, %v14123_v56  ;;  %v14158_v21 = vand.u32 4294901760, %v3414_v18  ;;  %v3413_v33 = vld [vmem:[%s17774_s7 + $0x2b0] sm:$0xff] }
 0x2c3   :  { %v5387_v57 = vsub.f32 %v14065_v27, %v18515_v7  ;;  %5193 = vmatmul.f32.vlgmr.msra.gmra.mxu3 %v18516_v37  ;;  %v4084_v7 = vpop.f32.mrf.mxu1  ;;  %5071 = vmatpush.msra.mxu1 %v5070_v34  ;;  %v5382_v58 = vand.u32 4294901760, %v5381_v42  ;;  %v5082_v2 = vand.u32 4294901760, %v5081_v1  ;;  %v14169_v59 = vsub.f32 %v3415_v32, %v14140_v26  ;;  %v4157_v27 = vpop.f32.mrf.mxu2  ;;  %v14174_v34 = vld [vmem:[#allocation8] sm:$0xff] }
 0x2c4   :  { %5206 = vmatpush.msrb.mxu0 %v18517_v36  ;;  %5371 = vmatpush.msrb.mxu3 %v5370_v46  ;;  %v4085_v37 = vadd.f32 %v4084_v7, %v14068_v14  ;;  %v18519_v36 = vand.u32 4294901760, %v13793_v12  ;;  %v3412_v46 = vld [vmem:[%s17774_s7 + $0x2a8] sm:$0xff]  ;;  %v4988_v1 = vsub.f32 %v14100_v9, %v4987_v3  ;;  %v14179_v7 = vand.u32 4294901760, %v3413_v33  ;;  %v4198_v14 = vpop.f32.mrf.mxu3 }
 0x2c5   :  { %5146 = vmatpush.msra.mxu2 %v14079_v47  ;;  %v5388_v12 = vand.u32 4294901760, %v5387_v57  ;;  %5077 = vmatpush.msra.mxu1 %v5076_v45  ;;  %v5088_v32 = vand.u32 4294901760, %v5087_v19  ;;  %v18004_v47 = vand.u32 4294901760, %v14156_v35  ;;  %v14194_v45 = vand.u32 4294901760, %v3412_v46 }
 0x2c6   :  { %5210 = vmatpush.msrb.mxu0 %v18519_v36  ;;  %5149 = vmatmul.f32.vlgmr.msra.gmra.mxu2 %v13991_v25  ;;  %v4158_v42 = vadd.f32 %v4157_v27, %v4085_v37  ;;  %v18520_v36 = vand.u32 4294901760, %v14121_v0  ;;  %v14187_v25 = vsub.f32 %v3414_v18, %v14158_v21  ;;  %v3411_v27 = vld [vmem:[%s17774_s7 + $0x2a0] sm:$0xff]  ;;  %v18522_v57 = vand.u32 4294901760, %v14138_v20 }
 0x2c7   :  { %5377 = vmatpush.msrb.mxu3 %v5376_v15  ;;  %5318 = vmatpush.msrb.mxu2 %v13966_v8  ;;  %v18521_v15 = vand.u32 4294901760, %v13807_v51  ;;  %v18005_v37 = vand.u32 4294901760, %v14169_v59  ;;  %v18523_v51 = vand.u32 4294901760, %v13820_v53  ;;  %v3409_v53 = vld [vmem:[%s17774_s7 + $0x290] sm:$0xff] }
 0x2c8   :  { %v5393_v52 = vsub.f32 %v14121_v0, %v18520_v36  ;;  %v14196_v19 = vadd.f32 %v4198_v14, %v4158_v42  ;;  %5083 = vmatpush.msra.mxu1 %v5082_v2  ;;  %v5399_v18 = vsub.f32 %v14138_v20, %v18522_v57  ;;  %v3410_v36 = vld [vmem:[%s17774_s7 + $0x298] sm:$0xff]  ;;  %v14209_v14 = vsub.f32 %v3413_v33, %v14179_v7 }
 0x2c9   :  { %5214 = vmatpush.msrb.mxu0 %v18521_v15  ;;  %5383 = vmatpush.msrb.mxu3 %v5382_v58  ;;  %v4989_v58 = vand.u32 4294901760, %v4988_v1  ;;  %v14211_v42 = vand.u32 4294901760, %v3411_v27  ;;  %v5405_v15 = vsub.f32 %v14156_v35, %v18004_v47  ;;  %v18524_v33 = vperm.slane %v14174_v34, 5 }
 0x2ca   :  { %5320 = vmatpush.msrb.mxu2 %v13977_v49  ;;  %5089 = vmatpush.msra.mxu1 %v5088_v32  ;;  %v5394_v2 = vand.u32 4294901760, %v5393_v52  ;;  %v14226_v1 = vsub.f32 %v3412_v46, %v14194_v45  ;;  %v14228_v52 = vand.u32 4294901760, %v3410_v36  ;;  %v3240_v32 = vld [vmem:[#allocation2 + $0x68] sm:$0xff]  ;;  %v5400_v47 = vand.u32 4294901760, %v5399_v18 }
 0x2cb   :  { %5218 = vmatpush.msrb.mxu0 %v18523_v51  ;;  %5389 = vmatpush.msrb.mxu3 %v5388_v12  ;;  %v3284_v12 = vmul.f32 %v18524_v33, %v12454_v23  ;;  %v18525_v51 = vand.u32 4294901760, %v13846_v10  ;;  %v5411_v57 = vsub.f32 %v14169_v59, %v18005_v37  ;;  %v14244_v10 = vand.u32 4294901760, %v3409_v53 }
 0x2cc   :  { %5322 = vmatpush.msrb.mxu2 %v14013_v29  ;;  %4990 = vmatmul.f32.gmra.mxu0 %v4989_v58  ;;  %v3408_v58 = vld [vmem:[%s17774_s7 + $0x288] sm:$0xff]  ;;  %v5406_v18 = vand.u32 4294901760, %v5405_v15  ;;  %v18526_v33 = vand.u32 4294901760, %v14187_v25  ;;  %v18527_v46 = vand.u32 4294901760, %v13864_v16  ;;  %v18529_v16 = vand.u32 4294901760, %v14209_v14 }
 0x2cd   :  { %5091 = vmatmul.f32.vlgmr.msra.gmra.mxu1 %v13941_v30  ;;  %5199 = vmatmul.f32.gmra.mxu3 %v4987_v3  ;;  %v14242_v3 = vsub.f32 %v3411_v27, %v14211_v42  ;;  %v3300_v37 = vadd.f32 %v3284_v12, %v3240_v32  ;;  %v5428_v27 = vand.u32 4294901760, %v14226_v1  ;;  %v5412_v15 = vand.u32 4294901760, %v5411_v57 }
 0x2ce   :  { %5222 = vmatpush.msrb.mxu0 %v18525_v51  ;;  %5277 = vmatpush.msrb.mxu1 %v13760_v17  ;;  %v5417_v51 = vsub.f32 %v14187_v25, %v18526_v33  ;;  %v3407_v17 = vld [vmem:[%s17774_s7 + $0x280] sm:$0xff]  ;;  %v18528_v33 = vand.u32 4294901760, %v13881_v41 }
 0x2cf   :  { %5324 = vmatpush.msrb.mxu2 %v14030_v43  ;;  %5395 = vmatpush.msrb.mxu3 %v5394_v2  ;;  %v14258_v2 = vsub.f32 %v3410_v36, %v14228_v52  ;;  %v5434_v12 = vand.u32 4294901760, %v14242_v3  ;;  %v14271_v36 = vsub.f32 %v3409_v53, %v14244_v10  ;;  %v14273_v32 = vand.u32 4294901760, %v3407_v17 }
 0x2d0   :  { %5154 = vmatmul.f32.gmra.mxu2 %v14100_v9  ;;  %5226 = vmatpush.msrb.mxu0 %v18527_v46  ;;  %v14260_v9 = vand.u32 4294901760, %v3408_v58  ;;  %v3316_v57 = vmax.f32 %v3300_v37, 0.0  ;;  %v18530_v46 = vand.u32 4294901760, %v13893_v55  ;;  %v18531_v55 = vand.u32 4294901760, %v13917_v4 }
 0x2d1   :  { %5279 = vmatpush.msrb.mxu1 %v13770_v38  ;;  %5326 = vmatpush.msrb.mxu2 %v14081_v60  ;;  %v5423_v38 = vsub.f32 %v14209_v14, %v18529_v16  ;;  %v5440_v53 = vand.u32 4294901760, %v14258_v2  ;;  %v5435_v37 = vsub.f32 %v14242_v3, %v5434_v12 }
 0x2d2   :  { %5401 = vmatpush.msrb.mxu3 %v5400_v47  ;;  %5230 = vmatpush.msrb.mxu0 %v18528_v33  ;;  %v5418_v47 = vand.u32 4294901760, %v5417_v51  ;;  %v14284_v33 = vsub.f32 %v3408_v58, %v14260_v9  ;;  %v14296_v58 = vsub.f32 %v3407_v17, %v14273_v32  ;;  %v3248_v51 = vld [vmem:[#allocation2 + $0x70] sm:$0xff] }
 0x2d3   :  { %5281 = vmatpush.msrb.mxu1 %v13783_v54  ;;  %5328 = vmatpush.msrb.mxu2 %v14102_v61  ;;  %v4239_v41 = vpop.f32.mrf.mxu0  ;;  %v5429_v54 = vsub.f32 %v14226_v1, %v5428_v27 }
 0x2d4   :  { %5407 = vmatpush.msrb.mxu3 %v5406_v18  ;;  %5234 = vmatpush.msrb.mxu0 %v18530_v46  ;;  %v4240_v16 = vadd.f32 %v4239_v41, %v14116_v5  ;;  %v5446_v18 = vand.u32 4294901760, %v14271_v36  ;;  %v18532_v5 = vperm.slane %v14174_v34, 5  ;;  %v5441_v41 = vsub.f32 %v14258_v2, %v5440_v53 }
 0x2d5   :  { %5283 = vmatpush.msrb.mxu1 %v13795_v63  ;;  %5330 = vmatpush.msrb.mxu2 %v14123_v56  ;;  %v5424_v63 = vand.u32 4294901760, %v5423_v38  ;;  %v5430_v38 = vand.u32 4294901760, %v5429_v54  ;;  %v5452_v17 = vand.u32 4294901760, %v14284_v33  ;;  %v14309_v46 = vand.u32 4294901760, %v3316_v57 }
 0x2d6   :  { %5413 = vmatpush.msrb.mxu3 %v5412_v15  ;;  %5095 = vmatmul.f32.gmra.mxu1 %v14048_v22  ;;  %v3292_v4 = vmul.f32 %v18532_v5, %v12568_v6  ;;  %v18533_v15 = vand.u32 4294901760, %v13930_v28  ;;  %v5436_v28 = vand.u32 4294901760, %v5435_v37  ;;  %v5447_v54 = vsub.f32 %v14271_v36, %v5446_v18 }
 0x2d7   :  { %5238 = vmatpush.msrb.mxu0 %v18531_v55  ;;  %5285 = vmatpush.msrb.mxu1 %v13815_v24  ;;  %v5458_v55 = vand.u32 4294901760, %v14296_v58 }
 0x2d8   :  { %5332 = vmatpush.msrb.mxu2 %v14140_v26  ;;  %5419 = vmatpush.msrb.mxu3 %v5418_v47  ;;  %v3308_v24 = vadd.f32 %v3292_v4, %v3248_v51  ;;  %v18534_v47 = vand.u32 4294901760, %v13954_v44  ;;  %v5442_v51 = vand.u32 4294901760, %v5441_v41  ;;  %v5453_v44 = vsub.f32 %v14284_v33, %v5452_v17 }
 0x2d9   :  { %5242 = vmatpush.msrb.mxu0 %v18533_v15  ;;  %5287 = vmatpush.msrb.mxu1 %v13829_v13  ;;  %v18535_v13 = vand.u32 4294901760, %v13974_v50  ;;  %v18536_v4 = vand.u32 4294901760, %v14005_v40  ;;  %v5448_v50 = vand.u32 4294901760, %v5447_v54  ;;  %v5459_v15 = vsub.f32 %v14296_v58, %v5458_v55 }
 0x2da   :  { %5334 = vmatpush.msrb.mxu2 %v14158_v21  ;;  %5425 = vmatpush.msrb.mxu3 %v5424_v63  ;;  %v14327_v63 = vsub.f32 %v3316_v57, %v14309_v46  ;;  %v3324_v37 = vmax.f32 %v3308_v24, 0.0  ;;  %v18537_v41 = vand.u32 4294901760, %v14028_v39  ;;  %v5454_v24 = vand.u32 4294901760, %v5453_v44  ;;  %v18541_v39 = vld [vmem:[#allocation18_spill] sm:$0xff] }
 0x2db   :  { %5246 = vmatpush.msrb.mxu0 %v18534_v47  ;;  %5289 = vmatpush.msrb.mxu1 %v13848_v11  ;;  %v4247_v11 = vpop.f32.mrf.mxu0  ;;  %v5460_v54 = vand.u32 4294901760, %v5459_v15  ;;  %v18542_v44 = vand.u32 4294901760, %v18541_v39  ;;  %v18545_v15 = vld [vmem:[#allocation16_spill] sm:$0xff]  ;;  %v18552_v39 = vld [vmem:[#allocation15_spill] sm:$0xff] }
 0x2dc   :  { %5336 = vmatpush.msrb.mxu2 %v14179_v7  ;;  %5431 = vmatpush.msrb.mxu3 %v5430_v38  ;;  %v4248_v38 = vadd.f32 %v4247_v11, %v14196_v19  ;;  %v5351_v40 = vand.u32 4294901760, %v14327_v63  ;;  %v14344_v19 = vand.u32 4294901760, %v3324_v37  ;;  %v18543_v11 = vld [vmem:[#allocation27_spill] sm:$0xff] }
 0x2dd   :  { %5250 = vmatpush.msrb.mxu0 %v18535_v13  ;;  %5291 = vmatpush.msrb.mxu1 %v13855_v31  ;;  %v4348_v5 = vpop.f32.mrf.mxu1  ;;  %v4406_v31 = vpop.f32.mrf.mxu2 }
 0x2de   :  { %5338 = vmatpush.msrb.mxu2 %v14194_v45  ;;  %5437 = vmatpush.msrb.mxu3 %v5436_v28  ;;  %v4349_v57 = vadd.f32 %v4348_v5, %v4240_v16  ;;  %v4450_v28 = vpop.f32.mrf.mxu3  ;;  %v14358_v5 = vsub.f32 %v3324_v37, %v14344_v19 }
 0x2df   :  { %5254 = vmatpush.msrb.mxu0 %v18536_v4  ;;  %5293 = vmatpush.msrb.mxu1 %v13883_v62  ;;  %v18538_v62 = vld [vmem:[#allocation29_spill] sm:$0xff]  ;;  %v18544_v4 = vld [vmem:[#allocation30_spill] sm:$0xff] }
 0x2e0   :  { %5340 = vmatpush.msrb.mxu2 %v14211_v42  ;;  %5443 = vmatpush.msrb.mxu3 %v5442_v51  ;;  %v4407_v47 = vadd.f32 %v4406_v31, %v4349_v57  ;;  %v18539_v16 = vand.u32 4294901760, %v18538_v62  ;;  %v18540_v51 = vld [vmem:[#allocation24_spill] sm:$0xff]  ;;  %v5359_v37 = vand.u32 4294901760, %v14358_v5  ;;  %v18548_v62 = vld [vmem:[#allocation14_spill] sm:$0xff] }
 0x2e1   :  { %5258 = vmatpush.msrb.mxu0 %v18537_v41  ;;  %5295 = vmatpush.msrb.mxu1 %v13900_v48  ;;  %v5352_v48 = vsub.f32 %v14327_v63, %v5351_v40  ;;  %v18546_v41 = vld [vmem:[#allocation17_spill] sm:$0xff] }
 0x2e2   :  { %5342 = vmatpush.msrb.mxu2 %v14228_v52  ;;  %5449 = vmatpush.msrb.mxu3 %v5448_v50  ;;  %v4451_v13 = vadd.f32 %v4450_v28, %v4407_v47  ;;  %v18547_v28 = vand.u32 4294901760, %v18544_v4 }
 0x2e3   :  { %5262 = vmatpush.msrb.mxu0 %v18539_v16  ;;  %5297 = vmatpush.msrb.mxu1 %v18540_v51  ;;  %v5353_v57 = vand.u32 4294901760, %v5352_v48  ;;  %v18551_v51 = vand.u32 4294901760, %v18546_v41  ;;  %v18553_v48 = vld [vmem:[#allocation20_spill] sm:$0xff] }
 0x2e4   :  { %5344 = vmatpush.msrb.mxu2 %v14244_v10  ;;  %5455 = vmatpush.msrb.mxu3 %v5454_v24 }
 0x2e5   :  { %5266 = vmatpush.msrb.mxu0 %v18542_v44  ;;  %5299 = vmatpush.msrb.mxu1 %v18543_v11  ;;  %v5360_v44 = vsub.f32 %v14358_v5, %v5359_v37 }
 0x2e6   :  { %5346 = vmatpush.msrb.mxu2 %v14260_v9  ;;  %5461 = vmatpush.msrb.mxu3 %v5460_v54  ;;  %v4411_v24 = vpop.f32.mrf.mxu2  ;;  %v4456_v16 = vpop.f32.mrf.mxu3  ;;  %v18549_v54 = vld [vmem:[#allocation28_spill] sm:$0xff] }
 0x2e7   :  { %5268 = vmatmul.f32.vlgmr.msrb.gmra.mxu0 %v13941_v30  ;;  %5463 = vmatmul.f32.vlgmr.msrb.gmra.mxu3 %v14309_v46  ;;  %v4352_v50 = vpop.f32.mrf.mxu1  ;;  %v18554_v11 = vand.u32 4294901760, %v18549_v54 }
 0x2e8   :  { %5473 = vmatpush.msra.mxu0 %v18544_v4  ;;  %5649 = vmatpush.msra.mxu3 %v13966_v8  ;;  %v4353_v31 = vadd.f32 %v4352_v50, %v4248_v38  ;;  %v18555_v4 = vld [vmem:[#allocation25_spill] sm:$0xff]  ;;  %v5361_v50 = vand.u32 4294901760, %v5360_v44 }
 0x2e9   :  { %5301 = vmatpush.msrb.mxu1 %v18545_v15  ;;  %5348 = vmatpush.msrb.mxu2 %v14273_v32  ;;  %v18556_v15 = vand.u32 4294901760, %v18553_v48 }
 0x2ea   :  { %5476 = vmatpush.msra.mxu0 %v18546_v41  ;;  %5354 = vmatmul.f32.vlgmr.msrb.gmra.mxu2 %v5353_v57  ;;  %v4412_v47 = vadd.f32 %v4411_v24, %v4353_v31  ;;  %v18557_v57 = vand.u32 4294901760, %v14121_v0  ;;  %v3269_v41 = vperm.slane %v14174_v34, 6 }
 0x2eb   :  { %5651 = vmatpush.msra.mxu3 %v13977_v49  ;;  %5578 = vmatpush.msra.mxu2 %v18547_v28 }
 0x2ec   :  { %5303 = vmatpush.msrb.mxu1 %v18548_v62  ;;  %5479 = vmatpush.msra.mxu0 %v18549_v54  ;;  %v14374_v38 = vadd.f32 %v4456_v16, %v4412_v47  ;;  %v3430_v62 = vld [vmem:[%s17774_s7 + $0x338] sm:$0xff]  ;;  %v3241_v54 = vld [vmem:[#allocation2 + $0x8] sm:$0xff] }
 0x2ed   :  { %5653 = vmatpush.msra.mxu3 %v14013_v29  ;;  %5582 = vmatpush.msra.mxu2 %v18551_v51  ;;  %v3285_v51 = vmul.f32 %v3269_v41, %v12454_v23 }
 0x2ee   :  { %18550 = vst [vmem:[#allocation26_spill] sm:$0xff] %v14374_v38  ;;  %5305 = vmatpush.msrb.mxu1 %v18552_v39  ;;  %5482 = vmatpush.msra.mxu0 %v18553_v48 }
 0x2ef   :  { %5655 = vmatpush.msra.mxu3 %v14030_v43  ;;  %5586 = vmatpush.msra.mxu2 %v18554_v11  ;;  %v14557_v11 = vand.u32 4294901760, %v3430_v62 }
 0x2f0   :  { %5307 = vmatpush.msrb.mxu1 %v18555_v4  ;;  %5272 = vmatmul.f32.gmra.mxu0 %v14048_v22 }
 0x2f1   :  { %5309 = vmatmul.f32.vlgmr.msrb.gmra.mxu1 %v13941_v30  ;;  %5467 = vmatmul.f32.gmra.mxu3 %v14344_v19  ;;  %v18558_v30 = vand.u32 4294901760, %v14138_v20 }
 0x2f2   :  { %5485 = vmatpush.msra.mxu0 %v14121_v0  ;;  %5531 = vmatpush.msra.mxu1 %v13966_v8  ;;  %v18559_v0 = vand.u32 4294901760, %v14156_v35 }
 0x2f3   :  { %5590 = vmatpush.msra.mxu2 %v18556_v15  ;;  %5657 = vmatpush.msra.mxu3 %v14081_v60 }
 0x2f4   :  { %5362 = vmatmul.f32.gmra.mxu2 %v5361_v50  ;;  %5488 = vmatpush.msra.mxu0 %v14138_v20  ;;  %v18561_v20 = vand.u32 4294901760, %v14187_v25 }
 0x2f5   :  { %5533 = vmatpush.msra.mxu1 %v13977_v49  ;;  %5594 = vmatpush.msra.mxu2 %v18557_v57  ;;  %v14569_v57 = vadd.f32 %v3285_v51, %v3241_v54  ;;  %v3293_v51 = vmul.f32 %v3269_v41, %v12568_v6  ;;  %v3424_v41 = vld [vmem:[%s17774_s7 + $0x308] sm:$0xff] }
 0x2f6   :  { %5659 = vmatpush.msra.mxu3 %v14102_v61  ;;  %5491 = vmatpush.msra.mxu0 %v14156_v35 }
 0x2f7   :  { %5535 = vmatpush.msra.mxu1 %v14013_v29  ;;  %5598 = vmatpush.msra.mxu2 %v18558_v30  ;;  %v4525_v8 = vpop.f32.mrf.mxu0  ;;  %v18560_v29 = vand.u32 4294901760, %v14169_v59 }
 0x2f8   :  { %5661 = vmatpush.msra.mxu3 %v14123_v56  ;;  %5494 = vmatpush.msra.mxu0 %v14169_v59  ;;  %v4526_v49 = vadd.f32 %v4525_v8, %v4451_v13  ;;  %v3432_v13 = vld [vmem:[%s17774_s7 + $0x348] sm:$0xff] }
 0x2f9   :  { %5537 = vmatpush.msra.mxu1 %v14030_v43  ;;  %5602 = vmatpush.msra.mxu2 %v18559_v0  ;;  %v3438_v43 = vld [vmem:[%s17774_s7 + $0x378] sm:$0xff] }
 0x2fa   :  { %5663 = vmatpush.msra.mxu3 %v14140_v26  ;;  %5313 = vmatmul.f32.gmra.mxu1 %v14048_v22  ;;  %v3437_v22 = vld [vmem:[%s17774_s7 + $0x370] sm:$0xff] }
 0x2fb   :  { %5497 = vmatpush.msra.mxu0 %v14187_v25  ;;  %5539 = vmatpush.msra.mxu1 %v14081_v60  ;;  %v18562_v60 = vand.u32 4294901760, %v14209_v14  ;;  %v14448_v25 = vand.u32 4294901760, %v3437_v22 }
 0x2fc   :  { %5606 = vmatpush.msra.mxu2 %v18560_v29  ;;  %5665 = vmatpush.msra.mxu3 %v14158_v21  ;;  %v14589_v29 = vsub.f32 %v3430_v62, %v14557_v11 }
 0x2fd   :  { %5500 = vmatpush.msra.mxu0 %v14209_v14  ;;  %5541 = vmatpush.msra.mxu1 %v14102_v61 }
 0x2fe   :  { %5610 = vmatpush.msra.mxu2 %v18561_v20  ;;  %5667 = vmatpush.msra.mxu3 %v14179_v7 }
 0x2ff   :  { %5503 = vmatpush.msra.mxu0 %v14226_v1  ;;  %5543 = vmatpush.msra.mxu1 %v14123_v56  ;;  %v14438_v56 = vand.u32 4294901760, %v3438_v43  ;;  %v4720_v1 = vpop.f32.mrf.mxu3 }
 0x300   :  { %5614 = vmatpush.msra.mxu2 %v18562_v60  ;;  %5669 = vmatpush.msra.mxu3 %v14194_v45 }
 0x301   :  { %5506 = vmatpush.msra.mxu0 %v14242_v3  ;;  %5545 = vmatpush.msra.mxu1 %v14140_v26  ;;  %v4566_v61 = vpop.f32.mrf.mxu1  ;;  %v3436_v26 = vld [vmem:[%s17774_s7 + $0x368] sm:$0xff]  ;;  %v4611_v35 = vpop.f32.mrf.mxu2  ;;  %v14459_v3 = vsub.f32 %v3438_v43, %v14438_v56 }
 0x302   :  { %5618 = vmatpush.msra.mxu2 %v5428_v27  ;;  %5671 = vmatpush.msra.mxu3 %v14211_v42  ;;  %v4567_v59 = vadd.f32 %v4566_v61, %v4526_v49  ;;  %v14461_v27 = vand.u32 4294901760, %v3436_v26  ;;  %v3427_v49 = vld [vmem:[%s17774_s7 + $0x320] sm:$0xff] }
 0x303   :  { %5509 = vmatpush.msra.mxu0 %v14258_v2  ;;  %5547 = vmatpush.msra.mxu1 %v14158_v21  ;;  %v3435_v21 = vld [vmem:[%s17774_s7 + $0x360] sm:$0xff] }
 0x304   :  { %5622 = vmatpush.msra.mxu2 %v5434_v12  ;;  %5673 = vmatpush.msra.mxu3 %v14228_v52  ;;  %v4612_v14 = vadd.f32 %v4611_v35, %v4567_v59  ;;  %v14473_v2 = vand.u32 4294901760, %v3435_v21  ;;  %v14604_v59 = vand.u32 4294901760, %v3427_v49  ;;  %v3426_v35 = vld [vmem:[%s17774_s7 + $0x318] sm:$0xff] }
 0x305   :  { %5512 = vmatpush.msra.mxu0 %v14271_v36  ;;  %5549 = vmatpush.msra.mxu1 %v14179_v7  ;;  %v14471_v7 = vsub.f32 %v3437_v22, %v14448_v25  ;;  %v18017_v36 = vand.u32 4294901760, %v14459_v3  ;;  %v3317_v22 = vmax.f32 %v14569_v57, 0.0 }
 0x306   :  { %5626 = vmatpush.msra.mxu2 %v5440_v53  ;;  %5675 = vmatpush.msra.mxu3 %v14244_v10  ;;  %v14463_v12 = vadd.f32 %v4720_v1, %v4612_v14  ;;  %v3434_v53 = vld [vmem:[%s17774_s7 + $0x358] sm:$0xff]  ;;  %18565 = vst [vmem:[#allocation21_spill] sm:$0xff] %v14604_v59 }
 0x307   :  { %5515 = vmatpush.msra.mxu0 %v14284_v33  ;;  %5551 = vmatpush.msra.mxu1 %v14194_v45  ;;  %v14484_v45 = vsub.f32 %v3436_v26, %v14461_v27  ;;  %v14497_v33 = vsub.f32 %v3435_v21, %v14473_v2  ;;  %v3454_v14 = vld [vmem:[%s17774_s7 + $0x3f8] sm:$0xff]  ;;  %v14632_v62 = vand.u32 4294901760, %v3317_v22 }
 0x308   :  { %18563 = vst [vmem:[#allocation23_spill] sm:$0xff] %v14463_v12  ;;  %5630 = vmatpush.msra.mxu2 %v5446_v18  ;;  %5677 = vmatpush.msra.mxu3 %v14260_v9  ;;  %v3433_v18 = vld [vmem:[%s17774_s7 + $0x350] sm:$0xff]  ;;  %v14634_v54 = vand.u32 4294901760, %v3454_v14 }
 0x309   :  { %5518 = vmatpush.msra.mxu0 %v14296_v58  ;;  %5553 = vmatpush.msra.mxu1 %v14211_v42  ;;  %v14492_v42 = vand.u32 4294901760, %v3434_v53  ;;  %v14506_v31 = vand.u32 4294901760, %v3433_v18  ;;  %v18014_v24 = vand.u32 4294901760, %v14484_v45  ;;  %v3431_v58 = vld [vmem:[%s17774_s7 + $0x340] sm:$0xff]  ;;  %v18013_v28 = vand.u32 4294901760, %v14497_v33 }
 0x30a   :  { %5634 = vmatpush.msra.mxu2 %v5452_v17  ;;  %5679 = vmatpush.msra.mxu3 %v14273_v32  ;;  %v18016_v17 = vand.u32 4294901760, %v14471_v7  ;;  %v14539_v16 = vand.u32 4294901760, %v3431_v58 }
 0x30b   :  { %5521 = vmatmul.f32.vlgmr.msra.gmra.mxu0 %v14327_v63  ;;  %5681 = vmatmul.f32.vlgmr.msra.gmra.mxu3 %v14309_v46  ;;  %v5753_v44 = vsub.f32 %v14484_v45, %v18014_v24  ;;  %v5759_v15 = vsub.f32 %v14497_v33, %v18013_v28 }
 0x30c   :  { %5690 = vmatpush.msrb.mxu0 %v14438_v56  ;;  %5903 = vmatpush.msrb.mxu3 %v14438_v56  ;;  %v5747_v47 = vsub.f32 %v14471_v7, %v18016_v17  ;;  %v14574_v30 = vsub.f32 %v3431_v58, %v14539_v16  ;;  %v14627_v58 = vand.u32 4294901760, %v3426_v35  ;;  %v3448_v17 = vld [vmem:[%s17774_s7 + $0x3c8] sm:$0xff] }
 0x30d   :  { %5555 = vmatpush.msra.mxu1 %v14228_v52  ;;  %5638 = vmatpush.msra.mxu2 %v5458_v55  ;;  %v5741_v52 = vsub.f32 %v14459_v3, %v18017_v36  ;;  %v14521_v55 = vsub.f32 %v3434_v53, %v14492_v42  ;;  %v5754_v8 = vand.u32 4294901760, %v5753_v44  ;;  %v5760_v43 = vand.u32 4294901760, %v5759_v15  ;;  %v3452_v15 = vld [vmem:[%s17774_s7 + $0x3e8] sm:$0xff] }
 0x30e   :  { %5692 = vmatpush.msrb.mxu0 %v14448_v25  ;;  %5640 = vmatmul.f32.vlgmr.msra.gmra.mxu2 %v14309_v46  ;;  %v14523_v46 = vand.u32 4294901760, %v3432_v13  ;;  %v5748_v50 = vand.u32 4294901760, %v5747_v47  ;;  %v18007_v26 = vand.u32 4294901760, %v14574_v30  ;;  %18566 = vst [vmem:[#allocation22_spill] sm:$0xff] %v14627_v58  ;;  %v3425_v47 = vld [vmem:[%s17774_s7 + $0x310] sm:$0xff] }
 0x30f   :  { %5905 = vmatpush.msrb.mxu3 %v14448_v25  ;;  %5845 = vmatpush.msrb.mxu2 %v14459_v3  ;;  %v5742_v39 = vand.u32 4294901760, %v5741_v52  ;;  %v18012_v4 = vand.u32 4294901760, %v14521_v55  ;;  %v3249_v52 = vld [vmem:[#allocation2 + $0x78] sm:$0xff] }
 0x310   :  { %5557 = vmatpush.msra.mxu1 %v14244_v10  ;;  %5694 = vmatpush.msrb.mxu0 %v14461_v27  ;;  %v14537_v10 = vsub.f32 %v3433_v18, %v14506_v31  ;;  %v14555_v48 = vsub.f32 %v3432_v13, %v14523_v46  ;;  %v18006_v18 = vand.u32 4294901760, %v14589_v29  ;;  %v3453_v13 = vld [vmem:[%s17774_s7 + $0x3f0] sm:$0xff]  ;;  %v5783_v44 = vsub.f32 %v14574_v30, %v18007_v26 }
 0x311   :  { %5907 = vmatpush.msrb.mxu3 %v14461_v27  ;;  %5848 = vmatpush.msrb.mxu2 %v14471_v7  ;;  %v5765_v0 = vsub.f32 %v14521_v55, %v18012_v4  ;;  %v14659_v57 = vadd.f32 %v3293_v51, %v3249_v52  ;;  %v14685_v52 = vand.u32 4294901760, %v3452_v15 }
 0x312   :  { %5559 = vmatpush.msra.mxu1 %v14260_v9  ;;  %5696 = vmatpush.msrb.mxu0 %v14473_v2  ;;  %v3429_v9 = vld [vmem:[%s17774_s7 + $0x330] sm:$0xff]  ;;  %v18009_v60 = vand.u32 4294901760, %v14555_v48  ;;  %v5784_v51 = vand.u32 4294901760, %v5783_v44 }
 0x313   :  { %5909 = vmatpush.msrb.mxu3 %v14473_v2  ;;  %5851 = vmatpush.msrb.mxu2 %v14484_v45  ;;  %v14576_v63 = vand.u32 4294901760, %v3429_v9  ;;  %v5766_v21 = vand.u32 4294901760, %v5765_v0  ;;  %v3451_v0 = vld [vmem:[%s17774_s7 + $0x3e0] sm:$0xff] }
 0x314   :  { %5561 = vmatpush.msra.mxu1 %v14273_v32  ;;  %5526 = vmatmul.f32.gmra.mxu0 %v14358_v5  ;;  %v3428_v32 = vld [vmem:[%s17774_s7 + $0x328] sm:$0xff]  ;;  %v5777_v1 = vsub.f32 %v14555_v48, %v18009_v60  ;;  %v14665_v5 = vand.u32 4294901760, %v3425_v47 }
 0x315   :  { %5565 = vmatmul.f32.vlgmr.msra.gmra.mxu1 %v5351_v40  ;;  %5685 = vmatmul.f32.gmra.mxu3 %v14344_v19  ;;  %v18010_v40 = vand.u32 4294901760, %v14537_v10  ;;  %v14591_v20 = vand.u32 4294901760, %v3428_v32  ;;  %v14602_v61 = vsub.f32 %v3429_v9, %v14576_v63  ;;  %v14645_v9 = vsub.f32 %v3427_v49, %v14604_v59 }
 0x316   :  { %5698 = vmatpush.msrb.mxu0 %v14492_v42  ;;  %5743 = vmatpush.msrb.mxu1 %v5742_v39  ;;  %v5789_v49 = vsub.f32 %v14589_v29, %v18006_v18  ;;  %18567 = vst [vmem:[#allocation29_spill] sm:$0xff] %v14665_v5  ;;  %v14691_v18 = vand.u32 4294901760, %v3424_v41  ;;  %v14707_v60 = vsub.f32 %v3425_v47, %v14665_v5  ;;  %v3450_v47 = vld [vmem:[%s17774_s7 + $0x3d8] sm:$0xff] }
 0x317   :  { %5854 = vmatpush.msrb.mxu2 %v14497_v33  ;;  %5911 = vmatpush.msrb.mxu3 %v14492_v42  ;;  %18564 = vst [vmem:[#allocation19_spill] sm:$0xff] %v14591_v20  ;;  %v14620_v53 = vsub.f32 %v3428_v32, %v14591_v20  ;;  %v14657_v32 = vand.u32 4294901760, %v3453_v13  ;;  %v18015_v26 = vand.u32 4294901760, %v14645_v9  ;;  %v14745_v36 = vand.u32 4294901760, %v3450_v47 }
 0x318   :  { %5644 = vmatmul.f32.gmra.mxu2 %v14344_v19  ;;  %5700 = vmatpush.msrb.mxu0 %v14506_v31  ;;  %v5771_v19 = vsub.f32 %v14537_v10, %v18010_v40  ;;  %18569 = vst [vmem:[#allocation18_spill] sm:$0xff] %v14691_v18  ;;  %v5790_v44 = vand.u32 4294901760, %v5789_v49  ;;  %v14717_v49 = vsub.f32 %v3452_v15, %v14685_v52 }
 0x319   :  { %5749 = vmatpush.msrb.mxu1 %v5748_v50  ;;  %5857 = vmatpush.msrb.mxu2 %v14521_v55  ;;  %v18008_v50 = vand.u32 4294901760, %v14602_v61  ;;  %v5807_v4 = vsub.f32 %v14645_v9, %v18015_v26  ;;  %v14727_v28 = vsub.f32 %v3424_v41, %v14691_v18 }
 0x31a   :  { %5913 = vmatpush.msrb.mxu3 %v14506_v31  ;;  %5702 = vmatpush.msrb.mxu0 %v14523_v46  ;;  %v5772_v39 = vand.u32 4294901760, %v5771_v19  ;;  %v3423_v19 = vld [vmem:[%s17774_s7 + $0x300] sm:$0xff]  ;;  %18571 = vst [vmem:[#allocation30_spill] sm:$0xff] %v14717_v49 }
 0x31b   :  { %5755 = vmatpush.msrb.mxu1 %v5754_v8  ;;  %5860 = vmatpush.msrb.mxu2 %v14537_v10  ;;  %v5778_v8 = vand.u32 4294901760, %v5777_v1  ;;  %v14683_v1 = vsub.f32 %v3454_v14, %v14634_v54  ;;  %v14699_v14 = vand.u32 4294901760, %v3451_v0  ;;  %v14709_v40 = vand.u32 4294901760, %v3423_v19  ;;  %18572 = vst [vmem:[#allocation16_spill] sm:$0xff] %v14727_v28 }
 0x31c   :  { %5915 = vmatpush.msrb.mxu3 %v14523_v46  ;;  %5704 = vmatpush.msrb.mxu0 %v14539_v16  ;;  %v5808_v15 = vand.u32 4294901760, %v5807_v4  ;;  %v3447_v4 = vld [vmem:[%s17774_s7 + $0x3c0] sm:$0xff] }
 0x31d   :  { %5761 = vmatpush.msrb.mxu1 %v5760_v43  ;;  %5863 = vmatpush.msrb.mxu2 %v14555_v48  ;;  %v14674_v43 = vsub.f32 %v3426_v35, %v14627_v58  ;;  %18568 = vst [vmem:[#allocation24_spill] sm:$0xff] %v14683_v1  ;;  %v5795_v35 = vsub.f32 %v14602_v61, %v18008_v50 }
 0x31e   :  { %5917 = vmatpush.msrb.mxu3 %v14539_v16  ;;  %5571 = vmatmul.f32.gmra.mxu1 %v5359_v37  ;;  %v18011_v37 = vand.u32 4294901760, %v14620_v53  ;;  %v14733_v24 = vsub.f32 %v3451_v0, %v14699_v14  ;;  %v14742_v26 = vsub.f32 %v3423_v19, %v14709_v40  ;;  %v14784_v19 = vand.u32 4294901760, %v3448_v17 }
 0x31f   :  { %5706 = vmatpush.msrb.mxu0 %v14557_v11  ;;  %5767 = vmatpush.msrb.mxu1 %v5766_v21  ;;  %v14680_v21 = vsub.f32 %v3317_v22, %v14632_v62  ;;  %v14697_v22 = vsub.f32 %v3453_v13, %v14657_v32 }
 0x320   :  { %5866 = vmatpush.msrb.mxu2 %v14574_v30  ;;  %5919 = vmatpush.msrb.mxu3 %v14557_v11  ;;  %v5801_v50 = vsub.f32 %v14620_v53, %v18011_v37  ;;  %v5796_v37 = vand.u32 4294901760, %v5795_v35  ;;  %v3449_v35 = vld [vmem:[%s17774_s7 + $0x3d0] sm:$0xff] }
 0x321   :  { %5708 = vmatpush.msrb.mxu0 %v14576_v63  ;;  %5773 = vmatpush.msrb.mxu1 %v5772_v39  ;;  %18570 = vst [vmem:[#allocation27_spill] sm:$0xff] %v14697_v22  ;;  %v3325_v39 = vmax.f32 %v14659_v57, 0.0  ;;  %v5723_v13 = vand.u32 4294901760, %v14680_v21  ;;  %v18018_v57 = vand.u32 4294901760, %v14683_v1  ;;  %v14762_v38 = vand.u32 4294901760, %v3449_v35 }
 0x322   :  { %5869 = vmatpush.msrb.mxu2 %v14589_v29  ;;  %5921 = vmatpush.msrb.mxu3 %v14576_v63  ;;  %v5802_v41 = vand.u32 4294901760, %v5801_v50 }
 0x323   :  { %5710 = vmatpush.msrb.mxu0 %v14591_v20  ;;  %5779 = vmatpush.msrb.mxu1 %v5778_v8  ;;  %v18019_v8 = vand.u32 4294901760, %v14674_v43  ;;  %v5724_v0 = vsub.f32 %v14680_v21, %v5723_v13 }
 0x324   :  { %5872 = vmatpush.msrb.mxu2 %v14602_v61  ;;  %5923 = vmatpush.msrb.mxu3 %v14591_v20 }
 0x325   :  { %5712 = vmatpush.msrb.mxu0 %v14604_v59  ;;  %5785 = vmatpush.msrb.mxu1 %v5784_v51  ;;  %v14735_v51 = vand.u32 4294901760, %v3325_v39  ;;  %v5813_v50 = vsub.f32 %v14674_v43, %v18019_v8 }
 0x326   :  { %5875 = vmatpush.msrb.mxu2 %v14620_v53  ;;  %5925 = vmatpush.msrb.mxu3 %v14604_v59 }
 0x327   :  { %5714 = vmatpush.msrb.mxu0 %v14627_v58  ;;  %5791 = vmatpush.msrb.mxu1 %v5790_v44  ;;  %v6113_v44 = vsub.f32 %v14683_v1, %v18018_v57  ;;  %v18573_v57 = vand.u32 4294901760, %v14697_v22  ;;  %v18575_v1 = vand.u32 4294901760, %v14717_v49 }
 0x328   :  { %5878 = vmatpush.msrb.mxu2 %v14645_v9  ;;  %5927 = vmatpush.msrb.mxu3 %v14627_v58  ;;  %v14771_v58 = vsub.f32 %v3325_v39, %v14735_v51  ;;  %v5725_v39 = vand.u32 4294901760, %v5724_v0  ;;  %v3446_v0 = vld [vmem:[%s17774_s7 + $0x3b8] sm:$0xff] }
 0x329   :  { %5716 = vmatpush.msrb.mxu0 %v14665_v5  ;;  %5797 = vmatpush.msrb.mxu1 %v5796_v37  ;;  %v6119_v8 = vsub.f32 %v14697_v22, %v18573_v57  ;;  %v18574_v37 = vand.u32 4294901760, %v14707_v60  ;;  %v14782_v57 = vsub.f32 %v3450_v47, %v14745_v36  ;;  %v6114_v22 = vand.u32 4294901760, %v6113_v44 }
 0x32a   :  { %5881 = vmatpush.msrb.mxu2 %v14674_v43  ;;  %5929 = vmatpush.msrb.mxu3 %v14665_v5  ;;  %v6125_v59 = vsub.f32 %v14717_v49, %v18575_v1  ;;  %v14796_v5 = vsub.f32 %v3449_v35, %v14762_v38  ;;  %v18578_v35 = vand.u32 4294901760, %v14459_v3  ;;  %v18579_v49 = vand.u32 4294901760, %v14742_v26 }
 0x32b   :  { %5718 = vmatpush.msrb.mxu0 %v14691_v18  ;;  %5803 = vmatpush.msrb.mxu1 %v5802_v41  ;;  %v5819_v12 = vsub.f32 %v14707_v60, %v18574_v37  ;;  %v5814_v41 = vand.u32 4294901760, %v5813_v50  ;;  %v18576_v37 = vand.u32 4294901760, %v14727_v28  ;;  %v6120_v1 = vand.u32 4294901760, %v6119_v8  ;;  %v3445_v8 = vld [vmem:[%s17774_s7 + $0x3b0] sm:$0xff] }
 0x32c   :  { %5884 = vmatpush.msrb.mxu2 %v14707_v60  ;;  %5931 = vmatpush.msrb.mxu3 %v14691_v18  ;;  %v14798_v18 = vand.u32 4294901760, %v3447_v4  ;;  %v5731_v50 = vand.u32 4294901760, %v14771_v58  ;;  %v5831_v20 = vsub.f32 %v14742_v26, %v18579_v49  ;;  %v18580_v3 = vand.u32 4294901760, %v14471_v7 }
 0x32d   :  { %5720 = vmatpush.msrb.mxu0 %v14709_v40  ;;  %5809 = vmatpush.msrb.mxu1 %v5808_v15  ;;  %v5825_v47 = vsub.f32 %v14727_v28, %v18576_v37  ;;  %v18577_v15 = vand.u32 4294901760, %v14733_v24  ;;  %v5820_v37 = vand.u32 4294901760, %v5819_v12  ;;  %v18033_v49 = vand.u32 4294901760, %v14796_v5 }
 0x32e   :  { %5887 = vmatpush.msrb.mxu2 %v14727_v28  ;;  %5933 = vmatpush.msrb.mxu3 %v14709_v40  ;;  %v18032_v28 = vand.u32 4294901760, %v14782_v57  ;;  %v5832_v7 = vand.u32 4294901760, %v5831_v20 }
 0x32f   :  { %5726 = vmatmul.f32.vlgmr.msrb.gmra.mxu0 %v5725_v39  ;;  %v6131_v44 = vsub.f32 %v14733_v24, %v18577_v15  ;;  %5937 = vmatmul.f32.vlgmr.msrb.gmra.mxu3 %v5723_v13  ;;  %v14815_v39 = vsub.f32 %v3448_v17, %v14784_v19  ;;  %v6126_v13 = vand.u32 4294901760, %v6125_v59  ;;  %v14820_v15 = vand.u32 4294901760, %v3446_v0 }
 0x330   :  { %5950 = vmatpush.msra.mxu0 %v18578_v35  ;;  %6115 = vmatpush.msra.mxu3 %v6114_v22  ;;  %v5826_v12 = vand.u32 4294901760, %v5825_v47  ;;  %v14827_v17 = vsub.f32 %v3447_v4, %v14798_v18  ;;  %v3444_v35 = vld [vmem:[%s17774_s7 + $0x3a8] sm:$0xff]  ;;  %v5732_v22 = vsub.f32 %v14771_v58, %v5731_v50  ;;  %v6137_v4 = vsub.f32 %v14782_v57, %v18032_v28 }
 0x331   :  { %5815 = vmatpush.msrb.mxu1 %v5814_v41  ;;  %5890 = vmatpush.msrb.mxu2 %v14742_v26  ;;  %v6132_v59 = vand.u32 4294901760, %v6131_v44  ;;  %v14834_v41 = vand.u32 4294901760, %v3445_v8  ;;  %v18034_v47 = vand.u32 4294901760, %v14815_v39  ;;  %v14847_v44 = vsub.f32 %v3446_v0, %v14820_v15 }
 0x332   :  { %5954 = vmatpush.msra.mxu0 %v18580_v3  ;;  %5893 = vmatmul.f32.vlgmr.msrb.gmra.mxu2 %v14680_v21  ;;  %v3443_v21 = vld [vmem:[%s17774_s7 + $0x3a0] sm:$0xff]  ;;  %v14849_v3 = vand.u32 4294901760, %v3444_v35  ;;  %v6143_v20 = vsub.f32 %v14796_v5, %v18033_v49  ;;  %v18582_v0 = vand.u32 4294901760, %v14497_v33  ;;  %v6138_v49 = vand.u32 4294901760, %v6137_v4  ;;  %v3441_v33 = vld [vmem:[%s17774_s7 + $0x390] sm:$0xff] }
 0x333   :  { %6121 = vmatpush.msra.mxu3 %v6120_v1  ;;  %6062 = vmatpush.msra.mxu2 %v14634_v54  ;;  %v18581_v1 = vand.u32 4294901760, %v14484_v45  ;;  %v3442_v45 = vld [vmem:[%s17774_s7 + $0x398] sm:$0xff]  ;;  %v14863_v28 = vsub.f32 %v3445_v8, %v14834_v41  ;;  %v18583_v4 = vand.u32 4294901760, %v14521_v55 }
 0x334   :  { %5821 = vmatpush.msrb.mxu1 %v5820_v37  ;;  %v6149_v37 = vsub.f32 %v14815_v39, %v18034_v47  ;;  %v18584_v47 = vand.u32 4294901760, %v14827_v17 }
 0x335   :  { %5958 = vmatpush.msra.mxu0 %v18581_v1  ;;  %6127 = vmatpush.msra.mxu3 %v6126_v13  ;;  %v5733_v1 = vand.u32 4294901760, %v5732_v22  ;;  %v14879_v22 = vand.u32 4294901760, %v3442_v45 }
 0x336   :  { %6064 = vmatpush.msra.mxu2 %v14657_v32  ;;  %5827 = vmatpush.msrb.mxu1 %v5826_v12  ;;  %v14865_v12 = vand.u32 4294901760, %v3443_v21  ;;  %v6155_v13 = vsub.f32 %v14827_v17, %v18584_v47  ;;  %v6150_v47 = vand.u32 4294901760, %v6149_v37 }
 0x337   :  { %5962 = vmatpush.msra.mxu0 %v18582_v0  ;;  %6133 = vmatpush.msra.mxu3 %v6132_v59  ;;  %v14877_v59 = vsub.f32 %v3444_v35, %v14849_v3  ;;  %v6144_v0 = vand.u32 4294901760, %v6143_v20  ;;  %v18585_v35 = vperm.slane %v14174_v34, 7  ;;  %v14898_v20 = vand.u32 4294901760, %v3441_v33 }
 0x338   :  { %6066 = vmatpush.msra.mxu2 %v14685_v52  ;;  %5833 = vmatpush.msrb.mxu1 %v5832_v7  ;;  %v3242_v7 = vld [vmem:[#allocation2 + $0x48] sm:$0xff]  ;;  %v6156_v37 = vand.u32 4294901760, %v6155_v13 }
 0x339   :  { %5734 = vmatmul.f32.gmra.mxu0 %v5733_v1  ;;  %5835 = vmatmul.f32.vlgmr.msrb.gmra.mxu1 %v14632_v62  ;;  %v3440_v1 = vld [vmem:[%s17774_s7 + $0x388] sm:$0xff]  ;;  %v3286_v8 = vmul.f32 %v18585_v35, %v12454_v23  ;;  %v18587_v35 = vand.u32 4294901760, %v14847_v44  ;;  %v6172_v55 = vand.u32 4294901760, %v14877_v59 }
 0x33a   :  { %5943 = vmatmul.f32.gmra.mxu3 %v5731_v50  ;;  %5966 = vmatpush.msra.mxu0 %v18583_v4  ;;  %v14896_v50 = vsub.f32 %v3443_v21, %v14865_v12  ;;  %v3439_v4 = vld [vmem:[%s17774_s7 + $0x380] sm:$0xff] }
 0x33b   :  { %6021 = vmatpush.msra.mxu1 %v14438_v56  ;;  %6068 = vmatpush.msra.mxu2 %v14699_v14  ;;  %v3302_v23 = vadd.f32 %v3286_v8, %v3242_v7  ;;  %v18586_v56 = vand.u32 4294901760, %v14537_v10  ;;  %v6161_v21 = vsub.f32 %v14847_v44, %v18587_v35  ;;  %v18588_v10 = vand.u32 4294901760, %v14555_v48 }
 0x33c   :  { %6139 = vmatpush.msra.mxu3 %v6138_v49  ;;  %5898 = vmatmul.f32.gmra.mxu2 %v14771_v58  ;;  %v14912_v49 = vsub.f32 %v3442_v45, %v14879_v22  ;;  %v14914_v58 = vand.u32 4294901760, %v3440_v1  ;;  %v6178_v7 = vand.u32 4294901760, %v14896_v50  ;;  %v14925_v45 = vsub.f32 %v3441_v33, %v14898_v20 }
 0x33d   :  { %5970 = vmatpush.msra.mxu0 %v18586_v56  ;;  %6023 = vmatpush.msra.mxu1 %v14448_v25  ;;  %v18589_v25 = vand.u32 4294901760, %v14863_v28  ;;  %v14927_v56 = vand.u32 4294901760, %v3439_v4  ;;  %v3318_v13 = vmax.f32 %v3302_v23, 0.0  ;;  %v18590_v48 = vand.u32 4294901760, %v14574_v30 }
 0x33e   :  { %6070 = vmatpush.msra.mxu2 %v14745_v36  ;;  %6145 = vmatpush.msra.mxu3 %v6144_v0  ;;  %v6173_v0 = vsub.f32 %v14877_v59, %v6172_v55  ;;  %v6184_v35 = vand.u32 4294901760, %v14912_v49  ;;  %v14938_v33 = vsub.f32 %v3440_v1, %v14914_v58  ;;  %v18591_v30 = vand.u32 4294901760, %v14589_v29  ;;  %v3250_v1 = vld [vmem:[#allocation2 + $0x28] sm:$0xff] }
 0x33f   :  { %5974 = vmatpush.msra.mxu0 %v18588_v10  ;;  %6025 = vmatpush.msra.mxu1 %v14461_v27  ;;  %v6167_v8 = vsub.f32 %v14863_v28, %v18589_v25  ;;  %v6162_v27 = vand.u32 4294901760, %v6161_v21  ;;  %v6190_v23 = vand.u32 4294901760, %v14925_v45  ;;  %v14949_v21 = vsub.f32 %v3439_v4, %v14927_v56 }
 0x340   :  { %6072 = vmatpush.msra.mxu2 %v14762_v38  ;;  %6151 = vmatpush.msra.mxu3 %v6150_v47  ;;  %v18593_v10 = vand.u32 4294901760, %v14602_v61  ;;  %v6174_v25 = vand.u32 4294901760, %v6173_v0  ;;  %v6196_v4 = vand.u32 4294901760, %v14938_v33 }
 0x341   :  { %5978 = vmatpush.msra.mxu0 %v18590_v48  ;;  %6027 = vmatpush.msra.mxu1 %v14473_v2  ;;  %v6168_v47 = vand.u32 4294901760, %v6167_v8  ;;  %v6179_v2 = vsub.f32 %v14896_v50, %v6178_v7  ;;  %v6185_v8 = vsub.f32 %v14912_v49, %v6184_v35  ;;  %v14962_v48 = vand.u32 4294901760, %v3318_v13 }
 0x342   :  { %6074 = vmatpush.msra.mxu2 %v14784_v19  ;;  %6157 = vmatpush.msra.mxu3 %v6156_v37  ;;  %v18592_v37 = vperm.slane %v14174_v34, 7  ;;  %v6191_v61 = vsub.f32 %v14925_v45, %v6190_v23 }
 0x343   :  { %5839 = vmatmul.f32.gmra.mxu1 %v14735_v51  ;;  %5982 = vmatpush.msra.mxu0 %v18591_v30  ;;  %v6180_v34 = vand.u32 4294901760, %v6179_v2  ;;  %v6186_v0 = vand.u32 4294901760, %v6185_v8  ;;  %v14980_v30 = vsub.f32 %v3318_v13, %v14962_v48  ;;  %v18597_v13 = vand.u32 4294901760, %v14707_v60 }
 0x344   :  { %6029 = vmatpush.msra.mxu1 %v14492_v42  ;;  %6076 = vmatpush.msra.mxu2 %v14798_v18  ;;  %v3294_v29 = vmul.f32 %v18592_v37, %v12568_v6  ;;  %v18594_v6 = vand.u32 4294901760, %v14620_v53  ;;  %v6197_v53 = vsub.f32 %v14938_v33, %v6196_v4  ;;  %v6192_v2 = vand.u32 4294901760, %v6191_v61  ;;  %v18598_v37 = vld [vmem:[#allocation16_spill] sm:$0xff] }
 0x345   :  { %6163 = vmatpush.msra.mxu3 %v6162_v27  ;;  %5986 = vmatpush.msra.mxu0 %v18593_v10  ;;  %v6202_v27 = vand.u32 4294901760, %v14949_v21  ;;  %v18600_v10 = vld [vmem:[#allocation19_spill] sm:$0xff]  ;;  %v18601_v60 = vand.u32 4294901760, %v14742_v26  ;;  %v18604_v26 = vld [vmem:[#allocation22_spill] sm:$0xff] }
 0x346   :  { %6031 = vmatpush.msra.mxu1 %v14506_v31  ;;  %6078 = vmatpush.msra.mxu2 %v14820_v15  ;;  %v3310_v42 = vadd.f32 %v3294_v29, %v3250_v1  ;;  %v18595_v31 = vand.u32 4294901760, %v14645_v9  ;;  %v6095_v1 = vand.u32 4294901760, %v14980_v30  ;;  %v18599_v29 = vand.u32 4294901760, %v18598_v37 }
 0x347   :  { %6169 = vmatpush.msra.mxu3 %v6168_v47  ;;  %5990 = vmatpush.msra.mxu0 %v18594_v6  ;;  %v6203_v9 = vsub.f32 %v14949_v21, %v6202_v27 }
 0x348   :  { %6033 = vmatpush.msra.mxu1 %v14523_v46  ;;  %6080 = vmatpush.msra.mxu2 %v14834_v41  ;;  %v3326_v47 = vmax.f32 %v3310_v42, 0.0  ;;  %v18596_v46 = vand.u32 4294901760, %v14674_v43  ;;  %v18603_v42 = vld [vmem:[#allocation24_spill] sm:$0xff] }
 0x349   :  { %6175 = vmatpush.msra.mxu3 %v6174_v25  ;;  %5994 = vmatpush.msra.mxu0 %v18595_v31  ;;  %v18602_v25 = vld [vmem:[#allocation21_spill] sm:$0xff]  ;;  %v18606_v31 = vand.u32 4294901760, %v18603_v42 }
 0x34a   :  { %6035 = vmatpush.msra.mxu1 %v14539_v16  ;;  %6082 = vmatpush.msra.mxu2 %v14849_v3  ;;  %v6198_v16 = vand.u32 4294901760, %v6197_v53  ;;  %v14996_v43 = vand.u32 4294901760, %v3326_v47  ;;  %v18608_v53 = vld [vmem:[#allocation30_spill] sm:$0xff] }
 0x34b   :  { %6181 = vmatpush.msra.mxu3 %v6180_v34  ;;  %5998 = vmatpush.msra.mxu0 %v18596_v46  ;;  %v18605_v34 = vld [vmem:[#allocation27_spill] sm:$0xff]  ;;  %v18610_v46 = vld [vmem:[#allocation18_spill] sm:$0xff] }
 0x34c   :  { %6037 = vmatpush.msra.mxu1 %v14557_v11  ;;  %6084 = vmatpush.msra.mxu2 %v14865_v12  ;;  %v6204_v11 = vand.u32 4294901760, %v6203_v9  ;;  %v15010_v8 = vsub.f32 %v3326_v47, %v14996_v43  ;;  %v18609_v47 = vand.u32 4294901760, %v18605_v34  ;;  %v18611_v9 = vand.u32 4294901760, %v18608_v53 }
 0x34d   :  { %6187 = vmatpush.msra.mxu3 %v6186_v0  ;;  %6002 = vmatpush.msra.mxu0 %v18597_v13  ;;  %v18607_v0 = vld [vmem:[#allocation29_spill] sm:$0xff] }
 0x34e   :  { %6039 = vmatpush.msra.mxu1 %v14576_v63  ;;  %6086 = vmatpush.msra.mxu2 %v14879_v22  ;;  %v6096_v63 = vsub.f32 %v14980_v30, %v6095_v1  ;;  %v6103_v61 = vand.u32 4294901760, %v15010_v8 }
 0x34f   :  { %6193 = vmatpush.msra.mxu3 %v6192_v2  ;;  %6006 = vmatpush.msra.mxu0 %v18599_v29 }
 0x350   :  { %6041 = vmatpush.msra.mxu1 %v18600_v10  ;;  %6088 = vmatpush.msra.mxu2 %v14898_v20  ;;  %v6097_v6 = vand.u32 4294901760, %v6096_v63  ;;  %v6104_v2 = vsub.f32 %v15010_v8, %v6103_v61 }
 0x351   :  { %6199 = vmatpush.msra.mxu3 %v6198_v16  ;;  %6010 = vmatpush.msra.mxu0 %v18601_v60  ;;  %v18612_v16 = vand.u32 4294901760, %v14733_v24 }
 0x352   :  { %6043 = vmatpush.msra.mxu1 %v18602_v25  ;;  %6090 = vmatpush.msra.mxu2 %v14914_v58  ;;  %v6105_v13 = vand.u32 4294901760, %v6104_v2 }
 0x353   :  { %6205 = vmatpush.msra.mxu3 %v6204_v11  ;;  %6012 = vmatmul.f32.vlgmr.msra.gmra.mxu0 %v14632_v62 }
 0x354   :  { %6207 = vmatmul.f32.vlgmr.msra.gmra.mxu3 %v14962_v48  ;;  %6217 = vmatpush.msrb.mxu0 %v18603_v42 }
 0x355   :  { %6393 = vmatpush.msrb.mxu3 %v14634_v54  ;;  %6045 = vmatpush.msra.mxu1 %v18604_v26 }
 0x356   :  { %6092 = vmatpush.msra.mxu2 %v14927_v56  ;;  %6220 = vmatpush.msrb.mxu0 %v18605_v34 }
 0x357   :  { %6098 = vmatmul.f32.vlgmr.msra.gmra.mxu2 %v6097_v6  ;;  %6395 = vmatpush.msrb.mxu3 %v14657_v32 }
 0x358   :  { %6322 = vmatpush.msrb.mxu2 %v18606_v31  ;;  %6047 = vmatpush.msra.mxu1 %v18607_v0 }
 0x359   :  { %6223 = vmatpush.msrb.mxu0 %v18608_v53  ;;  %6397 = vmatpush.msrb.mxu3 %v14685_v52 }
 0x35a   :  { %6326 = vmatpush.msrb.mxu2 %v18609_v47  ;;  %6049 = vmatpush.msra.mxu1 %v18610_v46 }
 0x35b   :  { %6226 = vmatpush.msrb.mxu0 %v14733_v24  ;;  %6399 = vmatpush.msrb.mxu3 %v14699_v14  ;;  %v18615_v24 = vand.u32 4294901760, %v14815_v39 }
 0x35c   :  { %6330 = vmatpush.msrb.mxu2 %v18611_v9  ;;  %6051 = vmatpush.msra.mxu1 %v14709_v40  ;;  %v18613_v40 = vand.u32 4294901760, %v14782_v57 }
 0x35d   :  { %6016 = vmatmul.f32.gmra.mxu0 %v14735_v51  ;;  %6053 = vmatmul.f32.vlgmr.msra.gmra.mxu1 %v14632_v62  ;;  %v18614_v62 = vand.u32 4294901760, %v14796_v5 }
 0x35e   :  { %6211 = vmatmul.f32.gmra.mxu3 %v14996_v43  ;;  %6229 = vmatpush.msrb.mxu0 %v14782_v57 }
 0x35f   :  { %6275 = vmatpush.msrb.mxu1 %v14634_v54  ;;  %6334 = vmatpush.msrb.mxu2 %v18612_v16  ;;  %v18616_v54 = vand.u32 4294901760, %v14827_v17 }
 0x360   :  { %6401 = vmatpush.msrb.mxu3 %v14745_v36  ;;  %6106 = vmatmul.f32.gmra.mxu2 %v6105_v13 }
 0x361   :  { %6232 = vmatpush.msrb.mxu0 %v14796_v5  ;;  %6277 = vmatpush.msrb.mxu1 %v14657_v32  ;;  %v18617_v32 = vand.u32 4294901760, %v14847_v44  ;;  %v4724_v5 = vpop.f32.mrf.mxu3 }
 0x362   :  { %6338 = vmatpush.msrb.mxu2 %v18613_v40  ;;  %6403 = vmatpush.msrb.mxu3 %v14762_v38 }
 0x363   :  { %6235 = vmatpush.msrb.mxu0 %v14815_v39  ;;  %6279 = vmatpush.msrb.mxu1 %v14685_v52 }
 0x364   :  { %6342 = vmatpush.msrb.mxu2 %v18614_v62  ;;  %6405 = vmatpush.msrb.mxu3 %v14784_v19 }
 0x365   :  { %6238 = vmatpush.msrb.mxu0 %v14827_v17  ;;  %6281 = vmatpush.msrb.mxu1 %v14699_v14 }
 0x366   :  { %6346 = vmatpush.msrb.mxu2 %v18615_v24  ;;  %6407 = vmatpush.msrb.mxu3 %v14798_v18 }
 0x367   :  { %6057 = vmatmul.f32.gmra.mxu1 %v14735_v51  ;;  %6241 = vmatpush.msrb.mxu0 %v14847_v44 }
 0x368   :  { %6283 = vmatpush.msrb.mxu1 %v14745_v36  ;;  %6350 = vmatpush.msrb.mxu2 %v18616_v54  ;;  %v18618_v36 = vand.u32 4294901760, %v14863_v28 }
 0x369   :  { %6409 = vmatpush.msrb.mxu3 %v14820_v15  ;;  %6244 = vmatpush.msrb.mxu0 %v14863_v28  ;;  %v4570_v28 = vpop.f32.mrf.mxu1 }
 0x36a   :  { %6285 = vmatpush.msrb.mxu1 %v14762_v38  ;;  %6354 = vmatpush.msrb.mxu2 %v18617_v32  ;;  %v4529_v38 = vpop.f32.mrf.mxu0 }
 0x36b   :  { %6411 = vmatpush.msrb.mxu3 %v14834_v41  ;;  %6247 = vmatpush.msrb.mxu0 %v14877_v59 }
 0x36c   :  { %6287 = vmatpush.msrb.mxu1 %v14784_v19  ;;  %6358 = vmatpush.msrb.mxu2 %v18618_v36  ;;  %v4938_v19 = vpop.f32.mrf.mxu3 }
 0x36d   :  { %6413 = vmatpush.msrb.mxu3 %v14849_v3  ;;  %6250 = vmatpush.msrb.mxu0 %v14896_v50 }
 0x36e   :  { %6289 = vmatpush.msrb.mxu1 %v14798_v18  ;;  %6362 = vmatpush.msrb.mxu2 %v6172_v55  ;;  %v4619_v18 = vpop.f32.mrf.mxu2 }
 0x36f   :  { %6415 = vmatpush.msrb.mxu3 %v14865_v12  ;;  %6253 = vmatpush.msrb.mxu0 %v14912_v49  ;;  %v18619_v49 = vld [vmem:[#allocation26_spill] sm:$0xff] }
 0x370   :  { %6291 = vmatpush.msrb.mxu1 %v14820_v15  ;;  %6366 = vmatpush.msrb.mxu2 %v6178_v7 }
 0x371   :  { %6417 = vmatpush.msrb.mxu3 %v14879_v22  ;;  %6256 = vmatpush.msrb.mxu0 %v14925_v45  ;;  %v4822_v14 = vpop.f32.mrf.mxu1  ;;  %v18620_v45 = vld [vmem:[#allocation23_spill] sm:$0xff] }
 0x372   :  { %6293 = vmatpush.msrb.mxu1 %v14834_v41  ;;  %6370 = vmatpush.msrb.mxu2 %v6184_v35  ;;  %v4778_v52 = vpop.f32.mrf.mxu0 }
 0x373   :  { %6419 = vmatpush.msrb.mxu3 %v14898_v20  ;;  %6259 = vmatpush.msrb.mxu0 %v14938_v33 }
 0x374   :  { %6295 = vmatpush.msrb.mxu1 %v14849_v3  ;;  %6374 = vmatpush.msrb.mxu2 %v6190_v23  ;;  %v4942_v17 = vpop.f32.mrf.mxu3 }
 0x375   :  { %6421 = vmatpush.msrb.mxu3 %v14914_v58  ;;  %6262 = vmatpush.msrb.mxu0 %v14949_v21 }
 0x376   :  { %6297 = vmatpush.msrb.mxu1 %v14865_v12  ;;  %6378 = vmatpush.msrb.mxu2 %v6196_v4  ;;  %v4897_v51 = vpop.f32.mrf.mxu2 }
 0x377   :  { %6423 = vmatpush.msrb.mxu3 %v14927_v56  ;;  %6265 = vmatmul.f32.vlgmr.msrb.gmra.mxu0 %v14980_v30 }
 0x378   :  { %6425 = vmatmul.f32.vlgmr.msrb.gmra.mxu3 %v14962_v48  ;;  %6299 = vmatpush.msrb.mxu1 %v14879_v22 }
 0x379   :  { %6382 = vmatpush.msrb.mxu2 %v6202_v27  ;;  %v4828_v39 = vpop.f32.mrf.mxu1 }
 0x37a   :  { %6384 = vmatmul.f32.vlgmr.msrb.gmra.mxu2 %v14962_v48  ;;  %6301 = vmatpush.msrb.mxu1 %v14898_v20  ;;  %v4783_v57 = vpop.f32.mrf.mxu0 }
 0x37c   :  { %6303 = vmatpush.msrb.mxu1 %v14914_v58  ;;  %v5194_v12 = vpop.f32.mrf.mxu3  ;;  %v4530_v58 = vadd.f32 %v4529_v38, %v18619_v49 }
 0x37e   :  { %6305 = vmatpush.msrb.mxu1 %v14927_v56  ;;  %v4901_v15 = vpop.f32.mrf.mxu2  ;;  %v4571_v7 = vadd.f32 %v4570_v28, %v4530_v58  ;;  %v4779_v56 = vadd.f32 %v4778_v52, %v18620_v45 }
 0x37f   :  { %6270 = vmatmul.f32.gmra.mxu0 %v15010_v8  ;;  %6309 = vmatmul.f32.vlgmr.msrb.gmra.mxu1 %v6095_v1 }
 0x380   :  { %6429 = vmatmul.f32.gmra.mxu3 %v14996_v43  ;;  %v4620_v33 = vadd.f32 %v4619_v18, %v4571_v7  ;;  %v4823_v23 = vadd.f32 %v4822_v14, %v4779_v56 }
 0x381   :  { %v5092_v44 = vpop.f32.mrf.mxu1 }
 0x382   :  { %6388 = vmatmul.f32.gmra.mxu2 %v14996_v43  ;;  %v4983_v41 = vpop.f32.mrf.mxu0  ;;  %v4725_v27 = vadd.f32 %v4724_v5, %v4620_v33  ;;  %v4898_v30 = vadd.f32 %v4897_v51, %v4823_v23 }
 0x384   :  { %v5200_v50 = vpop.f32.mrf.mxu3  ;;  %v4784_v1 = vadd.f32 %v4783_v57, %v4725_v27  ;;  %v4939_v37 = vadd.f32 %v4938_v19, %v4898_v30 }
 0x386   :  { %v5150_v3 = vpop.f32.mrf.mxu2  ;;  %v4829_v43 = vadd.f32 %v4828_v39, %v4784_v1  ;;  %v4984_v11 = vadd.f32 %v4983_v41, %v4939_v37 }
 0x387   :  { %6315 = vmatmul.f32.gmra.mxu1 %v6103_v61 }
 0x388   :  { %v4902_v25 = vadd.f32 %v4901_v15, %v4829_v43  ;;  %v5093_v8 = vadd.f32 %v5092_v44, %v4984_v11 }
 0x389   :  { %v5096_v22 = vpop.f32.mrf.mxu1 }
 0x38a   :  { %v4991_v59 = vpop.f32.mrf.mxu0  ;;  %v4943_v42 = vadd.f32 %v4942_v17, %v4902_v25  ;;  %v5151_v26 = vadd.f32 %v5150_v3, %v5093_v8 }
 0x38c   :  { %v5464_v4 = vpop.f32.mrf.mxu3  ;;  %v4992_v34 = vadd.f32 %v4991_v59, %v4943_v42  ;;  %v5195_v53 = vadd.f32 %v5194_v12, %v5151_v26 }
 0x38e   :  { %v5155_v55 = vpop.f32.mrf.mxu2  ;;  %v5097_v0 = vadd.f32 %v5096_v22, %v4992_v34 }
 0x390   :  { %v5156_v2 = vadd.f32 %v5155_v55, %v5097_v0 }
 0x391   :  { %v5310_v35 = vpop.f32.mrf.mxu1 }
 0x392   :  { %v5269_v20 = vpop.f32.mrf.mxu0  ;;  %v5201_v16 = vadd.f32 %v5200_v50, %v5156_v2 }
 0x393   :  { %v5270_v46 = vadd.f32 %v5269_v20, %v5195_v53 }
 0x394   :  { %v5468_v60 = vpop.f32.mrf.mxu3 }
 0x395   :  { %v5311_v9 = vadd.f32 %v5310_v35, %v5270_v46 }
 0x396   :  { %v5355_v21 = vpop.f32.mrf.mxu2 }
 0x397   :  { %v5356_v40 = vadd.f32 %v5355_v21, %v5311_v9 }
 0x399   :  { %v5314_v29 = vpop.f32.mrf.mxu1  ;;  %v5465_v38 = vadd.f32 %v5464_v4, %v5356_v40 }
 0x39a   :  { %v5273_v48 = vpop.f32.mrf.mxu0 }
 0x39b   :  { %v5274_v32 = vadd.f32 %v5273_v48, %v5201_v16 }
 0x39c   :  { %v5682_v31 = vpop.f32.mrf.mxu3 }
 0x39d   :  { %v5315_v36 = vadd.f32 %v5314_v29, %v5274_v32 }
 0x39e   :  { %v5363_v10 = vpop.f32.mrf.mxu2 }
 0x39f   :  { %v5364_v5 = vadd.f32 %v5363_v10, %v5315_v36 }
 0x3a1   :  { %v5566_v6 = vpop.f32.mrf.mxu1  ;;  %v5469_v57 = vadd.f32 %v5468_v60, %v5364_v5 }
 0x3a2   :  { %v5522_v63 = vpop.f32.mrf.mxu0 }
 0x3a3   :  { %v5523_v28 = vadd.f32 %v5522_v63, %v5465_v38 }
 0x3a4   :  { %v5686_v24 = vpop.f32.mrf.mxu3 }
 0x3a5   :  { %v5567_v52 = vadd.f32 %v5566_v6, %v5523_v28 }
 0x3a6   :  { %v5641_v61 = vpop.f32.mrf.mxu2 }
 0x3a7   :  { %v5642_v39 = vadd.f32 %v5641_v61, %v5567_v52 }
 0x3a9   :  { %v5572_v13 = vpop.f32.mrf.mxu1  ;;  %v5683_v41 = vadd.f32 %v5682_v31, %v5642_v39  ;;  %v15125_v39 = vmov 0.0  }
 0x3aa   :  { %v5527_v47 = vpop.f32.mrf.mxu0 }
 0x3ab   :  { %v5528_v15 = vadd.f32 %v5527_v47, %v5469_v57  ;;  %v15123_v57 = vmov 0.0  }
 0x3ad   :  { %v5573_v17 = vadd.f32 %v5572_v13, %v5528_v15 }
 0x3ae   :  { %v5645_v62 = vpop.f32.mrf.mxu2 }
 0x3af   :  { %v5646_v55 = vadd.f32 %v5645_v62, %v5573_v17 }
 0x3b1   :  { %v5687_v20 = vadd.f32 %v5686_v24, %v5646_v55 }
 0x3b2   :  { %v5727_v54 = vpop.f32.mrf.mxu0  ;;  %v5938_v51 = vpop.f32.mrf.mxu3 }
 0x3b3   :  { %v5728_v3 = vadd.f32 %v5727_v54, %v5683_v41 }
 0x3b6   :  { %v5836_v18 = vpop.f32.mrf.mxu1  ;;  %v5894_v14 = vpop.f32.mrf.mxu2 }
 0x3b7   :  { %v5837_v50 = vadd.f32 %v5836_v18, %v5728_v3 }
 0x3b9   :  { %v5895_v49 = vadd.f32 %v5894_v14, %v5837_v50 }
 0x3ba   :  { %v5735_v19 = vpop.f32.mrf.mxu0 }
 0x3bb   :  { %v5736_v7 = vadd.f32 %v5735_v19, %v5687_v20  ;;  %v5939_v33 = vadd.f32 %v5938_v51, %v5895_v49 }
 0x3bd   :  { %v5944_v59 = vpop.f32.mrf.mxu3 }
 0x3bf   :  { %v5899_v12 = vpop.f32.mrf.mxu2 }
 0x3c0   :  { %v5840_v44 = vpop.f32.mrf.mxu1 }
 0x3c1   :  { %v5841_v35 = vadd.f32 %v5840_v44, %v5736_v7 }
 0x3c3   :  { %v5900_v4 = vadd.f32 %v5899_v12, %v5841_v35 }
 0x3c5   :  { %v5945_v30 = vadd.f32 %v5944_v59, %v5900_v4 }
 0x3d0   :  { %v6013_v22 = vpop.f32.mrf.mxu0 }
 0x3d1   :  { %v6014_v21 = vadd.f32 %v6013_v22, %v5939_v33 }
 0x3d7   :  { %v6208_v56 = vpop.f32.mrf.mxu3 }
 0x3da   :  { %v6054_v58 = vpop.f32.mrf.mxu1  ;;  %v6099_v45 = vpop.f32.mrf.mxu2 }
 0x3db   :  { %v6017_v23 = vpop.f32.mrf.mxu0  ;;  %v6055_v48 = vadd.f32 %v6054_v58, %v6014_v21 }
 0x3dc   :  { %v6018_v11 = vadd.f32 %v6017_v23, %v5945_v30 }
 0x3dd   :  { %v6100_v1 = vadd.f32 %v6099_v45, %v6055_v48 }
 0x3df   :  { %v6209_v60 = vadd.f32 %v6208_v56, %v6100_v1 }
 0x3e1   :  { %v6212_v37 = vpop.f32.mrf.mxu3 }
 0x3e3   :  { %v6107_v43 = vpop.f32.mrf.mxu2 }
 0x3e4   :  { %v6058_v27 = vpop.f32.mrf.mxu1 }
 0x3e5   :  { %v6059_v10 = vadd.f32 %v6058_v27, %v6018_v11 }
 0x3e7   :  { %v6108_v8 = vadd.f32 %v6107_v43, %v6059_v10 }
 0x3e9   :  { %v6213_v31 = vadd.f32 %v6212_v37, %v6108_v8 }
 0x3f4   :  { %v6266_v29 = vpop.f32.mrf.mxu0 }
 0x3f5   :  { %v6267_v63 = vadd.f32 %v6266_v29, %v6209_v60 }
 0x3fb   :  { %v6426_v6 = vpop.f32.mrf.mxu3 }
 0x3fc   :  { %v6310_v25 = vpop.f32.mrf.mxu1  ;;  %v6271_v61 = vpop.f32.mrf.mxu0 }
 0x3fd   :  { %v6311_v42 = vadd.f32 %v6310_v25, %v6267_v63  ;;  %v6385_v26 = vpop.f32.mrf.mxu2  ;;  %v6272_v53 = vadd.f32 %v6271_v61, %v6213_v31 }
 0x3ff   :  { %v6386_v34 = vadd.f32 %v6385_v26, %v6311_v42 }
 0x401   :  { %v6427_v0 = vadd.f32 %v6426_v6, %v6386_v34 }
 0x403   :  { %v6433_v47 = vmin.f32 %v6427_v0, 20.0  ;;  %v6430_v40 = vpop.f32.mrf.mxu3  ;;  %vm6435_vm0 = vcmp.gt.f32.partialorder %v6427_v0, 20.0 }
 0x404   :  { %v6316_v46 = vpop.f32.mrf.mxu1 }
 0x405   :  { %v6437_v2 = vmul.f32 1.442695, %v6433_v47  ;;  %v6317_v9 = vadd.f32 %v6316_v46, %v6272_v53  ;;  %v6389_v13 = vpop.f32.mrf.mxu2 }
 0x407   :  { %9735 = vpow2.f32 %v6437_v2  ;;  %v6390_v16 = vadd.f32 %v6389_v13, %v6317_v9 }
 0x409   :  { %v6431_v62 = vadd.f32 %v6430_v40, %v6390_v16 }
 0x40b   :  { %v6434_v24 = vmin.f32 %v6431_v62, 20.0  ;;  %vm6436_vm1 = vcmp.gt.f32.partialorder %v6431_v62, 20.0 }
 0x40d   :  { %v9736_v54 = vpop.eup %9735  ;;  %v6439_v32 = vmul.f32 1.442695, %v6434_v24 }
 0x40e   :  { %v6441_v36 = vadd.f32 1.0, %v9736_v54 }
 0x40f   :  { %9737 = vpow2.f32 %v6439_v32 }
 0x410   :  { %9739 = vlog2.f32 %v6441_v36 }
 0x415   :  { %v9738_v38 = vpop.eup %9737 }
 0x416   :  { %v9740_v28 = vpop.eup %9739  ;;  %v6442_v18 = vadd.f32 1.0, %v9738_v38 }
 0x417   :  { %v6444_v5 = vmul.f32 0.6931472, %v9740_v28 }
 0x418   :  { %9741 = vlog2.f32 %v6442_v18 }
 0x419   :  { %v15119_v52 = vsel %vm6435_vm0, %v6427_v0, %v6444_v5 }
 0x41a   :  { %18621 = vst [vmem:[#allocation17_spill] sm:$0xff] %v15119_v52 }
 0x41e   :  { %v9742_v14 = vpop.eup %9741 }
 0x41f   :  { %v6446_v51 = vmul.f32 0.6931472, %v9742_v14 }
 0x421   :  { %v15121_v19 = vsel %vm6436_vm1, %v6431_v62, %v6446_v51 }
 0x422   :  { %18622 = vst [vmem:[#allocation14_spill] sm:$0xff] %v15121_v19 }
 0x423 LB: > { %18623 = vst [vmem:[#allocation31_spill] sm:$0xff] %v9863_v57  ;;  %v6541_v15 = vld [vmem:[%s17774_s7 + $0x78] sm:$0xff]  ;;  %v6540_v17 = vld [vmem:[%s17774_s7 + $0x70] sm:$0xff]  ;;  %v6539_v41 = vld [vmem:[%s17774_s7 + $0x68] sm:$0xff]  ;;  %s15379_s3 = sld [smem:[#allocation7 + %s9871_s19]]  ;;  %s6454_s19 = sadd.s32 1, %s9871_s19   ;;  %s9871_s19 = sphi %s15127_s19, %s6454_s19   ;;  %v9867_v39 = vphi %v15125_v39, %v18810_v39   ;;  %v9863_v57 = vphi %v15123_v57, %v18809_v57  }
 0x424   : > { %18624 = vst [vmem:[#allocation32_spill] sm:$0xff] %v9867_v39  ;;  %v15147_v44 = vand.u32 4294901760, %v6541_v15  ;;  %v15149_v3 = vand.u32 4294901760, %v6540_v17  ;;  %v15151_v12 = vand.u32 4294901760, %v6539_v41  ;;  %v6538_v59 = vld [vmem:[%s17774_s7 + $0x60] sm:$0xff]  ;;  %v6537_v22 = vld [vmem:[%s17774_s7 + $0x58] sm:$0xff] }
 0x425   : > { %v6536_v55 = vld [vmem:[%s17774_s7 + $0x50] sm:$0xff]  ;;  %v15162_v50 = vand.u32 4294901760, %v6538_v59  ;;  %v15164_v20 = vand.u32 4294901760, %v6537_v22  ;;  %v6535_v58 = vld [vmem:[%s17774_s7 + $0x48] sm:$0xff]  ;;  %v6534_v7 = vld [vmem:[%s17774_s7 + $0x40] sm:$0xff]  ;;  %s16320_s6 = sld [smem:[#allocation3]] }
 0x426   : > { %v15166_v49 = vand.u32 4294901760, %v6536_v55  ;;  %6657 = vmatpush.msra.mxu0 %v15147_v44  ;;  %v15176_v45 = vsub.f32 %v6541_v15, %v15147_v44  ;;  %v15179_v56 = vsub.f32 %v6540_v17, %v15149_v3  ;;  %6870 = vmatpush.msra.mxu3 %v15147_v44  ;;  %v15183_v35 = vsub.f32 %v6539_v41, %v15151_v12  ;;  %v6533_v23 = vld [vmem:[%s17774_s7 + $0x38] sm:$0xff]  ;;  %v6532_v37 = vld [vmem:[%s17774_s7 + $0x30] sm:$0xff]  ;;  %v6531_v6 = vld [vmem:[%s17774_s7 + $0x28] sm:$0xff]  ;;  %p6451_p0 = scmp.ge.s32.totalorder %s6454_s19, 60  }
 0x427   : > { %v15185_v33 = vand.u32 4294901760, %v6535_v58  ;;  %v15191_v21 = vsub.f32 %v6538_v59, %v15162_v50  ;;  %v15194_v4 = vsub.f32 %v6537_v22, %v15164_v20  ;;  %v15204_v43 = vand.u32 4294901760, %v6534_v7  ;;  %v6530_v47 = vld [vmem:[%s17774_s7 + $0x20] sm:$0xff]  ;;  %v6529_v40 = vld [vmem:[%s17774_s7 + $0x18] sm:$0xff]  ;;  %v6528_v36 = vld [vmem:[%s17774_s7 + $0x10] sm:$0xff] }
 0x428   : > { %v15197_v48 = vsub.f32 %v6536_v55, %v15166_v49  ;;  %6659 = vmatpush.msra.mxu0 %v15149_v3  ;;  %6812 = vmatpush.msra.mxu2 %v15176_v45  ;;  %v18048_v27 = vand.u32 4294901760, %v15176_v45  ;;  %v18047_v30 = vand.u32 4294901760, %v15179_v56  ;;  %v18046_v1 = vand.u32 4294901760, %v15183_v35  ;;  %v6557_v51 = vld [vmem:[%s17774_s7 + $0xf8] sm:$0xff]  ;;  %v6527_v17 = vld [vmem:[%s17774_s7 + $0x8] sm:$0xff] }
 0x429   : > { %6872 = vmatpush.msra.mxu3 %v15149_v3  ;;  %v18044_v29 = vand.u32 4294901760, %v15191_v21  ;;  %v15211_v11 = vand.u32 4294901760, %v6533_v23  ;;  %v15214_v10 = vsub.f32 %v6535_v58, %v15185_v33  ;;  %v18043_v8 = vand.u32 4294901760, %v15194_v4  ;;  %v6526_v58 = vld [vmem:[%s17774_s7] sm:$0xff] }
 0x42a   : > { %6661 = vmatpush.msra.mxu0 %v15151_v12  ;;  %6815 = vmatpush.msra.mxu2 %v15179_v56  ;;  %v6708_v60 = vsub.f32 %v15176_v45, %v18048_v27  ;;  %v6714_v63 = vsub.f32 %v15179_v56, %v18047_v30  ;;  %v6720_v25 = vsub.f32 %v15183_v35, %v18046_v1  ;;  %v15229_v42 = vand.u32 4294901760, %v6532_v37 }
 0x42b   : > { %6874 = vmatpush.msra.mxu3 %v15151_v12  ;;  %v18041_v26 = vand.u32 4294901760, %v15197_v48  ;;  %v6726_v31 = vsub.f32 %v15191_v21, %v18044_v29  ;;  %v15241_v0 = vsub.f32 %v6534_v7, %v15204_v43  ;;  %v15245_v53 = vsub.f32 %v6533_v23, %v15211_v11  ;;  %v6556_v7 = vld [vmem:[%s17774_s7 + $0xf0] sm:$0xff] }
 0x42c   : > { %6663 = vmatpush.msra.mxu0 %v15162_v50  ;;  %v6709_v34 = vand.u32 4294901760, %v6708_v60  ;;  %6818 = vmatpush.msra.mxu2 %v15183_v35  ;;  %v6715_v61 = vand.u32 4294901760, %v6714_v63  ;;  %v6721_v46 = vand.u32 4294901760, %v6720_v25  ;;  %v6732_v2 = vsub.f32 %v15194_v4, %v18043_v8 }
 0x42d   : > { %6876 = vmatpush.msra.mxu3 %v15162_v50  ;;  %v15254_v9 = vand.u32 4294901760, %v6531_v6  ;;  %v18040_v13 = vand.u32 4294901760, %v15214_v10  ;;  %v6738_v16 = vsub.f32 %v15197_v48, %v18041_v26  ;;  %v6727_v62 = vand.u32 4294901760, %v6726_v31 }
 0x42e   : > { %6665 = vmatpush.msra.mxu0 %v15164_v20  ;;  %6710 = vmatpush.msra.mxu1 %v6709_v34  ;;  %v15266_v24 = vand.u32 4294901760, %v6530_v47  ;;  %v18039_v54 = vand.u32 4294901760, %v15241_v0  ;;  %v15270_v32 = vsub.f32 %v6532_v37, %v15229_v42  ;;  %v18037_v38 = vand.u32 4294901760, %v15245_v53 }
 0x42f   : > { %6821 = vmatpush.msra.mxu2 %v15191_v21  ;;  %6878 = vmatpush.msra.mxu3 %v15164_v20  ;;  %v6733_v28 = vand.u32 4294901760, %v6732_v2  ;;  %v6744_v18 = vsub.f32 %v15214_v10, %v18040_v13  ;;  %v15282_v5 = vand.u32 4294901760, %v6529_v40  ;;  %v15285_v14 = vsub.f32 %v6531_v6, %v15254_v9 }
 0x430   : > { %6667 = vmatpush.msra.mxu0 %v15166_v49  ;;  %6716 = vmatpush.msra.mxu1 %v6715_v61  ;;  %v15292_v15 = vand.u32 4294901760, %v6528_v36  ;;  %v6739_v41 = vand.u32 4294901760, %v6738_v16  ;;  %v6750_v59 = vsub.f32 %v15241_v0, %v18039_v54  ;;  %v18036_v22 = vand.u32 4294901760, %v15270_v32 }
 0x431   : > { %6824 = vmatpush.msra.mxu2 %v15194_v4  ;;  %6880 = vmatpush.msra.mxu3 %v15166_v49  ;;  %v15303_v55 = vsub.f32 %v6530_v47, %v15266_v24  ;;  %v6756_v23 = vsub.f32 %v15245_v53, %v18037_v38  ;;  %v15316_v37 = vand.u32 4294901760, %v6557_v51  ;;  %v6745_v60 = vand.u32 4294901760, %v6744_v18  ;;  %v6555_v47 = vld [vmem:[%s17774_s7 + $0xe8] sm:$0xff] }
 0x432   : > { %6669 = vmatpush.msra.mxu0 %v15185_v33  ;;  %6722 = vmatpush.msra.mxu1 %v6721_v46  ;;  %18625 = vst [vmem:[#allocation33_spill] sm:$0xff] %v15292_v15  ;;  %v15319_v63 = vand.u32 4294901760, %v6527_v17  ;;  %v18035_v25 = vand.u32 4294901760, %v15285_v14  ;;  %v15323_v6 = vsub.f32 %v6529_v40, %v15282_v5  ;;  %v15327_v34 = vand.u32 4294901760, %v6526_v58 }
 0x433   : > { %6827 = vmatpush.msra.mxu2 %v15197_v48  ;;  %6882 = vmatpush.msra.mxu3 %v15185_v33  ;;  %18626 = vst [vmem:[#allocation34_spill] sm:$0xff] %v15316_v37  ;;  %v15330_v61 = vsub.f32 %v6528_v36, %v15292_v15  ;;  %v15332_v31 = vand.u32 4294901760, %v6556_v7  ;;  %v6751_v46 = vand.u32 4294901760, %v6750_v59  ;;  %v6762_v2 = vsub.f32 %v15270_v32, %v18036_v22  ;;  %v6554_v36 = vld [vmem:[%s17774_s7 + $0xe0] sm:$0xff] }
 0x434   : > { %6671 = vmatpush.msra.mxu0 %v15204_v43  ;;  %6728 = vmatpush.msra.mxu1 %v6727_v62  ;;  %18627 = vst [vmem:[#allocation35_spill] sm:$0xff] %v15319_v63  ;;  %v18038_v16 = vand.u32 4294901760, %v15303_v55  ;;  %v6757_v40 = vand.u32 4294901760, %v6756_v23  ;;  %v15345_v62 = vsub.f32 %v6557_v51, %v15316_v37  ;;  %v18042_v18 = vand.u32 4294901760, %v15323_v6  ;;  %v6553_v51 = vld [vmem:[%s17774_s7 + $0xd8] sm:$0xff] }
 0x435   : > { %6830 = vmatpush.msra.mxu2 %v15214_v10  ;;  %6884 = vmatpush.msra.mxu3 %v15204_v43  ;;  %18628 = vst [vmem:[#allocation36_spill] sm:$0xff] %v15327_v34  ;;  %v15358_v59 = vand.u32 4294901760, %v6555_v47  ;;  %v18045_v23 = vand.u32 4294901760, %v15330_v61  ;;  %v15376_v38 = vand.u32 4294901760, %v6554_v36  ;;  %v6475_v52 = vstv %s15379_s3 }
 0x436   : > { %6673 = vmatpush.msra.mxu0 %v15211_v11  ;;  %6734 = vmatpush.msra.mxu1 %v6733_v28  ;;  %v6768_v28 = vsub.f32 %v15285_v14, %v18035_v25  ;;  %v15370_v25 = vsub.f32 %v6556_v7, %v15332_v31  ;;  %v6774_v22 = vsub.f32 %v15303_v55, %v18038_v16  ;;  %v15384_v7 = vand.u32 4294901760, %v6553_v51 }
 0x437   : > { %6833 = vmatpush.msra.mxu2 %v15241_v0  ;;  %6886 = vmatpush.msra.mxu3 %v15211_v11  ;;  %v6780_v16 = vsub.f32 %v15323_v6, %v18042_v18  ;;  %v15395_v13 = vsub.f32 %v6555_v47, %v15358_v59  ;;  %v6786_v26 = vsub.f32 %v15330_v61, %v18045_v23  ;;  %v6551_v18 = vld [vmem:[%s17774_s7 + $0xc8] sm:$0xff]  ;;  %vm9682_vm12 = vcmask (%p6451_p0), 7168  }
 0x438   : > { %6675 = vmatpush.msra.mxu0 %v15229_v42  ;;  %6740 = vmatpush.msra.mxu1 %v6739_v41  ;;  %v15356_v41 = vsub.f32 %v6527_v17, %v15319_v63  ;;  %v6763_v17 = vand.u32 4294901760, %v6762_v2  ;;  %v6769_v2 = vand.u32 4294901760, %v6768_v28  ;;  %v18052_v28 = vand.u32 4294901760, %v15370_v25 }
 0x439   : > { %6836 = vmatpush.msra.mxu2 %v15245_v53  ;;  %6888 = vmatpush.msra.mxu3 %v15229_v42  ;;  %v6775_v47 = vand.u32 4294901760, %v6774_v22  ;;  %v15409_v8 = vsub.f32 %v6554_v36, %v15376_v38  ;;  %v15419_v1 = vsub.f32 %v6553_v51, %v15384_v7  ;;  %v6550_v22 = vld [vmem:[%s17774_s7 + $0xc0] sm:$0xff]  ;;  %v6781_v36 = vand.u32 4294901760, %v6780_v16 }
 0x43a   : > { %6677 = vmatpush.msra.mxu0 %v15254_v9  ;;  %6746 = vmatpush.msra.mxu1 %v6745_v60  ;;  %v15367_v60 = vsub.f32 %v6526_v58, %v15327_v34  ;;  %v18049_v58 = vand.u32 4294901760, %v15345_v62  ;;  %v18050_v54 = vand.u32 4294901760, %v15356_v41  ;;  %v15429_v27 = vand.u32 4294901760, %v6551_v18 }
 0x43b   : > { %6839 = vmatpush.msra.mxu2 %v15270_v32  ;;  %6890 = vmatpush.msra.mxu3 %v15254_v9  ;;  %v6787_v51 = vand.u32 4294901760, %v6786_v26  ;;  %v7086_v16 = vsub.f32 %v15370_v25, %v18052_v28  ;;  %v15447_v19 = vand.u32 4294901760, %v6550_v22  ;;  %v18629_v28 = vand.u32 4294901760, %v15176_v45 }
 0x43c   : > { %6679 = vmatpush.msra.mxu0 %v15266_v24  ;;  %6752 = vmatpush.msra.mxu1 %v6751_v46  ;;  %v6552_v46 = vld [vmem:[%s17774_s7 + $0xd0] sm:$0xff]  ;;  %v7080_v23 = vsub.f32 %v15345_v62, %v18049_v58  ;;  %v18630_v30 = vand.u32 4294901760, %v15395_v13 }
 0x43d   : > { %6842 = vmatpush.msra.mxu2 %v15285_v14  ;;  %6892 = vmatpush.msra.mxu3 %v15266_v24  ;;  %v15411_v29 = vand.u32 4294901760, %v6552_v46  ;;  %v6474_v58 = vld [vmem:[#allocation8] sm:$0xff] }
 0x43e   : > { %6681 = vmatpush.msra.mxu0 %v15282_v5  ;;  %6758 = vmatpush.msra.mxu1 %v6757_v40  ;;  %v18051_v40 = vand.u32 4294901760, %v15367_v60  ;;  %v7081_v57 = vand.u32 4294901760, %v7080_v23  ;;  %v15457_v39 = vmul.f32 %v6475_v52, %v6474_v58  ;;  %v18631_v23 = vand.u32 4294901760, %v15179_v56 }
 0x43f   : > { %6845 = vmatpush.msra.mxu2 %v15303_v55  ;;  %6894 = vmatpush.msra.mxu3 %v15282_v5  ;;  %v15445_v26 = vsub.f32 %v6552_v46, %v15411_v29  ;;  %v7087_v52 = vand.u32 4294901760, %v7086_v16  ;;  %v15483_v16 = vsub.f32 %v6550_v22, %v15447_v19 }
 0x440   : > { %6683 = vmatpush.msra.mxu0 %v15292_v15  ;;  %6764 = vmatpush.msra.mxu1 %v6763_v17  ;;  %v6792_v17 = vsub.f32 %v15356_v41, %v18050_v54  ;;  %v6549_v54 = vld [vmem:[%s17774_s7 + $0xb8] sm:$0xff] }
 0x441   : > { %6848 = vmatpush.msra.mxu2 %v15323_v6  ;;  %6896 = vmatpush.msra.mxu3 %v15292_v15  ;;  %v15464_v15 = vsub.f32 %v6551_v18, %v15429_v27  ;;  %v15466_v45 = vand.u32 4294901760, %v6549_v54 }
 0x442   : > { %6685 = vmatpush.msra.mxu0 %v15319_v63  ;;  %6770 = vmatpush.msra.mxu1 %v6769_v2  ;;  %v6798_v2 = vsub.f32 %v15367_v60, %v18051_v40  ;;  %v6548_v40 = vld [vmem:[%s17774_s7 + $0xb0] sm:$0xff]  ;;  %v6793_v46 = vand.u32 4294901760, %v6792_v17  ;;  %v18632_v17 = vand.u32 4294901760, %v15409_v8 }
 0x443   : > { %6851 = vmatpush.msra.mxu2 %v15330_v61  ;;  %6898 = vmatpush.msra.mxu3 %v15319_v63  ;;  %v7092_v63 = vsub.f32 %v15395_v13, %v18630_v30  ;;  %v15471_v58 = vand.u32 4294901760, %v6548_v40  ;;  %v6478_v30 = vperm.slane %v15457_v39, 0 }
 0x444   : > { %6687 = vmatpush.msra.mxu0 %v15327_v34  ;;  %6776 = vmatpush.msra.mxu1 %v6775_v47  ;;  %v6799_v18 = vand.u32 4294901760, %v6798_v2  ;;  %v7098_v56 = vsub.f32 %v15409_v8, %v18632_v17  ;;  %v18633_v47 = vand.u32 4294901760, %v15183_v35  ;;  %v6546_v2 = vld [vmem:[%s17774_s7 + $0xa0] sm:$0xff] }
 0x445   : > { %6854 = vmatpush.msra.mxu2 %v15356_v41  ;;  %6900 = vmatpush.msra.mxu3 %v15327_v34  ;;  %v18634_v34 = vand.u32 4294901760, %v15419_v1  ;;  %v7093_v17 = vand.u32 4294901760, %v7092_v63  ;;  %v18636_v63 = vand.u32 4294901760, %v15445_v26  ;;  %v15510_v22 = vand.u32 4294901760, %v6546_v2 }
 0x446   : > { %6917 = vmatpush.msrb.mxu0 %v18629_v28  ;;  %6782 = vmatpush.msra.mxu1 %v6781_v36  ;;  %v6458_v28 = vld [vmem:[#allocation2 + $0x30] sm:$0xff]  ;;  %v6547_v36 = vld [vmem:[%s17774_s7 + $0xa8] sm:$0xff] }
 0x447   : > { %6857 = vmatpush.msra.mxu2 %v15367_v60  ;;  %7082 = vmatpush.msrb.mxu3 %v7081_v57  ;;  %v15498_v35 = vand.u32 4294901760, %v6547_v36  ;;  %v18635_v57 = vand.u32 4294901760, %v15191_v21  ;;  %v18637_v21 = vand.u32 4294901760, %v15194_v4  ;;  %v18639_v4 = vand.u32 4294901760, %v15197_v48  ;;  %v6544_v48 = vld [vmem:[%s17774_s7 + $0x90] sm:$0xff] }
 0x448   : > { %6921 = vmatpush.msrb.mxu0 %v18631_v23  ;;  %6788 = vmatpush.msra.mxu1 %v6787_v51  ;;  %v7104_v51 = vsub.f32 %v15419_v1, %v18634_v34  ;;  %v15496_v23 = vsub.f32 %v6549_v54, %v15466_v45  ;;  %v15503_v34 = vsub.f32 %v6548_v40, %v15471_v58  ;;  %v18058_v54 = vand.u32 4294901760, %v15483_v16 }
 0x449   : > { %7029 = vmatpush.msrb.mxu2 %v15316_v37  ;;  %v6494_v37 = vadd.f32 %v6478_v30, %v6458_v28  ;;  %7088 = vmatpush.msrb.mxu3 %v7087_v52  ;;  %v7110_v28 = vsub.f32 %v15445_v26, %v18636_v63  ;;  %v6466_v52 = vld [vmem:[#allocation2 + $0x40] sm:$0xff] }
 0x44a   : > { %6925 = vmatpush.msrb.mxu0 %v18633_v47  ;;  %6794 = vmatpush.msra.mxu1 %v6793_v46  ;;  %v7099_v46 = vand.u32 4294901760, %v7098_v56  ;;  %v7105_v40 = vand.u32 4294901760, %v7104_v51  ;;  %v7127_v56 = vand.u32 4294901760, %v15496_v23  ;;  %v18059_v51 = vand.u32 4294901760, %v15503_v34 }
 0x44b   : > { %7031 = vmatpush.msrb.mxu2 %v15332_v31  ;;  %v6510_v47 = vmax.f32 %v6494_v37, 0.0  ;;  %7094 = vmatpush.msrb.mxu3 %v7093_v17  ;;  %v18638_v37 = vand.u32 4294901760, %v15464_v15  ;;  %v7111_v17 = vand.u32 4294901760, %v7110_v28 }
 0x44c   : > { %6929 = vmatpush.msrb.mxu0 %v18635_v57  ;;  %6800 = vmatpush.msra.mxu1 %v6799_v18  ;;  %v15521_v57 = vsub.f32 %v6547_v36, %v15498_v35  ;;  %v7122_v36 = vsub.f32 %v15483_v16, %v18058_v54 }
 0x44d   : > { %7033 = vmatpush.msrb.mxu2 %v15358_v59  ;;  %v7116_v18 = vsub.f32 %v15464_v15, %v18638_v37  ;;  %v15523_v63 = vand.u32 4294901760, %v6510_v47  ;;  %7100 = vmatpush.msrb.mxu3 %v7099_v46  ;;  %v6502_v37 = vadd.f32 %v6478_v30, %v6466_v52  ;;  %v7134_v30 = vsub.f32 %v15503_v34, %v18059_v51 }
 0x44e   : > { %6933 = vmatpush.msrb.mxu0 %v18637_v21  ;;  %6988 = vmatpush.msrb.mxu1 %v15147_v44  ;;  %v6545_v44 = vld [vmem:[%s17774_s7 + $0x98] sm:$0xff]  ;;  %v15537_v21 = vsub.f32 %v6546_v2, %v15510_v22  ;;  %v7128_v2 = vsub.f32 %v15496_v23, %v7127_v56  ;;  %v18060_v28 = vand.u32 4294901760, %v15521_v57 }
 0x44f   : > { %7035 = vmatpush.msrb.mxu2 %v15376_v38  ;;  %7106 = vmatpush.msrb.mxu3 %v7105_v40  ;;  %v7117_v46 = vand.u32 4294901760, %v7116_v18  ;;  %v15553_v54 = vsub.f32 %v6510_v47, %v15523_v63  ;;  %v15564_v40 = vand.u32 4294901760, %v6544_v48  ;;  %v7123_v47 = vand.u32 4294901760, %v7122_v36  ;;  %v6459_v36 = vld [vmem:[#allocation2] sm:$0xff] }
 0x450   : > { %6937 = vmatpush.msrb.mxu0 %v18639_v4  ;;  %6990 = vmatpush.msrb.mxu1 %v15149_v3  ;;  %v18640_v3 = vand.u32 4294901760, %v15214_v10  ;;  %v15545_v4 = vand.u32 4294901760, %v6545_v44  ;;  %v6543_v10 = vld [vmem:[%s17774_s7 + $0x88] sm:$0xff]  ;;  %v18061_v52 = vand.u32 4294901760, %v15537_v21  ;;  %v6518_v18 = vmax.f32 %v6502_v37, 0.0 }
 0x451   : > { %7037 = vmatpush.msrb.mxu2 %v15384_v7  ;;  %7112 = vmatpush.msrb.mxu3 %v7111_v17  ;;  %v6542_v17 = vld [vmem:[%s17774_s7 + $0x80] sm:$0xff]  ;;  %v7129_v37 = vand.u32 4294901760, %v7128_v2  ;;  %v15589_v51 = vsub.f32 %v6544_v48, %v15564_v40 }
 0x452   : > { %6941 = vmatpush.msrb.mxu0 %v18640_v3  ;;  %6992 = vmatpush.msrb.mxu1 %v15151_v12  ;;  %v18641_v12 = vand.u32 4294901760, %v15241_v0  ;;  %v6479_v3 = vperm.slane %v15457_v39, 1  ;;  %v18642_v0 = vand.u32 4294901760, %v15245_v53  ;;  %v7140_v53 = vsub.f32 %v15521_v57, %v18060_v28 }
 0x453   : > { %7039 = vmatpush.msrb.mxu2 %v15411_v29  ;;  %7118 = vmatpush.msrb.mxu3 %v7117_v46  ;;  %v7146_v46 = vsub.f32 %v15537_v21, %v18061_v52  ;;  %v15595_v2 = vand.u32 4294901760, %v6542_v17  ;;  %v15597_v28 = vand.u32 4294901760, %v6518_v18  ;;  %v18645_v52 = vand.u32 4294901760, %v15303_v55 }
 0x454   : > { %6945 = vmatpush.msrb.mxu0 %v18641_v12  ;;  %6994 = vmatpush.msrb.mxu1 %v15162_v50  ;;  %v15573_v50 = vsub.f32 %v6545_v44, %v15545_v4  ;;  %v15575_v12 = vand.u32 4294901760, %v6543_v10  ;;  %v18643_v44 = vand.u32 4294901760, %v15270_v32  ;;  %v6495_v32 = vadd.f32 %v6479_v3, %v6459_v36 }
 0x455   : > { %7041 = vmatpush.msrb.mxu2 %v15429_v27  ;;  %7124 = vmatpush.msrb.mxu3 %v7123_v47  ;;  %v7141_v47 = vand.u32 4294901760, %v7140_v53  ;;  %v15617_v36 = vsub.f32 %v6542_v17, %v15595_v2  ;;  %v18646_v53 = vand.u32 4294901760, %v15323_v6 }
 0x456   : > { %6949 = vmatpush.msrb.mxu0 %v18642_v0  ;;  %6996 = vmatpush.msrb.mxu1 %v15164_v20  ;;  %v6690_v20 = vand.u32 4294901760, %v15553_v54  ;;  %v7135_v0 = vand.u32 4294901760, %v7134_v30  ;;  %v7151_v48 = vand.u32 4294901760, %v15573_v50  ;;  %v15606_v30 = vsub.f32 %v6543_v10, %v15575_v12 }
 0x457   : > { %7043 = vmatpush.msrb.mxu2 %v15447_v19  ;;  %7130 = vmatpush.msrb.mxu3 %v7129_v37  ;;  %v6697_v10 = vsub.f32 %v6518_v18, %v15597_v28  ;;  %v6511_v37 = vmax.f32 %v6495_v32, 0.0  ;;  %v18647_v18 = vand.u32 4294901760, %v15330_v61 }
 0x458   : > { %6953 = vmatpush.msrb.mxu0 %v18643_v44  ;;  %6998 = vmatpush.msrb.mxu1 %v15166_v49  ;;  %v18644_v49 = vand.u32 4294901760, %v15285_v14  ;;  %v6691_v44 = vsub.f32 %v15553_v54, %v6690_v20  ;;  %v7157_v14 = vand.u32 4294901760, %v15589_v51  ;;  %v7163_v55 = vand.u32 4294901760, %v15606_v30 }
 0x459   : > { %7045 = vmatpush.msrb.mxu2 %v15466_v45  ;;  %7136 = vmatpush.msrb.mxu3 %v7135_v0  ;;  %v6698_v17 = vand.u32 4294901760, %v6697_v10  ;;  %v15635_v0 = vand.u32 4294901760, %v6511_v37 }
 0x45a   : > { %6957 = vmatpush.msrb.mxu0 %v18644_v49  ;;  %7000 = vmatpush.msrb.mxu1 %v15185_v33  ;;  %v7147_v33 = vand.u32 4294901760, %v7146_v46  ;;  %v7158_v6 = vsub.f32 %v15589_v51, %v7157_v14  ;;  %v18648_v46 = vand.u32 4294901760, %v15356_v41 }
 0x45b   : > { %7047 = vmatpush.msrb.mxu2 %v15471_v58  ;;  %7142 = vmatpush.msrb.mxu3 %v7141_v47  ;;  %v6699_v41 = vsub.f32 %v6697_v10, %v6698_v17  ;;  %v15652_v49 = vsub.f32 %v6511_v37, %v15635_v0  ;;  %v18651_v37 = vand.u32 4294901760, %v15345_v62 }
 0x45c   : > { %6961 = vmatpush.msrb.mxu0 %v18645_v52  ;;  %7002 = vmatpush.msrb.mxu1 %v15204_v43  ;;  %v7152_v43 = vsub.f32 %v15573_v50, %v7151_v48  ;;  %v6692_v52 = vand.u32 4294901760, %v6691_v44  ;;  %v7159_v32 = vand.u32 4294901760, %v7158_v6 }
 0x45d   : > { %7049 = vmatpush.msrb.mxu2 %v15498_v35  ;;  %7148 = vmatpush.msrb.mxu3 %v7147_v33  ;;  %v6700_v44 = vand.u32 4294901760, %v6699_v41  ;;  %v7062_v33 = vand.u32 4294901760, %v15652_v49 }
 0x45e   : > { %6965 = vmatpush.msrb.mxu0 %v18646_v53  ;;  %7004 = vmatpush.msrb.mxu1 %v15211_v11  ;;  %v7169_v11 = vand.u32 4294901760, %v15617_v36  ;;  %v7153_v61 = vand.u32 4294901760, %v7152_v43  ;;  %v18652_v53 = vld [vmem:[#allocation35_spill] sm:$0xff] }
 0x45f   : > { %7051 = vmatpush.msrb.mxu2 %v15510_v22  ;;  %6693 = vmatmul.f32.vlgmr.msra.gmra.mxu0 %v6692_v52  ;;  %v7063_v43 = vsub.f32 %v15652_v49, %v7062_v33  ;;  %v18654_v52 = vld [vmem:[#allocation34_spill] sm:$0xff] }
 0x460   : > { %6969 = vmatpush.msrb.mxu0 %v18647_v18  ;;  %7006 = vmatpush.msrb.mxu1 %v15229_v42  ;;  %v7164_v42 = vsub.f32 %v15606_v30, %v7163_v55  ;;  %v18655_v18 = vld [vmem:[#allocation36_spill] sm:$0xff] }
 0x461   : > { %6860 = vmatmul.f32.vlgmr.msra.gmra.mxu2 %v15553_v54  ;;  %6904 = vmatmul.f32.vlgmr.msra.gmra.mxu3 %v6690_v20  ;;  %v18649_v54 = vand.u32 4294901760, %v15367_v60  ;;  %v18650_v60 = vld [vmem:[#allocation33_spill] sm:$0xff]  ;;  %v7064_v6 = vand.u32 4294901760, %v7063_v43  ;;  %v6563_v43 = vld [vmem:[%s17774_s7 + $0x128] sm:$0xff] }
 0x462   : > { %6973 = vmatpush.msrb.mxu0 %v18648_v46  ;;  %7008 = vmatpush.msrb.mxu1 %v15254_v9  ;;  %v7170_v9 = vsub.f32 %v15617_v36, %v7169_v11  ;;  %v7165_v20 = vand.u32 4294901760, %v7164_v42  ;;  %v6480_v42 = vperm.slane %v15457_v39, 2 }
 0x463   : > { %7053 = vmatpush.msrb.mxu2 %v15545_v4  ;;  %7154 = vmatpush.msrb.mxu3 %v7153_v61 }
 0x464   : > { %6977 = vmatpush.msrb.mxu0 %v18649_v54  ;;  %7010 = vmatpush.msrb.mxu1 %v15266_v24  ;;  %v6467_v24 = vld [vmem:[#allocation2 + $0x20] sm:$0xff]  ;;  %v7171_v47 = vand.u32 4294901760, %v7170_v9  ;;  %v6565_v9 = vld [vmem:[%s17774_s7 + $0x138] sm:$0xff] }
 0x465   : > { %7055 = vmatpush.msrb.mxu2 %v15564_v40  ;;  %6802 = vmatmul.f32.vlgmr.msra.gmra.mxu1 %v15523_v63 }
 0x466   : > { %7184 = vmatpush.msra.mxu0 %v15345_v62  ;;  %7012 = vmatpush.msrb.mxu1 %v15282_v5  ;;  %v6503_v5 = vadd.f32 %v6479_v3, %v6467_v24  ;;  %v18656_v62 = vand.u32 4294901760, %v15395_v13 }
 0x467   : > { %7057 = vmatpush.msrb.mxu2 %v15575_v12  ;;  %7160 = vmatpush.msrb.mxu3 %v7159_v32  ;;  %v6460_v32 = vld [vmem:[#allocation2 + $0x58] sm:$0xff] }
 0x468   : > { %7187 = vmatpush.msra.mxu0 %v15370_v25  ;;  %7014 = vmatpush.msrb.mxu1 %v18650_v60  ;;  %v6519_v3 = vmax.f32 %v6503_v5, 0.0 }
 0x469   : > { %7059 = vmatpush.msrb.mxu2 %v15595_v2  ;;  %7166 = vmatpush.msrb.mxu3 %v7165_v20 }
 0x46a   : > { %6865 = vmatmul.f32.gmra.mxu2 %v6697_v10  ;;  %7190 = vmatpush.msra.mxu0 %v15395_v13  ;;  %v18653_v10 = vand.u32 4294901760, %v15370_v25  ;;  %v18657_v25 = vand.u32 4294901760, %v15409_v8  ;;  %v18658_v13 = vand.u32 4294901760, %v15419_v1 }
 0x46b   : > { %7289 = vmatpush.msra.mxu2 %v18651_v37  ;;  %7016 = vmatpush.msrb.mxu1 %v18652_v53 }
 0x46c   : > { %7172 = vmatpush.msrb.mxu3 %v7171_v47  ;;  %6701 = vmatmul.f32.gmra.mxu0 %v6700_v44  ;;  %v6496_v44 = vadd.f32 %v6480_v42, %v6460_v32 }
 0x46d   : > { %6910 = vmatmul.f32.gmra.mxu3 %v6698_v17  ;;  %7193 = vmatpush.msra.mxu0 %v15409_v8  ;;  %v15685_v17 = vand.u32 4294901760, %v6519_v3 }
 0x46e   : > { %7293 = vmatpush.msra.mxu2 %v18653_v10  ;;  %7360 = vmatpush.msra.mxu3 %v18654_v52 }
 0x46f   : > { %7018 = vmatpush.msrb.mxu1 %v18655_v18  ;;  %7196 = vmatpush.msra.mxu0 %v15419_v1  ;;  %v15696_v8 = vsub.f32 %v6519_v3, %v15685_v17 }
 0x470   : > { %6806 = vmatmul.f32.gmra.mxu1 %v15597_v28  ;;  %7297 = vmatpush.msra.mxu2 %v18656_v62  ;;  %v15884_v62 = vand.u32 4294901760, %v6563_v43 }
 0x471   : > { %7242 = vmatpush.msra.mxu1 %v18654_v52  ;;  %7362 = vmatpush.msra.mxu3 %v15332_v31  ;;  %v7070_v1 = vand.u32 4294901760, %v15696_v8 }
 0x472   : > { %7199 = vmatpush.msra.mxu0 %v15445_v26  ;;  %7301 = vmatpush.msra.mxu2 %v18657_v25 }
 0x473   : > { %7244 = vmatpush.msra.mxu1 %v15332_v31  ;;  %7364 = vmatpush.msra.mxu3 %v15358_v59  ;;  %v18659_v31 = vand.u32 4294901760, %v15445_v26  ;;  %v6572_v26 = vld [vmem:[%s17774_s7 + $0x170] sm:$0xff] }
 0x474   : > { %7065 = vmatmul.f32.vlgmr.msrb.gmra.mxu2 %v7064_v6  ;;  %7202 = vmatpush.msra.mxu0 %v15464_v15 }
 0x475   : > { %7246 = vmatpush.msra.mxu1 %v15358_v59  ;;  %7305 = vmatpush.msra.mxu2 %v18658_v13  ;;  %v18660_v59 = vand.u32 4294901760, %v15464_v15  ;;  %v7071_v15 = vsub.f32 %v15696_v8, %v7070_v1 }
 0x476   : > { %7366 = vmatpush.msra.mxu3 %v15376_v38  ;;  %6979 = vmatmul.f32.vlgmr.msrb.gmra.mxu0 %v15523_v63 }
 0x477   : > { %7174 = vmatmul.f32.vlgmr.msrb.gmra.mxu3 %v15635_v0  ;;  %7205 = vmatpush.msra.mxu0 %v15483_v16 }
 0x478   : > { %7248 = vmatpush.msra.mxu1 %v15376_v38  ;;  %7309 = vmatpush.msra.mxu2 %v18659_v31  ;;  %v18661_v38 = vand.u32 4294901760, %v15483_v16  ;;  %v18664_v16 = vand.u32 4294901760, %v15537_v21  ;;  %v6561_v31 = vld [vmem:[%s17774_s7 + $0x118] sm:$0xff] }
 0x479   : > { %7368 = vmatpush.msra.mxu3 %v15384_v7  ;;  %7020 = vmatmul.f32.vlgmr.msrb.gmra.mxu1 %v15523_v63  ;;  %v6569_v63 = vld [vmem:[%s17774_s7 + $0x158] sm:$0xff] }
 0x47a   : > { %7208 = vmatpush.msra.mxu0 %v15496_v23  ;;  %7250 = vmatpush.msra.mxu1 %v15384_v7  ;;  %v18662_v7 = vand.u32 4294901760, %v15503_v34 }
 0x47b   : > { %7313 = vmatpush.msra.mxu2 %v18660_v59  ;;  %7370 = vmatpush.msra.mxu3 %v15411_v29 }
 0x47c   : > { %7211 = vmatpush.msra.mxu0 %v15503_v34  ;;  %7252 = vmatpush.msra.mxu1 %v15411_v29  ;;  %v6573_v29 = vld [vmem:[%s17774_s7 + $0x178] sm:$0xff]  ;;  %v15750_v34 = vand.u32 4294901760, %v6572_v26 }
 0x47d   : > { %7317 = vmatpush.msra.mxu2 %v18661_v38  ;;  %7372 = vmatpush.msra.mxu3 %v15429_v27  ;;  %v15740_v23 = vand.u32 4294901760, %v6573_v29 }
 0x47e   : > { %7214 = vmatpush.msra.mxu0 %v15521_v57  ;;  %7254 = vmatpush.msra.mxu1 %v15429_v27  ;;  %v7072_v27 = vand.u32 4294901760, %v7071_v15 }
 0x47f   : > { %7321 = vmatpush.msra.mxu2 %v7127_v56  ;;  %7374 = vmatpush.msra.mxu3 %v15447_v19 }
 0x480   : > { %7217 = vmatpush.msra.mxu0 %v15537_v21  ;;  %7256 = vmatpush.msra.mxu1 %v15447_v19  ;;  %v18663_v19 = vand.u32 4294901760, %v15521_v57  ;;  %v6570_v57 = vld [vmem:[%s17774_s7 + $0x160] sm:$0xff] }
 0x481   : > { %7325 = vmatpush.msra.mxu2 %v18662_v7  ;;  %7376 = vmatpush.msra.mxu3 %v15466_v45  ;;  %v15777_v21 = vand.u32 4294901760, %v6570_v57  ;;  %v6468_v7 = vld [vmem:[#allocation2 + $0x10] sm:$0xff] }
 0x482   : > { %6983 = vmatmul.f32.gmra.mxu0 %v15597_v28  ;;  %7258 = vmatpush.msra.mxu1 %v15466_v45  ;;  %v6571_v45 = vld [vmem:[%s17774_s7 + $0x168] sm:$0xff] }
 0x483   : > { %7220 = vmatpush.msra.mxu0 %v15573_v50  ;;  %7329 = vmatpush.msra.mxu2 %v18663_v19  ;;  %v15755_v56 = vand.u32 4294901760, %v6571_v45  ;;  %v15781_v50 = vand.u32 4294901760, %v6569_v63  ;;  %v15804_v61 = vsub.f32 %v6570_v57, %v15777_v21 }
 0x484   : > { %7378 = vmatpush.msra.mxu3 %v15471_v58  ;;  %7260 = vmatpush.msra.mxu1 %v15471_v58  ;;  %v15758_v58 = vsub.f32 %v6573_v29, %v15740_v23 }
 0x485   : > { %7223 = vmatpush.msra.mxu0 %v15589_v51  ;;  %7333 = vmatpush.msra.mxu2 %v18664_v16  ;;  %v15785_v46 = vsub.f32 %v6571_v45, %v15755_v56  ;;  %v18074_v41 = vand.u32 4294901760, %v15804_v61  ;;  %v15916_v16 = vand.u32 4294901760, %v6561_v31 }
 0x486   : > { %7380 = vmatpush.msra.mxu3 %v15498_v35  ;;  %7073 = vmatmul.f32.gmra.mxu2 %v7072_v27 }
 0x487   : > { %7226 = vmatpush.msra.mxu0 %v15606_v30  ;;  %7262 = vmatpush.msra.mxu1 %v15498_v35  ;;  %v15772_v35 = vsub.f32 %v6572_v26, %v15750_v34  ;;  %v7470_v10 = vsub.f32 %v15804_v61, %v18074_v41  ;;  %v6560_v26 = vld [vmem:[%s17774_s7 + $0x110] sm:$0xff] }
 0x488   : > { %7337 = vmatpush.msra.mxu2 %v7151_v48  ;;  %7382 = vmatpush.msra.mxu3 %v15510_v22  ;;  %v7451_v48 = vand.u32 4294901760, %v15758_v58 }
 0x489   : > { %7178 = vmatmul.f32.gmra.mxu3 %v15685_v17  ;;  %7229 = vmatpush.msra.mxu0 %v15617_v36  ;;  %v7457_v51 = vand.u32 4294901760, %v15772_v35  ;;  %v7471_v59 = vand.u32 4294901760, %v7470_v10  ;;  %v6558_v10 = vld [vmem:[%s17774_s7 + $0x100] sm:$0xff] }
 0x48a   : > { %7264 = vmatpush.msra.mxu1 %v15510_v22  ;;  %7341 = vmatpush.msra.mxu2 %v7157_v14  ;;  %v6568_v22 = vld [vmem:[%s17774_s7 + $0x150] sm:$0xff]  ;;  %v7452_v30 = vsub.f32 %v15758_v58, %v7451_v48 }
 0x48b   : > { %7384 = vmatpush.msra.mxu3 %v15545_v4  ;;  %7024 = vmatmul.f32.gmra.mxu1 %v15597_v28  ;;  %v6567_v28 = vld [vmem:[%s17774_s7 + $0x148] sm:$0xff]  ;;  %v15801_v14 = vand.u32 4294901760, %v6568_v22  ;;  %v7458_v36 = vsub.f32 %v15772_v35, %v7457_v51 }
 0x48c   : > { %7232 = vmatmul.f32.vlgmr.msra.gmra.mxu0 %v15652_v49  ;;  %7266 = vmatpush.msra.mxu1 %v15545_v4  ;;  %v6566_v4 = vld [vmem:[%s17774_s7 + $0x140] sm:$0xff]  ;;  %v15822_v54 = vand.u32 4294901760, %v6567_v28  ;;  %v7453_v24 = vand.u32 4294901760, %v7452_v30  ;;  %v15932_v30 = vand.u32 4294901760, %v6560_v26 }
 0x48d   : > { %7401 = vmatpush.msrb.mxu0 %v15740_v23  ;;  %7345 = vmatpush.msra.mxu2 %v7163_v55  ;;  %v15817_v55 = vsub.f32 %v6569_v63, %v15781_v50  ;;  %v15838_v20 = vsub.f32 %v6568_v22, %v15801_v14  ;;  %v7459_v37 = vand.u32 4294901760, %v7458_v36  ;;  %v6562_v49 = vld [vmem:[%s17774_s7 + $0x120] sm:$0xff]  ;;  %v15920_v63 = vsub.f32 %v6563_v43, %v15884_v62 }
 0x48e   : > { %7386 = vmatpush.msra.mxu3 %v15564_v40  ;;  %7268 = vmatpush.msra.mxu1 %v15564_v40  ;;  %v7463_v40 = vand.u32 4294901760, %v15785_v46  ;;  %v15856_v5 = vsub.f32 %v6567_v28, %v15822_v54  ;;  %v15900_v15 = vand.u32 4294901760, %v6562_v49  ;;  %v15929_v28 = vadd.f32 %v6480_v42, %v6468_v7  ;;  %v6559_v42 = vld [vmem:[%s17774_s7 + $0x108] sm:$0xff] }
 0x48f   : > { %7403 = vmatpush.msrb.mxu0 %v15750_v34  ;;  %7349 = vmatpush.msra.mxu2 %v7169_v11  ;;  %v15829_v11 = vand.u32 4294901760, %v6566_v4  ;;  %v18071_v47 = vand.u32 4294901760, %v15817_v55  ;;  %v18070_v52 = vand.u32 4294901760, %v15838_v20  ;;  %v15965_v43 = vand.u32 4294901760, %v6559_v42 }
 0x490   : > { %7388 = vmatpush.msra.mxu3 %v15575_v12  ;;  %7351 = vmatmul.f32.vlgmr.msra.gmra.mxu2 %v15635_v0  ;;  %v7464_v60 = vsub.f32 %v15785_v46, %v7463_v40  ;;  %v18069_v6 = vand.u32 4294901760, %v15856_v5  ;;  %v15986_v7 = vand.u32 4294901760, %v6558_v10 }
 0x491   : > { %7405 = vmatpush.msrb.mxu0 %v15755_v56  ;;  %7556 = vmatpush.msrb.mxu2 %v15758_v58  ;;  %v15861_v53 = vsub.f32 %v6566_v4, %v15829_v11  ;;  %v7476_v18 = vsub.f32 %v15817_v55, %v18071_v47  ;;  %v7482_v38 = vsub.f32 %v15838_v20, %v18070_v52  ;;  %v6584_v47 = vld [vmem:[%s17774_s7 + $0x1d0] sm:$0xff] }
 0x492   : > { %7270 = vmatpush.msra.mxu1 %v15575_v12  ;;  %7390 = vmatpush.msra.mxu3 %v15595_v2  ;;  %v6564_v12 = vld [vmem:[%s17774_s7 + $0x130] sm:$0xff]  ;;  %v7465_v3 = vand.u32 4294901760, %v7464_v60  ;;  %v7488_v45 = vsub.f32 %v15856_v5, %v18069_v6  ;;  %v18063_v60 = vand.u32 4294901760, %v15920_v63 }
 0x493   : > { %7392 = vmatmul.f32.vlgmr.msra.gmra.mxu3 %v15635_v0  ;;  %7407 = vmatpush.msrb.mxu0 %v15777_v21  ;;  %v15853_v0 = vand.u32 4294901760, %v6565_v9  ;;  %v18068_v13 = vand.u32 4294901760, %v15861_v53  ;;  %v7477_v27 = vand.u32 4294901760, %v7476_v18  ;;  %v7483_v4 = vand.u32 4294901760, %v7482_v38 }
 0x494   : > { %7559 = vmatpush.msrb.mxu2 %v15772_v35  ;;  %7614 = vmatpush.msrb.mxu3 %v15740_v23  ;;  %v15972_v18 = vsub.f32 %v6560_v26, %v15932_v30  ;;  %v6581_v35 = vld [vmem:[%s17774_s7 + $0x1b8] sm:$0xff] }
 0x495   : > { %7272 = vmatpush.msra.mxu1 %v15595_v2  ;;  %7409 = vmatpush.msrb.mxu0 %v15781_v50  ;;  %v15872_v2 = vand.u32 4294901760, %v6564_v12  ;;  %v15888_v25 = vsub.f32 %v6565_v9, %v15853_v0  ;;  %v7494_v22 = vsub.f32 %v15861_v53, %v18068_v13  ;;  %v7489_v9 = vand.u32 4294901760, %v7488_v45 }
 0x496   : > { %7276 = vmatmul.f32.vlgmr.msra.gmra.mxu1 %v7062_v33  ;;  %7562 = vmatpush.msrb.mxu2 %v15785_v46  ;;  %v6512_v33 = vmax.f32 %v6496_v44, 0.0  ;;  %v6520_v44 = vmax.f32 %v15929_v28, 0.0  ;;  %v15998_v28 = vsub.f32 %v6559_v42, %v15965_v43  ;;  %v6580_v46 = vld [vmem:[%s17774_s7 + $0x1b0] sm:$0xff] }
 0x497   : > { %7454 = vmatpush.msrb.mxu1 %v7453_v24  ;;  %7616 = vmatpush.msrb.mxu3 %v15750_v34  ;;  %v15903_v29 = vsub.f32 %v6564_v12, %v15872_v2  ;;  %v18066_v57 = vand.u32 4294901760, %v15888_v25  ;;  %v6589_v12 = vld [vmem:[%s17774_s7 + $0x1f8] sm:$0xff] }
 0x498   : > { %7411 = vmatpush.msrb.mxu0 %v15801_v14  ;;  %7565 = vmatpush.msrb.mxu2 %v15804_v61  ;;  %v15909_v19 = vand.u32 4294901760, %v6512_v33  ;;  %v15982_v38 = vand.u32 4294901760, %v6589_v12  ;;  %v15991_v26 = vand.u32 4294901760, %v6520_v44 }
 0x499   : > { %7460 = vmatpush.msrb.mxu1 %v7459_v37  ;;  %7618 = vmatpush.msrb.mxu3 %v15755_v56  ;;  %v18064_v32 = vand.u32 4294901760, %v15903_v29  ;;  %v7500_v24 = vsub.f32 %v15888_v25, %v18066_v57 }
 0x49a   : > { %7355 = vmatmul.f32.gmra.mxu2 %v15685_v17  ;;  %7413 = vmatpush.msrb.mxu0 %v15822_v54  ;;  %v15945_v36 = vsub.f32 %v6512_v33, %v15909_v19 }
 0x49b   : > { %7466 = vmatpush.msrb.mxu1 %v7465_v3  ;;  %7568 = vmatpush.msrb.mxu2 %v15817_v55  ;;  %v7506_v37 = vsub.f32 %v15903_v29, %v18064_v32  ;;  %v7501_v33 = vand.u32 4294901760, %v7500_v24  ;;  %v6587_v24 = vld [vmem:[%s17774_s7 + $0x1e8] sm:$0xff]  ;;  %v16024_v32 = vsub.f32 %v6520_v44, %v15991_v26 }
 0x49c   : > { %7620 = vmatpush.msrb.mxu3 %v15777_v21  ;;  %7237 = vmatmul.f32.gmra.mxu0 %v15696_v8  ;;  %v15953_v8 = vsub.f32 %v6561_v31, %v15916_v16  ;;  %v7512_v31 = vsub.f32 %v15920_v63, %v18063_v60  ;;  %v16021_v60 = vsub.f32 %v6558_v10, %v15986_v7  ;;  %v16034_v57 = vand.u32 4294901760, %v6587_v24  ;;  %v6585_v10 = vld [vmem:[%s17774_s7 + $0x1d8] sm:$0xff] }
 0x49d   : > { %7396 = vmatmul.f32.gmra.mxu3 %v15685_v17  ;;  %7415 = vmatpush.msrb.mxu0 %v15829_v11  ;;  %v15936_v17 = vsub.f32 %v6562_v49, %v15900_v15  ;;  %v18077_v49 = vand.u32 4294901760, %v15945_v36  ;;  %v7507_v45 = vand.u32 4294901760, %v7506_v37  ;;  %v16014_v37 = vsub.f32 %v6589_v12, %v15982_v38 }
 0x49e   : > { %7472 = vmatpush.msrb.mxu1 %v7471_v59  ;;  %7571 = vmatpush.msrb.mxu2 %v15838_v20  ;;  %v18065_v59 = vand.u32 4294901760, %v15953_v8  ;;  %v18076_v6 = vand.u32 4294901760, %v16024_v32  ;;  %v16059_v52 = vand.u32 4294901760, %v6585_v10 }
 0x49f   : > { %7622 = vmatpush.msrb.mxu3 %v15781_v50  ;;  %7282 = vmatmul.f32.gmra.mxu1 %v7070_v1  ;;  %v7495_v1 = vand.u32 4294901760, %v7494_v22  ;;  %v18062_v3 = vand.u32 4294901760, %v15936_v17 }
 0x4a0   : > { %7417 = vmatpush.msrb.mxu0 %v15853_v0  ;;  %7478 = vmatpush.msrb.mxu1 %v7477_v27  ;;  %v6588_v27 = vld [vmem:[%s17774_s7 + $0x1f0] sm:$0xff]  ;;  %v7524_v42 = vsub.f32 %v15953_v8, %v18065_v59  ;;  %v18072_v59 = vand.u32 4294901760, %v15998_v28  ;;  %v16090_v58 = vsub.f32 %v6585_v10, %v16059_v52 }
 0x4a1   : > { %7574 = vmatpush.msrb.mxu2 %v15856_v5  ;;  %7624 = vmatpush.msrb.mxu3 %v15801_v14  ;;  %v7518_v22 = vsub.f32 %v15936_v17, %v18062_v3  ;;  %v16016_v3 = vand.u32 4294901760, %v6588_v27 }
 0x4a2   : > { %7419 = vmatpush.msrb.mxu0 %v15872_v2  ;;  %7484 = vmatpush.msrb.mxu1 %v7483_v4  ;;  %v18067_v4 = vand.u32 4294901760, %v15972_v18 }
 0x4a3   : > { %7577 = vmatpush.msrb.mxu2 %v15861_v53  ;;  %7626 = vmatpush.msrb.mxu3 %v15822_v54  ;;  %18665 = vst [vmem:[#allocation33_spill] sm:$0xff] %v16016_v3  ;;  %v7519_v12 = vand.u32 4294901760, %v7518_v22  ;;  %v18073_v22 = vand.u32 4294901760, %v16014_v37 }
 0x4a4   : > { %7421 = vmatpush.msrb.mxu0 %v15884_v62  ;;  %7490 = vmatpush.msrb.mxu1 %v7489_v9  ;;  %v7435_v9 = vsub.f32 %v15945_v36, %v18077_v49 }
 0x4a5   : > { %7580 = vmatpush.msrb.mxu2 %v15888_v25  ;;  %7628 = vmatpush.msrb.mxu3 %v15829_v11 }
 0x4a6   : > { %7423 = vmatpush.msrb.mxu0 %v15900_v15  ;;  %7496 = vmatpush.msrb.mxu1 %v7495_v1  ;;  %v7513_v1 = vand.u32 4294901760, %v7512_v31  ;;  %v7530_v31 = vsub.f32 %v15972_v18, %v18067_v4  ;;  %v7436_v44 = vand.u32 4294901760, %v7435_v9  ;;  %v16044_v4 = vsub.f32 %v6588_v27, %v16016_v3 }
 0x4a7   : > { %7583 = vmatpush.msrb.mxu2 %v15903_v29  ;;  %7630 = vmatpush.msrb.mxu3 %v15853_v0  ;;  %v18075_v9 = vand.u32 4294901760, %v16021_v60  ;;  %v16057_v27 = vsub.f32 %v6587_v24, %v16034_v57 }
 0x4a8   : > { %7425 = vmatpush.msrb.mxu0 %v15916_v16  ;;  %7502 = vmatpush.msrb.mxu1 %v7501_v33  ;;  %v6586_v33 = vld [vmem:[%s17774_s7 + $0x1e0] sm:$0xff] }
 0x4a9   : > { %7586 = vmatpush.msrb.mxu2 %v15920_v63  ;;  %7632 = vmatpush.msrb.mxu3 %v15872_v2  ;;  %v16046_v13 = vand.u32 4294901760, %v6586_v33  ;;  %v18079_v41 = vand.u32 4294901760, %v16057_v27 }
 0x4aa   : > { %7427 = vmatpush.msrb.mxu0 %v15932_v30  ;;  %7508 = vmatpush.msrb.mxu1 %v7507_v45  ;;  %v7525_v45 = vand.u32 4294901760, %v7524_v42  ;;  %v7536_v42 = vsub.f32 %v15998_v28, %v18072_v59  ;;  %v6583_v59 = vld [vmem:[%s17774_s7 + $0x1c8] sm:$0xff] }
 0x4ab   : > { %7589 = vmatpush.msrb.mxu2 %v15936_v17  ;;  %7634 = vmatpush.msrb.mxu3 %v15884_v62  ;;  %18666 = vst [vmem:[#allocation35_spill] sm:$0xff] %v16046_v13  ;;  %v16071_v24 = vsub.f32 %v6586_v33, %v16046_v13 }
 0x4ac   : > { %7429 = vmatpush.msrb.mxu0 %v15965_v43  ;;  %7514 = vmatpush.msrb.mxu1 %v7513_v1  ;;  %v7531_v1 = vand.u32 4294901760, %v7530_v31  ;;  %v18078_v31 = vand.u32 4294901760, %v16044_v4  ;;  %v7537_v33 = vand.u32 4294901760, %v7536_v42 }
 0x4ad   : > { %7592 = vmatpush.msrb.mxu2 %v15953_v8  ;;  %7636 = vmatpush.msrb.mxu3 %v15900_v15 }
 0x4ae   : > { %7431 = vmatpush.msrb.mxu0 %v15986_v7  ;;  %7520 = vmatpush.msrb.mxu1 %v7519_v12  ;;  %v7824_v12 = vsub.f32 %v16014_v37, %v18073_v22  ;;  %v16085_v22 = vand.u32 4294901760, %v6584_v47  ;;  %v7830_v10 = vsub.f32 %v16044_v4, %v18078_v31  ;;  %v7836_v31 = vsub.f32 %v16057_v27, %v18079_v41 }
 0x4af   : > { %7595 = vmatpush.msrb.mxu2 %v15972_v18  ;;  %7638 = vmatpush.msrb.mxu3 %v15916_v16  ;;  %v18670_v41 = vand.u32 4294901760, %v16071_v24 }
 0x4b0   : > { %7437 = vmatmul.f32.vlgmr.msrb.gmra.mxu0 %v7436_v44  ;;  %7526 = vmatpush.msrb.mxu1 %v7525_v45  ;;  %v7542_v44 = vsub.f32 %v16021_v60, %v18075_v9  ;;  %v7443_v45 = vsub.f32 %v16024_v32, %v18076_v6  ;;  %18667 = vst [vmem:[#allocation34_spill] sm:$0xff] %v16085_v22  ;;  %v16098_v9 = vand.u32 4294901760, %v6583_v59 }
 0x4b1   : > { %7661 = vmatpush.msra.mxu0 %v7451_v48  ;;  %7598 = vmatpush.msrb.mxu2 %v15998_v28  ;;  %v6582_v48 = vld [vmem:[%s17774_s7 + $0x1c0] sm:$0xff]  ;;  %v16113_v49 = vsub.f32 %v6584_v47, %v16085_v22  ;;  %v18669_v47 = vand.u32 4294901760, %v15804_v61  ;;  %v7842_v42 = vsub.f32 %v16071_v24, %v18670_v41  ;;  %v18671_v41 = vand.u32 4294901760, %v15817_v55 }
 0x4b2   : > { %7640 = vmatpush.msrb.mxu3 %v15932_v30  ;;  %7532 = vmatpush.msrb.mxu1 %v7531_v1  ;;  %v7825_v1 = vand.u32 4294901760, %v7824_v12  ;;  %v7444_v6 = vand.u32 4294901760, %v7443_v45  ;;  %v16115_v12 = vand.u32 4294901760, %v6582_v48  ;;  %v16132_v45 = vand.u32 4294901760, %v6581_v35 }
 0x4b3   : > { %7665 = vmatpush.msra.mxu0 %v7457_v51  ;;  %7601 = vmatpush.msrb.mxu2 %v16021_v60  ;;  %v7543_v51 = vand.u32 4294901760, %v7542_v44  ;;  %v16130_v44 = vsub.f32 %v6583_v59, %v16098_v9 }
 0x4b4   : > { %7642 = vmatpush.msrb.mxu3 %v15965_v43  ;;  %7604 = vmatmul.f32.vlgmr.msrb.gmra.mxu2 %v15945_v36 }
 0x4b5   : > { %7669 = vmatpush.msra.mxu0 %v7463_v40  ;;  %7773 = vmatpush.msra.mxu2 %v15982_v38  ;;  %v18668_v40 = vand.u32 4294901760, %v15945_v36  ;;  %v6579_v36 = vld [vmem:[%s17774_s7 + $0x1a8] sm:$0xff] }
 0x4b6   : > { %7538 = vmatpush.msrb.mxu1 %v7537_v33  ;;  %7644 = vmatpush.msrb.mxu3 %v15986_v7  ;;  %v7831_v33 = vand.u32 4294901760, %v7830_v10  ;;  %v7837_v10 = vand.u32 4294901760, %v7836_v31  ;;  %v16163_v55 = vand.u32 4294901760, %v6579_v36  ;;  %v18673_v31 = vand.u32 4294901760, %v15838_v20 }
 0x4b7   : > { %7648 = vmatmul.f32.vlgmr.msrb.gmra.mxu3 %v18668_v40  ;;  %7673 = vmatpush.msra.mxu0 %v18669_v47  ;;  %v16144_v40 = vsub.f32 %v6582_v48, %v16115_v12  ;;  %v16146_v47 = vand.u32 4294901760, %v6580_v46 }
 0x4b8   : > { %7775 = vmatpush.msra.mxu2 %v16016_v3  ;;  %7826 = vmatpush.msra.mxu3 %v7825_v1  ;;  %v6461_v1 = vld [vmem:[#allocation2 + $0x18] sm:$0xff]  ;;  %v18672_v3 = vand.u32 4294901760, %v16090_v58 }
 0x4b9   : > { %7544 = vmatpush.msrb.mxu1 %v7543_v51  ;;  %7445 = vmatmul.f32.gmra.mxu0 %v7444_v6  ;;  %v6578_v6 = vld [vmem:[%s17774_s7 + $0x1a0] sm:$0xff]  ;;  %v16161_v51 = vsub.f32 %v6581_v35, %v16132_v45  ;;  %v18675_v35 = vand.u32 4294901760, %v16113_v49  ;;  %v16179_v20 = vsub.f32 %v6580_v46, %v16146_v47  ;;  %v16192_v46 = vsub.f32 %v6579_v36, %v16163_v55 }
 0x4ba   : > { %7546 = vmatmul.f32.vlgmr.msrb.gmra.mxu1 %v15909_v19  ;;  %7677 = vmatpush.msra.mxu0 %v18671_v41  ;;  %v7848_v61 = vsub.f32 %v16090_v58, %v18672_v3  ;;  %v7843_v3 = vand.u32 4294901760, %v7842_v42  ;;  %v6577_v41 = vld [vmem:[%s17774_s7 + $0x198] sm:$0xff]  ;;  %v16181_v42 = vand.u32 4294901760, %v6578_v6  ;;  %v18680_v36 = vand.u32 4294901760, %v16144_v40 }
 0x4bb   : > { %7732 = vmatpush.msra.mxu1 %v15740_v23  ;;  %7777 = vmatpush.msra.mxu2 %v16034_v57  ;;  %v18674_v23 = vperm.slane %v15457_v39, 3  ;;  %v7854_v48 = vsub.f32 %v16113_v49, %v18675_v35  ;;  %v18086_v35 = vand.u32 4294901760, %v16179_v20 }
 0x4bc   : > { %7832 = vmatpush.msra.mxu3 %v7831_v33  ;;  %7681 = vmatpush.msra.mxu0 %v18673_v31  ;;  %v7849_v31 = vand.u32 4294901760, %v7848_v61  ;;  %v16194_v33 = vand.u32 4294901760, %v6577_v41  ;;  %v6576_v61 = vld [vmem:[%s17774_s7 + $0x190] sm:$0xff] }
 0x4bd   : > { %v6497_v59 = vadd.f32 %v18674_v23, %v6461_v1  ;;  %7734 = vmatpush.msra.mxu1 %v15750_v34  ;;  %7779 = vmatpush.msra.mxu2 %v16046_v13  ;;  %v18676_v1 = vand.u32 4294901760, %v15856_v5  ;;  %v18677_v34 = vand.u32 4294901760, %v16130_v44  ;;  %v16209_v13 = vsub.f32 %v6578_v6, %v16181_v42 }
 0x4be   : > { %7838 = vmatpush.msra.mxu3 %v7837_v10  ;;  %7609 = vmatmul.f32.gmra.mxu2 %v16024_v32  ;;  %v18679_v10 = vand.u32 4294901760, %v15861_v53  ;;  %v16216_v53 = vand.u32 4294901760, %v6576_v61 }
 0x4bf   : > { %7685 = vmatpush.msra.mxu0 %v18676_v1  ;;  %7736 = vmatpush.msra.mxu1 %v15755_v56  ;;  %v7860_v23 = vsub.f32 %v16130_v44, %v18677_v34  ;;  %v6513_v5 = vmax.f32 %v6497_v59, 0.0  ;;  %v18678_v56 = vand.u32 4294901760, %v16024_v32  ;;  %v7855_v1 = vand.u32 4294901760, %v7854_v48  ;;  %v6575_v59 = vld [vmem:[%s17774_s7 + $0x188] sm:$0xff] }
 0x4c0   : > { %7781 = vmatpush.msra.mxu2 %v16059_v52  ;;  %7844 = vmatpush.msra.mxu3 %v7843_v3  ;;  %v7866_v34 = vsub.f32 %v16144_v40, %v18680_v36  ;;  %v18681_v48 = vand.u32 4294901760, %v16161_v51  ;;  %v18682_v36 = vand.u32 4294901760, %v15888_v25 }
 0x4c1   : > { %7654 = vmatmul.f32.gmra.mxu3 %v18678_v56  ;;  %7689 = vmatpush.msra.mxu0 %v18679_v10  ;;  %v7861_v32 = vand.u32 4294901760, %v7860_v23  ;;  %v16224_v56 = vsub.f32 %v6577_v41, %v16194_v33  ;;  %v6469_v10 = vld [vmem:[#allocation2 + $0x38] sm:$0xff]  ;;  %v16234_v23 = vand.u32 4294901760, %v6513_v5  ;;  %v7878_v41 = vsub.f32 %v16179_v20, %v18086_v35 }
 0x4c2   : > { %7738 = vmatpush.msra.mxu1 %v15777_v21  ;;  %7783 = vmatpush.msra.mxu2 %v16085_v22  ;;  %v7872_v3 = vsub.f32 %v16161_v51, %v18681_v48  ;;  %v6574_v21 = vld [vmem:[%s17774_s7 + $0x180] sm:$0xff]  ;;  %v7867_v48 = vand.u32 4294901760, %v7866_v34  ;;  %v18683_v22 = vand.u32 4294901760, %v15903_v29  ;;  %v18685_v35 = vand.u32 4294901760, %v16192_v46 }
 0x4c3   : > { %7850 = vmatpush.msra.mxu3 %v7849_v31  ;;  %7550 = vmatmul.f32.gmra.mxu1 %v15991_v26  ;;  %v16232_v31 = vand.u32 4294901760, %v6575_v59  ;;  %v16247_v25 = vand.u32 4294901760, %v6574_v21  ;;  %v7895_v29 = vand.u32 4294901760, %v16224_v56 }
 0x4c4   : > { %7693 = vmatpush.msra.mxu0 %v18682_v36  ;;  %7740 = vmatpush.msra.mxu1 %v15781_v50  ;;  %v16245_v50 = vsub.f32 %v6576_v61, %v16216_v53  ;;  %v18684_v36 = vperm.slane %v15457_v39, 3  ;;  %v7873_v34 = vand.u32 4294901760, %v7872_v3  ;;  %v7884_v6 = vsub.f32 %v16192_v46, %v18685_v35 }
 0x4c5   : > { %7785 = vmatpush.msra.mxu2 %v16098_v9  ;;  %7856 = vmatpush.msra.mxu3 %v7855_v1  ;;  %v16263_v61 = vsub.f32 %v6513_v5, %v16234_v23  ;;  %v18687_v3 = vand.u32 4294901760, %v16209_v13 }
 0x4c6   : > { %7697 = vmatpush.msra.mxu0 %v18683_v22  ;;  %7742 = vmatpush.msra.mxu1 %v15801_v14  ;;  %v6505_v1 = vadd.f32 %v18684_v36, %v6469_v10  ;;  %v18686_v14 = vand.u32 4294901760, %v15920_v63  ;;  %v16260_v22 = vsub.f32 %v6575_v59, %v16232_v31  ;;  %v18688_v10 = vand.u32 4294901760, %v15936_v17 }
 0x4c7   : > { %7787 = vmatpush.msra.mxu2 %v16115_v12  ;;  %7862 = vmatpush.msra.mxu3 %v7861_v32  ;;  %v7879_v32 = vand.u32 4294901760, %v7878_v41  ;;  %v7890_v35 = vsub.f32 %v16209_v13, %v18687_v3  ;;  %v16274_v63 = vsub.f32 %v6574_v21, %v16247_v25  ;;  %v7885_v59 = vand.u32 4294901760, %v7884_v6 }
 0x4c8   : > { %7701 = vmatpush.msra.mxu0 %v18686_v14  ;;  %7744 = vmatpush.msra.mxu1 %v15822_v54  ;;  %v7901_v54 = vand.u32 4294901760, %v16245_v50  ;;  %v6521_v5 = vmax.f32 %v6505_v1, 0.0  ;;  %v18689_v41 = vand.u32 4294901760, %v15953_v8  ;;  %v7806_v17 = vand.u32 4294901760, %v16263_v61 }
 0x4c9   : > { %7789 = vmatpush.msra.mxu2 %v16132_v45  ;;  %7868 = vmatpush.msra.mxu3 %v7867_v48  ;;  %v7896_v48 = vsub.f32 %v16224_v56, %v7895_v29  ;;  %v7891_v21 = vand.u32 4294901760, %v7890_v35  ;;  %v18690_v36 = vand.u32 4294901760, %v15972_v18  ;;  %v7913_v6 = vand.u32 4294901760, %v16274_v63 }
 0x4ca   : > { %7705 = vmatpush.msra.mxu0 %v18688_v10  ;;  %7746 = vmatpush.msra.mxu1 %v15829_v11  ;;  %v7907_v11 = vand.u32 4294901760, %v16260_v22  ;;  %v7902_v8 = vsub.f32 %v16245_v50, %v7901_v54  ;;  %v7807_v18 = vsub.f32 %v16263_v61, %v7806_v17  ;;  %v18692_v14 = vand.u32 4294901760, %v16021_v60 }
 0x4cb   : > { %7791 = vmatpush.msra.mxu2 %v16146_v47  ;;  %7874 = vmatpush.msra.mxu3 %v7873_v34  ;;  %v7897_v1 = vand.u32 4294901760, %v7896_v48  ;;  %v18691_v34 = vand.u32 4294901760, %v15998_v28  ;;  %v18694_v10 = vand.u32 4294901760, %v16044_v4 }
 0x4cc   : > { %7709 = vmatpush.msra.mxu0 %v18689_v41  ;;  %7748 = vmatpush.msra.mxu1 %v15853_v0  ;;  %v16293_v0 = vand.u32 4294901760, %v6521_v5  ;;  %v7903_v28 = vand.u32 4294901760, %v7902_v8  ;;  %v7808_v60 = vand.u32 4294901760, %v7807_v18  ;;  %v18698_v41 = vand.u32 4294901760, %v16090_v58 }
 0x4cd   : > { %7793 = vmatpush.msra.mxu2 %v16163_v55  ;;  %7880 = vmatpush.msra.mxu3 %v7879_v32 }
 0x4ce   : > { %7713 = vmatpush.msra.mxu0 %v18690_v36  ;;  %7750 = vmatpush.msra.mxu1 %v15872_v2  ;;  %v7908_v2 = vsub.f32 %v16260_v22, %v7907_v11  ;;  %v16313_v32 = vsub.f32 %v6521_v5, %v16293_v0  ;;  %v18695_v5 = vand.u32 4294901760, %v16057_v27  ;;  %v18700_v36 = vand.u32 4294901760, %v16113_v49 }
 0x4cf   : > { %7795 = vmatpush.msra.mxu2 %v16181_v42  ;;  %7886 = vmatpush.msra.mxu3 %v7885_v59 }
 0x4d0   : > { %7717 = vmatpush.msra.mxu0 %v18691_v34  ;;  %7752 = vmatpush.msra.mxu1 %v15884_v62  ;;  %v7914_v62 = vsub.f32 %v16274_v63, %v7913_v6  ;;  %v7909_v3 = vand.u32 4294901760, %v7908_v2  ;;  %v7814_v35 = vand.u32 4294901760, %v16313_v32  ;;  %v18703_v2 = vand.u32 4294901760, %v16144_v40 }
 0x4d1   : > { %7797 = vmatpush.msra.mxu2 %v16194_v33  ;;  %7892 = vmatpush.msra.mxu3 %v7891_v21  ;;  %v18699_v21 = vld [vmem:[#allocation35_spill] sm:$0xff] }
 0x4d2   : > { %7721 = vmatpush.msra.mxu0 %v18692_v14  ;;  %7754 = vmatpush.msra.mxu1 %v15900_v15  ;;  %v7915_v15 = vand.u32 4294901760, %v7914_v62  ;;  %v18705_v14 = vand.u32 4294901760, %v16179_v20 }
 0x4d3   : > { %7799 = vmatpush.msra.mxu2 %v16216_v53  ;;  %7898 = vmatpush.msra.mxu3 %v7897_v1  ;;  %v18702_v1 = vld [vmem:[#allocation34_spill] sm:$0xff] }
 0x4d4   : > { %7723 = vmatmul.f32.vlgmr.msra.gmra.mxu0 %v15909_v19  ;;  %7756 = vmatpush.msra.mxu1 %v15916_v16  ;;  %v18693_v16 = vand.u32 4294901760, %v16014_v37 }
 0x4d5   : > { %7928 = vmatpush.msrb.mxu0 %v16014_v37  ;;  %7801 = vmatpush.msra.mxu2 %v16232_v31  ;;  %v6655_v37 = vstv %s16320_s6 }
 0x4d6   : > { %7904 = vmatpush.msra.mxu3 %v7903_v28  ;;  %7758 = vmatpush.msra.mxu1 %v15932_v30  ;;  %v7815_v30 = vsub.f32 %v16313_v32, %v7814_v35 }
 0x4d7   : > { %7931 = vmatpush.msrb.mxu0 %v16044_v4  ;;  %7803 = vmatpush.msra.mxu2 %v16247_v25  ;;  %v18696_v4 = vld [vmem:[#allocation33_spill] sm:$0xff] }
 0x4d8   : > { %7910 = vmatpush.msra.mxu3 %v7909_v3  ;;  %7809 = vmatmul.f32.vlgmr.msra.gmra.mxu2 %v7808_v60  ;;  %v18706_v3 = vand.u32 4294901760, %v16192_v46 }
 0x4d9   : > { %7934 = vmatpush.msrb.mxu0 %v16057_v27  ;;  %8033 = vmatpush.msrb.mxu2 %v18693_v16  ;;  %v6602_v16 = vld [vmem:[%s17774_s7 + $0x260] sm:$0xff] }
 0x4da   : > { %7760 = vmatpush.msra.mxu1 %v15965_v43  ;;  %7916 = vmatpush.msra.mxu3 %v7915_v15  ;;  %v7816_v43 = vand.u32 4294901760, %v7815_v30 }
 0x4db   : > { %7918 = vmatmul.f32.vlgmr.msra.gmra.mxu3 %v16234_v23  ;;  %7937 = vmatpush.msrb.mxu0 %v16071_v24 }
 0x4dc   : > { %8037 = vmatpush.msrb.mxu2 %v18694_v10  ;;  %8104 = vmatpush.msrb.mxu3 %v15982_v38  ;;  %v6694_v59 = vpop.f32.mrf.mxu0  ;;  %v6601_v10 = vld [vmem:[%s17774_s7 + $0x258] sm:$0xff] }
 0x4dd   : > { %7762 = vmatpush.msra.mxu1 %v15986_v7  ;;  %7727 = vmatmul.f32.gmra.mxu0 %v15991_v26  ;;  %v6695_v48 = vadd.f32 %v6694_v59, %v6655_v37  ;;  %v18697_v7 = vand.u32 4294901760, %v16071_v24 }
 0x4de   : > { %7764 = vmatmul.f32.vlgmr.msra.gmra.mxu1 %v15909_v19  ;;  %7940 = vmatpush.msrb.mxu0 %v16090_v58  ;;  %v18701_v58 = vand.u32 4294901760, %v16130_v44 }
 0x4df   : > { %7986 = vmatpush.msrb.mxu1 %v15982_v38  ;;  %8041 = vmatpush.msrb.mxu2 %v18695_v5 }
 0x4e0   : > { %8106 = vmatpush.msrb.mxu3 %v18696_v4  ;;  %7943 = vmatpush.msrb.mxu0 %v16113_v49 }
 0x4e1   : > { %7988 = vmatpush.msrb.mxu1 %v18696_v4  ;;  %8045 = vmatpush.msrb.mxu2 %v18697_v7  ;;  %v6599_v4 = vld [vmem:[%s17774_s7 + $0x248] sm:$0xff] }
 0x4e2   : > { %8108 = vmatpush.msrb.mxu3 %v16034_v57  ;;  %7817 = vmatmul.f32.gmra.mxu2 %v7816_v43  ;;  %v6803_v19 = vpop.f32.mrf.mxu1 }
 0x4e3   : > { %7946 = vmatpush.msrb.mxu0 %v16130_v44  ;;  %7990 = vmatpush.msrb.mxu1 %v16034_v57  ;;  %v6804_v38 = vadd.f32 %v6803_v19, %v6695_v48  ;;  %v6598_v19 = vld [vmem:[%s17774_s7 + $0x240] sm:$0xff] }
 0x4e4   : > { %v6861_v27 = vpop.f32.mrf.mxu2  ;;  %8049 = vmatpush.msrb.mxu2 %v18698_v41  ;;  %8110 = vmatpush.msrb.mxu3 %v18699_v21  ;;  %v6905_v8 = vpop.f32.mrf.mxu3 }
 0x4e5   : > { %7922 = vmatmul.f32.gmra.mxu3 %v16293_v0  ;;  %7949 = vmatpush.msrb.mxu0 %v16144_v40  ;;  %v6862_v24 = vadd.f32 %v6861_v27, %v6804_v38  ;;  %v6604_v40 = vld [vmem:[%s17774_s7 + $0x270] sm:$0xff]  ;;  %v6482_v38 = vperm.slane %v15457_v39, 4 }
 0x4e6   : > { %7992 = vmatpush.msrb.mxu1 %v18699_v21  ;;  %8053 = vmatpush.msrb.mxu2 %v18700_v36  ;;  %v6462_v27 = vld [vmem:[#allocation2 + $0x50] sm:$0xff]  ;;  %v16493_v36 = vand.u32 4294901760, %v6598_v19 }
 0x4e7   : > { %8112 = vmatpush.msrb.mxu3 %v16059_v52  ;;  %7768 = vmatmul.f32.gmra.mxu1 %v15991_v26  ;;  %v6906_v57 = vadd.f32 %v6905_v8, %v6862_v24  ;;  %v18704_v26 = vand.u32 4294901760, %v16161_v51  ;;  %v6597_v24 = vld [vmem:[%s17774_s7 + $0x238] sm:$0xff] }
 0x4e8   : > { %7952 = vmatpush.msrb.mxu0 %v16161_v51  ;;  %7994 = vmatpush.msrb.mxu1 %v16059_v52  ;;  %v6605_v52 = vld [vmem:[%s17774_s7 + $0x278] sm:$0xff] }
 0x4e9   : > { %8057 = vmatpush.msrb.mxu2 %v18701_v58  ;;  %8114 = vmatpush.msrb.mxu3 %v18702_v1  ;;  %v6702_v34 = vpop.f32.mrf.mxu0  ;;  %v16390_v51 = vand.u32 4294901760, %v6605_v52 }
 0x4ea   : > { %7955 = vmatpush.msrb.mxu0 %v16179_v20  ;;  %7996 = vmatpush.msrb.mxu1 %v18702_v1  ;;  %v6703_v49 = vadd.f32 %v6702_v34, %v6655_v37  ;;  %v16400_v20 = vand.u32 4294901760, %v6604_v40  ;;  %v16430_v37 = vand.u32 4294901760, %v6602_v16  ;;  %v6596_v1 = vld [vmem:[%s17774_s7 + $0x230] sm:$0xff]  ;;  %v16506_v34 = vadd.f32 %v6482_v38, %v6462_v27 }
 0x4eb   : > { %8061 = vmatpush.msrb.mxu2 %v18703_v2  ;;  %8116 = vmatpush.msrb.mxu3 %v16098_v9 }
 0x4ec   : > { %7958 = vmatpush.msrb.mxu0 %v16192_v46  ;;  %7998 = vmatpush.msrb.mxu1 %v16098_v9  ;;  %v16412_v46 = vsub.f32 %v6605_v52, %v16390_v51 }
 0x4ed   : > { %8065 = vmatpush.msrb.mxu2 %v18704_v26  ;;  %8118 = vmatpush.msrb.mxu3 %v16115_v12  ;;  %v6807_v44 = vpop.f32.mrf.mxu1  ;;  %v6866_v18 = vpop.f32.mrf.mxu2 }
 0x4ee   : > { %7961 = vmatpush.msrb.mxu0 %v16209_v13  ;;  %8000 = vmatpush.msrb.mxu1 %v16115_v12  ;;  %v6808_v9 = vadd.f32 %v6807_v44, %v6703_v49  ;;  %v6603_v12 = vld [vmem:[%s17774_s7 + $0x268] sm:$0xff] }
 0x4ef   : > { %8069 = vmatpush.msrb.mxu2 %v18705_v14  ;;  %8120 = vmatpush.msrb.mxu3 %v16132_v45  ;;  %v16409_v15 = vand.u32 4294901760, %v6603_v12 }
 0x4f0   : > { %7964 = vmatpush.msrb.mxu0 %v16224_v56  ;;  %8002 = vmatpush.msrb.mxu1 %v16132_v45  ;;  %v6867_v28 = vadd.f32 %v6866_v18, %v6808_v9  ;;  %v6911_v62 = vpop.f32.mrf.mxu3  ;;  %v18707_v45 = vand.u32 4294901760, %v16209_v13  ;;  %v16423_v13 = vsub.f32 %v6604_v40, %v16400_v20  ;;  %v6595_v18 = vld [vmem:[%s17774_s7 + $0x228] sm:$0xff]  ;;  %v16529_v9 = vand.u32 4294901760, %v6596_v1 }
 0x4f1   : > { %8073 = vmatpush.msrb.mxu2 %v18706_v3  ;;  %8122 = vmatpush.msrb.mxu3 %v16146_v47  ;;  %v16440_v43 = vsub.f32 %v6603_v12, %v16409_v15 }
 0x4f2   : > { %7967 = vmatpush.msrb.mxu0 %v16245_v50  ;;  %8004 = vmatpush.msrb.mxu1 %v16146_v47  ;;  %v16404_v60 = vadd.f32 %v6911_v62, %v6867_v28  ;;  %v16544_v28 = vand.u32 4294901760, %v6595_v18 }
 0x4f3   : > { %8077 = vmatpush.msrb.mxu2 %v18707_v45  ;;  %8124 = vmatpush.msrb.mxu3 %v16163_v55  ;;  %v6980_v30 = vpop.f32.mrf.mxu0 }
 0x4f4   : > { %7970 = vmatpush.msrb.mxu0 %v16260_v22  ;;  %8006 = vmatpush.msrb.mxu1 %v16163_v55  ;;  %v6981_v47 = vadd.f32 %v6980_v30, %v6906_v57  ;;  %v6600_v55 = vld [vmem:[%s17774_s7 + $0x250] sm:$0xff] }
 0x4f5   : > { %8081 = vmatpush.msrb.mxu2 %v7895_v29  ;;  %8126 = vmatpush.msrb.mxu3 %v16181_v42  ;;  %v8195_v29 = vand.u32 4294901760, %v16412_v46  ;;  %v16449_v50 = vand.u32 4294901760, %v6600_v55 }
 0x4f6   : > { %7973 = vmatpush.msrb.mxu0 %v16274_v63  ;;  %8008 = vmatpush.msrb.mxu1 %v16181_v42  ;;  %v7021_v56 = vpop.f32.mrf.mxu1  ;;  %v16444_v42 = vand.u32 4294901760, %v6601_v10  ;;  %v16475_v63 = vand.u32 4294901760, %v6599_v4 }
 0x4f7   : > { %8085 = vmatpush.msrb.mxu2 %v7901_v54  ;;  %8128 = vmatpush.msrb.mxu3 %v16194_v33  ;;  %v7022_v5 = vadd.f32 %v7021_v56, %v6981_v47  ;;  %v7066_v59 = vpop.f32.mrf.mxu2  ;;  %v18101_v54 = vand.u32 4294901760, %v16423_v13  ;;  %v8196_v22 = vsub.f32 %v16412_v46, %v8195_v29  ;;  %v16486_v21 = vsub.f32 %v6600_v55, %v16449_v50  ;;  %v6592_v55 = vld [vmem:[%s17774_s7 + $0x210] sm:$0xff]  ;;  %v6470_v56 = vld [vmem:[#allocation2 + $0x60] sm:$0xff] }
 0x4f8   : > { %7976 = vmatmul.f32.vlgmr.msrb.gmra.mxu0 %v16263_v61  ;;  %8010 = vmatpush.msrb.mxu1 %v16194_v33  ;;  %v16458_v33 = vsub.f32 %v6602_v16, %v16430_v37  ;;  %v16514_v2 = vsub.f32 %v6599_v4, %v16475_v63  ;;  %v6594_v61 = vld [vmem:[%s17774_s7 + $0x220] sm:$0xff] }
 0x4f9   : > { %8145 = vmatpush.msra.mxu0 %v16390_v51  ;;  %8089 = vmatpush.msrb.mxu2 %v7907_v11  ;;  %v7067_v48 = vadd.f32 %v7066_v59, %v7022_v5  ;;  %v18099_v11 = vand.u32 4294901760, %v16440_v43  ;;  %v8202_v41 = vsub.f32 %v16423_v13, %v18101_v54  ;;  %v8197_v57 = vand.u32 4294901760, %v8196_v22 }
 0x4fa   : > { %8130 = vmatpush.msrb.mxu3 %v16216_v53  ;;  %8012 = vmatpush.msrb.mxu1 %v16216_v53  ;;  %v7175_v7 = vpop.f32.mrf.mxu3  ;;  %v18097_v8 = vand.u32 4294901760, %v16458_v33  ;;  %v18093_v44 = vand.u32 4294901760, %v16486_v21  ;;  %v18092_v62 = vand.u32 4294901760, %v16514_v2  ;;  %v16559_v30 = vand.u32 4294901760, %v6594_v61 }
 0x4fb   : > { %8147 = vmatpush.msra.mxu0 %v16400_v20  ;;  %8093 = vmatpush.msrb.mxu2 %v7913_v6  ;;  %v16470_v53 = vadd.f32 %v7175_v7, %v7067_v48  ;;  %v16478_v6 = vsub.f32 %v6601_v10, %v16444_v42  ;;  %v8208_v58 = vsub.f32 %v16440_v43, %v18099_v11  ;;  %v8203_v26 = vand.u32 4294901760, %v8202_v41 }
 0x4fc   : > { %8132 = vmatpush.msrb.mxu3 %v16232_v31  ;;  %8095 = vmatmul.f32.vlgmr.msrb.gmra.mxu2 %v16234_v23  ;;  %v8214_v40 = vsub.f32 %v16458_v33, %v18097_v8  ;;  %v8226_v45 = vsub.f32 %v16486_v21, %v18093_v44  ;;  %v16563_v10 = vsub.f32 %v6596_v1, %v16529_v9  ;;  %v16584_v41 = vand.u32 4294901760, %v6592_v55 }
 0x4fd   : > { %8149 = vmatpush.msra.mxu0 %v16409_v15  ;;  %8300 = vmatpush.msra.mxu2 %v16412_v46  ;;  %v18095_v49 = vand.u32 4294901760, %v16478_v6  ;;  %v8209_v14 = vand.u32 4294901760, %v8208_v58  ;;  %v8232_v48 = vsub.f32 %v16514_v2, %v18092_v62  ;;  %v16580_v22 = vsub.f32 %v6595_v18, %v16544_v28  ;;  %v6614_v46 = vld [vmem:[%s17774_s7 + $0x2c0] sm:$0xff] }
 0x4fe   : > { %8014 = vmatpush.msrb.mxu1 %v16232_v31  ;;  %8134 = vmatpush.msrb.mxu3 %v16247_v25  ;;  %v8215_v16 = vand.u32 4294901760, %v8214_v40  ;;  %v8227_v27 = vand.u32 4294901760, %v8226_v45  ;;  %18708 = vst [vmem:[#allocation36_spill] sm:$0xff] %v16584_v41  ;;  %v16588_v1 = vadd.f32 %v6482_v38, %v6470_v56  ;;  %v6591_v38 = vld [vmem:[%s17774_s7 + $0x208] sm:$0xff] }
 0x4ff   : > { %8136 = vmatmul.f32.vlgmr.msrb.gmra.mxu3 %v16234_v23  ;;  %8151 = vmatpush.msra.mxu0 %v16430_v37  ;;  %v6984_v31 = vpop.f32.mrf.mxu0  ;;  %v16510_v23 = vand.u32 4294901760, %v6597_v24  ;;  %v8220_v12 = vsub.f32 %v16478_v6, %v18095_v49 }
 0x500   : > { %8303 = vmatpush.msra.mxu2 %v16423_v13  ;;  %8358 = vmatpush.msra.mxu3 %v16390_v51  ;;  %v6985_v52 = vadd.f32 %v6984_v31, %v16404_v60  ;;  %v6593_v60 = vld [vmem:[%s17774_s7 + $0x218] sm:$0xff]  ;;  %v6522_v45 = vmax.f32 %v16588_v1, 0.0 }
 0x501   : > { %8016 = vmatpush.msrb.mxu1 %v16247_v25  ;;  %7981 = vmatmul.f32.gmra.mxu0 %v16313_v32  ;;  %v16532_v25 = vsub.f32 %v6598_v19, %v16493_v36  ;;  %v16548_v3 = vsub.f32 %v6597_v24, %v16510_v23  ;;  %v16569_v5 = vand.u32 4294901760, %v6593_v60  ;;  %v8221_v4 = vand.u32 4294901760, %v8220_v12 }
 0x502   : > { %8020 = vmatmul.f32.vlgmr.msrb.gmra.mxu1 %v7806_v17  ;;  %8153 = vmatpush.msra.mxu0 %v16444_v42  ;;  %v6514_v17 = vmax.f32 %v16506_v34, 0.0  ;;  %v16596_v34 = vsub.f32 %v6594_v61, %v16559_v30  ;;  %v16625_v12 = vsub.f32 %v6592_v55, %v16584_v41 }
 0x503   : > { %8198 = vmatpush.msra.mxu1 %v8197_v57  ;;  %8306 = vmatpush.msra.mxu2 %v16440_v43  ;;  %v18091_v47 = vand.u32 4294901760, %v16532_v25  ;;  %v18090_v7 = vand.u32 4294901760, %v16548_v3 }
 0x504   : > { %8360 = vmatpush.msra.mxu3 %v16400_v20  ;;  %8155 = vmatpush.msra.mxu0 %v16449_v50  ;;  %v16571_v59 = vand.u32 4294901760, %v6514_v17  ;;  %v18096_v1 = vand.u32 4294901760, %v16625_v12 }
 0x505   : > { %8204 = vmatpush.msra.mxu1 %v8203_v26  ;;  %8309 = vmatpush.msra.mxu2 %v16458_v33  ;;  %v8238_v31 = vsub.f32 %v16532_v25, %v18091_v47  ;;  %v16606_v26 = vsub.f32 %v6593_v60, %v16569_v5  ;;  %v8244_v32 = vsub.f32 %v16548_v3, %v18090_v7 }
 0x506   : > { %8362 = vmatpush.msra.mxu3 %v16409_v15  ;;  %8099 = vmatmul.f32.gmra.mxu2 %v16293_v0  ;;  %v16609_v18 = vsub.f32 %v6514_v17, %v16571_v59  ;;  %v6590_v17 = vld [vmem:[%s17774_s7 + $0x200] sm:$0xff] }
 0x507   : > { %8157 = vmatpush.msra.mxu0 %v16475_v63  ;;  %8210 = vmatpush.msra.mxu1 %v8209_v14  ;;  %v6621_v14 = vld [vmem:[%s17774_s7 + $0x2f8] sm:$0xff] }
 0x508   : > { %8312 = vmatpush.msra.mxu2 %v16478_v6  ;;  %8364 = vmatpush.msra.mxu3 %v16430_v37  ;;  %v7025_v19 = vpop.f32.mrf.mxu1  ;;  %v18098_v55 = vand.u32 4294901760, %v16609_v18 }
 0x509   : > { %8140 = vmatmul.f32.gmra.mxu3 %v16293_v0  ;;  %8159 = vmatpush.msra.mxu0 %v16493_v36  ;;  %v7026_v24 = vadd.f32 %v7025_v19, %v6985_v52  ;;  %v7233_v57 = vpop.f32.mrf.mxu0  ;;  %v7074_v58 = vpop.f32.mrf.mxu2  ;;  %v18089_v0 = vand.u32 4294901760, %v16563_v10  ;;  %v18094_v19 = vand.u32 4294901760, %v16606_v26 }
 0x50a   : > { %8216 = vmatpush.msra.mxu1 %v8215_v16  ;;  %8315 = vmatpush.msra.mxu2 %v16486_v21  ;;  %v7234_v52 = vadd.f32 %v7233_v57, %v16470_v53  ;;  %v8233_v53 = vand.u32 4294901760, %v8232_v48  ;;  %v8239_v16 = vand.u32 4294901760, %v8238_v31  ;;  %v18088_v48 = vand.u32 4294901760, %v16596_v34  ;;  %v6620_v31 = vld [vmem:[%s17774_s7 + $0x2f0] sm:$0xff] }
 0x50b   : > { %8366 = vmatpush.msra.mxu3 %v16444_v42  ;;  %8026 = vmatmul.f32.gmra.mxu1 %v7814_v35  ;;  %v7075_v40 = vadd.f32 %v7074_v58, %v7026_v24  ;;  %v18087_v35 = vand.u32 4294901760, %v16580_v22  ;;  %v8250_v56 = vsub.f32 %v16563_v10, %v18089_v0  ;;  %v16641_v24 = vand.u32 4294901760, %v6621_v14 }
 0x50c   : > { %8161 = vmatpush.msra.mxu0 %v16510_v23  ;;  %8222 = vmatpush.msra.mxu1 %v8221_v4  ;;  %v7179_v61 = vpop.f32.mrf.mxu3  ;;  %v16634_v4 = vand.u32 4294901760, %v6591_v38  ;;  %v16647_v58 = vand.u32 4294901760, %v6590_v17  ;;  %v16682_v62 = vand.u32 4294901760, %v6620_v31 }
 0x50d   : > { %8318 = vmatpush.msra.mxu2 %v16514_v2  ;;  %8368 = vmatpush.msra.mxu3 %v16449_v50  ;;  %v16627_v60 = vadd.f32 %v7179_v61, %v7075_v40  ;;  %v8256_v57 = vsub.f32 %v16580_v22, %v18087_v35  ;;  %v16655_v40 = vand.u32 4294901760, %v6522_v45  ;;  %v8179_v35 = vsub.f32 %v16609_v18, %v18098_v55  ;;  %v6617_v55 = vld [vmem:[%s17774_s7 + $0x2d8] sm:$0xff] }
 0x50e   : > { %8163 = vmatpush.msra.mxu0 %v16529_v9  ;;  %8228 = vmatpush.msra.mxu1 %v8227_v27  ;;  %v8245_v27 = vand.u32 4294901760, %v8244_v32  ;;  %v8262_v32 = vsub.f32 %v16596_v34, %v18088_v48  ;;  %v16662_v61 = vsub.f32 %v6591_v38, %v16634_v4  ;;  %v6619_v38 = vld [vmem:[%s17774_s7 + $0x2e8] sm:$0xff]  ;;  %v16680_v47 = vsub.f32 %v6590_v17, %v16647_v58 }
 0x50f   : > { %8321 = vmatpush.msra.mxu2 %v16532_v25  ;;  %8370 = vmatpush.msra.mxu3 %v16475_v63  ;;  %v8257_v7 = vand.u32 4294901760, %v8256_v57  ;;  %18710 = vst [vmem:[#allocation35_spill] sm:$0xff] %v16682_v62 }
 0x510   : > { %8165 = vmatpush.msra.mxu0 %v16544_v28  ;;  %8234 = vmatpush.msra.mxu1 %v8233_v53  ;;  %v8251_v53 = vand.u32 4294901760, %v8250_v56  ;;  %v16673_v56 = vsub.f32 %v6621_v14, %v16641_v24  ;;  %v8274_v14 = vsub.f32 %v16625_v12, %v18096_v1  ;;  %v8263_v17 = vand.u32 4294901760, %v8262_v32 }
 0x511   : > { %8324 = vmatpush.msra.mxu2 %v16548_v3  ;;  %8372 = vmatpush.msra.mxu3 %v16493_v36 }
 0x512   : > { %8167 = vmatpush.msra.mxu0 %v16559_v30  ;;  %8240 = vmatpush.msra.mxu1 %v8239_v16  ;;  %v8268_v16 = vsub.f32 %v16606_v26, %v18094_v19  ;;  %18709 = vst [vmem:[#allocation33_spill] sm:$0xff] %v16673_v56  ;;  %v16690_v19 = vsub.f32 %v6522_v45, %v16655_v40  ;;  %v8180_v45 = vand.u32 4294901760, %v8179_v35  ;;  %v18102_v8 = vand.u32 4294901760, %v16673_v56 }
 0x513   : > { %8327 = vmatpush.msra.mxu2 %v16563_v10  ;;  %8374 = vmatpush.msra.mxu3 %v16510_v23  ;;  %v7277_v48 = vpop.f32.mrf.mxu1  ;;  %v7352_v0 = vpop.f32.mrf.mxu2  ;;  %v8275_v35 = vand.u32 4294901760, %v8274_v14 }
 0x514   : > { %8169 = vmatpush.msra.mxu0 %v16569_v5  ;;  %8246 = vmatpush.msra.mxu1 %v8245_v27  ;;  %v7278_v44 = vadd.f32 %v7277_v48, %v7234_v52  ;;  %v6618_v27 = vld [vmem:[%s17774_s7 + $0x2e0] sm:$0xff]  ;;  %v18100_v52 = vand.u32 4294901760, %v16662_v61  ;;  %v16697_v48 = vand.u32 4294901760, %v6619_v38  ;;  %v8269_v1 = vand.u32 4294901760, %v8268_v16 }
 0x515   : > { %8330 = vmatpush.msra.mxu2 %v16580_v22  ;;  %8376 = vmatpush.msra.mxu3 %v16529_v9  ;;  %v18106_v16 = vand.u32 4294901760, %v16690_v19 }
 0x516   : > { %8171 = vmatpush.msra.mxu0 %v16584_v41  ;;  %8252 = vmatpush.msra.mxu1 %v8251_v53  ;;  %v7353_v57 = vadd.f32 %v7352_v0, %v7278_v44  ;;  %v7393_v49 = vpop.f32.mrf.mxu3  ;;  %v18103_v53 = vand.u32 4294901760, %v16680_v47  ;;  %v16708_v44 = vsub.f32 %v6620_v31, %v16682_v62  ;;  %v16710_v0 = vand.u32 4294901760, %v6618_v27 }
 0x517   : > { %8333 = vmatpush.msra.mxu2 %v16596_v34  ;;  %8378 = vmatpush.msra.mxu3 %v16544_v28  ;;  %v16722_v31 = vsub.f32 %v6619_v38, %v16697_v48 }
 0x518   : > { %8173 = vmatpush.msra.mxu0 %v16634_v4  ;;  %8258 = vmatpush.msra.mxu1 %v8257_v7  ;;  %18711 = vst [vmem:[#allocation34_spill] sm:$0xff] %v16710_v0  ;;  %v16712_v32 = vadd.f32 %v7393_v49, %v7353_v57  ;;  %v8280_v7 = vsub.f32 %v16662_v61, %v18100_v52  ;;  %v16724_v49 = vand.u32 4294901760, %v6617_v55  ;;  %v6616_v57 = vld [vmem:[%s17774_s7 + $0x2d0] sm:$0xff] }
 0x519   : > { %8336 = vmatpush.msra.mxu2 %v16606_v26  ;;  %8380 = vmatpush.msra.mxu3 %v16559_v30  ;;  %v7238_v11 = vpop.f32.mrf.mxu0  ;;  %v8286_v38 = vsub.f32 %v16680_v47, %v18103_v53  ;;  %v16740_v54 = vsub.f32 %v6618_v27, %v16710_v0 }
 0x51a   : > { %8175 = vmatpush.msra.mxu0 %v16647_v58  ;;  %8264 = vmatpush.msra.mxu1 %v8263_v17  ;;  %18712 = vst [vmem:[#allocation37_spill] sm:$0xff] %v16724_v49  ;;  %v7239_v14 = vadd.f32 %v7238_v11, %v16627_v60  ;;  %v8568_v17 = vsub.f32 %v16673_v56, %v18102_v8  ;;  %v6615_v11 = vld [vmem:[%s17774_s7 + $0x2c8] sm:$0xff]  ;;  %v8281_v27 = vand.u32 4294901760, %v8280_v7 }
 0x51b   : > { %8339 = vmatpush.msra.mxu2 %v16625_v12  ;;  %8382 = vmatpush.msra.mxu3 %v16569_v5  ;;  %v16756_v56 = vsub.f32 %v6617_v55, %v16724_v49  ;;  %v8287_v7 = vand.u32 4294901760, %v8286_v38  ;;  %v18714_v55 = vand.u32 4294901760, %v16708_v44 }
 0x51c   : > { %8181 = vmatmul.f32.vlgmr.msra.gmra.mxu0 %v8180_v45  ;;  %8270 = vmatpush.msra.mxu1 %v8269_v1  ;;  %v7283_v60 = vpop.f32.mrf.mxu1  ;;  %v8187_v1 = vsub.f32 %v16690_v19, %v18106_v16  ;;  %v16751_v45 = vand.u32 4294901760, %v6616_v57 }
 0x51d   : > { %8405 = vmatpush.msrb.mxu0 %v8195_v29  ;;  %8342 = vmatpush.msra.mxu2 %v16662_v61  ;;  %v7284_v8 = vadd.f32 %v7283_v60, %v7239_v14  ;;  %v7356_v53 = vpop.f32.mrf.mxu2  ;;  %v18713_v29 = vand.u32 4294901760, %v16423_v13  ;;  %v16764_v14 = vand.u32 4294901760, %v6615_v11  ;;  %v8574_v16 = vsub.f32 %v16708_v44, %v18714_v55  ;;  %v6613_v13 = vld [vmem:[%s17774_s7 + $0x2b8] sm:$0xff] }
 0x51e   : > { %8384 = vmatpush.msra.mxu3 %v16584_v41  ;;  %8276 = vmatpush.msra.mxu1 %v8275_v35  ;;  %v8569_v35 = vand.u32 4294901760, %v8568_v17  ;;  %v18715_v41 = vand.u32 4294901760, %v16440_v43  ;;  %v16781_v17 = vand.u32 4294901760, %v6614_v46  ;;  %v18716_v55 = vand.u32 4294901760, %v16722_v31 }
 0x51f   : > { %8409 = vmatpush.msrb.mxu0 %v18713_v29  ;;  %8345 = vmatpush.msra.mxu2 %v16680_v47  ;;  %v7357_v60 = vadd.f32 %v7356_v53, %v7284_v8  ;;  %v8188_v8 = vand.u32 4294901760, %v8187_v1  ;;  %v16779_v53 = vsub.f32 %v6616_v57, %v16751_v45  ;;  %v18717_v57 = vand.u32 4294901760, %v16609_v18 }
 0x520   : > { %8386 = vmatpush.msra.mxu3 %v16634_v4  ;;  %8348 = vmatmul.f32.vlgmr.msra.gmra.mxu2 %v16609_v18  ;;  %v7397_v29 = vpop.f32.mrf.mxu3  ;;  %v8580_v52 = vsub.f32 %v16722_v31, %v18716_v55  ;;  %v18718_v1 = vand.u32 4294901760, %v16458_v33  ;;  %v18719_v55 = vand.u32 4294901760, %v16740_v54  ;;  %v6611_v18 = vld [vmem:[%s17774_s7 + $0x2a8] sm:$0xff] }
 0x521   : > { %8413 = vmatpush.msrb.mxu0 %v18715_v41  ;;  %8517 = vmatpush.msrb.mxu2 %v16641_v24  ;;  %v16783_v38 = vadd.f32 %v7397_v29, %v7357_v60  ;;  %v6612_v41 = vld [vmem:[%s17774_s7 + $0x2b0] sm:$0xff]  ;;  %v16800_v60 = vand.u32 4294901760, %v6613_v13  ;;  %v8575_v29 = vand.u32 4294901760, %v8574_v16  ;;  %v6463_v16 = vld [vmem:[#allocation2 + $0x68] sm:$0xff] }
 0x522   : > { %8282 = vmatpush.msra.mxu1 %v8281_v27  ;;  %8388 = vmatpush.msra.mxu3 %v16647_v58  ;;  %v16798_v27 = vsub.f32 %v6615_v11, %v16764_v14  ;;  %v8586_v43 = vsub.f32 %v16740_v54, %v18719_v55  ;;  %v8581_v55 = vand.u32 4294901760, %v8580_v52  ;;  %v18722_v52 = vand.u32 4294901760, %v16486_v21 }
 0x523   : > { %8392 = vmatmul.f32.vlgmr.msra.gmra.mxu3 %v18717_v57  ;;  %8417 = vmatpush.msrb.mxu0 %v18718_v1  ;;  %v16812_v57 = vsub.f32 %v6614_v46, %v16781_v17  ;;  %v16814_v1 = vand.u32 4294901760, %v6612_v41 }
 0x524   : > { %8519 = vmatpush.msrb.mxu2 %v16682_v62  ;;  %8570 = vmatpush.msrb.mxu3 %v8569_v35  ;;  %v18720_v35 = vand.u32 4294901760, %v16478_v6  ;;  %v18721_v62 = vand.u32 4294901760, %v16756_v56  ;;  %v18110_v46 = vand.u32 4294901760, %v16798_v27  ;;  %v16831_v6 = vand.u32 4294901760, %v6611_v18 }
 0x525   : > { %8288 = vmatpush.msra.mxu1 %v8287_v7  ;;  %8189 = vmatmul.f32.gmra.mxu0 %v8188_v8  ;;  %v6610_v7 = vld [vmem:[%s17774_s7 + $0x2a0] sm:$0xff]  ;;  %v16829_v8 = vsub.f32 %v6613_v13, %v16800_v60  ;;  %v18724_v13 = vand.u32 4294901760, %v16779_v53 }
 0x526   : > { %8290 = vmatmul.f32.vlgmr.msra.gmra.mxu1 %v16571_v59  ;;  %8421 = vmatpush.msrb.mxu0 %v18720_v35  ;;  %v8592_v33 = vsub.f32 %v16756_v56, %v18721_v62  ;;  %v8587_v62 = vand.u32 4294901760, %v8586_v43  ;;  %v6609_v35 = vld [vmem:[%s17774_s7 + $0x298] sm:$0xff]  ;;  %v16849_v43 = vsub.f32 %v6612_v41, %v16814_v1  ;;  %v16862_v41 = vsub.f32 %v6611_v18, %v16831_v6 }
 0x527   : > { %8476 = vmatpush.msrb.mxu1 %v16390_v51  ;;  %8521 = vmatpush.msrb.mxu2 %v16697_v48  ;;  %v18723_v51 = vperm.slane %v15457_v39, 5  ;;  %v16864_v21 = vand.u32 4294901760, %v6609_v35  ;;  %v18728_v18 = vand.u32 4294901760, %v16812_v57 }
 0x528   : > { %8576 = vmatpush.msrb.mxu3 %v8575_v29  ;;  %8425 = vmatpush.msrb.mxu0 %v18722_v52  ;;  %v8598_v29 = vsub.f32 %v16779_v53, %v18724_v13  ;;  %v16851_v52 = vand.u32 4294901760, %v6610_v7  ;;  %v18115_v13 = vand.u32 4294901760, %v16849_v43 }
 0x529   : > { %v16840_v11 = vadd.f32 %v18723_v51, %v6463_v16  ;;  %8478 = vmatpush.msrb.mxu1 %v16400_v20  ;;  %8523 = vmatpush.msrb.mxu2 %v16710_v0  ;;  %v8593_v16 = vand.u32 4294901760, %v8592_v33  ;;  %v18725_v51 = vand.u32 4294901760, %v16514_v2  ;;  %v8604_v20 = vsub.f32 %v16798_v27, %v18110_v46  ;;  %v6608_v33 = vld [vmem:[%s17774_s7 + $0x290] sm:$0xff] }
 0x52a   : > { %8582 = vmatpush.msrb.mxu3 %v8581_v55  ;;  %8353 = vmatmul.f32.gmra.mxu2 %v16690_v19  ;;  %v18726_v2 = vand.u32 4294901760, %v16690_v19  ;;  %v18727_v55 = vand.u32 4294901760, %v16532_v25  ;;  %v8610_v46 = vsub.f32 %v16812_v57, %v18728_v18  ;;  %v16880_v0 = vsub.f32 %v6610_v7, %v16851_v52  ;;  %v6471_v18 = vld [vmem:[#allocation2 + $0x70] sm:$0xff] }
 0x52b   : > { %8429 = vmatpush.msrb.mxu0 %v18725_v51  ;;  %8480 = vmatpush.msrb.mxu1 %v16409_v15  ;;  %v6515_v15 = vmax.f32 %v16840_v11, 0.0  ;;  %v8599_v51 = vand.u32 4294901760, %v8598_v29  ;;  %v6607_v11 = vld [vmem:[%s17774_s7 + $0x288] sm:$0xff]  ;;  %v16887_v25 = vand.u32 4294901760, %v6608_v33  ;;  %v18729_v7 = vand.u32 4294901760, %v16829_v8 }
 0x52c   : > { %8525 = vmatpush.msrb.mxu2 %v16724_v49  ;;  %8588 = vmatpush.msrb.mxu3 %v8587_v62  ;;  %v8605_v62 = vand.u32 4294901760, %v8604_v20  ;;  %v8611_v20 = vand.u32 4294901760, %v8610_v46 }
 0x52d   : > { %8398 = vmatmul.f32.gmra.mxu3 %v18726_v2  ;;  %8433 = vmatpush.msrb.mxu0 %v18727_v55  ;;  %v7438_v49 = vpop.f32.mrf.mxu0  ;;  %v8616_v29 = vsub.f32 %v16829_v8, %v18729_v7  ;;  %v16896_v55 = vsub.f32 %v6609_v35, %v16864_v21  ;;  %v8622_v35 = vsub.f32 %v16849_v43, %v18115_v13  ;;  %v18731_v2 = vand.u32 4294901760, %v16563_v10 }
 0x52e   : > { %8482 = vmatpush.msrb.mxu1 %v16430_v37  ;;  %8527 = vmatpush.msrb.mxu2 %v16751_v45  ;;  %v7439_v19 = vadd.f32 %v7438_v49, %v16712_v32  ;;  %v6606_v37 = vld [vmem:[%s17774_s7 + $0x280] sm:$0xff]  ;;  %v18730_v32 = vand.u32 4294901760, %v16548_v3  ;;  %v16904_v49 = vand.u32 4294901760, %v6607_v11  ;;  %v18733_v13 = vand.u32 4294901760, %v16862_v41 }
 0x52f   : > { %8594 = vmatpush.msrb.mxu3 %v8593_v16  ;;  %8294 = vmatmul.f32.gmra.mxu1 %v16655_v40  ;;  %v16906_v16 = vand.u32 4294901760, %v6515_v15  ;;  %v16919_v3 = vand.u32 4294901760, %v6606_v37  ;;  %v8617_v46 = vand.u32 4294901760, %v8616_v29  ;;  %v8639_v10 = vand.u32 4294901760, %v16896_v55 }
 0x530   : > { %8437 = vmatpush.msrb.mxu0 %v18730_v32  ;;  %8484 = vmatpush.msrb.mxu1 %v16444_v42  ;;  %v16917_v42 = vsub.f32 %v6608_v33, %v16887_v25  ;;  %v18732_v32 = vperm.slane %v15457_v39, 5  ;;  %v8628_v7 = vsub.f32 %v16862_v41, %v18733_v13  ;;  %v16932_v33 = vsub.f32 %v6607_v11, %v16904_v49 }
 0x531   : > { %8529 = vmatpush.msrb.mxu2 %v16764_v14  ;;  %8600 = vmatpush.msrb.mxu3 %v8599_v51  ;;  %v18735_v29 = vand.u32 4294901760, %v16880_v0 }
 0x532   : > { %8441 = vmatpush.msrb.mxu0 %v18731_v2  ;;  %8486 = vmatpush.msrb.mxu1 %v16449_v50  ;;  %v6507_v51 = vadd.f32 %v18732_v32, %v6471_v18  ;;  %v18734_v50 = vand.u32 4294901760, %v16580_v22  ;;  %v16935_v2 = vsub.f32 %v6515_v15, %v16906_v16  ;;  %v18736_v18 = vand.u32 4294901760, %v16596_v34 }
 0x533   : > { %8531 = vmatpush.msrb.mxu2 %v16781_v17  ;;  %8606 = vmatpush.msrb.mxu3 %v8605_v62  ;;  %v8623_v62 = vand.u32 4294901760, %v8622_v35  ;;  %v8634_v13 = vsub.f32 %v16880_v0, %v18735_v29  ;;  %v16946_v22 = vsub.f32 %v6606_v37, %v16919_v3  ;;  %v8640_v35 = vsub.f32 %v16896_v55, %v8639_v10 }
 0x534   : > { %8445 = vmatpush.msrb.mxu0 %v18734_v50  ;;  %8488 = vmatpush.msrb.mxu1 %v16475_v63  ;;  %v8645_v63 = vand.u32 4294901760, %v16917_v42  ;;  %v6523_v11 = vmax.f32 %v6507_v51, 0.0  ;;  %v8651_v37 = vand.u32 4294901760, %v16932_v33  ;;  %v8550_v51 = vand.u32 4294901760, %v16935_v2 }
 0x535   : > { %8533 = vmatpush.msrb.mxu2 %v16800_v60  ;;  %8612 = vmatpush.msrb.mxu3 %v8611_v20  ;;  %v8629_v20 = vand.u32 4294901760, %v8628_v7  ;;  %v8635_v7 = vand.u32 4294901760, %v8634_v13 }
 0x536   : > { %8449 = vmatpush.msrb.mxu0 %v18736_v18  ;;  %8490 = vmatpush.msrb.mxu1 %v16493_v36  ;;  %v7446_v15 = vpop.f32.mrf.mxu0  ;;  %v18737_v36 = vand.u32 4294901760, %v16606_v26  ;;  %v8646_v26 = vsub.f32 %v16917_v42, %v8645_v63  ;;  %v16966_v18 = vand.u32 4294901760, %v6523_v11 }
 0x537   : > { %8535 = vmatpush.msrb.mxu2 %v16814_v1  ;;  %8618 = vmatpush.msrb.mxu3 %v8617_v46  ;;  %v7447_v34 = vadd.f32 %v7446_v15, %v16783_v38  ;;  %v7547_v32 = vpop.f32.mrf.mxu1  ;;  %v7605_v50 = vpop.f32.mrf.mxu2  ;;  %v18738_v46 = vand.u32 4294901760, %v16625_v12  ;;  %v8551_v12 = vsub.f32 %v16935_v2, %v8550_v51 }
 0x538   : > { %8453 = vmatpush.msrb.mxu0 %v18737_v36  ;;  %8492 = vmatpush.msrb.mxu1 %v16510_v23  ;;  %v7548_v29 = vadd.f32 %v7547_v32, %v7439_v19  ;;  %v8657_v23 = vand.u32 4294901760, %v16946_v22  ;;  %v8641_v19 = vand.u32 4294901760, %v8640_v35  ;;  %v16986_v35 = vsub.f32 %v6523_v11, %v16966_v18  ;;  %v18741_v36 = vld [vmem:[#allocation33_spill] sm:$0xff] }
 0x539   : > { %8537 = vmatpush.msrb.mxu2 %v16831_v6  ;;  %8624 = vmatpush.msrb.mxu3 %v8623_v62  ;;  %v18739_v62 = vand.u32 4294901760, %v16662_v61  ;;  %v8647_v61 = vand.u32 4294901760, %v8646_v26 }
 0x53a   : > { %8457 = vmatpush.msrb.mxu0 %v18738_v46  ;;  %8494 = vmatpush.msrb.mxu1 %v16529_v9  ;;  %v7606_v38 = vadd.f32 %v7605_v50, %v7548_v29  ;;  %v7649_v15 = vpop.f32.mrf.mxu3  ;;  %v8652_v9 = vsub.f32 %v16932_v33, %v8651_v37  ;;  %v8558_v46 = vand.u32 4294901760, %v16986_v35 }
 0x53b   : > { %8539 = vmatpush.msrb.mxu2 %v16851_v52  ;;  %8630 = vmatpush.msrb.mxu3 %v8629_v20  ;;  %v18740_v20 = vand.u32 4294901760, %v16680_v47  ;;  %v8552_v47 = vand.u32 4294901760, %v8551_v12  ;;  %v18752_v12 = vld [vmem:[#allocation37_spill] sm:$0xff] }
 0x53c   : > { %8461 = vmatpush.msrb.mxu0 %v18739_v62  ;;  %8496 = vmatpush.msrb.mxu1 %v16544_v28  ;;  %v7650_v13 = vadd.f32 %v7649_v15, %v7606_v38  ;;  %v8658_v28 = vsub.f32 %v16946_v22, %v8657_v23  ;;  %v8653_v32 = vand.u32 4294901760, %v8652_v9  ;;  %v18743_v38 = vand.u32 4294901760, %v18741_v36  ;;  %v18747_v9 = vld [vmem:[#allocation35_spill] sm:$0xff] }
 0x53d   : > { %8541 = vmatpush.msrb.mxu2 %v16864_v21  ;;  %8636 = vmatpush.msrb.mxu3 %v8635_v7  ;;  %v18742_v7 = vld [vmem:[#allocation36_spill] sm:$0xff]  ;;  %v8559_v15 = vsub.f32 %v16986_v35, %v8558_v46  ;;  %v18746_v62 = vand.u32 4294901760, %v16722_v31 }
 0x53e   : > { %8465 = vmatpush.msrb.mxu0 %v18740_v20  ;;  %8498 = vmatpush.msrb.mxu1 %v16559_v30  ;;  %v8659_v11 = vand.u32 4294901760, %v8658_v28  ;;  %v18757_v20 = vand.u32 4294901760, %v16862_v41 }
 0x53f   : > { %8543 = vmatpush.msrb.mxu2 %v16887_v25  ;;  %8642 = vmatpush.msrb.mxu3 %v8641_v19  ;;  %v18745_v19 = vand.u32 4294901760, %v16708_v44 }
 0x540   : > { %8467 = vmatmul.f32.vlgmr.msrb.gmra.mxu0 %v16571_v59  ;;  %8500 = vmatpush.msrb.mxu1 %v16569_v5  ;;  %v7551_v50 = vpop.f32.mrf.mxu1 }
 0x541   : > { %8672 = vmatpush.msra.mxu0 %v18741_v36  ;;  %8545 = vmatpush.msrb.mxu2 %v16904_v49  ;;  %v7552_v30 = vadd.f32 %v7551_v50, %v7447_v34  ;;  %v7610_v29 = vpop.f32.mrf.mxu2 }
 0x542   : > { %8648 = vmatpush.msrb.mxu3 %v8647_v61  ;;  %8502 = vmatpush.msrb.mxu1 %v18742_v7  ;;  %v6484_v7 = vperm.slane %v15457_v39, 6 }
 0x543   : > { %8675 = vmatpush.msra.mxu0 %v16708_v44  ;;  %8547 = vmatpush.msrb.mxu2 %v16919_v3  ;;  %v7611_v5 = vadd.f32 %v7610_v29, %v7552_v30  ;;  %v6632_v30 = vld [vmem:[%s17774_s7 + $0x350] sm:$0xff] }
 0x544   : > { %8654 = vmatpush.msrb.mxu3 %v8653_v32  ;;  %8553 = vmatmul.f32.vlgmr.msrb.gmra.mxu2 %v8552_v47  ;;  %v7655_v26 = vpop.f32.mrf.mxu3  ;;  %v6634_v47 = vld [vmem:[%s17774_s7 + $0x360] sm:$0xff] }
 0x545   : > { %8678 = vmatpush.msra.mxu0 %v16722_v31  ;;  %8777 = vmatpush.msra.mxu2 %v18743_v38  ;;  %v17000_v34 = vadd.f32 %v7655_v26, %v7611_v5  ;;  %v17102_v36 = vand.u32 4294901760, %v6634_v47  ;;  %v6464_v5 = vld [vmem:[#allocation2 + $0x8] sm:$0xff]  ;;  %v6629_v26 = vld [vmem:[%s17774_s7 + $0x338] sm:$0xff] }
 0x546   : > { %8504 = vmatpush.msrb.mxu1 %v16634_v4  ;;  %8660 = vmatpush.msrb.mxu3 %v8659_v11  ;;  %v8560_v4 = vand.u32 4294901760, %v8559_v15 }
 0x547   : > { %18744 = vst [vmem:[#allocation33_spill] sm:$0xff] %v17000_v34  ;;  %8662 = vmatmul.f32.vlgmr.msrb.gmra.mxu3 %v16906_v16  ;;  %8681 = vmatpush.msra.mxu0 %v16740_v54  ;;  %v17130_v29 = vsub.f32 %v6634_v47, %v17102_v36 }
 0x548   : > { %8781 = vmatpush.msra.mxu2 %v18745_v19  ;;  %8848 = vmatpush.msra.mxu3 %v16641_v24 }
 0x549   : > { %8506 = vmatpush.msrb.mxu1 %v16647_v58  ;;  %8471 = vmatmul.f32.gmra.mxu0 %v16655_v40  ;;  %v18748_v58 = vand.u32 4294901760, %v16740_v54  ;;  %v18751_v54 = vand.u32 4294901760, %v16779_v53  ;;  %v18126_v38 = vand.u32 4294901760, %v17130_v29 }
 0x54a   : > { %8508 = vmatmul.f32.vlgmr.msrb.gmra.mxu1 %v16571_v59  ;;  %8684 = vmatpush.msra.mxu0 %v16756_v56  ;;  %v18749_v59 = vand.u32 4294901760, %v16756_v56  ;;  %v18753_v56 = vand.u32 4294901760, %v16798_v27 }
 0x54b   : > { %8730 = vmatpush.msra.mxu1 %v16641_v24  ;;  %8785 = vmatpush.msra.mxu2 %v18746_v62  ;;  %v18750_v24 = vld [vmem:[#allocation34_spill] sm:$0xff] }
 0x54c   : > { %8850 = vmatpush.msra.mxu3 %v18747_v9  ;;  %8687 = vmatpush.msra.mxu0 %v16779_v53  ;;  %v18755_v53 = vand.u32 4294901760, %v16829_v8 }
 0x54d   : > { %8732 = vmatpush.msra.mxu1 %v18747_v9  ;;  %8789 = vmatpush.msra.mxu2 %v18748_v58  ;;  %v6500_v9 = vadd.f32 %v6484_v7, %v6464_v5 }
 0x54e   : > { %8852 = vmatpush.msra.mxu3 %v16697_v48  ;;  %8561 = vmatmul.f32.gmra.mxu2 %v8560_v4 }
 0x54f   : > { %8690 = vmatpush.msra.mxu0 %v16798_v27  ;;  %8734 = vmatpush.msra.mxu1 %v16697_v48  ;;  %v18754_v48 = vand.u32 4294901760, %v16812_v57  ;;  %v18756_v27 = vand.u32 4294901760, %v16849_v43 }
 0x550   : > { %8793 = vmatpush.msra.mxu2 %v18749_v59  ;;  %8854 = vmatpush.msra.mxu3 %v18750_v24 }
 0x551   : > { %8666 = vmatmul.f32.gmra.mxu3 %v16966_v18  ;;  %8693 = vmatpush.msra.mxu0 %v16812_v57  ;;  %v7724_v44 = vpop.f32.mrf.mxu0 }
 0x552   : > { %8736 = vmatpush.msra.mxu1 %v18750_v24  ;;  %8797 = vmatpush.msra.mxu2 %v18751_v54  ;;  %v7725_v31 = vadd.f32 %v7724_v44, %v7650_v13  ;;  %v6627_v44 = vld [vmem:[%s17774_s7 + $0x328] sm:$0xff]  ;;  %v8958_v54 = vsub.f32 %v17130_v29, %v18126_v38 }
 0x553   : > { %8856 = vmatpush.msra.mxu3 %v18752_v12  ;;  %8512 = vmatmul.f32.gmra.mxu1 %v16655_v40  ;;  %v6637_v40 = vld [vmem:[%s17774_s7 + $0x378] sm:$0xff] }
 0x554   : > { %8696 = vmatpush.msra.mxu0 %v16829_v8  ;;  %8738 = vmatpush.msra.mxu1 %v18752_v12 }
 0x555   : > { %8801 = vmatpush.msra.mxu2 %v18753_v56  ;;  %8858 = vmatpush.msra.mxu3 %v16751_v45 }
 0x556   : > { %8699 = vmatpush.msra.mxu0 %v16849_v43  ;;  %8740 = vmatpush.msra.mxu1 %v16751_v45  ;;  %v6636_v45 = vld [vmem:[%s17774_s7 + $0x370] sm:$0xff] }
 0x557   : > { %8805 = vmatpush.msra.mxu2 %v18754_v48  ;;  %8860 = vmatpush.msra.mxu3 %v16764_v14  ;;  %v17072_v43 = vand.u32 4294901760, %v6636_v45  ;;  %v17210_v48 = vand.u32 4294901760, %v6627_v44 }
 0x558   : > { %8702 = vmatpush.msra.mxu0 %v16862_v41  ;;  %8742 = vmatpush.msra.mxu1 %v16764_v14  ;;  %v17062_v14 = vand.u32 4294901760, %v6637_v40 }
 0x559   : > { %8809 = vmatpush.msra.mxu2 %v18755_v53  ;;  %8862 = vmatpush.msra.mxu3 %v16781_v17  ;;  %v17098_v50 = vsub.f32 %v6636_v45, %v17072_v43 }
 0x55a   : > { %8705 = vmatpush.msra.mxu0 %v16880_v0  ;;  %8744 = vmatpush.msra.mxu1 %v16781_v17  ;;  %v6635_v17 = vld [vmem:[%s17774_s7 + $0x368] sm:$0xff]  ;;  %v17082_v41 = vsub.f32 %v6637_v40, %v17062_v14 }
 0x55b   : > { %8813 = vmatpush.msra.mxu2 %v18756_v27  ;;  %8864 = vmatpush.msra.mxu3 %v16800_v60  ;;  %v7765_v57 = vpop.f32.mrf.mxu1  ;;  %v7810_v8 = vpop.f32.mrf.mxu2  ;;  %v17079_v32 = vand.u32 4294901760, %v6635_v17  ;;  %v6625_v27 = vld [vmem:[%s17774_s7 + $0x318] sm:$0xff] }
 0x55c   : > { %8708 = vmatpush.msra.mxu0 %v16896_v55  ;;  %8746 = vmatpush.msra.mxu1 %v16800_v60  ;;  %v7766_v13 = vadd.f32 %v7765_v57, %v7725_v31  ;;  %v18758_v60 = vand.u32 4294901760, %v16880_v0  ;;  %v6633_v0 = vld [vmem:[%s17774_s7 + $0x358] sm:$0xff]  ;;  %v8939_v55 = vand.u32 4294901760, %v17082_v41  ;;  %v8959_v57 = vand.u32 4294901760, %v8958_v54 }
 0x55d   : > { %8817 = vmatpush.msra.mxu2 %v18757_v20  ;;  %8866 = vmatpush.msra.mxu3 %v16814_v1  ;;  %v6472_v20 = vld [vmem:[#allocation2 + $0x78] sm:$0xff] }
 0x55e   : > { %8711 = vmatpush.msra.mxu0 %v16917_v42  ;;  %8748 = vmatpush.msra.mxu1 %v16814_v1  ;;  %v7811_v61 = vadd.f32 %v7810_v8, %v7766_v13  ;;  %v7919_v28 = vpop.f32.mrf.mxu3  ;;  %v6631_v42 = vld [vmem:[%s17774_s7 + $0x348] sm:$0xff] }
 0x55f   : > { %8821 = vmatpush.msra.mxu2 %v18758_v60  ;;  %8868 = vmatpush.msra.mxu3 %v16831_v6  ;;  %v17148_v11 = vand.u32 4294901760, %v6631_v42 }
 0x560   : > { %8714 = vmatpush.msra.mxu0 %v16932_v33  ;;  %8750 = vmatpush.msra.mxu1 %v16831_v6  ;;  %v17092_v1 = vadd.f32 %v7919_v28, %v7811_v61  ;;  %v17107_v6 = vand.u32 4294901760, %v6633_v0  ;;  %v8940_v33 = vsub.f32 %v17082_v41, %v8939_v55  ;;  %v6624_v28 = vld [vmem:[%s17774_s7 + $0x310] sm:$0xff] }
 0x561   : > { %8825 = vmatpush.msra.mxu2 %v8639_v10  ;;  %8870 = vmatpush.msra.mxu3 %v16851_v52  ;;  %v17111_v10 = vsub.f32 %v6635_v17, %v17079_v32  ;;  %v17182_v58 = vsub.f32 %v6631_v42, %v17148_v11  ;;  %v17246_v42 = vsub.f32 %v6627_v44, %v17210_v48 }
 0x562   : > { %18759 = vst [vmem:[#allocation36_spill] sm:$0xff] %v17092_v1  ;;  %8717 = vmatpush.msra.mxu0 %v16946_v22  ;;  %8752 = vmatpush.msra.mxu1 %v16851_v52  ;;  %v8945_v52 = vand.u32 4294901760, %v17098_v50  ;;  %v8941_v19 = vand.u32 4294901760, %v8940_v33  ;;  %v17255_v33 = vadd.f32 %v6484_v7, %v6472_v20  ;;  %v6623_v7 = vld [vmem:[%s17774_s7 + $0x308] sm:$0xff] }
 0x563   : > { %8829 = vmatpush.msra.mxu2 %v8645_v63  ;;  %8872 = vmatpush.msra.mxu3 %v16864_v21  ;;  %v17127_v63 = vand.u32 4294901760, %v6632_v30  ;;  %v18122_v40 = vand.u32 4294901760, %v17182_v58 }
 0x564   : > { %8720 = vmatmul.f32.vlgmr.msra.gmra.mxu0 %v16935_v2  ;;  %8754 = vmatpush.msra.mxu1 %v16864_v21  ;;  %v6630_v21 = vld [vmem:[%s17774_s7 + $0x340] sm:$0xff]  ;;  %v8946_v22 = vsub.f32 %v17098_v50, %v8945_v52  ;;  %v6524_v44 = vmax.f32 %v17255_v33, 0.0 }
 0x565   : > { %8889 = vmatpush.msrb.mxu0 %v17062_v14  ;;  %8833 = vmatpush.msra.mxu2 %v8651_v37  ;;  %v17143_v37 = vsub.f32 %v6633_v0, %v17107_v6  ;;  %v17164_v15 = vsub.f32 %v6632_v30, %v17127_v63  ;;  %v6626_v2 = vld [vmem:[%s17774_s7 + $0x320] sm:$0xff]  ;;  %v8976_v47 = vsub.f32 %v17182_v58, %v18122_v40  ;;  %v17242_v0 = vand.u32 4294901760, %v6625_v27 }
 0x566   : > { %8874 = vmatpush.msra.mxu3 %v16887_v25  ;;  %8756 = vmatpush.msra.mxu1 %v16887_v25  ;;  %v18130_v25 = vand.u32 4294901760, %v17111_v10  ;;  %v8947_v59 = vand.u32 4294901760, %v8946_v22  ;;  %v17226_v17 = vand.u32 4294901760, %v6626_v2  ;;  %v17258_v22 = vand.u32 4294901760, %v6624_v28 }
 0x567   : > { %8891 = vmatpush.msrb.mxu0 %v17072_v43  ;;  %8837 = vmatpush.msra.mxu2 %v8657_v23  ;;  %v17155_v23 = vand.u32 4294901760, %v6630_v21  ;;  %v18125_v62 = vand.u32 4294901760, %v17143_v37  ;;  %v18124_v31 = vand.u32 4294901760, %v17164_v15 }
 0x568   : > { %8876 = vmatpush.msra.mxu3 %v16904_v49  ;;  %8839 = vmatmul.f32.vlgmr.msra.gmra.mxu2 %v16906_v16  ;;  %v8952_v4 = vsub.f32 %v17111_v10, %v18130_v25 }
 0x569   : > { %8893 = vmatpush.msrb.mxu0 %v17079_v32  ;;  %9044 = vmatpush.msrb.mxu2 %v17082_v41  ;;  %v17187_v24 = vsub.f32 %v6630_v21, %v17155_v23  ;;  %v8964_v56 = vsub.f32 %v17143_v37, %v18125_v62  ;;  %v8970_v8 = vsub.f32 %v17164_v15, %v18124_v31 }
 0x56a   : > { %8758 = vmatpush.msra.mxu1 %v16904_v49  ;;  %8878 = vmatpush.msra.mxu3 %v16919_v3  ;;  %v6628_v49 = vld [vmem:[%s17774_s7 + $0x330] sm:$0xff]  ;;  %v8953_v12 = vand.u32 4294901760, %v8952_v4  ;;  %v8977_v4 = vand.u32 4294901760, %v8976_v47 }
 0x56b   : > { %8880 = vmatmul.f32.vlgmr.msra.gmra.mxu3 %v16906_v16  ;;  %8895 = vmatpush.msrb.mxu0 %v17102_v36  ;;  %v17179_v16 = vand.u32 4294901760, %v6629_v26  ;;  %v18120_v45 = vand.u32 4294901760, %v17187_v24  ;;  %v8965_v61 = vand.u32 4294901760, %v8964_v56  ;;  %v8971_v5 = vand.u32 4294901760, %v8970_v8  ;;  %v6622_v56 = vld [vmem:[%s17774_s7 + $0x300] sm:$0xff]  ;;  %v6652_v47 = vld [vmem:[%s17774_s7 + $0x3f0] sm:$0xff] }
 0x56c   : > { %9047 = vmatpush.msrb.mxu2 %v17098_v50  ;;  %9102 = vmatpush.msrb.mxu3 %v17062_v14  ;;  %v6645_v50 = vld [vmem:[%s17774_s7 + $0x3b8] sm:$0xff] }
 0x56d   : > { %8760 = vmatpush.msra.mxu1 %v16919_v3  ;;  %8725 = vmatmul.f32.gmra.mxu0 %v16986_v35  ;;  %v17198_v3 = vand.u32 4294901760, %v6628_v49  ;;  %v17214_v53 = vsub.f32 %v6629_v26, %v17179_v16  ;;  %v8982_v21 = vsub.f32 %v17187_v24, %v18120_v45  ;;  %v17279_v35 = vsub.f32 %v6625_v27, %v17242_v0 }
 0x56e   : > { %8764 = vmatmul.f32.vlgmr.msra.gmra.mxu1 %v8550_v51  ;;  %8897 = vmatpush.msrb.mxu0 %v17107_v6  ;;  %v6516_v51 = vmax.f32 %v6500_v9, 0.0  ;;  %v18116_v9 = vand.u32 4294901760, %v17246_v42 }
 0x56f   : > { %8942 = vmatpush.msrb.mxu1 %v8941_v19  ;;  %9050 = vmatpush.msrb.mxu2 %v17111_v10  ;;  %v17229_v13 = vsub.f32 %v6628_v49, %v17198_v3  ;;  %v18119_v30 = vand.u32 4294901760, %v17214_v53  ;;  %v18121_v20 = vand.u32 4294901760, %v17279_v35 }
 0x570   : > { %9104 = vmatpush.msrb.mxu3 %v17072_v43  ;;  %8899 = vmatpush.msrb.mxu0 %v17127_v63  ;;  %v17235_v60 = vand.u32 4294901760, %v6516_v51  ;;  %v9000_v8 = vsub.f32 %v17246_v42, %v18116_v9 }
 0x571   : > { %8948 = vmatpush.msrb.mxu1 %v8947_v59  ;;  %9053 = vmatpush.msrb.mxu2 %v17130_v29  ;;  %v18118_v26 = vand.u32 4294901760, %v17229_v13  ;;  %v8988_v49 = vsub.f32 %v17214_v53, %v18119_v30  ;;  %v6653_v59 = vld [vmem:[%s17774_s7 + $0x3f8] sm:$0xff] }
 0x572   : > { %9106 = vmatpush.msrb.mxu3 %v17079_v32  ;;  %8843 = vmatmul.f32.gmra.mxu2 %v16966_v18  ;;  %v17271_v19 = vsub.f32 %v6516_v51, %v17235_v60  ;;  %v17298_v51 = vsub.f32 %v6624_v28, %v17258_v22  ;;  %v17312_v28 = vand.u32 4294901760, %v6622_v56 }
 0x573   : > { %8901 = vmatpush.msrb.mxu0 %v17148_v11  ;;  %8954 = vmatpush.msrb.mxu1 %v8953_v12  ;;  %v8994_v54 = vsub.f32 %v17229_v13, %v18118_v26  ;;  %v17291_v12 = vand.u32 4294901760, %v6623_v7  ;;  %v17342_v26 = vand.u32 4294901760, %v6652_v47 }
 0x574   : > { %9056 = vmatpush.msrb.mxu2 %v17143_v37  ;;  %9108 = vmatpush.msrb.mxu3 %v17102_v36  ;;  %v18127_v27 = vand.u32 4294901760, %v17271_v19  ;;  %v17347_v30 = vsub.f32 %v6622_v56, %v17312_v28  ;;  %v6649_v56 = vld [vmem:[%s17774_s7 + $0x3d8] sm:$0xff] }
 0x575   : > { %8884 = vmatmul.f32.gmra.mxu3 %v16966_v18  ;;  %8903 = vmatpush.msrb.mxu0 %v17155_v23  ;;  %v17262_v18 = vsub.f32 %v6626_v2, %v17226_v17  ;;  %v8995_v33 = vand.u32 4294901760, %v8994_v54  ;;  %v9001_v54 = vand.u32 4294901760, %v9000_v8  ;;  %18760 = vst [vmem:[#allocation35_spill] sm:$0xff] %v17342_v26  ;;  %v17385_v38 = vand.u32 4294901760, %v6649_v56 }
 0x576   : > { %8960 = vmatpush.msrb.mxu1 %v8959_v57  ;;  %9059 = vmatpush.msrb.mxu2 %v17164_v15  ;;  %v8989_v57 = vand.u32 4294901760, %v8988_v49  ;;  %v18123_v49 = vand.u32 4294901760, %v17298_v51  ;;  %v8923_v9 = vsub.f32 %v17271_v19, %v18127_v27  ;;  %v6648_v27 = vld [vmem:[%s17774_s7 + $0x3d0] sm:$0xff] }
 0x577   : > { %9110 = vmatpush.msrb.mxu3 %v17107_v6  ;;  %8770 = vmatmul.f32.gmra.mxu1 %v8558_v46  ;;  %v8983_v46 = vand.u32 4294901760, %v8982_v21  ;;  %v18117_v2 = vand.u32 4294901760, %v17262_v18  ;;  %v17317_v21 = vand.u32 4294901760, %v6524_v44  ;;  %v17416_v41 = vsub.f32 %v6649_v56, %v17385_v38 }
 0x578   : > { %8905 = vmatpush.msrb.mxu0 %v17179_v16  ;;  %8966 = vmatpush.msrb.mxu1 %v8965_v61  ;;  %v17308_v61 = vand.u32 4294901760, %v6653_v59  ;;  %v9018_v8 = vsub.f32 %v17298_v51, %v18123_v49  ;;  %v17370_v49 = vsub.f32 %v6652_v47, %v17342_v26 }
 0x579   : > { %9062 = vmatpush.msrb.mxu2 %v17182_v58  ;;  %9112 = vmatpush.msrb.mxu3 %v17127_v63  ;;  %v17350_v45 = vsub.f32 %v6524_v44, %v17317_v21  ;;  %v8924_v44 = vand.u32 4294901760, %v8923_v9  ;;  %v18131_v9 = vand.u32 4294901760, %v17347_v30 }
 0x57a   : > { %8907 = vmatpush.msrb.mxu0 %v17198_v3  ;;  %8972 = vmatpush.msrb.mxu1 %v8971_v5  ;;  %v9006_v5 = vsub.f32 %v17262_v18, %v18117_v2  ;;  %v17340_v2 = vsub.f32 %v6653_v59, %v17308_v61 }
 0x57b   : > { %9065 = vmatpush.msrb.mxu2 %v17187_v24  ;;  %9114 = vmatpush.msrb.mxu3 %v17148_v11  ;;  %v18132_v62 = vand.u32 4294901760, %v17350_v45 }
 0x57c   : > { %8909 = vmatpush.msrb.mxu0 %v17210_v48  ;;  %8978 = vmatpush.msrb.mxu1 %v8977_v4  ;;  %v17324_v4 = vsub.f32 %v6623_v7, %v17291_v12  ;;  %v9012_v7 = vsub.f32 %v17279_v35, %v18121_v20  ;;  %v9007_v59 = vand.u32 4294901760, %v9006_v5  ;;  %v18129_v5 = vand.u32 4294901760, %v17340_v2 }
 0x57d   : > { %9068 = vmatpush.msrb.mxu2 %v17214_v53  ;;  %9116 = vmatpush.msrb.mxu3 %v17155_v23 }
 0x57e   : > { %8911 = vmatpush.msrb.mxu0 %v17226_v17  ;;  %8984 = vmatpush.msrb.mxu1 %v8983_v46  ;;  %v6651_v46 = vld [vmem:[%s17774_s7 + $0x3e8] sm:$0xff]  ;;  %v18128_v20 = vand.u32 4294901760, %v17324_v4 }
 0x57f   : > { %9071 = vmatpush.msrb.mxu2 %v17229_v13  ;;  %9118 = vmatpush.msrb.mxu3 %v17179_v16  ;;  %v17360_v40 = vand.u32 4294901760, %v6651_v46 }
 0x580   : > { %8913 = vmatpush.msrb.mxu0 %v17242_v0  ;;  %8990 = vmatpush.msrb.mxu1 %v8989_v57  ;;  %v6650_v57 = vld [vmem:[%s17774_s7 + $0x3e0] sm:$0xff] }
 0x581   : > { %9074 = vmatpush.msrb.mxu2 %v17246_v42  ;;  %9120 = vmatpush.msrb.mxu3 %v17198_v3  ;;  %v17372_v31 = vand.u32 4294901760, %v6650_v57  ;;  %v17383_v47 = vsub.f32 %v6651_v46, %v17360_v40 }
 0x582   : > { %8915 = vmatpush.msrb.mxu0 %v17258_v22  ;;  %8996 = vmatpush.msrb.mxu1 %v8995_v33  ;;  %v9013_v33 = vand.u32 4294901760, %v9012_v7  ;;  %v9024_v7 = vsub.f32 %v17324_v4, %v18128_v20  ;;  %v6647_v20 = vld [vmem:[%s17774_s7 + $0x3c8] sm:$0xff] }
 0x583   : > { %9077 = vmatpush.msrb.mxu2 %v17262_v18  ;;  %9122 = vmatpush.msrb.mxu3 %v17210_v48  ;;  %18761 = vst [vmem:[#allocation34_spill] sm:$0xff] %v17372_v31  ;;  %v17397_v46 = vsub.f32 %v6650_v57, %v17372_v31 }
 0x584   : > { %8917 = vmatpush.msrb.mxu0 %v17291_v12  ;;  %9002 = vmatpush.msrb.mxu1 %v9001_v54  ;;  %v9019_v54 = vand.u32 4294901760, %v9018_v8  ;;  %v18133_v8 = vand.u32 4294901760, %v17370_v49  ;;  %v9025_v57 = vand.u32 4294901760, %v9024_v7 }
 0x585   : > { %9080 = vmatpush.msrb.mxu2 %v17279_v35  ;;  %9124 = vmatpush.msrb.mxu3 %v17226_v17 }
 0x586   : > { %8919 = vmatpush.msrb.mxu0 %v17312_v28  ;;  %9008 = vmatpush.msrb.mxu1 %v9007_v59  ;;  %v9312_v59 = vsub.f32 %v17340_v2, %v18129_v5  ;;  %v17411_v5 = vand.u32 4294901760, %v6648_v27  ;;  %v9318_v56 = vsub.f32 %v17370_v49, %v18133_v8  ;;  %v18764_v8 = vand.u32 4294901760, %v17383_v47 }
 0x587   : > { %9083 = vmatpush.msrb.mxu2 %v17298_v51  ;;  %9126 = vmatpush.msrb.mxu3 %v17242_v0 }
 0x588   : > { %8925 = vmatmul.f32.vlgmr.msrb.gmra.mxu0 %v8924_v44  ;;  %9014 = vmatpush.msrb.mxu1 %v9013_v33  ;;  %v9030_v44 = vsub.f32 %v17347_v30, %v18131_v9  ;;  %v8931_v33 = vsub.f32 %v17350_v45, %v18132_v62  ;;  %18762 = vst [vmem:[#allocation37_spill] sm:$0xff] %v17411_v5  ;;  %v17424_v9 = vand.u32 4294901760, %v6647_v20 }
 0x589   : > { %9149 = vmatpush.msra.mxu0 %v8939_v55  ;;  %9086 = vmatpush.msrb.mxu2 %v17324_v4  ;;  %v6646_v55 = vld [vmem:[%s17774_s7 + $0x3c0] sm:$0xff]  ;;  %v17439_v1 = vsub.f32 %v6648_v27, %v17411_v5  ;;  %v9324_v7 = vsub.f32 %v17383_v47, %v18764_v8  ;;  %v18766_v27 = vand.u32 4294901760, %v17130_v29  ;;  %v9319_v8 = vand.u32 4294901760, %v9318_v56 }
 0x58a   : > { %9128 = vmatpush.msrb.mxu3 %v17258_v22  ;;  %9020 = vmatpush.msrb.mxu1 %v9019_v54  ;;  %v9313_v54 = vand.u32 4294901760, %v9312_v59  ;;  %v9031_v62 = vand.u32 4294901760, %v9030_v44  ;;  %v8932_v25 = vand.u32 4294901760, %v8931_v33  ;;  %v17441_v59 = vand.u32 4294901760, %v6646_v55 }
 0x58b   : > { %9153 = vmatpush.msra.mxu0 %v8945_v52  ;;  %9089 = vmatpush.msrb.mxu2 %v17347_v30  ;;  %v18763_v52 = vand.u32 4294901760, %v17111_v10  ;;  %v6644_v10 = vld [vmem:[%s17774_s7 + $0x3b0] sm:$0xff]  ;;  %v18765_v44 = vand.u32 4294901760, %v17271_v19  ;;  %v17456_v33 = vsub.f32 %v6647_v20, %v17424_v9  ;;  %v18768_v56 = vand.u32 4294901760, %v17143_v37 }
 0x58c   : > { %9130 = vmatpush.msrb.mxu3 %v17291_v12  ;;  %9092 = vmatmul.f32.vlgmr.msrb.gmra.mxu2 %v17271_v19  ;;  %v6643_v19 = vld [vmem:[%s17774_s7 + $0x3a8] sm:$0xff] }
 0x58d   : > { %9157 = vmatpush.msra.mxu0 %v18763_v52  ;;  %9261 = vmatpush.msra.mxu2 %v17308_v61  ;;  %v18767_v52 = vand.u32 4294901760, %v17397_v46  ;;  %v17489_v37 = vand.u32 4294901760, %v6643_v19 }
 0x58e   : > { %9026 = vmatpush.msrb.mxu1 %v9025_v57  ;;  %9132 = vmatpush.msrb.mxu3 %v17312_v28  ;;  %v17458_v57 = vand.u32 4294901760, %v6645_v50 }
 0x58f   : > { %9136 = vmatmul.f32.vlgmr.msrb.gmra.mxu3 %v18765_v44  ;;  %9161 = vmatpush.msra.mxu0 %v18766_v27  ;;  %v9330_v34 = vsub.f32 %v17397_v46, %v18767_v52  ;;  %v17470_v44 = vsub.f32 %v6646_v55, %v17441_v59  ;;  %v17472_v27 = vand.u32 4294901760, %v6644_v10  ;;  %v9325_v52 = vand.u32 4294901760, %v9324_v7 }
 0x590   : > { %9263 = vmatpush.msra.mxu2 %v17342_v26  ;;  %9314 = vmatpush.msra.mxu3 %v9313_v54  ;;  %v6465_v54 = vld [vmem:[#allocation2 + $0x48] sm:$0xff]  ;;  %v18769_v26 = vand.u32 4294901760, %v17416_v41  ;;  %v17487_v55 = vsub.f32 %v6645_v50, %v17458_v57  ;;  %v18770_v7 = vand.u32 4294901760, %v17164_v15  ;;  %v18772_v50 = vand.u32 4294901760, %v17439_v1 }
 0x591   : > { %9032 = vmatpush.msrb.mxu1 %v9031_v62  ;;  %8933 = vmatmul.f32.gmra.mxu0 %v8932_v25  ;;  %v6642_v25 = vld [vmem:[%s17774_s7 + $0x3a0] sm:$0xff]  ;;  %v17505_v15 = vsub.f32 %v6644_v10, %v17472_v27  ;;  %v17518_v10 = vsub.f32 %v6643_v19, %v17489_v37  ;;  %v18777_v19 = vand.u32 4294901760, %v17470_v44 }
 0x592   : > { %9034 = vmatmul.f32.vlgmr.msrb.gmra.mxu1 %v17235_v60  ;;  %9165 = vmatpush.msra.mxu0 %v18768_v56  ;;  %v9336_v29 = vsub.f32 %v17416_v41, %v18769_v26  ;;  %v9331_v26 = vand.u32 4294901760, %v9330_v34  ;;  %v6641_v56 = vld [vmem:[%s17774_s7 + $0x398] sm:$0xff]  ;;  %v9342_v62 = vsub.f32 %v17439_v1, %v18772_v50  ;;  %v17507_v34 = vand.u32 4294901760, %v6642_v25 }
 0x593   : > { %9220 = vmatpush.msra.mxu1 %v17062_v14  ;;  %9265 = vmatpush.msra.mxu2 %v17360_v40  ;;  %v18771_v14 = vperm.slane %v15457_v39, 7  ;;  %v18140_v50 = vand.u32 4294901760, %v17505_v15 }
 0x594   : > { %9320 = vmatpush.msra.mxu3 %v9319_v8  ;;  %9169 = vmatpush.msra.mxu0 %v18770_v7  ;;  %v9337_v7 = vand.u32 4294901760, %v9336_v29  ;;  %v17520_v8 = vand.u32 4294901760, %v6641_v56  ;;  %v6640_v29 = vld [vmem:[%s17774_s7 + $0x390] sm:$0xff] }
 0x595   : > { %v6501_v20 = vadd.f32 %v18771_v14, %v6465_v54  ;;  %9222 = vmatpush.msra.mxu1 %v17072_v43  ;;  %9267 = vmatpush.msra.mxu2 %v17372_v31  ;;  %v18773_v54 = vand.u32 4294901760, %v17182_v58  ;;  %v18774_v43 = vand.u32 4294901760, %v17456_v33  ;;  %v17535_v31 = vsub.f32 %v6642_v25, %v17507_v34 }
 0x596   : > { %9326 = vmatpush.msra.mxu3 %v9325_v52  ;;  %9097 = vmatmul.f32.gmra.mxu2 %v17350_v45  ;;  %v18776_v52 = vand.u32 4294901760, %v17187_v24  ;;  %v17542_v24 = vand.u32 4294901760, %v6640_v29 }
 0x597   : > { %9173 = vmatpush.msra.mxu0 %v18773_v54  ;;  %9224 = vmatpush.msra.mxu1 %v17079_v32  ;;  %v9348_v14 = vsub.f32 %v17456_v33, %v18774_v43  ;;  %v6517_v58 = vmax.f32 %v6501_v20, 0.0  ;;  %v18775_v32 = vand.u32 4294901760, %v17350_v45  ;;  %v9343_v54 = vand.u32 4294901760, %v9342_v62  ;;  %v6639_v20 = vld [vmem:[%s17774_s7 + $0x388] sm:$0xff] }
 0x598   : > { %9269 = vmatpush.msra.mxu2 %v17385_v38  ;;  %9332 = vmatpush.msra.mxu3 %v9331_v26  ;;  %v9354_v43 = vsub.f32 %v17470_v44, %v18777_v19  ;;  %v18778_v62 = vand.u32 4294901760, %v17487_v55  ;;  %v18779_v19 = vand.u32 4294901760, %v17214_v53 }
 0x599   : > { %9142 = vmatmul.f32.gmra.mxu3 %v18775_v32  ;;  %9177 = vmatpush.msra.mxu0 %v18776_v52  ;;  %v9349_v45 = vand.u32 4294901760, %v9348_v14  ;;  %v17550_v32 = vsub.f32 %v6641_v56, %v17520_v8  ;;  %v6473_v52 = vld [vmem:[#allocation2 + $0x28] sm:$0xff]  ;;  %v17560_v14 = vand.u32 4294901760, %v6517_v58  ;;  %v9366_v56 = vsub.f32 %v17505_v15, %v18140_v50 }
 0x59a   : > { %9226 = vmatpush.msra.mxu1 %v17102_v36  ;;  %9271 = vmatpush.msra.mxu2 %v17411_v5  ;;  %v9360_v26 = vsub.f32 %v17487_v55, %v18778_v62  ;;  %v6638_v36 = vld [vmem:[%s17774_s7 + $0x380] sm:$0xff]  ;;  %v9355_v62 = vand.u32 4294901760, %v9354_v43  ;;  %v18780_v5 = vand.u32 4294901760, %v17229_v13  ;;  %v18782_v50 = vand.u32 4294901760, %v17518_v10 }
 0x59b   : > { %9338 = vmatpush.msra.mxu3 %v9337_v7  ;;  %9038 = vmatmul.f32.gmra.mxu1 %v17317_v21  ;;  %v17558_v7 = vand.u32 4294901760, %v6639_v20  ;;  %v17573_v53 = vand.u32 4294901760, %v6638_v36  ;;  %v9383_v13 = vand.u32 4294901760, %v17550_v32 }
 0x59c   : > { %9181 = vmatpush.msra.mxu0 %v18779_v19  ;;  %9228 = vmatpush.msra.mxu1 %v17107_v6  ;;  %v17571_v6 = vsub.f32 %v6640_v29, %v17542_v24  ;;  %v18781_v19 = vperm.slane %v15457_v39, 7  ;;  %v9361_v43 = vand.u32 4294901760, %v9360_v26  ;;  %v9372_v25 = vsub.f32 %v17518_v10, %v18782_v50 }
 0x59d   : > { %9273 = vmatpush.msra.mxu2 %v17424_v9  ;;  %9344 = vmatpush.msra.mxu3 %v9343_v54  ;;  %v17589_v39 = vsub.f32 %v6517_v58, %v17560_v14  ;;  %v9367_v29 = vand.u32 4294901760, %v9366_v56  ;;  %v18785_v26 = vand.u32 4294901760, %v17262_v18  ;;  %v18787_v56 = vand.u32 4294901760, %v17298_v51 }
 0x59e   : > { %9185 = vmatpush.msra.mxu0 %v18780_v5  ;;  %9230 = vmatpush.msra.mxu1 %v17127_v63  ;;  %v6509_v54 = vadd.f32 %v18781_v19, %v6473_v52  ;;  %v18783_v63 = vand.u32 4294901760, %v17246_v42  ;;  %v17586_v5 = vsub.f32 %v6639_v20, %v17558_v7  ;;  %v17600_v42 = vsub.f32 %v6638_v36, %v17573_v53 }
 0x59f   : > { %9275 = vmatpush.msra.mxu2 %v17441_v59  ;;  %9350 = vmatpush.msra.mxu3 %v9349_v45  ;;  %v18784_v45 = vand.u32 4294901760, %v17535_v31  ;;  %v9373_v20 = vand.u32 4294901760, %v9372_v25  ;;  %v9384_v52 = vsub.f32 %v17550_v32, %v9383_v13  ;;  %v9294_v18 = vand.u32 4294901760, %v17589_v39 }
 0x5a0   : > { %9189 = vmatpush.msra.mxu0 %v18783_v63  ;;  %9232 = vmatpush.msra.mxu1 %v17148_v11  ;;  %v9389_v11 = vand.u32 4294901760, %v17571_v6  ;;  %v6525_v58 = vmax.f32 %v6509_v54, 0.0  ;;  %v9401_v25 = vand.u32 4294901760, %v17600_v42  ;;  %v18788_v54 = vand.u32 4294901760, %v17324_v4 }
 0x5a1   : > { %9277 = vmatpush.msra.mxu2 %v17458_v57  ;;  %9356 = vmatpush.msra.mxu3 %v9355_v62  ;;  %v9378_v50 = vsub.f32 %v17535_v31, %v18784_v45  ;;  %v18786_v62 = vand.u32 4294901760, %v17279_v35  ;;  %v9385_v19 = vand.u32 4294901760, %v9384_v52  ;;  %v9295_v51 = vsub.f32 %v17589_v39, %v9294_v18 }
 0x5a2   : > { %9193 = vmatpush.msra.mxu0 %v18785_v26  ;;  %9234 = vmatpush.msra.mxu1 %v17155_v23  ;;  %v9395_v23 = vand.u32 4294901760, %v17586_v5  ;;  %v9390_v35 = vsub.f32 %v17571_v6, %v9389_v11  ;;  %v18793_v26 = vld [vmem:[#allocation35_spill] sm:$0xff] }
 0x5a3   : > { %9279 = vmatpush.msra.mxu2 %v17472_v27  ;;  %9362 = vmatpush.msra.mxu3 %v9361_v43  ;;  %v9379_v36 = vand.u32 4294901760, %v9378_v50  ;;  %v18789_v43 = vand.u32 4294901760, %v17347_v30  ;;  %v9296_v30 = vand.u32 4294901760, %v9295_v51  ;;  %v18791_v50 = vand.u32 4294901760, %v17370_v49 }
 0x5a4   : > { %9197 = vmatpush.msra.mxu0 %v18786_v62  ;;  %9236 = vmatpush.msra.mxu1 %v17179_v16  ;;  %v17619_v16 = vand.u32 4294901760, %v6525_v58  ;;  %v9391_v4 = vand.u32 4294901760, %v9390_v35 }
 0x5a5   : > { %9281 = vmatpush.msra.mxu2 %v17489_v37  ;;  %9368 = vmatpush.msra.mxu3 %v9367_v29 }
 0x5a6   : > { %9201 = vmatpush.msra.mxu0 %v18787_v56  ;;  %9238 = vmatpush.msra.mxu1 %v17198_v3  ;;  %v9396_v3 = vsub.f32 %v17586_v5, %v9395_v23  ;;  %v17639_v63 = vsub.f32 %v6525_v58, %v17619_v16  ;;  %v18806_v58 = vld [vmem:[#allocation36_spill] sm:$0xff] }
 0x5a7   : > { %9283 = vmatpush.msra.mxu2 %v17507_v34  ;;  %9374 = vmatpush.msra.mxu3 %v9373_v20 }
 0x5a8   : > { %9205 = vmatpush.msra.mxu0 %v18788_v54  ;;  %9240 = vmatpush.msra.mxu1 %v17210_v48  ;;  %v9402_v48 = vsub.f32 %v17600_v42, %v9401_v25  ;;  %v9397_v29 = vand.u32 4294901760, %v9396_v3  ;;  %v9302_v45 = vand.u32 4294901760, %v17639_v63 }
 0x5a9   : > { %9285 = vmatpush.msra.mxu2 %v17520_v8  ;;  %9380 = vmatpush.msra.mxu3 %v9379_v36 }
 0x5aa   : > { %9209 = vmatpush.msra.mxu0 %v18789_v43  ;;  %9242 = vmatpush.msra.mxu1 %v17226_v17  ;;  %v9403_v17 = vand.u32 4294901760, %v9402_v48 }
 0x5ab   : > { %9287 = vmatpush.msra.mxu2 %v17542_v24  ;;  %9386 = vmatpush.msra.mxu3 %v9385_v19 }
 0x5ac   : > { %9211 = vmatmul.f32.vlgmr.msra.gmra.mxu0 %v17235_v60  ;;  %9244 = vmatpush.msra.mxu1 %v17242_v0  ;;  %v18790_v0 = vand.u32 4294901760, %v17340_v2 }
 0x5ad   : > { %9416 = vmatpush.msrb.mxu0 %v17340_v2  ;;  %9289 = vmatpush.msra.mxu2 %v17558_v7  ;;  %v18792_v2 = vand.u32 4294901760, %v17383_v47 }
 0x5ae   : > { %9392 = vmatpush.msra.mxu3 %v9391_v4  ;;  %9246 = vmatpush.msra.mxu1 %v17258_v22  ;;  %v9303_v22 = vsub.f32 %v17639_v63, %v9302_v45 }
 0x5af   : > { %9419 = vmatpush.msrb.mxu0 %v17370_v49  ;;  %9291 = vmatpush.msra.mxu2 %v17573_v53  ;;  %v18797_v49 = vand.u32 4294901760, %v17439_v1 }
 0x5b0   : > { %9398 = vmatpush.msra.mxu3 %v9397_v29  ;;  %9297 = vmatmul.f32.vlgmr.msra.gmra.mxu2 %v9296_v30 }
 0x5b1   : > { %9422 = vmatpush.msrb.mxu0 %v17383_v47  ;;  %9521 = vmatpush.msrb.mxu2 %v18790_v0  ;;  %v18799_v47 = vld [vmem:[#allocation37_spill] sm:$0xff] }
 0x5b2   : > { %9248 = vmatpush.msra.mxu1 %v17291_v12  ;;  %9404 = vmatpush.msra.mxu3 %v9403_v17  ;;  %v9304_v12 = vand.u32 4294901760, %v9303_v22 }
 0x5b3   : > { %9406 = vmatmul.f32.vlgmr.msra.gmra.mxu3 %v17560_v14  ;;  %9425 = vmatpush.msrb.mxu0 %v17397_v46 }
 0x5b4   : > { %9525 = vmatpush.msrb.mxu2 %v18791_v50  ;;  %9592 = vmatpush.msrb.mxu3 %v17308_v61 }
 0x5b5   : > { %9250 = vmatpush.msra.mxu1 %v17312_v28  ;;  %9215 = vmatmul.f32.gmra.mxu0 %v17317_v21  ;;  %v18794_v28 = vand.u32 4294901760, %v17397_v46  ;;  %v18804_v46 = vand.u32 4294901760, %v17535_v31 }
 0x5b6   : > { %9252 = vmatmul.f32.vlgmr.msra.gmra.mxu1 %v17235_v60  ;;  %9428 = vmatpush.msrb.mxu0 %v17416_v41  ;;  %v18795_v60 = vand.u32 4294901760, %v17416_v41  ;;  %v7769_v41 = vpop.f32.mrf.mxu1 }
 0x5b7   : > { %9474 = vmatpush.msrb.mxu1 %v17308_v61  ;;  %9529 = vmatpush.msrb.mxu2 %v18792_v2  ;;  %v18796_v61 = vld [vmem:[#allocation34_spill] sm:$0xff] }
 0x5b8   : > { %9594 = vmatpush.msrb.mxu3 %v18793_v26  ;;  %9431 = vmatpush.msrb.mxu0 %v17439_v1  ;;  %v18800_v1 = vand.u32 4294901760, %v17470_v44 }
 0x5b9   : > { %9476 = vmatpush.msrb.mxu1 %v18793_v26  ;;  %9533 = vmatpush.msrb.mxu2 %v18794_v28 }
 0x5ba   : > { %9596 = vmatpush.msrb.mxu3 %v17360_v40  ;;  %9305 = vmatmul.f32.gmra.mxu2 %v9304_v12 }
 0x5bb   : > { %9434 = vmatpush.msrb.mxu0 %v17456_v33  ;;  %9478 = vmatpush.msrb.mxu1 %v17360_v40  ;;  %v18798_v40 = vand.u32 4294901760, %v17456_v33  ;;  %v7818_v33 = vpop.f32.mrf.mxu2 }
 0x5bc   : > { %9537 = vmatpush.msrb.mxu2 %v18795_v60  ;;  %9598 = vmatpush.msrb.mxu3 %v18796_v61 }
 0x5bd   : > { %9410 = vmatmul.f32.gmra.mxu3 %v17619_v16  ;;  %9437 = vmatpush.msrb.mxu0 %v17470_v44 }
 0x5be   : > { %9480 = vmatpush.msrb.mxu1 %v18796_v61  ;;  %9541 = vmatpush.msrb.mxu2 %v18797_v49  ;;  %v8021_v44 = vpop.f32.mrf.mxu1 }
 0x5bf   : > { %9600 = vmatpush.msrb.mxu3 %v17385_v38  ;;  %9256 = vmatmul.f32.gmra.mxu1 %v17317_v21  ;;  %v18802_v21 = vand.u32 4294901760, %v17505_v15 }
 0x5c0   : > { %9440 = vmatpush.msrb.mxu0 %v17487_v55  ;;  %9482 = vmatpush.msrb.mxu1 %v17385_v38  ;;  %v18801_v38 = vand.u32 4294901760, %v17487_v55 }
 0x5c1   : > { %9545 = vmatpush.msrb.mxu2 %v18798_v40  ;;  %9602 = vmatpush.msrb.mxu3 %v18799_v47 }
 0x5c2   : > { %9443 = vmatpush.msrb.mxu0 %v17505_v15  ;;  %9484 = vmatpush.msrb.mxu1 %v18799_v47 }
 0x5c3   : > { %9549 = vmatpush.msrb.mxu2 %v18800_v1  ;;  %9604 = vmatpush.msrb.mxu3 %v17424_v9 }
 0x5c4   : > { %9446 = vmatpush.msrb.mxu0 %v17518_v10  ;;  %9486 = vmatpush.msrb.mxu1 %v17424_v9  ;;  %v18803_v9 = vand.u32 4294901760, %v17518_v10 }
 0x5c5   : > { %9553 = vmatpush.msrb.mxu2 %v18801_v38  ;;  %9606 = vmatpush.msrb.mxu3 %v17441_v59 }
 0x5c6   : > { %9449 = vmatpush.msrb.mxu0 %v17535_v31  ;;  %9488 = vmatpush.msrb.mxu1 %v17441_v59  ;;  %v7728_v31 = vpop.f32.mrf.mxu0 }
 0x5c7   : > { %9557 = vmatpush.msrb.mxu2 %v18802_v21  ;;  %9608 = vmatpush.msrb.mxu3 %v17458_v57 }
 0x5c8   : > { %9452 = vmatpush.msrb.mxu0 %v17550_v32  ;;  %9490 = vmatpush.msrb.mxu1 %v17458_v57  ;;  %v7923_v57 = vpop.f32.mrf.mxu3 }
 0x5c9   : > { %9561 = vmatpush.msrb.mxu2 %v18803_v9  ;;  %9610 = vmatpush.msrb.mxu3 %v17472_v27 }
 0x5ca   : > { %9455 = vmatpush.msrb.mxu0 %v17571_v6  ;;  %9492 = vmatpush.msrb.mxu1 %v17472_v27  ;;  %v8096_v27 = vpop.f32.mrf.mxu2 }
 0x5cb   : > { %9565 = vmatpush.msrb.mxu2 %v18804_v46  ;;  %9612 = vmatpush.msrb.mxu3 %v17489_v37 }
 0x5cc   : > { %9458 = vmatpush.msrb.mxu0 %v17586_v5  ;;  %9494 = vmatpush.msrb.mxu1 %v17489_v37 }
 0x5cd   : > { %9569 = vmatpush.msrb.mxu2 %v9383_v13  ;;  %9614 = vmatpush.msrb.mxu3 %v17507_v34  ;;  %v18805_v13 = vld [vmem:[#allocation33_spill] sm:$0xff] }
 0x5ce   : > { %9461 = vmatpush.msrb.mxu0 %v17600_v42  ;;  %9496 = vmatpush.msrb.mxu1 %v17507_v34  ;;  %v7977_v59 = vpop.f32.mrf.mxu0  ;;  %v7729_v5 = vadd.f32 %v7728_v31, %v18805_v13 }
 0x5cf   : > { %9573 = vmatpush.msrb.mxu2 %v9389_v11  ;;  %9616 = vmatpush.msrb.mxu3 %v17520_v8  ;;  %v7978_v20 = vadd.f32 %v7977_v59, %v18806_v58 }
 0x5d0   : > { %9464 = vmatmul.f32.vlgmr.msrb.gmra.mxu0 %v17589_v39  ;;  %9498 = vmatpush.msrb.mxu1 %v17520_v8  ;;  %v8137_v37 = vpop.f32.mrf.mxu3  ;;  %v8027_v8 = vpop.f32.mrf.mxu1  ;;  %v7770_v11 = vadd.f32 %v7769_v41, %v7729_v5 }
 0x5d1   : > { %9577 = vmatpush.msrb.mxu2 %v9395_v23  ;;  %9618 = vmatpush.msrb.mxu3 %v17542_v24  ;;  %v8022_v23 = vadd.f32 %v8021_v44, %v7978_v20 }
 0x5d2   : > { %9500 = vmatpush.msrb.mxu1 %v17542_v24  ;;  %v8100_v34 = vpop.f32.mrf.mxu2  ;;  %v7819_v62 = vadd.f32 %v7818_v33, %v7770_v11 }
 0x5d3   : > { %9581 = vmatpush.msrb.mxu2 %v9401_v25  ;;  %9620 = vmatpush.msrb.mxu3 %v17558_v7  ;;  %v8097_v35 = vadd.f32 %v8096_v27, %v8022_v23 }
 0x5d4   : > { %9583 = vmatmul.f32.vlgmr.msrb.gmra.mxu2 %v17560_v14  ;;  %9502 = vmatpush.msrb.mxu1 %v17558_v7  ;;  %v7924_v56 = vadd.f32 %v7923_v57, %v7819_v62 }
 0x5d5   : > { %9622 = vmatpush.msrb.mxu3 %v17573_v53  ;;  %v8138_v19 = vadd.f32 %v8137_v37, %v8097_v35 }
 0x5d6   : > { %9624 = vmatmul.f32.vlgmr.msrb.gmra.mxu3 %v17560_v14  ;;  %9504 = vmatpush.msrb.mxu1 %v17573_v53  ;;  %v7982_v55 = vpop.f32.mrf.mxu0 }
 0x5d7   : > { %9508 = vmatmul.f32.vlgmr.msrb.gmra.mxu1 %v9294_v18 }
 0x5d8   : > { %9469 = vmatmul.f32.gmra.mxu0 %v17639_v63  ;;  %v8141_v10 = vpop.f32.mrf.mxu3  ;;  %v8291_v24 = vpop.f32.mrf.mxu1 }
 0x5da   : > { %v8349_v32 = vpop.f32.mrf.mxu2 }
 0x5dc   : > { %9587 = vmatmul.f32.gmra.mxu2 %v17619_v16 }
 0x5de   : > { %9628 = vmatmul.f32.gmra.mxu3 %v17619_v16  ;;  %v8182_v15 = vpop.f32.mrf.mxu0  ;;  %v7983_v16 = vadd.f32 %v7982_v55, %v7924_v56 }
 0x5df   : > { %9514 = vmatmul.f32.gmra.mxu1 %v9302_v45  ;;  %v8183_v51 = vadd.f32 %v8182_v15, %v8138_v19 }
 0x5e0   : > { %v8393_v14 = vpop.f32.mrf.mxu3  ;;  %v8295_v6 = vpop.f32.mrf.mxu1  ;;  %v8028_v54 = vadd.f32 %v8027_v8, %v7983_v16 }
 0x5e1   : > { %v8292_v48 = vadd.f32 %v8291_v24, %v8183_v51 }
 0x5e2   : > { %v8354_v39 = vpop.f32.mrf.mxu2  ;;  %v8101_v4 = vadd.f32 %v8100_v34, %v8028_v54 }
 0x5e3   : > { %v8350_v17 = vadd.f32 %v8349_v32, %v8292_v48 }
 0x5e4   : > { %v8142_v30 = vadd.f32 %v8141_v10, %v8101_v4 }
 0x5e5   : > { %v8394_v22 = vadd.f32 %v8393_v14, %v8350_v17 }
 0x5e6   : > { %v8190_v7 = vpop.f32.mrf.mxu0 }
 0x5e7   : > { %v8191_v0 = vadd.f32 %v8190_v7, %v8142_v30 }
 0x5e8   : > { %v8399_v42 = vpop.f32.mrf.mxu3  ;;  %v8509_v52 = vpop.f32.mrf.mxu1 }
 0x5e9   : > { %v8296_v50 = vadd.f32 %v8295_v6, %v8191_v0 }
 0x5ea   : > { %v8554_v18 = vpop.f32.mrf.mxu2 }
 0x5eb   : > { %v8355_v60 = vadd.f32 %v8354_v39, %v8296_v50 }
 0x5ed   : > { %v8400_v40 = vadd.f32 %v8399_v42, %v8355_v60 }
 0x5ee   : > { %v8468_v53 = vpop.f32.mrf.mxu0 }
 0x5ef   : > { %v8469_v26 = vadd.f32 %v8468_v53, %v8394_v22 }
 0x5f0   : > { %v8663_v25 = vpop.f32.mrf.mxu3  ;;  %v8513_v3 = vpop.f32.mrf.mxu1 }
 0x5f1   : > { %v8510_v61 = vadd.f32 %v8509_v52, %v8469_v26 }
 0x5f2   : > { %v8562_v63 = vpop.f32.mrf.mxu2 }
 0x5f3   : > { %v8555_v47 = vadd.f32 %v8554_v18, %v8510_v61 }
 0x5f5   : > { %v8664_v9 = vadd.f32 %v8663_v25, %v8555_v47 }
 0x5f6   : > { %v8472_v36 = vpop.f32.mrf.mxu0 }
 0x5f7   : > { %v8473_v38 = vadd.f32 %v8472_v36, %v8400_v40 }
 0x5f8   : > { %v8667_v29 = vpop.f32.mrf.mxu3  ;;  %v8765_v45 = vpop.f32.mrf.mxu1 }
 0x5f9   : > { %v8514_v46 = vadd.f32 %v8513_v3, %v8473_v38 }
 0x5fa   : > { %v8840_v12 = vpop.f32.mrf.mxu2 }
 0x5fb   : > { %v8563_v33 = vadd.f32 %v8562_v63, %v8514_v46 }
 0x5fd   : > { %v8668_v55 = vadd.f32 %v8667_v29, %v8563_v33 }
 0x5fe   : > { %v8721_v43 = vpop.f32.mrf.mxu0 }
 0x5ff   : > { %v8722_v41 = vadd.f32 %v8721_v43, %v8664_v9 }
 0x600   : > { %v8881_v28 = vpop.f32.mrf.mxu3  ;;  %v8771_v49 = vpop.f32.mrf.mxu1 }
 0x601   : > { %v8766_v57 = vadd.f32 %v8765_v45, %v8722_v41 }
 0x602   : > { %v8844_v21 = vpop.f32.mrf.mxu2 }
 0x603   : > { %v8841_v37 = vadd.f32 %v8840_v12, %v8766_v57 }
 0x605   : > { %v8882_v34 = vadd.f32 %v8881_v28, %v8841_v37 }
 0x606   : > { %v8726_v2 = vpop.f32.mrf.mxu0 }
 0x607   : > { %v8727_v15 = vadd.f32 %v8726_v2, %v8668_v55 }
 0x608   : > { %v8885_v31 = vpop.f32.mrf.mxu3 }
 0x609   : > { %v8772_v10 = vadd.f32 %v8771_v49, %v8727_v15  ;;  %v18808_v15 = vld [vmem:[#allocation31_spill] sm:$0xff] }
 0x60b   : > { %v8845_v14 = vadd.f32 %v8844_v21, %v8772_v10 }
 0x60d   : > { %v8886_v5 = vadd.f32 %v8885_v31, %v8845_v14 }
 0x60e   : > { %v8926_v1 = vpop.f32.mrf.mxu0 }
 0x60f   : > { %v9035_v59 = vpop.f32.mrf.mxu1  ;;  %v9093_v44 = vpop.f32.mrf.mxu2  ;;  %v8927_v32 = vadd.f32 %v8926_v1, %v8882_v34 }
 0x611   : > { %v9036_v6 = vadd.f32 %v9035_v59, %v8927_v32 }
 0x612   : > { %v9137_v8 = vpop.f32.mrf.mxu3 }
 0x613   : > { %v9094_v39 = vadd.f32 %v9093_v44, %v9036_v6  ;;  %v18807_v44 = vld [vmem:[#allocation32_spill] sm:$0xff] }
 0x615   : > { %v9138_v58 = vadd.f32 %v9137_v8, %v9094_v39 }
 0x616   : > { %v8934_v27 = vpop.f32.mrf.mxu0 }
 0x617   : > { %v8935_v42 = vadd.f32 %v8934_v27, %v8886_v5 }
 0x618   : > { %v9039_v24 = vpop.f32.mrf.mxu1 }
 0x619   : > { %v9098_v53 = vpop.f32.mrf.mxu2  ;;  %v9040_v20 = vadd.f32 %v9039_v24, %v8935_v42 }
 0x61b   : > { %v9099_v36 = vadd.f32 %v9098_v53, %v9040_v20  ;;  %v18811_v20 = vld [vmem:[#allocation17_spill] sm:$0xff] (%p6451_p0) }
 0x61c   : > { %v9143_v13 = vpop.f32.mrf.mxu3 }
 0x61d   : > { %v9144_v25 = vadd.f32 %v9143_v13, %v9099_v36 }
 0x629   : > { %v9212_v7 = vpop.f32.mrf.mxu0 }
 0x62a   : > { %v9213_v23 = vadd.f32 %v9212_v7, %v9138_v58 }
 0x632   : > { %v9216_v62 = vpop.f32.mrf.mxu0 }
 0x633   : > { %v9253_v11 = vpop.f32.mrf.mxu1  ;;  %v9298_v52 = vpop.f32.mrf.mxu2  ;;  %v9217_v54 = vadd.f32 %v9216_v62, %v9144_v25 }
 0x634   : > { %v9254_v56 = vadd.f32 %v9253_v11, %v9213_v23 }
 0x636   : > { %v9407_v18 = vpop.f32.mrf.mxu3  ;;  %v9299_v16 = vadd.f32 %v9298_v52, %v9254_v56  ;;  %v9650_v52 = vmul.f32 (%p6451_p0), 60.0, %v18811_v20 }
 0x638   : > { %v9408_v51 = vadd.f32 %v9407_v18, %v9299_v16  ;;  %v18812_v18 = vld [vmem:[#allocation14_spill] sm:$0xff] (%p6451_p0) }
 0x639   :  { %v9651_v36 = vmul.f32 (%p6451_p0), 60.0, %v18812_v18 }
 0x63c   : > { %v9257_v35 = vpop.f32.mrf.mxu1 }
 0x63d   : > { %v9306_v3 = vpop.f32.mrf.mxu2  ;;  %v9258_v43 = vadd.f32 %v9257_v35, %v9217_v54 }
 0x63f   : > { %v9307_v29 = vadd.f32 %v9306_v3, %v9258_v43 }
 0x640   : > { %v9411_v4 = vpop.f32.mrf.mxu3 }
 0x641   : > { %v9412_v22 = vadd.f32 %v9411_v4, %v9307_v29 }
 0x64d   : > { %v9465_v19 = vpop.f32.mrf.mxu0 }
 0x64e   : > { %v9466_v48 = vadd.f32 %v9465_v19, %v9408_v51 }
 0x654   : > { %v9509_v63 = vpop.f32.mrf.mxu1 }
 0x655   : > { %v9510_v30 = vadd.f32 %v9509_v63, %v9466_v48  ;;  %v9470_v45 = vpop.f32.mrf.mxu0 }
 0x656   : > { %v9471_v2 = vadd.f32 %v9470_v45, %v9412_v22 }
 0x657   : > { %v9584_v17 = vpop.f32.mrf.mxu2 }
 0x658   : > { %v9585_v0 = vadd.f32 %v9584_v17, %v9510_v30 }
 0x659   : > { %v9625_v50 = vpop.f32.mrf.mxu3 }
 0x65a   : > { %v9626_v12 = vadd.f32 %v9625_v50, %v9585_v0 }
 0x65c   : > { %v9632_v26 = vmin.f32 %v9626_v12, 20.0  ;;  %v9515_v28 = vpop.f32.mrf.mxu1  ;;  %vm9634_vm2 = vcmp.gt.f32.partialorder %v9626_v12, 20.0 }
 0x65d   : > { %v9516_v60 = vadd.f32 %v9515_v28, %v9471_v2 }
 0x65e   : > { %v9636_v61 = vmul.f32 1.442695, %v9632_v26 }
 0x65f   : > { %v9588_v49 = vpop.f32.mrf.mxu2 }
 0x660   : > { %9747 = vpow2.f32 %v9636_v61  ;;  %v9589_v40 = vadd.f32 %v9588_v49, %v9516_v60 }
 0x661   : > { %v9629_v47 = vpop.f32.mrf.mxu3 }
 0x662   : > { %v9630_v1 = vadd.f32 %v9629_v47, %v9589_v40 }
 0x664   : > { %v9633_v38 = vmin.f32 %v9630_v1, 20.0  ;;  %vm9635_vm3 = vcmp.gt.f32.partialorder %v9630_v1, 20.0 }
 0x666   : > { %v9748_v21 = vpop.eup %9747  ;;  %v9638_v9 = vmul.f32 1.442695, %v9633_v38 }
 0x667   : > { %v9640_v46 = vadd.f32 1.0, %v9748_v21 }
 0x668   : > { %9749 = vpow2.f32 %v9638_v9 }
 0x669   : > { %9751 = vlog2.f32 %v9640_v46 }
 0x66e   : > { %v9750_v31 = vpop.eup %9749 }
 0x66f   : > { %v9752_v41 = vpop.eup %9751  ;;  %v9641_v59 = vadd.f32 1.0, %v9750_v31 }
 0x670   : > { %v9643_v33 = vmul.f32 0.6931472, %v9752_v41 }
 0x671   : > { %9753 = vlog2.f32 %v9641_v59 }
 0x672   : > { %v9646_v57 = vsel %vm9634_vm2, %v9626_v12, %v9643_v33 }
 0x673   : > { %v9648_v27 = vadd.f32 %v18807_v44, %v9646_v57  }
 0x675   : > { %v18810_v39 = vmov %v9648_v27  ;;  %9755 = vrcp.f32 (%p6451_p0), %v9648_v27  ;;  %vm9657_vm4 = vweird.f32 (%p6451_p0), %v9648_v27  ;;  %v9663_v7 = vand.u32 (%p6451_p0), 2147483648, %v9648_v27 }
 0x676   :  { %v9661_v53 = vand.u32 (%p6451_p0), 2147483647, %v9648_v27 }
 0x677   : > { %v9754_v55 = vpop.eup %9753  ;;  %v9664_v42 = vor.u32 (%p6451_p0), 1.1754944e-38, %v9663_v7 }
 0x678   : > { %v9645_v37 = vmul.f32 0.6931472, %v9754_v55  ;;  %vm9662_vm9 = vcmp.eq.f32.partialorder (%p6451_p0), %v9661_v53, 8.507059e+37 }
 0x679   :  { %6453 = sbr.rel (!%p6451_p0) target bundleno = 1059 (0x423), region = 79 }
 0x67a   : > { %v9647_v8 = vsel %vm9635_vm3, %v9630_v1, %v9645_v37 }
 0x67b   : > { %v9649_v34 = vadd.f32 %v18808_v15, %v9647_v8   ;;  %v9756_v10 = vpop.eup (%p6451_p0), %9755 }
 0x67c   :  { %v9653_v32 = vmul.f32 (%p6451_p0), %v9756_v10, %v9648_v27  ;;  %vm9658_vm5 = vweird.f32 (%p6451_p0), %v9756_v10 }
 0x67d   : > { %v18809_v57 = vmov %v9649_v34  ;;  %9757 = vrcp.f32 (%p6451_p0), %v9649_v34  ;;  %v9678_v13 = vand.u32 (%p6451_p0), 2147483648, %v9649_v34  ;;  %vm9672_vm6 = vweird.f32 (%p6451_p0), %v9649_v34  ;;  %vm9659_vm8 = vmor (%p6451_p0), %vm9657_vm4, %vm9658_vm5 }
 0x67e   :  { %v9654_v6 = vsub.f32 1.0, %v9653_v32  ;;  %v9676_v39 = vand.u32 2147483647, %v9649_v34 }
 0x67f   :  { %v9679_v23 = vor.u32 1.1754944e-38, %v9678_v13 }
 0x680   :  { %v9655_v11 = vmul.f32 %v9756_v10, %v9654_v6  ;;  %vm9677_vm11 = vcmp.eq.f32.partialorder %v9676_v39, 8.507059e+37 }
 0x682   :  { %v9656_v62 = vadd.f32 %v9756_v10, %v9655_v11 }
 0x683   :  { %v9758_v24 = vpop.eup %9757 }
 0x684   :  { %v9668_v14 = vmul.f32 %v9758_v24, %v9649_v34  ;;  %vm9673_vm7 = vweird.f32 %v9758_v24  ;;  %v9660_v35 = vsel %vm9659_vm8, %v9756_v10, %v9656_v62 }
 0x685   :  { %vm9674_vm10 = vmor %vm9672_vm6, %vm9673_vm7  ;;  %v9665_v25 = vsel %vm9662_vm9, %v9664_v42, %v9660_v35 }
 0x686   :  { %v9669_v5 = vsub.f32 1.0, %v9668_v14  ;;  %v9666_v19 = vmul.f32 %v9665_v25, %v9650_v52 }
 0x688   :  { %v9670_v58 = vmul.f32 %v9758_v24, %v9669_v5  ;;  %9683 = vst.msk [vmem:[%s17776_s9] sm:$0xff] %vm9682_vm12, %v9666_v19 }
 0x68a   :  { %v9671_v56 = vadd.f32 %v9758_v24, %v9670_v58 }
 0x68c   :  { %v9675_v16 = vsel %vm9674_vm10, %v9758_v24, %v9671_v56 }
 0x68d   :  { %v9680_v54 = vsel %vm9677_vm11, %v9679_v23, %v9675_v16 }
 0x68e   :  { %v9681_v3 = vmul.f32 %v9680_v54, %v9651_v36 }
 0x690   :  { %9684 = vst.msk [vmem:[%s17776_s9 + $0x8] sm:$0xff] %vm9682_vm12, %v9681_v3 }
 0x691   :  { %9689 = vsyncpa [#allocation5], 1 }
 0x692   :  { %9690 = vsyncpa [#allocation9], 1 }
 0x693   :  { %9691 = vsyncpa [#allocation6], 1 }

</bundles_post_ra>
